<compile_context>
chip_gen: v7x
topology: tpu7x:2x2x1
jax: 0.10.0
libtpu: 0.0.40
codegen_flags: <defaults>
</compile_context>

<pallas_src>
import functools

import jax
import jax.numpy as jnp
from jax.experimental import pallas as pl
from jax.experimental.pallas import tpu as pltpu


_HIDDEN = (500, 500, 2000)


def _round_up(x, m):
    return ((x + m - 1) // m) * m


def _tpu_config():
    """Returns (num_tensorcores_per_chip, vmem_limit_bytes), generation-safe."""
    vmem_cap = 64 << 20          # conservative fallback (v7x per-TC VMEM)
    num_tc = 1                   # v5e/v6e: 1 TensorCore per chip
    try:
        info = pltpu.get_tpu_info()
        vmem_cap = int(getattr(info, "vmem_capacity_bytes", vmem_cap))
    except Exception:
        pass
    try:
        kind = str(getattr(jax.devices()[0], "device_kind", "")).lower()
        if "v7" in kind:
            num_tc = 2           # v7x: 2 TensorCores share the grid
    except Exception:
        pass
    return num_tc, min((vmem_cap * 3) // 4, 100 << 20)


def _pick_tile_b(batch, num_tensorcores):
    """Batch tile policy.

    Tiny batches: a single tile, rounded to a multiple of 16 (bf16 sublane
    packing).  Larger batches: multiples of 128 (full MXU M passes), as big
    as possible to amortize grid-step overhead and weight residency.  Only on
    2-TC parts (v7x) do we force >=2 grid steps so both cores get work; on
    v5e/v6e splitting would just halve MXU fill per step for no gain.
    """
    if batch <= 128:
        return _round_up(max(batch, 16), 16)
    b128 = _round_up(batch, 128)
    cap = 1024 if b128 >= 4096 else 512
    if num_tensorcores >= 2:
        per_core = _round_up(-(-b128 // 2), 128)
        return min(per_core, cap)
    return min(b128, cap)


def mlp_kernel(x_ref, w1_ref, b1_ref, w2_ref, b2_ref,
               w3_ref, b3_ref, w4_ref, b4_ref, o_ref):
    # Fused 4-layer MLP.  bf16 operands feed the MXU; accumulation, bias-add
    # and ReLU run in f32 (v5e VPU has no bf16 ALU).  The f32->bf16 cast of x
    # is folded into the kernel (no extra wrapper-side HBM pass).
    x = x_ref[...].astype(jnp.bfloat16)

    h = jnp.dot(x, w1_ref[...], preferred_element_type=jnp.float32)
    h = jnp.maximum(h + b1_ref[...], 0.0).astype(jnp.bfloat16)

    h = jnp.dot(h, w2_ref[...], preferred_element_type=jnp.float32)
    h = jnp.maximum(h + b2_ref[...], 0.0).astype(jnp.bfloat16)

    h = jnp.dot(h, w3_ref[...], preferred_element_type=jnp.float32)
    h = jnp.maximum(h + b3_ref[...], 0.0).astype(jnp.bfloat16)

    h = jnp.dot(h, w4_ref[...], preferred_element_type=jnp.float32)
    o_ref[...] = (h + b4_ref[...]).astype(o_ref.dtype)


@functools.partial(
    jax.jit,
    static_argnames=("out_dim", "tile_b", "vmem_limit", "single_buffer"))
def _encoder_forward_impl(x, params, out_dim, tile_b, vmem_limit, single_buffer):
    w1, b1 = params["w1"], params["b1"]
    w2, b2 = params["w2"], params["b2"]
    w3, b3 = params["w3"], params["b3"]
    w4, b4 = params["w4"], params["b4"]

    B, d_in = x.shape
    assert w1.shape[0] == d_in, (w1.shape, d_in)
    h1, h2, h3 = w1.shape[1], w2.shape[1], w3.shape[1]
    d_out_p = w4.shape[1]

    # Only a zero row-pad when the batch is not tile-aligned (no cast here).
    B_p = _round_up(B, tile_b)
    if B_p != B:
        x = jnp.pad(x, ((0, B_p - B), (0, 0)))

    grid = (B_p // tile_b,)

    def const_spec(shape):
        # Whole-array block, constant index map -> Mosaic skips re-DMA across
        # grid steps; request a single pipeline buffer (no point double
        # buffering a block that never changes).
        idx = lambda i: (0,) * len(shape)
        if single_buffer:
            return pl.BlockSpec(shape, idx, pipeline_mode=pl.Buffered(1))
        return pl.BlockSpec(shape, idx)

    # Advisory cost hint for XLA's scheduler around the custom call.
    flops = 2 * B_p * (d_in * h1 + h1 * h2 + h2 * h3 + h3 * d_out_p)
    weight_bytes = sum(int(p.size) * p.dtype.itemsize
                       for p in (w1, b1, w2, b2, w3, b3, w4, b4))
    bytes_accessed = (int(x.size) * x.dtype.itemsize
                      + weight_bytes + B_p * d_out_p * 4)
    cost = pl.CostEstimate(flops=flops, transcendentals=0,
                           bytes_accessed=bytes_accessed)

    out_p = pl.pallas_call(
        mlp_kernel,
        out_shape=jax.ShapeDtypeStruct((B_p, d_out_p), jnp.float32),
        grid_spec=pltpu.PrefetchScalarGridSpec(
            num_scalar_prefetch=0,
            grid=grid,
            in_specs=[
                pl.BlockSpec((tile_b, d_in), lambda i: (i, 0)),  # x tile (f32)
                const_spec(w1.shape), const_spec(b1.shape),
                const_spec(w2.shape), const_spec(b2.shape),
                const_spec(w3.shape), const_spec(b3.shape),
                const_spec(w4.shape), const_spec(b4.shape),
            ],
            out_specs=pl.BlockSpec((tile_b, d_out_p), lambda i: (i, 0)),
        ),
        compiler_params=pltpu.CompilerParams(
            dimension_semantics=("parallel",),
            vmem_limit_bytes=vmem_limit,
        ),
        cost_estimate=cost,
    )(x, w1, b1, w2, b2, w3, b3, w4, b4)

    # Slice off BOTH the batch padding and the feature-dim padding.
    return out_p[:B, :out_dim]


def encoder_forward(x, params, feature_dim):
    """x: (B, input_dim) float32.  params: padded bf16 weights / f32 biases."""
    num_tc, vmem_limit = _tpu_config()
    tile_b = _pick_tile_b(x.shape[0], num_tc)
    try:
        # Preferred: single-buffered constant weight blocks.
        return _encoder_forward_impl(x, params, feature_dim, tile_b,
                                     vmem_limit, True)
    except Exception:
        # Fallback if this Pallas build rejects pipeline_mode on top-level
        # BlockSpecs: default double buffering (still only ~6.5 MiB of bf16
        # weights, comfortably within every generation's VMEM limit).
        return _encoder_forward_impl(x, params, feature_dim, tile_b,
                                     vmem_limit, False)


def init_encoder_params(key, input_dim, feature_dim):
    """PyTorch nn.Linear-style U(-1/sqrt(fan_in), +1/sqrt(fan_in)) init.
    Returns (kernel_params, ref_params):
      kernel_params: weights stored (in, out), bf16, with the *output* dim of
                     every layer zero-padded to a multiple of 128 (and inner
                     dims padded consistently); w1's input dim stays unpadded.
                     Biases padded, f32, shape (1, out_p).
      ref_params:    unpadded f32 weights/biases for the pure-JAX reference."""
    dims = [input_dim] + list(_HIDDEN) + [feature_dim]
    kernel_params, ref_params = {}, {}
    for li in range(4):
        fan_in, fan_out = dims[li], dims[li + 1]
        key, kw, kb = jax.random.split(key, 3)
        bound = 1.0 / (fan_in ** 0.5)
        w = jax.random.uniform(kw, (fan_in, fan_out), jnp.float32, -bound, bound)
        b = jax.random.uniform(kb, (fan_out,), jnp.float32, -bound, bound)

        in_p = fan_in if li == 0 else _round_up(fan_in, 128)
        out_p = _round_up(fan_out, 128)
        w_p = (jnp.zeros((in_p, out_p), jnp.bfloat16)
               .at[:fan_in, :fan_out].set(w.astype(jnp.bfloat16)))
        b_p = jnp.zeros((1, out_p), jnp.float32).at[0, :fan_out].set(b)

        kernel_params[f"w{li + 1}"] = w_p
        kernel_params[f"b{li + 1}"] = b_p
        ref_params[f"w{li + 1}"] = w
        ref_params[f"b{li + 1}"] = b
    return kernel_params, ref_params


def encoder_reference(x, ref_params):
    """Plain-JAX reference matching the kernel's numerics (bf16 matmul inputs,
    f32 accumulation, f32 bias-add / ReLU)."""
    h = x
    for li in range(1, 5):
        w = ref_params[f"w{li}"].astype(jnp.bfloat16)
        h = jnp.dot(h.astype(jnp.bfloat16), w,
                    preferred_element_type=jnp.float32) + ref_params[f"b{li}"]
        if li < 4:
            h = jnp.maximum(h, 0.0)
    return h


if __name__ == "__main__":
    input_dim, feature_dim = 32, 32
    batch = 8

    key = jax.random.PRNGKey(0)
    kx, kp = jax.random.split(key)
    x = jax.random.normal(kx, (batch, input_dim), jnp.float32)
    kernel_params, ref_params = init_encoder_params(kp, input_dim, feature_dim)

    out = encoder_forward(x, kernel_params, feature_dim)
    out = jax.block_until_ready(out)
    assert out.shape == (batch, feature_dim), out.shape

    ref = encoder_reference(x, ref_params)
    max_err = float(jnp.max(jnp.abs(out - ref)))
    assert jnp.allclose(out, ref, atol=1e-2, rtol=1e-2), max_err

    print("KERNEL_OK")
</pallas_src>

<mosaic_0001>
module attributes {stable_mosaic.version = 11 : i64} {
  func.func @mlp_kernel(%arg0: i32, %arg1: memref<16x32xf32, #tpu.memory_space<vmem>>, %arg2: memref<32x512xbf16, #tpu.memory_space<vmem>>, %arg3: memref<1x512xf32, #tpu.memory_space<vmem>>, %arg4: memref<512x512xbf16, #tpu.memory_space<vmem>>, %arg5: memref<1x512xf32, #tpu.memory_space<vmem>>, %arg6: memref<512x2048xbf16, #tpu.memory_space<vmem>>, %arg7: memref<1x2048xf32, #tpu.memory_space<vmem>>, %arg8: memref<2048x128xbf16, #tpu.memory_space<vmem>>, %arg9: memref<1x128xf32, #tpu.memory_space<vmem>>, %arg10: memref<16x128xf32, #tpu.memory_space<vmem>>) attributes {dimension_semantics = [#tpu.dimension_semantics<parallel>], iteration_bounds = array<i64: 1>, scalar_prefetch = 0 : i64, scratch_operands = 0 : i64, tpu.core_type = #tpu.core_type<tc>, window_params = [{transform_indices = @transform_0, window_bounds = array<i64: 16, 32>}, {pipeline_mode = #tpu.pipeline_mode<synchronous>, transform_indices = @transform_1, window_bounds = array<i64: 32, 512>}, {pipeline_mode = #tpu.pipeline_mode<synchronous>, transform_indices = @transform_2, window_bounds = array<i64: 1, 512>}, {pipeline_mode = #tpu.pipeline_mode<synchronous>, transform_indices = @transform_3, window_bounds = array<i64: 512, 512>}, {pipeline_mode = #tpu.pipeline_mode<synchronous>, transform_indices = @transform_4, window_bounds = array<i64: 1, 512>}, {pipeline_mode = #tpu.pipeline_mode<synchronous>, transform_indices = @transform_5, window_bounds = array<i64: 512, 2048>}, {pipeline_mode = #tpu.pipeline_mode<synchronous>, transform_indices = @transform_6, window_bounds = array<i64: 1, 2048>}, {pipeline_mode = #tpu.pipeline_mode<synchronous>, transform_indices = @transform_7, window_bounds = array<i64: 2048, 128>}, {pipeline_mode = #tpu.pipeline_mode<synchronous>, transform_indices = @transform_8, window_bounds = array<i64: 1, 128>}, {transform_indices = @transform_9, window_bounds = array<i64: 16, 128>}]} {
    %c0 = arith.constant 0 : index
    %c0_0 = arith.constant 0 : index
    %0 = vector.load %arg1[%c0, %c0_0] : memref<16x32xf32, #tpu.memory_space<vmem>>, vector<16x32xf32>
    %1 = arith.truncf %0 : vector<16x32xf32> to vector<16x32xbf16>
    %c0_1 = arith.constant 0 : index
    %c0_2 = arith.constant 0 : index
    %2 = vector.load %arg2[%c0_1, %c0_2] : memref<32x512xbf16, #tpu.memory_space<vmem>>, vector<32x512xbf16>
    %cst = arith.constant dense<0.000000e+00> : vector<16x512xf32>
    %3 = tpu.matmul %1, %2, %cst {dimension_numbers = #tpu.dot_dimension_numbers<[1], [0], [0], [1], [0, 0, 1, 1], [], []>} : vector<16x32xbf16>, vector<32x512xbf16>, vector<16x512xf32> -> vector<16x512xf32>
    %c0_3 = arith.constant 0 : index
    %c0_4 = arith.constant 0 : index
    %4 = vector.load %arg3[%c0_3, %c0_4] : memref<1x512xf32, #tpu.memory_space<vmem>>, vector<1x512xf32>
    %5 = vector.broadcast %4 : vector<1x512xf32> to vector<16x512xf32>
    %6 = arith.addf %3, %5 : vector<16x512xf32>
    %cst_5 = arith.constant 0.000000e+00 : f32
    %7 = vector.broadcast %cst_5 : f32 to vector<16x512xf32>
    %8 = arith.maximumf %6, %7 : vector<16x512xf32>
    %9 = arith.truncf %8 : vector<16x512xf32> to vector<16x512xbf16>
    %c0_6 = arith.constant 0 : index
    %c0_7 = arith.constant 0 : index
    %10 = vector.load %arg4[%c0_6, %c0_7] : memref<512x512xbf16, #tpu.memory_space<vmem>>, vector<512x512xbf16>
    %cst_8 = arith.constant dense<0.000000e+00> : vector<16x512xf32>
    %11 = tpu.matmul %9, %10, %cst_8 {dimension_numbers = #tpu.dot_dimension_numbers<[1], [0], [0], [1], [0, 0, 1, 1], [], []>} : vector<16x512xbf16>, vector<512x512xbf16>, vector<16x512xf32> -> vector<16x512xf32>
    %c0_9 = arith.constant 0 : index
    %c0_10 = arith.constant 0 : index
    %12 = vector.load %arg5[%c0_9, %c0_10] : memref<1x512xf32, #tpu.memory_space<vmem>>, vector<1x512xf32>
    %13 = vector.broadcast %12 : vector<1x512xf32> to vector<16x512xf32>
    %14 = arith.addf %11, %13 : vector<16x512xf32>
    %cst_11 = arith.constant 0.000000e+00 : f32
    %15 = vector.broadcast %cst_11 : f32 to vector<16x512xf32>
    %16 = arith.maximumf %14, %15 : vector<16x512xf32>
    %17 = arith.truncf %16 : vector<16x512xf32> to vector<16x512xbf16>
    %c0_12 = arith.constant 0 : index
    %c0_13 = arith.constant 0 : index
    %18 = vector.load %arg6[%c0_12, %c0_13] : memref<512x2048xbf16, #tpu.memory_space<vmem>>, vector<512x2048xbf16>
    %cst_14 = arith.constant dense<0.000000e+00> : vector<16x2048xf32>
    %19 = tpu.matmul %17, %18, %cst_14 {dimension_numbers = #tpu.dot_dimension_numbers<[1], [0], [0], [1], [0, 0, 1, 1], [], []>} : vector<16x512xbf16>, vector<512x2048xbf16>, vector<16x2048xf32> -> vector<16x2048xf32>
    %c0_15 = arith.constant 0 : index
    %c0_16 = arith.constant 0 : index
    %20 = vector.load %arg7[%c0_15, %c0_16] : memref<1x2048xf32, #tpu.memory_space<vmem>>, vector<1x2048xf32>
    %21 = vector.broadcast %20 : vector<1x2048xf32> to vector<16x2048xf32>
    %22 = arith.addf %19, %21 : vector<16x2048xf32>
    %cst_17 = arith.constant 0.000000e+00 : f32
    %23 = vector.broadcast %cst_17 : f32 to vector<16x2048xf32>
    %24 = arith.maximumf %22, %23 : vector<16x2048xf32>
    %25 = arith.truncf %24 : vector<16x2048xf32> to vector<16x2048xbf16>
    %c0_18 = arith.constant 0 : index
    %c0_19 = arith.constant 0 : index
    %26 = vector.load %arg8[%c0_18, %c0_19] : memref<2048x128xbf16, #tpu.memory_space<vmem>>, vector<2048x128xbf16>
    %cst_20 = arith.constant dense<0.000000e+00> : vector<16x128xf32>
    %27 = tpu.matmul %25, %26, %cst_20 {dimension_numbers = #tpu.dot_dimension_numbers<[1], [0], [0], [1], [0, 0, 1, 1], [], []>} : vector<16x2048xbf16>, vector<2048x128xbf16>, vector<16x128xf32> -> vector<16x128xf32>
    %c0_21 = arith.constant 0 : index
    %c0_22 = arith.constant 0 : index
    %28 = vector.load %arg9[%c0_21, %c0_22] : memref<1x128xf32, #tpu.memory_space<vmem>>, vector<1x128xf32>
    %29 = vector.broadcast %28 : vector<1x128xf32> to vector<16x128xf32>
    %30 = arith.addf %27, %29 : vector<16x128xf32>
    %c0_23 = arith.constant 0 : index
    %c0_24 = arith.constant 0 : index
    %31 = vector.load %arg10[%c0_23, %c0_24] : memref<16x128xf32, #tpu.memory_space<vmem>>, vector<16x128xf32>
    tpu.vector_store %arg10[%c0_23, %c0_24], %30 {strides = array<i32>} : memref<16x128xf32, #tpu.memory_space<vmem>>, vector<16x128xf32>,
    return
  }
  func.func @transform_0(%arg0: i32) -> (i32, i32) {
    %c0_i32 = arith.constant 0 : i32
    %c0_i32_0 = arith.constant 0 : i32
    return %arg0, %c0_i32 : i32, i32
  }
  func.func @transform_1(%arg0: i32) -> (i32, i32) {
    %c0_i32 = arith.constant 0 : i32
    %c0_i32_0 = arith.constant 0 : i32
    %c0_i32_1 = arith.constant 0 : i32
    return %c0_i32, %c0_i32_0 : i32, i32
  }
  func.func @transform_2(%arg0: i32) -> (i32, i32) {
    %c0_i32 = arith.constant 0 : i32
    %c0_i32_0 = arith.constant 0 : i32
    %c0_i32_1 = arith.constant 0 : i32
    return %c0_i32, %c0_i32_0 : i32, i32
  }
  func.func @transform_3(%arg0: i32) -> (i32, i32) {
    %c0_i32 = arith.constant 0 : i32
    %c0_i32_0 = arith.constant 0 : i32
    %c0_i32_1 = arith.constant 0 : i32
    return %c0_i32, %c0_i32_0 : i32, i32
  }
  func.func @transform_4(%arg0: i32) -> (i32, i32) {
    %c0_i32 = arith.constant 0 : i32
    %c0_i32_0 = arith.constant 0 : i32
    %c0_i32_1 = arith.constant 0 : i32
    return %c0_i32, %c0_i32_0 : i32, i32
  }
  func.func @transform_5(%arg0: i32) -> (i32, i32) {
    %c0_i32 = arith.constant 0 : i32
    %c0_i32_0 = arith.constant 0 : i32
    %c0_i32_1 = arith.constant 0 : i32
    return %c0_i32, %c0_i32_0 : i32, i32
  }
  func.func @transform_6(%arg0: i32) -> (i32, i32) {
    %c0_i32 = arith.constant 0 : i32
    %c0_i32_0 = arith.constant 0 : i32
    %c0_i32_1 = arith.constant 0 : i32
    return %c0_i32, %c0_i32_0 : i32, i32
  }
  func.func @transform_7(%arg0: i32) -> (i32, i32) {
    %c0_i32 = arith.constant 0 : i32
    %c0_i32_0 = arith.constant 0 : i32
    %c0_i32_1 = arith.constant 0 : i32
    return %c0_i32, %c0_i32_0 : i32, i32
  }
  func.func @transform_8(%arg0: i32) -> (i32, i32) {
    %c0_i32 = arith.constant 0 : i32
    %c0_i32_0 = arith.constant 0 : i32
    %c0_i32_1 = arith.constant 0 : i32
    return %c0_i32, %c0_i32_0 : i32, i32
  }
  func.func @transform_9(%arg0: i32) -> (i32, i32) {
    %c0_i32 = arith.constant 0 : i32
    %c0_i32_0 = arith.constant 0 : i32
    return %arg0, %c0_i32 : i32, i32
  }
}

module attributes {stable_mosaic.version = 11 : i64} {
  func.func @mlp_kernel(%arg0: i32, %arg1: memref<16x32xf32, #tpu.memory_space<vmem>>, %arg2: memref<32x512xbf16, #tpu.memory_space<vmem>>, %arg3: memref<1x512xf32, #tpu.memory_space<vmem>>, %arg4: memref<512x512xbf16, #tpu.memory_space<vmem>>, %arg5: memref<1x512xf32, #tpu.memory_space<vmem>>, %arg6: memref<512x2048xbf16, #tpu.memory_space<vmem>>, %arg7: memref<1x2048xf32, #tpu.memory_space<vmem>>, %arg8: memref<2048x128xbf16, #tpu.memory_space<vmem>>, %arg9: memref<1x128xf32, #tpu.memory_space<vmem>>, %arg10: memref<16x128xf32, #tpu.memory_space<vmem>>) attributes {dimension_semantics = [#tpu.dimension_semantics<parallel>], iteration_bounds = array<i64: 1>, scalar_prefetch = 0 : i64, scratch_operands = 0 : i64, tpu.core_type = #tpu.core_type<tc>, window_params = [{transform_indices = @transform_0, window_bounds = array<i64: 16, 32>}, {pipeline_mode = #tpu.pipeline_mode<synchronous>, transform_indices = @transform_1, window_bounds = array<i64: 32, 512>}, {pipeline_mode = #tpu.pipeline_mode<synchronous>, transform_indices = @transform_2, window_bounds = array<i64: 1, 512>}, {pipeline_mode = #tpu.pipeline_mode<synchronous>, transform_indices = @transform_3, window_bounds = array<i64: 512, 512>}, {pipeline_mode = #tpu.pipeline_mode<synchronous>, transform_indices = @transform_4, window_bounds = array<i64: 1, 512>}, {pipeline_mode = #tpu.pipeline_mode<synchronous>, transform_indices = @transform_5, window_bounds = array<i64: 512, 2048>}, {pipeline_mode = #tpu.pipeline_mode<synchronous>, transform_indices = @transform_6, window_bounds = array<i64: 1, 2048>}, {pipeline_mode = #tpu.pipeline_mode<synchronous>, transform_indices = @transform_7, window_bounds = array<i64: 2048, 128>}, {pipeline_mode = #tpu.pipeline_mode<synchronous>, transform_indices = @transform_8, window_bounds = array<i64: 1, 128>}, {transform_indices = @transform_9, window_bounds = array<i64: 16, 128>}]} {
    %c0 = arith.constant 0 : index
    %c0_0 = arith.constant 0 : index
    %0 = vector.load %arg1[%c0, %c0_0] : memref<16x32xf32, #tpu.memory_space<vmem>>, vector<16x32xf32>
    %1 = arith.truncf %0 : vector<16x32xf32> to vector<16x32xbf16>
    %c0_1 = arith.constant 0 : index
    %c0_2 = arith.constant 0 : index
    %2 = vector.load %arg2[%c0_1, %c0_2] : memref<32x512xbf16, #tpu.memory_space<vmem>>, vector<32x512xbf16>
    %cst = arith.constant dense<0.000000e+00> : vector<16x512xf32>
    %3 = tpu.matmul %1, %2, %cst {dimension_numbers = #tpu.dot_dimension_numbers<[1], [0], [0], [1], [0, 0, 1, 1], [], []>} : vector<16x32xbf16>, vector<32x512xbf16>, vector<16x512xf32> -> vector<16x512xf32>
    %c0_3 = arith.constant 0 : index
    %c0_4 = arith.constant 0 : index
    %4 = vector.load %arg3[%c0_3, %c0_4] : memref<1x512xf32, #tpu.memory_space<vmem>>, vector<1x512xf32>
    %5 = vector.broadcast %4 : vector<1x512xf32> to vector<16x512xf32>
    %6 = arith.addf %3, %5 : vector<16x512xf32>
    %cst_5 = arith.constant 0.000000e+00 : f32
    %7 = vector.broadcast %cst_5 : f32 to vector<16x512xf32>
    %8 = arith.maximumf %6, %7 : vector<16x512xf32>
    %9 = arith.truncf %8 : vector<16x512xf32> to vector<16x512xbf16>
    %c0_6 = arith.constant 0 : index
    %c0_7 = arith.constant 0 : index
    %10 = vector.load %arg4[%c0_6, %c0_7] : memref<512x512xbf16, #tpu.memory_space<vmem>>, vector<512x512xbf16>
    %cst_8 = arith.constant dense<0.000000e+00> : vector<16x512xf32>
    %11 = tpu.matmul %9, %10, %cst_8 {dimension_numbers = #tpu.dot_dimension_numbers<[1], [0], [0], [1], [0, 0, 1, 1], [], []>} : vector<16x512xbf16>, vector<512x512xbf16>, vector<16x512xf32> -> vector<16x512xf32>
    %c0_9 = arith.constant 0 : index
    %c0_10 = arith.constant 0 : index
    %12 = vector.load %arg5[%c0_9, %c0_10] : memref<1x512xf32, #tpu.memory_space<vmem>>, vector<1x512xf32>
    %13 = vector.broadcast %12 : vector<1x512xf32> to vector<16x512xf32>
    %14 = arith.addf %11, %13 : vector<16x512xf32>
    %cst_11 = arith.constant 0.000000e+00 : f32
    %15 = vector.broadcast %cst_11 : f32 to vector<16x512xf32>
    %16 = arith.maximumf %14, %15 : vector<16x512xf32>
    %17 = arith.truncf %16 : vector<16x512xf32> to vector<16x512xbf16>
    %c0_12 = arith.constant 0 : index
    %c0_13 = arith.constant 0 : index
    %18 = vector.load %arg6[%c0_12, %c0_13] : memref<512x2048xbf16, #tpu.memory_space<vmem>>, vector<512x2048xbf16>
    %cst_14 = arith.constant dense<0.000000e+00> : vector<16x2048xf32>
    %19 = tpu.matmul %17, %18, %cst_14 {dimension_numbers = #tpu.dot_dimension_numbers<[1], [0], [0], [1], [0, 0, 1, 1], [], []>} : vector<16x512xbf16>, vector<512x2048xbf16>, vector<16x2048xf32> -> vector<16x2048xf32>
    %c0_15 = arith.constant 0 : index
    %c0_16 = arith.constant 0 : index
    %20 = vector.load %arg7[%c0_15, %c0_16] : memref<1x2048xf32, #tpu.memory_space<vmem>>, vector<1x2048xf32>
    %21 = vector.broadcast %20 : vector<1x2048xf32> to vector<16x2048xf32>
    %22 = arith.addf %19, %21 : vector<16x2048xf32>
    %cst_17 = arith.constant 0.000000e+00 : f32
    %23 = vector.broadcast %cst_17 : f32 to vector<16x2048xf32>
    %24 = arith.maximumf %22, %23 : vector<16x2048xf32>
    %25 = arith.truncf %24 : vector<16x2048xf32> to vector<16x2048xbf16>
    %c0_18 = arith.constant 0 : index
    %c0_19 = arith.constant 0 : index
    %26 = vector.load %arg8[%c0_18, %c0_19] : memref<2048x128xbf16, #tpu.memory_space<vmem>>, vector<2048x128xbf16>
    %cst_20 = arith.constant dense<0.000000e+00> : vector<16x128xf32>
    %27 = tpu.matmul %25, %26, %cst_20 {dimension_numbers = #tpu.dot_dimension_numbers<[1], [0], [0], [1], [0, 0, 1, 1], [], []>} : vector<16x2048xbf16>, vector<2048x128xbf16>, vector<16x128xf32> -> vector<16x128xf32>
    %c0_21 = arith.constant 0 : index
    %c0_22 = arith.constant 0 : index
    %28 = vector.load %arg9[%c0_21, %c0_22] : memref<1x128xf32, #tpu.memory_space<vmem>>, vector<1x128xf32>
    %29 = vector.broadcast %28 : vector<1x128xf32> to vector<16x128xf32>
    %30 = arith.addf %27, %29 : vector<16x128xf32>
    %c0_23 = arith.constant 0 : index
    %c0_24 = arith.constant 0 : index
    %31 = vector.load %arg10[%c0_23, %c0_24] : memref<16x128xf32, #tpu.memory_space<vmem>>, vector<16x128xf32>
    tpu.vector_store %arg10[%c0_23, %c0_24], %30 {strides = array<i32>} : memref<16x128xf32, #tpu.memory_space<vmem>>, vector<16x128xf32>,
    return
  }
  func.func @transform_0(%arg0: i32) -> (i32, i32) {
    %c0_i32 = arith.constant 0 : i32
    %c0_i32_0 = arith.constant 0 : i32
    return %arg0, %c0_i32 : i32, i32
  }
  func.func @transform_1(%arg0: i32) -> (i32, i32) {
    %c0_i32 = arith.constant 0 : i32
    %c0_i32_0 = arith.constant 0 : i32
    %c0_i32_1 = arith.constant 0 : i32
    return %c0_i32, %c0_i32_0 : i32, i32
  }
  func.func @transform_2(%arg0: i32) -> (i32, i32) {
    %c0_i32 = arith.constant 0 : i32
    %c0_i32_0 = arith.constant 0 : i32
    %c0_i32_1 = arith.constant 0 : i32
    return %c0_i32, %c0_i32_0 : i32, i32
  }
  func.func @transform_3(%arg0: i32) -> (i32, i32) {
    %c0_i32 = arith.constant 0 : i32
    %c0_i32_0 = arith.constant 0 : i32
    %c0_i32_1 = arith.constant 0 : i32
    return %c0_i32, %c0_i32_0 : i32, i32
  }
  func.func @transform_4(%arg0: i32) -> (i32, i32) {
    %c0_i32 = arith.constant 0 : i32
    %c0_i32_0 = arith.constant 0 : i32
    %c0_i32_1 = arith.constant 0 : i32
    return %c0_i32, %c0_i32_0 : i32, i32
  }
  func.func @transform_5(%arg0: i32) -> (i32, i32) {
    %c0_i32 = arith.constant 0 : i32
    %c0_i32_0 = arith.constant 0 : i32
    %c0_i32_1 = arith.constant 0 : i32
    return %c0_i32, %c0_i32_0 : i32, i32
  }
  func.func @transform_6(%arg0: i32) -> (i32, i32) {
    %c0_i32 = arith.constant 0 : i32
    %c0_i32_0 = arith.constant 0 : i32
    %c0_i32_1 = arith.constant 0 : i32
    return %c0_i32, %c0_i32_0 : i32, i32
  }
  func.func @transform_7(%arg0: i32) -> (i32, i32) {
    %c0_i32 = arith.constant 0 : i32
    %c0_i32_0 = arith.constant 0 : i32
    %c0_i32_1 = arith.constant 0 : i32
    return %c0_i32, %c0_i32_0 : i32, i32
  }
  func.func @transform_8(%arg0: i32) -> (i32, i32) {
    %c0_i32 = arith.constant 0 : i32
    %c0_i32_0 = arith.constant 0 : i32
    %c0_i32_1 = arith.constant 0 : i32
    return %c0_i32, %c0_i32_0 : i32, i32
  }
  func.func @transform_9(%arg0: i32) -> (i32, i32) {
    %c0_i32 = arith.constant 0 : i32
    %c0_i32_0 = arith.constant 0 : i32
    return %arg0, %c0_i32 : i32, i32
  }
}

</mosaic_0001>

<bundles_post_ra>
// kernel: _encoder_forward_impl.1
= control target key start
LH: loop header
LB: loop body
LE: loop exit
PB: predicated region body
PF: predicated region fallthrough
CT: control target
= control target key end

     0   :  { %14 = vsyncpa [#allocation3], 0  ;;  %s8438_s0 = inlined_call_operand.vmem [shape: f32[16,32], index: 0, kind: input, shape index: {}]   ;;  %s8439_s1 = inlined_call_operand.hbm [shape: bf16[32,512], index: 1, kind: input, shape index: {}]   ;;  %s8440_s2 = inlined_call_operand.hbm [shape: f32[1,512], index: 2, kind: input, shape index: {}]   ;;  %s8441_s3 = inlined_call_operand.hbm [shape: bf16[512,512], index: 3, kind: input, shape index: {}]   ;;  %s8442_s4 = inlined_call_operand.hbm [shape: f32[1,512], index: 4, kind: input, shape index: {}]   ;;  %s8443_s5 = inlined_call_operand.hbm [shape: bf16[512,2048], index: 5, kind: input, shape index: {}]   ;;  %s8444_s6 = inlined_call_operand.hbm [shape: f32[1,2048], index: 6, kind: input, shape index: {}]   ;;  %s8445_s7 = inlined_call_operand.hbm [shape: bf16[2048,128], index: 7, kind: input, shape index: {}]   ;;  %s8446_s8 = inlined_call_operand.hbm [shape: f32[1,128], index: 8, kind: input, shape index: {}]   ;;  %s8447_s9 = inlined_call_operand.vmem [shape: f32[16,128], index: 9, kind: output, shape index: {}]  }
   0x1   :  { %15 = vsyncpa [#allocation5], 0 }
   0x2   :  { %16 = vsyncpa [#allocation8], 0 }
   0x3   :  { %17 = vsyncpa [#allocation11], 0 }
   0x4   :  { %18 = vsyncpa [#allocation14], 0  ;;  %s8112_s30 = smov [#allocation4]   ;;  %s8113_s11 = smov [#allocation7]  }
   0x5   :  { %s39_s10 = sshll.u32 %s8112_s30, 4  ;;  %s61_s12 = sshll.u32 %s8113_s11, 4  ;;  %s40_s10 = int_to_ptr.vmem [resolvable:$true] %s39_s10  ;;  %s62_s12 = int_to_ptr.vmem [resolvable:$true] %s61_s12 }
   0x6   :  { %s7926_s15 = scalar_lea.hbm %s8440_s2, 64 }
   0x7   :  { %p7927_p0 = scmp.ne.s32.totalorder %s8440_s2, %s7926_s15  ;;  %p7930_p1 = scmp.lt.u32.totalorder %s7926_s15, %s8440_s2 }
   0x9   :  { %p7932_p2 = pnand %p7930_p1, %p7927_p0 }
   0xb   :  { %7935 = shalt.err (!%p7932_p2)
}
   0xc   :  { %s7936_s20 = scalar_lea.vmem %s40_s10, 64  ;;  %p7941_p4 = scmp.lt.s32.totalorder %s40_s10, %s40_s10 }
   0xd   :  { %p7937_p3 = scmp.ne.s32.totalorder %s40_s10, %s7936_s20  ;;  %p7942_p5 = scmp.lt.s32.totalorder %s7936_s20, %s7936_s20 }
   0xf   :  { %p7943_p6 = por %p7942_p5, %p7941_p4 }
  0x11   :  { %p7944_p7 = pnand %p7943_p6, %p7937_p3 }
  0x13   :  { %7947 = shalt.err (!%p7944_p7)
}
  0x14   :  { %42 = dma.hbm_to_vmem [thread:$0]  %s8440_s2, 64, %s40_s10, [#allocation5]  }
  0x15   :  { %s7948_s25 = scalar_lea.hbm %s8442_s4, 64 }
  0x16   :  { %p7949_p8 = scmp.ne.s32.totalorder %s8442_s4, %s7948_s25  ;;  %p7952_p9 = scmp.lt.u32.totalorder %s7948_s25, %s8442_s4 }
  0x18   :  { %p7954_p10 = pnand %p7952_p9, %p7949_p8 }
  0x1a   :  { %7957 = shalt.err (!%p7954_p10)
}
  0x1b   :  { %s7958_s30 = scalar_lea.vmem %s62_s12, 64  ;;  %p7963_p12 = scmp.lt.s32.totalorder %s62_s12, %s62_s12 }
  0x1c   :  { %p7959_p11 = scmp.ne.s32.totalorder %s62_s12, %s7958_s30  ;;  %p7964_p13 = scmp.lt.s32.totalorder %s7958_s30, %s7958_s30 }
  0x1e   :  { %p7965_p0 = por %p7964_p13, %p7963_p12 }
  0x20   :  { %p7966_p1 = pnand %p7965_p0, %p7959_p11 }
  0x22   :  { %7969 = shalt.err (!%p7966_p1)
}
  0x23   :  { %64 = dma.hbm_to_vmem [thread:$0]  %s8442_s4, 64, %s62_s12, [#allocation8]  }
  0x24   :  { %s8114_s11 = smov [#allocation10]   ;;  %s8115_s14 = smov [#allocation2]  }
  0x25   :  { %s83_s13 = sshll.u32 %s8114_s11, 4  ;;  %s26_s15 = sshll.u32 %s8115_s14, 4  ;;  %s84_s13 = int_to_ptr.vmem [resolvable:$true] %s83_s13  ;;  %s8200_s15 = int_to_ptr.vmem [resolvable:$true] %s26_s15 }
  0x26   :  { %s7970_s18 = scalar_lea.hbm %s8444_s6, 256 }
  0x27   :  { %p7971_p2 = scmp.ne.s32.totalorder %s8444_s6, %s7970_s18  ;;  %p7974_p3 = scmp.lt.u32.totalorder %s7970_s18, %s8444_s6 }
  0x29   :  { %p7976_p4 = pnand %p7974_p3, %p7971_p2 }
  0x2b   :  { %7979 = shalt.err (!%p7976_p4)
}
  0x2c   :  { %s7980_s4 = scalar_lea.vmem %s84_s13, 256  ;;  %p7985_p6 = scmp.lt.s32.totalorder %s84_s13, %s84_s13 }
  0x2d   :  { %p7981_p5 = scmp.ne.s32.totalorder %s84_s13, %s7980_s4  ;;  %p7986_p7 = scmp.lt.s32.totalorder %s7980_s4, %s7980_s4 }
  0x2f   :  { %p7987_p8 = por %p7986_p7, %p7985_p6 }
  0x31   :  { %p7988_p9 = pnand %p7987_p8, %p7981_p5 }
  0x33   :  { %7991 = shalt.err (!%p7988_p9)
}
  0x34   :  { %86 = dma.hbm_to_vmem [thread:$0]  %s8444_s6, 256, %s84_s13, [#allocation11]  }
  0x35   :  { %s7992_s26 = scalar_lea.hbm %s8439_s1, 1024 }
  0x36   :  { %p7993_p10 = scmp.ne.s32.totalorder %s8439_s1, %s7992_s26  ;;  %p7996_p11 = scmp.lt.u32.totalorder %s7992_s26, %s8439_s1 }
  0x38   :  { %p7998_p12 = pnand %p7996_p11, %p7993_p10 }
  0x3a   :  { %8001 = shalt.err (!%p7998_p12)
}
  0x3b   :  { %s8002_s2 = scalar_lea.vmem %s8200_s15, 1024  ;;  %p8007_p0 = scmp.lt.s32.totalorder %s8200_s15, %s8200_s15 }
  0x3c   :  { %p8003_p13 = scmp.ne.s32.totalorder %s8200_s15, %s8002_s2  ;;  %p8008_p1 = scmp.lt.s32.totalorder %s8002_s2, %s8002_s2 }
  0x3e   :  { %p8009_p2 = por %p8008_p1, %p8007_p0 }
  0x40   :  { %p8010_p3 = pnand %p8009_p2, %p8003_p13 }
  0x42   :  { %8013 = shalt.err (!%p8010_p3)
}
  0x43   :  { %s8116_s6 = smov 256   ;;  %s8117_s10 = smov 16  }
  0x44   :  { %32 = dma.hbm_to_vmem [thread:$0]  %s8439_s1, 1024, %s8200_s15, [#allocation3], %s8116_s6, %s8116_s6, %s8117_s10  }
  0x45   :  { %s8118_s14 = smov [#allocation6]   ;;  %s8119_s17 = smov [#allocation9]  }
  0x46   :  { %s48_s16 = sshll.u32 %s8118_s14, 4  ;;  %s70_s18 = sshll.u32 %s8119_s17, 4  ;;  %s49_s16 = int_to_ptr.vmem [resolvable:$true] %s48_s16  ;;  %s8231_s18 = int_to_ptr.vmem [resolvable:$true] %s70_s18 }
  0x47   :  { %s8014_s21 = scalar_lea.hbm %s8441_s3, 16384 }
  0x48   :  { %p8015_p4 = scmp.ne.s32.totalorder %s8441_s3, %s8014_s21  ;;  %p8018_p5 = scmp.lt.u32.totalorder %s8014_s21, %s8441_s3 }
  0x4a   :  { %p8020_p6 = pnand %p8018_p5, %p8015_p4 }
  0x4c   :  { %8023 = shalt.err (!%p8020_p6)
}
  0x4d   :  { %s8024_s1 = scalar_lea.vmem %s49_s16, 16384  ;;  %p8029_p8 = scmp.lt.s32.totalorder %s49_s16, %s49_s16 }
  0x4e   :  { %p8025_p7 = scmp.ne.s32.totalorder %s49_s16, %s8024_s1  ;;  %p8030_p9 = scmp.lt.s32.totalorder %s8024_s1, %s8024_s1 }
  0x50   :  { %p8031_p10 = por %p8030_p9, %p8029_p8 }
  0x52   :  { %p8032_p11 = pnand %p8031_p10, %p8025_p7 }
  0x54   :  { %8035 = shalt.err (!%p8032_p11)
}
  0x55   :  { %54 = dma.hbm_to_vmem [thread:$0]  %s8441_s3, 16384, %s49_s16, [#allocation5], %s8116_s6, %s8116_s6, %s8117_s10  }
  0x56   :  { %s8036_s27 = scalar_lea.hbm %s8443_s5, 65536 }
  0x57   :  { %p8037_p12 = scmp.ne.s32.totalorder %s8443_s5, %s8036_s27  ;;  %p8040_p13 = scmp.lt.u32.totalorder %s8036_s27, %s8443_s5 }
  0x59   :  { %p8042_p0 = pnand %p8040_p13, %p8037_p12 }
  0x5b   :  { %8045 = shalt.err (!%p8042_p0)
}
  0x5c   :  { %s8046_s11 = scalar_lea.vmem %s8231_s18, 65536  ;;  %p8051_p2 = scmp.lt.s32.totalorder %s8231_s18, %s8231_s18 }
  0x5d   :  { %p8047_p1 = scmp.ne.s32.totalorder %s8231_s18, %s8046_s11  ;;  %p8052_p3 = scmp.lt.s32.totalorder %s8046_s11, %s8046_s11 }
  0x5f   :  { %p8053_p4 = por %p8052_p3, %p8051_p2 }
  0x61   :  { %p8054_p5 = pnand %p8053_p4, %p8047_p1 }
  0x63   :  { %8057 = shalt.err (!%p8054_p5)
}
  0x64   :  { %s8120_s3 = smov 1024   ;;  %s8121_s6 = smov 64  }
  0x65   :  { %76 = dma.hbm_to_vmem [thread:$0]  %s8443_s5, 65536, %s8231_s18, [#allocation8], %s8120_s3, %s8120_s3, %s8121_s6  }
  0x66   :  { %s8122_s14 = smov [#allocation12]   ;;  %s8123_s17 = smov [#allocation13]  }
  0x67   :  { %s92_s16 = sshll.u32 %s8122_s14, 4  ;;  %s105_s19 = sshll.u32 %s8123_s17, 4  ;;  %s93_s16 = int_to_ptr.vmem [resolvable:$true] %s92_s16  ;;  %s106_s19 = int_to_ptr.vmem [resolvable:$true] %s105_s19 }
  0x68   :  { %s8058_s22 = scalar_lea.hbm %s8445_s7, 16384 }
  0x69   :  { %p8059_p6 = scmp.ne.s32.totalorder %s8445_s7, %s8058_s22  ;;  %p8062_p7 = scmp.lt.u32.totalorder %s8058_s22, %s8445_s7 }
  0x6b   :  { %p8064_p8 = pnand %p8062_p7, %p8059_p6 }
  0x6d   :  { %8067 = shalt.err (!%p8064_p8)
}
  0x6e   :  { %s8068_s5 = scalar_lea.vmem %s93_s16, 16384  ;;  %p8073_p10 = scmp.lt.s32.totalorder %s93_s16, %s93_s16 }
  0x6f   :  { %p8069_p9 = scmp.ne.s32.totalorder %s93_s16, %s8068_s5  ;;  %p8074_p11 = scmp.lt.s32.totalorder %s8068_s5, %s8068_s5 }
  0x71   :  { %p8075_p12 = por %p8074_p11, %p8073_p10 }
  0x73   :  { %p8076_p13 = pnand %p8075_p12, %p8069_p9 }
  0x75   :  { %8079 = shalt.err (!%p8076_p13)
}
  0x76   :  { %s8124_s18 = smov 4   ;;  %s8080_s27 = scalar_lea.hbm %s8446_s8, 16 }
  0x77   :  { %98 = dma.hbm_to_vmem [thread:$0]  %s8445_s7, 16384, %s93_s16, [#allocation11], %s8121_s6, %s8121_s6, %s8124_s18  }
  0x78   :  { %p8081_p0 = scmp.ne.s32.totalorder %s8446_s8, %s8080_s27  ;;  %p8084_p1 = scmp.lt.u32.totalorder %s8080_s27, %s8446_s8 }
  0x7a   :  { %p8086_p2 = pnand %p8084_p1, %p8081_p0 }
  0x7c   :  { %8089 = shalt.err (!%p8086_p2)
}
  0x7d   :  { %s8090_s11 = scalar_lea.vmem %s106_s19, 16  ;;  %s8094_s3 = scalar_lea.vmem %s106_s19, 32 }
  0x7e   :  { %p8091_p3 = scmp.ne.s32.totalorder %s106_s19, %s8090_s11  ;;  %p8095_p4 = scmp.lt.s32.totalorder %s106_s19, %s106_s19 }
  0x7f   :  { %p8096_p5 = scmp.lt.s32.totalorder %s8094_s3, %s8090_s11 }
  0x81   :  { %p8097_p6 = por %p8096_p5, %p8095_p4 }
  0x83   :  { %p8098_p7 = pnand %p8097_p6, %p8091_p3 }
  0x85   :  { %8101 = shalt.err (!%p8098_p7)
}
  0x86   :  { %108 = dma.hbm_to_vmem [thread:$0]  %s8446_s8, 16, %s106_s19, [#allocation14]  }
  0x87   :  { %8102 = dma.done.wait [#allocation3], 1024  }
  0x88   :  { %8103 = vsyncadd [#allocation3], 4294966272 }
  0x89   :  { %8104 = dma.done.wait [#allocation5], 16448  }
  0x8a   :  { %8105 = vsyncadd [#allocation5], 4294950848 }
  0x8b   :  { %8106 = dma.done.wait [#allocation8], 65600  }
  0x8c   :  { %8107 = vsyncadd [#allocation8], 4294901696 }
  0x8d   :  { %8108 = dma.done.wait [#allocation11], 16640  }
  0x8e   :  { %8109 = vsyncadd [#allocation11], 4294950656 }
  0x8f   :  { %8110 = dma.done.wait [#allocation14], 16  }
  0x90   :  { %8111 = vsyncadd [#allocation14], 4294967280  ;;  %v8125_v0 = vmov 0   ;;  %v7594_v1 = vld [vmem:[#allocation2 + $0x4] ss:$16 sps:$4 sm:$0xff]   ;;  %v135_v6 = vld [vmem:[%s8438_s0 + $0x8] sm:$0xff] }
  0x91   :  { %243 = vmatprep.mubr.bf16.mxu0 %v8125_v0  ;;  %286 = vmatprep.mubr.bf16.mxu1 %v8125_v0  ;;  %v7596_v2 = vld [vmem:[#allocation2] ss:$16 sps:$4 sm:$0xff]   ;;  %v7597_v3 = vld [vmem:[#allocation2 + $0x24] ss:$16 sps:$4 sm:$0xff]   ;;  %v7600_v7 = vld [vmem:[#allocation2 + $0xc] ss:$16 sps:$4 sm:$0xff]  }
  0x92   :  { %211 = vmatprep.subr.bf16.mxu0 %v7594_v1  ;;  %v7599_v4 = vld [vmem:[#allocation2 + $0x20] ss:$16 sps:$4 sm:$0xff]   ;;  %v7602_v8 = vld [vmem:[#allocation2 + $0x8] ss:$16 sps:$4 sm:$0xff]   ;;  %v7603_v9 = vld [vmem:[#allocation2 + $0x2c] ss:$16 sps:$4 sm:$0xff]   ;;  %254 = vmatprep.subr.bf16.mxu1 %v7600_v7 }
  0x93   :  { %v134_v5 = vld [vmem:[%s8438_s0] sm:$0xff]  ;;  %212 = vmatpush1.bf16.msra.mxu0 %v7596_v2  ;;  %v7605_v10 = vld [vmem:[#allocation2 + $0x28] ss:$16 sps:$4 sm:$0xff]   ;;  %vm207_vm0 = vcmask 261120   ;;  %255 = vmatpush1.bf16.msra.mxu1 %v7602_v8  ;;  %v7609_v16 = vld [vmem:[#allocation6 + $0x8] ss:$16 sps:$4 sm:$0xff]  }
  0x94   :  { %213 = vmatprep.subr.bf16.mxu0 %v7597_v3  ;;  %v136_v11 = vpack.c.bf16 %v135_v6, %v134_v5  ;;  %v7606_v12 = vld [vmem:[#allocation6] ss:$16 sps:$4 sm:$0xff]   ;;  %v7608_v13 = vld [vmem:[#allocation6 + $0x4] ss:$16 sps:$4 sm:$0xff]   ;;  %256 = vmatprep.subr.bf16.mxu1 %v7603_v9  ;;  %v7611_v14 = vld [vmem:[#allocation6 + $0xc] ss:$16 sps:$4 sm:$0xff]  }
  0x95   :  { %v7614_v15 = vld [vmem:[#allocation6 + $0x24] ss:$16 sps:$4 sm:$0xff]   ;;  %v7612_v17 = vld [vmem:[#allocation6 + $0x20] ss:$16 sps:$4 sm:$0xff]   ;;  %v7617_v18 = vld [vmem:[#allocation6 + $0x2c] ss:$16 sps:$4 sm:$0xff]  }
  0x96   :  { %v7620_v19 = vld [vmem:[#allocation6 + $0x44] ss:$16 sps:$4 sm:$0xff]   ;;  %v7615_v20 = vld [vmem:[#allocation6 + $0x28] ss:$16 sps:$4 sm:$0xff]   ;;  %v7618_v21 = vld [vmem:[#allocation6 + $0x40] ss:$16 sps:$4 sm:$0xff]  }
  0x97   :  { %214 = vmatpush1.bf16.msra.mxu0 %v7599_v4  ;;  %257 = vmatpush1.bf16.msra.mxu1 %v7605_v10  ;;  %v7623_v22 = vld [vmem:[#allocation6 + $0x4c] ss:$16 sps:$4 sm:$0xff]   ;;  %v7626_v23 = vld [vmem:[#allocation6 + $0x64] ss:$16 sps:$4 sm:$0xff]   ;;  %v7621_v24 = vld [vmem:[#allocation6 + $0x48] ss:$16 sps:$4 sm:$0xff]  }
  0x98   :  { %1099 = vmatprep.subr.bf16.mxu0 %v7608_v13  ;;  %1185 = vmatprep.subr.bf16.mxu1 %v7611_v14  ;;  %v7624_v25 = vld [vmem:[#allocation6 + $0x60] ss:$16 sps:$4 sm:$0xff]   ;;  %v7629_v26 = vld [vmem:[#allocation6 + $0x6c] ss:$16 sps:$4 sm:$0xff]   ;;  %v7632_v27 = vld [vmem:[#allocation6 + $0x84] ss:$16 sps:$4 sm:$0xff]   ;;  %v147_v14 = vlaneseq }
  0x99   :  { %v7627_v28 = vld [vmem:[#allocation6 + $0x68] ss:$16 sps:$4 sm:$0xff]   ;;  %v7630_v29 = vld [vmem:[#allocation6 + $0x80] ss:$16 sps:$4 sm:$0xff]   ;;  %v7635_v30 = vld [vmem:[#allocation6 + $0x8c] ss:$16 sps:$4 sm:$0xff]  }
  0x9a   :  { %6553 = vmatmul.mubr.msk.bf16.vlgmr.msra.gmra.mrb[0].mxu0 %vm207_vm0, %v136_v11  ;;  %6554 = vmatmul.mubr.msk.bf16.vlgmr.msra.gmra.mrb[0].mxu1 %vm207_vm0, %v136_v11  ;;  %v7638_v31 = vld [vmem:[#allocation6 + $0xa4] ss:$16 sps:$4 sm:$0xff]   ;;  %v7633_v32 = vld [vmem:[#allocation6 + $0x88] ss:$16 sps:$4 sm:$0xff]   ;;  %v7636_v33 = vld [vmem:[#allocation6 + $0xa0] ss:$16 sps:$4 sm:$0xff]  }
  0x9b   :  { %1100 = vmatpush1.bf16.msra.mxu0 %v7606_v12  ;;  %1186 = vmatpush1.bf16.msra.mxu1 %v7609_v16  ;;  %v7641_v34 = vld [vmem:[#allocation6 + $0xac] ss:$16 sps:$4 sm:$0xff]   ;;  %v7644_v35 = vld [vmem:[#allocation6 + $0xc4] ss:$16 sps:$4 sm:$0xff]   ;;  %v7639_v36 = vld [vmem:[#allocation6 + $0xa8] ss:$16 sps:$4 sm:$0xff]  }
  0x9c   :  { %1101 = vmatprep.subr.bf16.mxu0 %v7614_v15  ;;  %1187 = vmatprep.subr.bf16.mxu1 %v7617_v18  ;;  %v7642_v37 = vld [vmem:[#allocation6 + $0xc0] ss:$16 sps:$4 sm:$0xff]   ;;  %v7647_v38 = vld [vmem:[#allocation6 + $0xcc] ss:$16 sps:$4 sm:$0xff]   ;;  %v7650_v39 = vld [vmem:[#allocation6 + $0xe4] ss:$16 sps:$4 sm:$0xff]  }
  0x9d   :  { %v7645_v40 = vld [vmem:[#allocation6 + $0xc8] ss:$16 sps:$4 sm:$0xff]   ;;  %v7648_v41 = vld [vmem:[#allocation6 + $0xe0] ss:$16 sps:$4 sm:$0xff]   ;;  %v7653_v42 = vld [vmem:[#allocation6 + $0xec] ss:$16 sps:$4 sm:$0xff]  }
  0x9e   :  { %v7656_v43 = vld [vmem:[#allocation6 + $0x104] ss:$16 sps:$4 sm:$0xff]   ;;  %v7651_v44 = vld [vmem:[#allocation6 + $0xe8] ss:$16 sps:$4 sm:$0xff]   ;;  %v7654_v45 = vld [vmem:[#allocation6 + $0x100] ss:$16 sps:$4 sm:$0xff]  }
  0x9f   :  { %1102 = vmatpush1.bf16.msra.mxu0 %v7612_v17  ;;  %1188 = vmatpush1.bf16.msra.mxu1 %v7615_v20  ;;  %v7659_v46 = vld [vmem:[#allocation6 + $0x10c] ss:$16 sps:$4 sm:$0xff]   ;;  %v7662_v47 = vld [vmem:[#allocation6 + $0x124] ss:$16 sps:$4 sm:$0xff]   ;;  %v7657_v48 = vld [vmem:[#allocation6 + $0x108] ss:$16 sps:$4 sm:$0xff]  }
  0xa0   :  { %1103 = vmatprep.subr.bf16.mxu0 %v7620_v19  ;;  %1189 = vmatprep.subr.bf16.mxu1 %v7623_v22  ;;  %v7660_v49 = vld [vmem:[#allocation6 + $0x120] ss:$16 sps:$4 sm:$0xff]   ;;  %v7665_v50 = vld [vmem:[#allocation6 + $0x12c] ss:$16 sps:$4 sm:$0xff]   ;;  %v7668_v51 = vld [vmem:[#allocation6 + $0x144] ss:$16 sps:$4 sm:$0xff]  }
  0xa1   :  { %v7663_v52 = vld [vmem:[#allocation6 + $0x128] ss:$16 sps:$4 sm:$0xff]   ;;  %v7666_v53 = vld [vmem:[#allocation6 + $0x140] ss:$16 sps:$4 sm:$0xff]   ;;  %v7671_v54 = vld [vmem:[#allocation6 + $0x14c] ss:$16 sps:$4 sm:$0xff]  }
  0xa2   :  { %v7674_v55 = vld [vmem:[#allocation6 + $0x164] ss:$16 sps:$4 sm:$0xff]   ;;  %v7669_v56 = vld [vmem:[#allocation6 + $0x148] ss:$16 sps:$4 sm:$0xff]   ;;  %v7672_v57 = vld [vmem:[#allocation6 + $0x160] ss:$16 sps:$4 sm:$0xff]  }
  0xa3   :  { %1104 = vmatpush1.bf16.msra.mxu0 %v7618_v21  ;;  %1190 = vmatpush1.bf16.msra.mxu1 %v7621_v24  ;;  %v7677_v58 = vld [vmem:[#allocation6 + $0x16c] ss:$16 sps:$4 sm:$0xff]   ;;  %v7680_v59 = vld [vmem:[#allocation6 + $0x184] ss:$16 sps:$4 sm:$0xff]   ;;  %v7675_v60 = vld [vmem:[#allocation6 + $0x168] ss:$16 sps:$4 sm:$0xff]  }
  0xa4   :  { %1105 = vmatprep.subr.bf16.mxu0 %v7626_v23  ;;  %1191 = vmatprep.subr.bf16.mxu1 %v7629_v26  ;;  %v7678_v61 = vld [vmem:[#allocation6 + $0x180] ss:$16 sps:$4 sm:$0xff]   ;;  %v7683_v62 = vld [vmem:[#allocation6 + $0x18c] ss:$16 sps:$4 sm:$0xff]   ;;  %v7686_v63 = vld [vmem:[#allocation6 + $0x1a4] ss:$16 sps:$4 sm:$0xff]  }
  0xa5   :  { %v7681_v0 = vld [vmem:[#allocation6 + $0x188] ss:$16 sps:$4 sm:$0xff]   ;;  %v7684_v1 = vld [vmem:[#allocation6 + $0x1a0] ss:$16 sps:$4 sm:$0xff]   ;;  %v7689_v2 = vld [vmem:[#allocation6 + $0x1ac] ss:$16 sps:$4 sm:$0xff]  }
  0xa6   :  { %v7687_v3 = vld [vmem:[#allocation6 + $0x1a8] ss:$16 sps:$4 sm:$0xff]   ;;  %v7692_v4 = vld [vmem:[#allocation6 + $0x1c4] ss:$16 sps:$4 sm:$0xff]   ;;  %v7695_v5 = vld [vmem:[#allocation6 + $0x1cc] ss:$16 sps:$4 sm:$0xff]  }
  0xa7   :  { %1106 = vmatpush1.bf16.msra.mxu0 %v7624_v25  ;;  %1192 = vmatpush1.bf16.msra.mxu1 %v7627_v28  ;;  %v7690_v6 = vld [vmem:[#allocation6 + $0x1c0] ss:$16 sps:$4 sm:$0xff]   ;;  %v7693_v7 = vld [vmem:[#allocation6 + $0x1c8] ss:$16 sps:$4 sm:$0xff]   ;;  %v7698_v8 = vld [vmem:[#allocation6 + $0x1e4] ss:$16 sps:$4 sm:$0xff]  }
  0xa8   :  { %1107 = vmatprep.subr.bf16.mxu0 %v7632_v27  ;;  %1193 = vmatprep.subr.bf16.mxu1 %v7635_v30  ;;  %v7701_v9 = vld [vmem:[#allocation6 + $0x1ec] ss:$16 sps:$4 sm:$0xff]   ;;  %v7696_v10 = vld [vmem:[#allocation6 + $0x1e0] ss:$16 sps:$4 sm:$0xff]   ;;  %v7699_v11 = vld [vmem:[#allocation6 + $0x1e8] ss:$16 sps:$4 sm:$0xff]  }
  0xa9   :  { %v7704_v12 = vld [vmem:[#allocation6 + $0x204] ss:$16 sps:$4 sm:$0xff]   ;;  %v7707_v13 = vld [vmem:[#allocation6 + $0x20c] ss:$16 sps:$4 sm:$0xff]   ;;  %v8294_v15 = vshrl.u32 %v147_v14, 7 }
  0xaa   :  { %v145_v17 = vld [vmem:[#allocation4] sm:$0xf]  ;;  %v7741_v14 = vld [vmem:[#allocation6 + $0x2c8] ss:$16 sps:$4 sm:$0xff]  }
  0xab   :  { %1108 = vmatpush1.bf16.msra.mxu0 %v7630_v29  ;;  %1194 = vmatpush1.bf16.msra.mxu1 %v7633_v32  ;;  %v8297_v16 = vsub.s32 0, %v8294_v15  ;;  %v8300_v18 = vsub.s32 1, %v8294_v15  ;;  %v8304_v20 = vsub.s32 2, %v8294_v15  ;;  %v8308_v22 = vsub.s32 3, %v8294_v15 }
  0xac   :  { %1109 = vmatprep.subr.bf16.mxu0 %v7638_v31  ;;  %1195 = vmatprep.subr.bf16.mxu1 %v7641_v34 }
  0xad   :  { %v150_v19 = vrot.slane %v145_v17, %v8297_v16  ;;  %v154_v21 = vrot.slane %v145_v17, %v8300_v18  ;;  %v158_v26 = vrot.slane %v145_v17, %v8304_v20  ;;  %v162_v29 = vrot.slane %v145_v17, %v8308_v22  ;;  %v7746_v17 = vld [vmem:[#allocation6 + $0x2e4] ss:$16 sps:$4 sm:$0xff]  }
  0xaf   :  { %1110 = vmatpush1.bf16.msra.mxu0 %v7636_v33  ;;  %1196 = vmatpush1.bf16.msra.mxu1 %v7639_v36 }
  0xb0   :  { %1111 = vmatprep.subr.bf16.mxu0 %v7644_v35  ;;  %1197 = vmatprep.subr.bf16.mxu1 %v7647_v38 }
  0xb3   :  { %1112 = vmatpush1.bf16.msra.mxu0 %v7642_v37  ;;  %1198 = vmatpush1.bf16.msra.mxu1 %v7645_v40 }
  0xb4   :  { %1113 = vmatprep.subr.bf16.mxu0 %v7650_v39  ;;  %1199 = vmatprep.subr.bf16.mxu1 %v7653_v42 }
  0xb7   :  { %1114 = vmatpush1.bf16.msra.mxu0 %v7648_v41  ;;  %1200 = vmatpush1.bf16.msra.mxu1 %v7651_v44 }
  0xb8   :  { %1115 = vmatprep.subr.bf16.mxu0 %v7656_v43  ;;  %1201 = vmatprep.subr.bf16.mxu1 %v7659_v46 }
  0xbb   :  { %1116 = vmatpush1.bf16.msra.mxu0 %v7654_v45  ;;  %1202 = vmatpush1.bf16.msra.mxu1 %v7657_v48  ;;  %v7705_v48 = vld [vmem:[#allocation6 + $0x208] ss:$16 sps:$4 sm:$0xff]  }
  0xbc   :  { %1117 = vmatprep.subr.bf16.mxu0 %v7662_v47  ;;  %1203 = vmatprep.subr.bf16.mxu1 %v7665_v50  ;;  %v7702_v47 = vld [vmem:[#allocation6 + $0x200] ss:$16 sps:$4 sm:$0xff]  }
  0xbf   :  { %1118 = vmatpush1.bf16.msra.mxu0 %v7660_v49  ;;  %1204 = vmatpush1.bf16.msra.mxu1 %v7663_v52  ;;  %v7713_v52 = vld [vmem:[#allocation6 + $0x22c] ss:$16 sps:$4 sm:$0xff]  }
  0xc0   :  { %1119 = vmatprep.subr.bf16.mxu0 %v7668_v51  ;;  %1205 = vmatprep.subr.bf16.mxu1 %v7671_v54  ;;  %v7710_v51 = vld [vmem:[#allocation6 + $0x224] ss:$16 sps:$4 sm:$0xff]  }
  0xc3   :  { %1120 = vmatpush1.bf16.msra.mxu0 %v7666_v53  ;;  %1206 = vmatpush1.bf16.msra.mxu1 %v7669_v56  ;;  %v7708_v56 = vld [vmem:[#allocation6 + $0x220] ss:$16 sps:$4 sm:$0xff]  }
  0xc4   :  { %1121 = vmatprep.subr.bf16.mxu0 %v7674_v55  ;;  %1207 = vmatprep.subr.bf16.mxu1 %v7677_v58 }
  0xc7   :  { %1122 = vmatpush1.bf16.msra.mxu0 %v7672_v57  ;;  %1208 = vmatpush1.bf16.msra.mxu1 %v7675_v60  ;;  %v7711_v57 = vld [vmem:[#allocation6 + $0x228] ss:$16 sps:$4 sm:$0xff]   ;;  %v7719_v60 = vld [vmem:[#allocation6 + $0x24c] ss:$16 sps:$4 sm:$0xff]  }
  0xc8   :  { %1123 = vmatprep.subr.bf16.mxu0 %v7680_v59  ;;  %1209 = vmatprep.subr.bf16.mxu1 %v7683_v62  ;;  %v7716_v59 = vld [vmem:[#allocation6 + $0x244] ss:$16 sps:$4 sm:$0xff]   ;;  %v7717_v62 = vld [vmem:[#allocation6 + $0x248] ss:$16 sps:$4 sm:$0xff]  }
  0xcb   :  { %1124 = vmatpush1.bf16.msra.mxu0 %v7678_v61  ;;  %1210 = vmatpush1.bf16.msra.mxu1 %v7681_v0  ;;  %v7714_v61 = vld [vmem:[#allocation6 + $0x240] ss:$16 sps:$4 sm:$0xff]   ;;  %v7725_v0 = vld [vmem:[#allocation6 + $0x26c] ss:$16 sps:$4 sm:$0xff]  }
  0xcc   :  { %1125 = vmatprep.subr.bf16.mxu0 %v7686_v63  ;;  %1211 = vmatprep.subr.bf16.mxu1 %v7689_v2  ;;  %v7722_v63 = vld [vmem:[#allocation6 + $0x264] ss:$16 sps:$4 sm:$0xff]   ;;  %v7723_v2 = vld [vmem:[#allocation6 + $0x268] ss:$16 sps:$4 sm:$0xff]  }
  0xcf   :  { %1126 = vmatpush1.bf16.msra.mxu0 %v7684_v1  ;;  %1212 = vmatpush1.bf16.msra.mxu1 %v7687_v3  ;;  %v7720_v1 = vld [vmem:[#allocation6 + $0x260] ss:$16 sps:$4 sm:$0xff]   ;;  %v7728_v3 = vld [vmem:[#allocation6 + $0x284] ss:$16 sps:$4 sm:$0xff]  }
  0xd0   :  { %1127 = vmatprep.subr.bf16.mxu0 %v7692_v4  ;;  %1213 = vmatprep.subr.bf16.mxu1 %v7695_v5  ;;  %v7731_v4 = vld [vmem:[#allocation6 + $0x28c] ss:$16 sps:$4 sm:$0xff]   ;;  %v7726_v5 = vld [vmem:[#allocation6 + $0x280] ss:$16 sps:$4 sm:$0xff]  }
  0xd3   :  { %1128 = vmatpush1.bf16.msra.mxu0 %v7690_v6  ;;  %1214 = vmatpush1.bf16.msra.mxu1 %v7693_v7  ;;  %v7729_v6 = vld [vmem:[#allocation6 + $0x288] ss:$16 sps:$4 sm:$0xff]   ;;  %v7734_v7 = vld [vmem:[#allocation6 + $0x2a4] ss:$16 sps:$4 sm:$0xff]  }
  0xd4   :  { %1129 = vmatprep.subr.bf16.mxu0 %v7698_v8  ;;  %1215 = vmatprep.subr.bf16.mxu1 %v7701_v9  ;;  %v7737_v8 = vld [vmem:[#allocation6 + $0x2ac] ss:$16 sps:$4 sm:$0xff]   ;;  %v7732_v9 = vld [vmem:[#allocation6 + $0x2a0] ss:$16 sps:$4 sm:$0xff]  }
  0xd7   :  { %1130 = vmatpush1.bf16.msra.mxu0 %v7696_v10  ;;  %1216 = vmatpush1.bf16.msra.mxu1 %v7699_v11  ;;  %v7735_v10 = vld [vmem:[#allocation6 + $0x2a8] ss:$16 sps:$4 sm:$0xff]   ;;  %v7740_v11 = vld [vmem:[#allocation6 + $0x2c4] ss:$16 sps:$4 sm:$0xff]  }
  0xd8   :  { %1142 = vmatprep.subr.bf16.mxu0 %v7704_v12  ;;  %1228 = vmatprep.subr.bf16.mxu1 %v7707_v13  ;;  %v7743_v12 = vld [vmem:[#allocation6 + $0x2cc] ss:$16 sps:$4 sm:$0xff]   ;;  %v7738_v13 = vld [vmem:[#allocation6 + $0x2c0] ss:$16 sps:$4 sm:$0xff]  }
 0x16d   :  { %v245_v23 = vpop.f32.mrb[0].mxu0  ;;  %v288_v33 = vpop.f32.mrb[0].mxu1 }
 0x16e   :  { %v246_v24 = vadd.f32 %v245_v23, %v150_v19  ;;  %v247_v25 = vpop.f32.mrb[1].mxu0  ;;  %v289_v36 = vadd.f32 %v288_v33, %v158_v26  ;;  %v290_v37 = vpop.f32.mrb[1].mxu1  ;;  %v7747_v23 = vld [vmem:[#allocation6 + $0x2e8] ss:$16 sps:$4 sm:$0xff]   ;;  %v7767_v33 = vld [vmem:[#allocation6 + $0x34c] ss:$16 sps:$4 sm:$0xff]  }
 0x16f   :  { %v248_v27 = vadd.f32 %v247_v25, %v154_v21  ;;  %v249_v28 = vpop.f32.mrb[2].mxu0  ;;  %v291_v40 = vadd.f32 %v290_v37, %v162_v29  ;;  %v292_v41 = vpop.f32.mrb[2].mxu1  ;;  %v7755_v25 = vld [vmem:[#allocation6 + $0x30c] ss:$16 sps:$4 sm:$0xff]  }
 0x170   :  { %v250_v30 = vadd.f32 %v249_v28, %v150_v19  ;;  %v251_v31 = vpop.f32.mrb[3].mxu0  ;;  %v297_v34 = vmax.f32 %v246_v24, 0.0  ;;  %v299_v43 = vmax.f32 %v289_v36, 0.0  ;;  %v293_v44 = vadd.f32 %v292_v41, %v158_v26  ;;  %v294_v45 = vpop.f32.mrb[3].mxu1  ;;  %v7749_v19 = vld [vmem:[#allocation6 + $0x2ec] ss:$16 sps:$4 sm:$0xff]  }
 0x171   :  { %v252_v32 = vadd.f32 %v251_v31, %v154_v21  ;;  %v298_v38 = vmax.f32 %v248_v27, 0.0  ;;  %v300_v49 = vmax.f32 %v291_v40, 0.0  ;;  %v295_v50 = vadd.f32 %v294_v45, %v162_v29  ;;  %v7744_v21 = vld [vmem:[#allocation6 + $0x2e0] ss:$16 sps:$4 sm:$0xff]   ;;  %v7752_v24 = vld [vmem:[#allocation6 + $0x304] ss:$16 sps:$4 sm:$0xff]  }
 0x172   :  { %v301_v35 = vmax.f32 %v250_v30, 0.0  ;;  %v303_v53 = vmax.f32 %v293_v44, 0.0  ;;  %v7750_v26 = vld [vmem:[#allocation6 + $0x300] ss:$16 sps:$4 sm:$0xff]   ;;  %v7753_v27 = vld [vmem:[#allocation6 + $0x308] ss:$16 sps:$4 sm:$0xff]  }
 0x173   :  { %v302_v39 = vmax.f32 %v252_v32, 0.0  ;;  %v304_v54 = vmax.f32 %v295_v50, 0.0  ;;  %v7758_v28 = vld [vmem:[#allocation6 + $0x324] ss:$16 sps:$4 sm:$0xff]   ;;  %v7761_v29 = vld [vmem:[#allocation6 + $0x32c] ss:$16 sps:$4 sm:$0xff]  }
 0x174   :  { %v305_v42 = vpack.c.bf16 %v301_v35, %v297_v34  ;;  %v8312_v55 = vpack.c.bf16 %v303_v53, %v299_v43  ;;  %v7756_v30 = vld [vmem:[#allocation6 + $0x320] ss:$16 sps:$4 sm:$0xff]   ;;  %v7759_v31 = vld [vmem:[#allocation6 + $0x328] ss:$16 sps:$4 sm:$0xff]   ;;  %v7764_v32 = vld [vmem:[#allocation6 + $0x344] ss:$16 sps:$4 sm:$0xff]  }
 0x175   :  { %v306_v46 = vpack.c.bf16 %v302_v39, %v298_v38  ;;  %v308_v58 = vpack.c.bf16 %v304_v54, %v300_v49  ;;  %v7762_v34 = vld [vmem:[#allocation6 + $0x340] ss:$16 sps:$4 sm:$0xff]   ;;  %v7765_v35 = vld [vmem:[#allocation6 + $0x348] ss:$16 sps:$4 sm:$0xff]   ;;  %v7770_v36 = vld [vmem:[#allocation6 + $0x364] ss:$16 sps:$4 sm:$0xff]  }
 0x176   :  { %v7773_v37 = vld [vmem:[#allocation6 + $0x36c] ss:$16 sps:$4 sm:$0xff]   ;;  %v7768_v38 = vld [vmem:[#allocation6 + $0x360] ss:$16 sps:$4 sm:$0xff]   ;;  %v7771_v39 = vld [vmem:[#allocation6 + $0x368] ss:$16 sps:$4 sm:$0xff]  }
 0x177   :  { %1131 = vmatprep.mubr.bf16.mxu0 %v306_v46  ;;  %1217 = vmatprep.mubr.bf16.mxu1 %v306_v46  ;;  %v7776_v40 = vld [vmem:[#allocation6 + $0x384] ss:$16 sps:$4 sm:$0xff]   ;;  %v7779_v41 = vld [vmem:[#allocation6 + $0x38c] ss:$16 sps:$4 sm:$0xff]   ;;  %v7777_v43 = vld [vmem:[#allocation6 + $0x388] ss:$16 sps:$4 sm:$0xff]  }
 0x178   :  { %1132 = vmatmul.mubr.bf16.vlgmr.msra.gmra.mrb[4].mxu0 %v305_v42  ;;  %1218 = vmatmul.mubr.bf16.vlgmr.msra.gmra.mrb[4].mxu1 %v305_v42  ;;  %v7774_v42 = vld [vmem:[#allocation6 + $0x380] ss:$16 sps:$4 sm:$0xff]   ;;  %v7782_v44 = vld [vmem:[#allocation6 + $0x3a4] ss:$16 sps:$4 sm:$0xff]   ;;  %v7785_v45 = vld [vmem:[#allocation6 + $0x3ac] ss:$16 sps:$4 sm:$0xff]  }
 0x179   :  { %1143 = vmatpush1.bf16.msra.mxu0 %v7702_v47  ;;  %1229 = vmatpush1.bf16.msra.mxu1 %v7705_v48  ;;  %v7780_v46 = vld [vmem:[#allocation6 + $0x3a0] ss:$16 sps:$4 sm:$0xff]   ;;  %v7783_v47 = vld [vmem:[#allocation6 + $0x3a8] ss:$16 sps:$4 sm:$0xff]   ;;  %v7788_v48 = vld [vmem:[#allocation6 + $0x3c4] ss:$16 sps:$4 sm:$0xff]  }
 0x17a   :  { %1144 = vmatprep.subr.bf16.mxu0 %v7710_v51  ;;  %1230 = vmatprep.subr.bf16.mxu1 %v7713_v52  ;;  %v7791_v49 = vld [vmem:[#allocation6 + $0x3cc] ss:$16 sps:$4 sm:$0xff]   ;;  %v7786_v50 = vld [vmem:[#allocation6 + $0x3c0] ss:$16 sps:$4 sm:$0xff]   ;;  %v7789_v51 = vld [vmem:[#allocation6 + $0x3c8] ss:$16 sps:$4 sm:$0xff]  }
 0x17b   :  { %1174 = vmatprep.mubr.bf16.mxu0 %v308_v58  ;;  %1260 = vmatprep.mubr.bf16.mxu1 %v308_v58  ;;  %v7794_v52 = vld [vmem:[#allocation6 + $0x3e4] ss:$16 sps:$4 sm:$0xff]   ;;  %v7797_v53 = vld [vmem:[#allocation6 + $0x3ec] ss:$16 sps:$4 sm:$0xff]  }
 0x17c   :  { %v1283_v54 = vld [vmem:[#allocation9] sm:$0xff]  ;;  %v1292_v58 = vld [vmem:[#allocation9 + $0x48] sm:$0xff] }
 0x17d   :  { %1145 = vmatpush1.bf16.msra.mxu0 %v7708_v56  ;;  %1231 = vmatpush1.bf16.msra.mxu1 %v7711_v57  ;;  %v1291_v56 = vld [vmem:[#allocation9 + $0x40] sm:$0xff]  ;;  %v1284_v57 = vld [vmem:[#allocation9 + $0x8] sm:$0xff] }
 0x17e   :  { %1146 = vmatprep.subr.bf16.mxu0 %v7716_v59  ;;  %1232 = vmatprep.subr.bf16.mxu1 %v7719_v60  ;;  %v7792_v59 = vld [vmem:[#allocation6 + $0x3e0] ss:$16 sps:$4 sm:$0xff]   ;;  %v7795_v60 = vld [vmem:[#allocation6 + $0x3e8] ss:$16 sps:$4 sm:$0xff]  }
 0x181   :  { %1147 = vmatpush1.bf16.msra.mxu0 %v7714_v61  ;;  %1233 = vmatpush1.bf16.msra.mxu1 %v7717_v62  ;;  %v6684_v61 = vcombine.high %v1283_v54, %v1291_v56  ;;  %v6686_v62 = vcombine.high %v1284_v57, %v1292_v58 }
 0x182   :  { %1148 = vmatprep.subr.bf16.mxu0 %v7722_v63  ;;  %1234 = vmatprep.subr.bf16.mxu1 %v7725_v0  ;;  %v1299_v63 = vld [vmem:[#allocation9 + $0x80] sm:$0xff] }
 0x183   :  { %v1307_v0 = vld [vmem:[#allocation9 + $0xc0] sm:$0xff] }
 0x185   :  { %1149 = vmatpush1.bf16.msra.mxu0 %v7720_v1  ;;  %1235 = vmatpush1.bf16.msra.mxu1 %v7723_v2  ;;  %v1300_v1 = vld [vmem:[#allocation9 + $0x88] sm:$0xff] }
 0x186   :  { %1150 = vmatprep.subr.bf16.mxu0 %v7728_v3  ;;  %1236 = vmatprep.subr.bf16.mxu1 %v7731_v4  ;;  %v1308_v2 = vld [vmem:[#allocation9 + $0xc8] sm:$0xff]  ;;  %v6683_v3 = vcombine.low %v1283_v54, %v1291_v56  ;;  %v6685_v4 = vcombine.low %v1284_v57, %v1292_v58 }
 0x187   :  { %v1404_v54 = vld [vmem:[#allocation9 + $0x3c8] sm:$0xff] }
 0x189   :  { %1151 = vmatpush1.bf16.msra.mxu0 %v7726_v5  ;;  %1237 = vmatpush1.bf16.msra.mxu1 %v7729_v6  ;;  %v6700_v5 = vcombine.high %v1299_v63, %v1307_v0  ;;  %v6702_v6 = vcombine.high %v1300_v1, %v1308_v2 }
 0x18a   :  { %1152 = vmatprep.subr.bf16.mxu0 %v7734_v7  ;;  %1238 = vmatprep.subr.bf16.mxu1 %v7737_v8  ;;  %v1315_v7 = vld [vmem:[#allocation9 + $0x100] sm:$0xff] }
 0x18b   :  { %v1323_v8 = vld [vmem:[#allocation9 + $0x140] sm:$0xff] }
 0x18d   :  { %1153 = vmatpush1.bf16.msra.mxu0 %v7732_v9  ;;  %1239 = vmatpush1.bf16.msra.mxu1 %v7735_v10  ;;  %v1316_v9 = vld [vmem:[#allocation9 + $0x108] sm:$0xff] }
 0x18e   :  { %1154 = vmatprep.subr.bf16.mxu0 %v7740_v11  ;;  %1240 = vmatprep.subr.bf16.mxu1 %v7743_v12  ;;  %v1324_v10 = vld [vmem:[#allocation9 + $0x148] sm:$0xff]  ;;  %v6699_v11 = vcombine.low %v1299_v63, %v1307_v0  ;;  %v6701_v12 = vcombine.low %v1300_v1, %v1308_v2 }
 0x18f   :  { %v1420_v63 = vld [vmem:[#allocation9 + $0x448] sm:$0xff] }
 0x191   :  { %1155 = vmatpush1.bf16.msra.mxu0 %v7738_v13  ;;  %1241 = vmatpush1.bf16.msra.mxu1 %v7741_v14  ;;  %v6716_v13 = vcombine.high %v1315_v7, %v1323_v8  ;;  %v6718_v14 = vcombine.high %v1316_v9, %v1324_v10 }
 0x192   :  { %1156 = vmatprep.subr.bf16.mxu0 %v7746_v17  ;;  %1242 = vmatprep.subr.bf16.mxu1 %v7749_v19  ;;  %v1331_v17 = vld [vmem:[#allocation9 + $0x180] sm:$0xff] }
 0x193   :  { %v1339_v19 = vld [vmem:[#allocation9 + $0x1c0] sm:$0xff] }
 0x195   :  { %1157 = vmatpush1.bf16.msra.mxu0 %v7744_v21  ;;  %1243 = vmatpush1.bf16.msra.mxu1 %v7747_v23  ;;  %v1332_v21 = vld [vmem:[#allocation9 + $0x188] sm:$0xff] }
 0x196   :  { %1158 = vmatprep.subr.bf16.mxu0 %v7752_v24  ;;  %1244 = vmatprep.subr.bf16.mxu1 %v7755_v25  ;;  %v1340_v23 = vld [vmem:[#allocation9 + $0x1c8] sm:$0xff]  ;;  %v6715_v24 = vcombine.low %v1315_v7, %v1323_v8  ;;  %v6717_v25 = vcombine.low %v1316_v9, %v1324_v10 }
 0x197   :  { %v1436_v7 = vld [vmem:[#allocation9 + $0x4c8] sm:$0xff] }
 0x199   :  { %1159 = vmatpush1.bf16.msra.mxu0 %v7750_v26  ;;  %1245 = vmatpush1.bf16.msra.mxu1 %v7753_v27  ;;  %v6732_v26 = vcombine.high %v1331_v17, %v1339_v19  ;;  %v1347_v27 = vld [vmem:[#allocation9 + $0x200] sm:$0xff] }
 0x19a   :  { %1160 = vmatprep.subr.bf16.mxu0 %v7758_v28  ;;  %1246 = vmatprep.subr.bf16.mxu1 %v7761_v29  ;;  %v1355_v28 = vld [vmem:[#allocation9 + $0x240] sm:$0xff]  ;;  %v1348_v29 = vld [vmem:[#allocation9 + $0x208] sm:$0xff] }
 0x19d   :  { %1161 = vmatpush1.bf16.msra.mxu0 %v7756_v30  ;;  %1247 = vmatpush1.bf16.msra.mxu1 %v7759_v31  ;;  %v1356_v30 = vld [vmem:[#allocation9 + $0x248] sm:$0xff]  ;;  %v6731_v31 = vcombine.low %v1331_v17, %v1339_v19 }
 0x19e   :  { %1162 = vmatprep.subr.bf16.mxu0 %v7764_v32  ;;  %1248 = vmatprep.subr.bf16.mxu1 %v7767_v33  ;;  %v6733_v32 = vcombine.low %v1332_v21, %v1340_v23  ;;  %v6748_v33 = vcombine.high %v1347_v27, %v1355_v28  ;;  %v1452_v17 = vld [vmem:[#allocation9 + $0x548] sm:$0xff] }
 0x1a1   :  { %1163 = vmatpush1.bf16.msra.mxu0 %v7762_v34  ;;  %1249 = vmatpush1.bf16.msra.mxu1 %v7765_v35  ;;  %v6750_v34 = vcombine.high %v1348_v29, %v1356_v30  ;;  %v1363_v35 = vld [vmem:[#allocation9 + $0x280] sm:$0xff] }
 0x1a2   :  { %1164 = vmatprep.subr.bf16.mxu0 %v7770_v36  ;;  %1250 = vmatprep.subr.bf16.mxu1 %v7773_v37  ;;  %v1371_v36 = vld [vmem:[#allocation9 + $0x2c0] sm:$0xff]  ;;  %v1364_v37 = vld [vmem:[#allocation9 + $0x288] sm:$0xff] }
 0x1a5   :  { %1165 = vmatpush1.bf16.msra.mxu0 %v7768_v38  ;;  %1251 = vmatpush1.bf16.msra.mxu1 %v7771_v39  ;;  %v1372_v38 = vld [vmem:[#allocation9 + $0x2c8] sm:$0xff]  ;;  %v6747_v39 = vcombine.low %v1347_v27, %v1355_v28 }
 0x1a6   :  { %1166 = vmatprep.subr.bf16.mxu0 %v7776_v40  ;;  %1252 = vmatprep.subr.bf16.mxu1 %v7779_v41  ;;  %v6749_v40 = vcombine.low %v1348_v29, %v1356_v30  ;;  %v6764_v41 = vcombine.high %v1363_v35, %v1371_v36  ;;  %v1468_v27 = vld [vmem:[#allocation9 + $0x5c8] sm:$0xff] }
 0x1a9   :  { %1167 = vmatpush1.bf16.msra.mxu0 %v7774_v42  ;;  %1253 = vmatpush1.bf16.msra.mxu1 %v7777_v43  ;;  %v6766_v42 = vcombine.high %v1364_v37, %v1372_v38  ;;  %v1379_v43 = vld [vmem:[#allocation9 + $0x300] sm:$0xff] }
 0x1aa   :  { %1168 = vmatprep.subr.bf16.mxu0 %v7782_v44  ;;  %1254 = vmatprep.subr.bf16.mxu1 %v7785_v45  ;;  %v1387_v44 = vld [vmem:[#allocation9 + $0x340] sm:$0xff]  ;;  %v1380_v45 = vld [vmem:[#allocation9 + $0x308] sm:$0xff] }
 0x1ab   :  { %v6779_v56 = vcombine.low %v1379_v43, %v1387_v44 }
 0x1ad   :  { %1169 = vmatpush1.bf16.msra.mxu0 %v7780_v46  ;;  %1255 = vmatpush1.bf16.msra.mxu1 %v7783_v47  ;;  %v1388_v46 = vld [vmem:[#allocation9 + $0x348] sm:$0xff]  ;;  %v6763_v47 = vcombine.low %v1363_v35, %v1371_v36 }
 0x1ae   :  { %1170 = vmatprep.subr.bf16.mxu0 %v7788_v48  ;;  %1256 = vmatprep.subr.bf16.mxu1 %v7791_v49  ;;  %v6765_v48 = vcombine.low %v1364_v37, %v1372_v38  ;;  %v6780_v49 = vcombine.high %v1379_v43, %v1387_v44  ;;  %v6781_v57 = vcombine.low %v1380_v45, %v1388_v46  ;;  %v1484_v35 = vld [vmem:[#allocation9 + $0x648] sm:$0xff] }
 0x1af   :  { %v1500_v43 = vld [vmem:[#allocation9 + $0x6c8] sm:$0xff] }
 0x1b1   :  { %1171 = vmatpush1.bf16.msra.mxu0 %v7786_v50  ;;  %1257 = vmatpush1.bf16.msra.mxu1 %v7789_v51  ;;  %v6782_v50 = vcombine.high %v1380_v45, %v1388_v46  ;;  %v1395_v51 = vld [vmem:[#allocation9 + $0x380] sm:$0xff] }
 0x1b2   :  { %1172 = vmatprep.subr.bf16.mxu0 %v7794_v52  ;;  %1258 = vmatprep.subr.bf16.mxu1 %v7797_v53  ;;  %v1403_v52 = vld [vmem:[#allocation9 + $0x3c0] sm:$0xff]  ;;  %v1396_v53 = vld [vmem:[#allocation9 + $0x388] sm:$0xff] }
 0x1b3   :  { %v6796_v58 = vcombine.high %v1395_v51, %v1403_v52  ;;  %v6795_v0 = vcombine.low %v1395_v51, %v1403_v52  ;;  %v6797_v1 = vcombine.low %v1396_v53, %v1404_v54  ;;  %v1515_v51 = vld [vmem:[#allocation9 + $0x740] sm:$0xff]  ;;  %v1508_v52 = vld [vmem:[#allocation9 + $0x708] sm:$0xff] }
 0x1b5   :  { %1173 = vmatpush1.bf16.msra.mxu0 %v7792_v59  ;;  %1259 = vmatpush1.bf16.msra.mxu1 %v7795_v60  ;;  %v6798_v59 = vcombine.high %v1396_v53, %v1404_v54  ;;  %v1411_v60 = vld [vmem:[#allocation9 + $0x400] sm:$0xff]  ;;  %v1516_v54 = vld [vmem:[#allocation9 + $0x748] sm:$0xff] }
 0x1b6   :  { %4439 = vmatprep.subr.bf16.mxu0 %v6684_v61  ;;  %4525 = vmatprep.subr.bf16.mxu1 %v6686_v62  ;;  %v1419_v61 = vld [vmem:[#allocation9 + $0x440] sm:$0xff]  ;;  %v1412_v62 = vld [vmem:[#allocation9 + $0x408] sm:$0xff] }
 0x1b7   :  { %v6812_v2 = vcombine.high %v1411_v60, %v1419_v61  ;;  %v6811_v8 = vcombine.low %v1411_v60, %v1419_v61  ;;  %v6813_v9 = vcombine.low %v1412_v62, %v1420_v63  ;;  %v1531_v60 = vld [vmem:[#allocation9 + $0x7c0] sm:$0xff]  ;;  %v1524_v61 = vld [vmem:[#allocation9 + $0x788] sm:$0xff] }
 0x1b8   :  { %1175 = vmatmul.mubr.bf16.vlgmr.msra.gmra.mrb[4].mxu0 %v8312_v55  ;;  %1261 = vmatmul.mubr.bf16.vlgmr.msra.gmra.mrb[4].mxu1 %v8312_v55  ;;  %v6734_v55 = vcombine.high %v1332_v21, %v1340_v23 }
 0x1b9   :  { %4440 = vmatpush1.bf16.msra.mxu0 %v6683_v3  ;;  %4526 = vmatpush1.bf16.msra.mxu1 %v6685_v4  ;;  %v6814_v3 = vcombine.high %v1412_v62, %v1420_v63  ;;  %v1427_v4 = vld [vmem:[#allocation9 + $0x480] sm:$0xff]  ;;  %v1532_v63 = vld [vmem:[#allocation9 + $0x7c8] sm:$0xff] }
 0x1ba   :  { %4441 = vmatprep.subr.bf16.mxu0 %v6700_v5  ;;  %4527 = vmatprep.subr.bf16.mxu1 %v6702_v6  ;;  %v1435_v5 = vld [vmem:[#allocation9 + $0x4c0] sm:$0xff]  ;;  %v1428_v6 = vld [vmem:[#allocation9 + $0x488] sm:$0xff] }
 0x1bb   :  { %v6828_v10 = vcombine.high %v1427_v4, %v1435_v5  ;;  %v6827_v19 = vcombine.low %v1427_v4, %v1435_v5  ;;  %v6829_v21 = vcombine.low %v1428_v6, %v1436_v7  ;;  %v1547_v4 = vld [vmem:[#allocation9 + $0x840] sm:$0xff]  ;;  %v1540_v5 = vld [vmem:[#allocation9 + $0x808] sm:$0xff] }
 0x1bd   :  { %4442 = vmatpush1.bf16.msra.mxu0 %v6699_v11  ;;  %4528 = vmatpush1.bf16.msra.mxu1 %v6701_v12  ;;  %v6830_v11 = vcombine.high %v1428_v6, %v1436_v7  ;;  %v1443_v12 = vld [vmem:[#allocation9 + $0x500] sm:$0xff]  ;;  %v1548_v7 = vld [vmem:[#allocation9 + $0x848] sm:$0xff] }
 0x1be   :  { %4443 = vmatprep.subr.bf16.mxu0 %v6716_v13  ;;  %4529 = vmatprep.subr.bf16.mxu1 %v6718_v14  ;;  %v1451_v13 = vld [vmem:[#allocation9 + $0x540] sm:$0xff]  ;;  %v1444_v14 = vld [vmem:[#allocation9 + $0x508] sm:$0xff] }
 0x1bf   :  { %v6844_v23 = vcombine.high %v1443_v12, %v1451_v13  ;;  %v6843_v28 = vcombine.low %v1443_v12, %v1451_v13  ;;  %v6845_v29 = vcombine.low %v1444_v14, %v1452_v17 }
 0x1c1   :  { %4444 = vmatpush1.bf16.msra.mxu0 %v6715_v24  ;;  %4530 = vmatpush1.bf16.msra.mxu1 %v6717_v25  ;;  %v6846_v24 = vcombine.high %v1444_v14, %v1452_v17  ;;  %v1459_v25 = vld [vmem:[#allocation9 + $0x580] sm:$0xff] }
 0x1c2   :  { %4445 = vmatprep.subr.bf16.mxu0 %v6732_v26  ;;  %4531 = vmatprep.subr.bf16.mxu1 %v6734_v55  ;;  %v1467_v26 = vld [vmem:[#allocation9 + $0x5c0] sm:$0xff]  ;;  %v1460_v55 = vld [vmem:[#allocation9 + $0x588] sm:$0xff] }
 0x1c3   :  { %v6860_v30 = vcombine.high %v1459_v25, %v1467_v26  ;;  %v6859_v36 = vcombine.low %v1459_v25, %v1467_v26  ;;  %v6861_v37 = vcombine.low %v1460_v55, %v1468_v27 }
 0x1c5   :  { %4446 = vmatpush1.bf16.msra.mxu0 %v6731_v31  ;;  %4532 = vmatpush1.bf16.msra.mxu1 %v6733_v32  ;;  %v6862_v31 = vcombine.high %v1460_v55, %v1468_v27  ;;  %v1475_v32 = vld [vmem:[#allocation9 + $0x600] sm:$0xff] }
 0x1c6   :  { %4447 = vmatprep.subr.bf16.mxu0 %v6748_v33  ;;  %4533 = vmatprep.subr.bf16.mxu1 %v6750_v34  ;;  %v1483_v33 = vld [vmem:[#allocation9 + $0x640] sm:$0xff]  ;;  %v1476_v34 = vld [vmem:[#allocation9 + $0x608] sm:$0xff] }
 0x1c7   :  { %v6876_v38 = vcombine.high %v1475_v32, %v1483_v33  ;;  %v6875_v44 = vcombine.low %v1475_v32, %v1483_v33  ;;  %v6877_v45 = vcombine.low %v1476_v34, %v1484_v35 }
 0x1c9   :  { %4448 = vmatpush1.bf16.msra.mxu0 %v6747_v39  ;;  %4534 = vmatpush1.bf16.msra.mxu1 %v6749_v40  ;;  %v6878_v39 = vcombine.high %v1476_v34, %v1484_v35  ;;  %v1491_v40 = vld [vmem:[#allocation9 + $0x680] sm:$0xff] }
 0x1ca   :  { %4449 = vmatprep.subr.bf16.mxu0 %v6764_v41  ;;  %4535 = vmatprep.subr.bf16.mxu1 %v6766_v42  ;;  %v1499_v41 = vld [vmem:[#allocation9 + $0x6c0] sm:$0xff]  ;;  %v1492_v42 = vld [vmem:[#allocation9 + $0x688] sm:$0xff] }
 0x1cb   :  { %v6892_v46 = vcombine.high %v1491_v40, %v1499_v41 }
 0x1cd   :  { %4450 = vmatpush1.bf16.msra.mxu0 %v6763_v47  ;;  %4536 = vmatpush1.bf16.msra.mxu1 %v6765_v48  ;;  %v6894_v47 = vcombine.high %v1492_v42, %v1500_v43  ;;  %v6891_v48 = vcombine.low %v1491_v40, %v1499_v41 }
 0x1ce   :  { %4451 = vmatprep.subr.bf16.mxu0 %v6780_v49  ;;  %4537 = vmatprep.subr.bf16.mxu1 %v6782_v50  ;;  %v6893_v49 = vcombine.low %v1492_v42, %v1500_v43  ;;  %v1507_v50 = vld [vmem:[#allocation9 + $0x700] sm:$0xff] }
 0x1cf   :  { %v6908_v53 = vcombine.high %v1507_v50, %v1515_v51 }
 0x1d1   :  { %4452 = vmatpush1.bf16.msra.mxu0 %v6779_v56  ;;  %4538 = vmatpush1.bf16.msra.mxu1 %v6781_v57  ;;  %v6907_v56 = vcombine.low %v1507_v50, %v1515_v51  ;;  %v6909_v57 = vcombine.low %v1508_v52, %v1516_v54 }
 0x1d2   :  { %4453 = vmatprep.subr.bf16.mxu0 %v6796_v58  ;;  %4539 = vmatprep.subr.bf16.mxu1 %v6798_v59  ;;  %v6910_v58 = vcombine.high %v1508_v52, %v1516_v54  ;;  %v1523_v59 = vld [vmem:[#allocation9 + $0x780] sm:$0xff] }
 0x1d3   :  { %v6924_v62 = vcombine.high %v1523_v59, %v1531_v60  ;;  %v1571_v52 = vld [vmem:[#allocation9 + $0x900] sm:$0xff] }
 0x1d5   :  { %4454 = vmatpush1.bf16.msra.mxu0 %v6795_v0  ;;  %4540 = vmatpush1.bf16.msra.mxu1 %v6797_v1  ;;  %v6923_v0 = vcombine.low %v1523_v59, %v1531_v60  ;;  %v6925_v1 = vcombine.low %v1524_v61, %v1532_v63 }
 0x1d6   :  { %4455 = vmatprep.subr.bf16.mxu0 %v6812_v2  ;;  %4541 = vmatprep.subr.bf16.mxu1 %v6814_v3  ;;  %v6926_v2 = vcombine.high %v1524_v61, %v1532_v63  ;;  %v1539_v3 = vld [vmem:[#allocation9 + $0x800] sm:$0xff] }
 0x1d7   :  { %v6940_v6 = vcombine.high %v1539_v3, %v1547_v4  ;;  %v1587_v63 = vld [vmem:[#allocation9 + $0x980] sm:$0xff] }
 0x1d9   :  { %4456 = vmatpush1.bf16.msra.mxu0 %v6811_v8  ;;  %4542 = vmatpush1.bf16.msra.mxu1 %v6813_v9  ;;  %v6939_v8 = vcombine.low %v1539_v3, %v1547_v4  ;;  %v6941_v9 = vcombine.low %v1540_v5, %v1548_v7 }
 0x1da   :  { %4457 = vmatprep.subr.bf16.mxu0 %v6828_v10  ;;  %4543 = vmatprep.subr.bf16.mxu1 %v6830_v11  ;;  %v6942_v10 = vcombine.high %v1540_v5, %v1548_v7  ;;  %v437_v11 = vld [vmem:[#allocation7] sm:$0xf]  ;;  %v1603_v7 = vld [vmem:[#allocation9 + $0xa00] sm:$0xff] }
 0x1db   :  { %v442_v12 = vrot.slane %v437_v11, %v8297_v16  ;;  %v450_v13 = vrot.slane %v437_v11, %v8304_v20  ;;  %v446_v14 = vrot.slane %v437_v11, %v8300_v18  ;;  %v454_v17 = vrot.slane %v437_v11, %v8308_v22 }
 0x1dd   :  { %4458 = vmatpush1.bf16.msra.mxu0 %v6827_v19  ;;  %4544 = vmatpush1.bf16.msra.mxu1 %v6829_v21 }
 0x1de   :  { %4459 = vmatprep.subr.bf16.mxu0 %v6844_v23  ;;  %4545 = vmatprep.subr.bf16.mxu1 %v6846_v24 }
 0x1e1   :  { %4460 = vmatpush1.bf16.msra.mxu0 %v6843_v28  ;;  %4546 = vmatpush1.bf16.msra.mxu1 %v6845_v29 }
 0x1e2   :  { %4461 = vmatprep.subr.bf16.mxu0 %v6860_v30  ;;  %4547 = vmatprep.subr.bf16.mxu1 %v6862_v31 }
 0x1e5   :  { %4462 = vmatpush1.bf16.msra.mxu0 %v6859_v36  ;;  %4548 = vmatpush1.bf16.msra.mxu1 %v6861_v37 }
 0x1e6   :  { %4463 = vmatprep.subr.bf16.mxu0 %v6876_v38  ;;  %4549 = vmatprep.subr.bf16.mxu1 %v6878_v39 }
 0x1e9   :  { %4464 = vmatpush1.bf16.msra.mxu0 %v6875_v44  ;;  %4550 = vmatpush1.bf16.msra.mxu1 %v6877_v45  ;;  %v1555_v44 = vld [vmem:[#allocation9 + $0x880] sm:$0xff] }
 0x1ea   :  { %4465 = vmatprep.subr.bf16.mxu0 %v6892_v46  ;;  %4551 = vmatprep.subr.bf16.mxu1 %v6894_v47  ;;  %v1563_v47 = vld [vmem:[#allocation9 + $0x8c0] sm:$0xff] }
 0x1eb   :  { %v6955_v59 = vcombine.low %v1555_v44, %v1563_v47 }
 0x1ed   :  { %4466 = vmatpush1.bf16.msra.mxu0 %v6891_v48  ;;  %4552 = vmatpush1.bf16.msra.mxu1 %v6893_v49  ;;  %v1556_v48 = vld [vmem:[#allocation9 + $0x888] sm:$0xff] }
 0x1ee   :  { %4467 = vmatprep.subr.bf16.mxu0 %v6908_v53  ;;  %4553 = vmatprep.subr.bf16.mxu1 %v6910_v58  ;;  %v1564_v49 = vld [vmem:[#allocation9 + $0x8c8] sm:$0xff]  ;;  %v6956_v53 = vcombine.high %v1555_v44, %v1563_v47  ;;  %v1675_v44 = vld [vmem:[#allocation9 + $0xc40] sm:$0xff] }
 0x1ef   :  { %v6958_v54 = vcombine.high %v1556_v48, %v1564_v49  ;;  %v1580_v58 = vld [vmem:[#allocation9 + $0x948] sm:$0xff]  ;;  %v6957_v60 = vcombine.low %v1556_v48, %v1564_v49 }
 0x1f0   :  { %v1668_v47 = vld [vmem:[#allocation9 + $0xc08] sm:$0xff] }
 0x1f1   :  { %4468 = vmatpush1.bf16.msra.mxu0 %v6907_v56  ;;  %4554 = vmatpush1.bf16.msra.mxu1 %v6909_v57  ;;  %v1579_v56 = vld [vmem:[#allocation9 + $0x940] sm:$0xff]  ;;  %v1572_v57 = vld [vmem:[#allocation9 + $0x908] sm:$0xff] }
 0x1f2   :  { %4469 = vmatprep.subr.bf16.mxu0 %v6924_v62  ;;  %4555 = vmatprep.subr.bf16.mxu1 %v6926_v2  ;;  %v6972_v61 = vcombine.high %v1571_v52, %v1579_v56  ;;  %v6974_v62 = vcombine.high %v1572_v57, %v1580_v58  ;;  %v1596_v2 = vld [vmem:[#allocation9 + $0x9c8] sm:$0xff]  ;;  %v6971_v3 = vcombine.low %v1571_v52, %v1579_v56  ;;  %v1683_v56 = vld [vmem:[#allocation9 + $0xc80] sm:$0xff] }
 0x1f3   :  { %v6973_v4 = vcombine.low %v1572_v57, %v1580_v58  ;;  %v1676_v48 = vld [vmem:[#allocation9 + $0xc48] sm:$0xff]  ;;  %v1691_v57 = vld [vmem:[#allocation9 + $0xcc0] sm:$0xff] }
 0x1f4   :  { %v1684_v58 = vld [vmem:[#allocation9 + $0xc88] sm:$0xff] }
 0x1f5   :  { %4470 = vmatpush1.bf16.msra.mxu0 %v6923_v0  ;;  %4556 = vmatpush1.bf16.msra.mxu1 %v6925_v1  ;;  %v1595_v0 = vld [vmem:[#allocation9 + $0x9c0] sm:$0xff]  ;;  %v1588_v1 = vld [vmem:[#allocation9 + $0x988] sm:$0xff] }
 0x1f6   :  { %4482 = vmatprep.subr.bf16.mxu0 %v6940_v6  ;;  %4568 = vmatprep.subr.bf16.mxu1 %v6942_v10  ;;  %v6988_v5 = vcombine.high %v1587_v63, %v1595_v0  ;;  %v6990_v6 = vcombine.high %v1588_v1, %v1596_v2  ;;  %v1612_v10 = vld [vmem:[#allocation9 + $0xa48] sm:$0xff]  ;;  %v6987_v11 = vcombine.low %v1587_v63, %v1595_v0  ;;  %v1699_v0 = vld [vmem:[#allocation9 + $0xd00] sm:$0xff] }
 0x28b   :  { %v1176_v19 = vpop.f32.mrb[4].mxu0  ;;  %v1262_v21 = vpop.f32.mrb[4].mxu1 }
 0x28c   :  { %v7500_v23 = vadd.f32 %v1176_v19, %v442_v12  ;;  %v7504_v24 = vadd.f32 %v1262_v21, %v450_v13  ;;  %v1178_v25 = vpop.f32.mrb[5].mxu0  ;;  %v1264_v26 = vpop.f32.mrb[5].mxu1  ;;  %v1627_v19 = vld [vmem:[#allocation9 + $0xac0] sm:$0xff]  ;;  %v1620_v21 = vld [vmem:[#allocation9 + $0xa88] sm:$0xff] }
 0x28d   :  { %v7501_v55 = vadd.f32 %v1178_v25, %v446_v14  ;;  %v7505_v27 = vadd.f32 %v1264_v26, %v454_v17  ;;  %v1180_v28 = vpop.f32.mrb[6].mxu0  ;;  %v1266_v29 = vpop.f32.mrb[6].mxu1 }
 0x28e   :  { %v7502_v30 = vadd.f32 %v1180_v28, %v442_v12  ;;  %v7506_v31 = vadd.f32 %v1266_v29, %v450_v13  ;;  %v1182_v32 = vpop.f32.mrb[7].mxu0  ;;  %v1268_v33 = vpop.f32.mrb[7].mxu1  ;;  %v1271_v36 = vmax.f32 %v7500_v23, 0.0  ;;  %v1273_v37 = vmax.f32 %v7504_v24, 0.0  ;;  %v1628_v23 = vld [vmem:[#allocation9 + $0xac8] sm:$0xff]  ;;  %v1643_v28 = vld [vmem:[#allocation9 + $0xb40] sm:$0xff] }
 0x28f   :  { %v7503_v34 = vadd.f32 %v1182_v32, %v446_v14  ;;  %v7507_v35 = vadd.f32 %v1268_v33, %v454_v17  ;;  %v1272_v40 = vmax.f32 %v7501_v55, 0.0  ;;  %v1274_v41 = vmax.f32 %v7505_v27, 0.0  ;;  %v1619_v17 = vld [vmem:[#allocation9 + $0xa80] sm:$0xff]  ;;  %v1636_v29 = vld [vmem:[#allocation9 + $0xb08] sm:$0xff] }
 0x290   :  { %v1275_v38 = vmax.f32 %v7502_v30, 0.0  ;;  %v1277_v39 = vmax.f32 %v7506_v31, 0.0  ;;  %v6989_v12 = vcombine.low %v1588_v1, %v1596_v2  ;;  %v7020_v26 = vcombine.high %v1619_v17, %v1627_v19  ;;  %v1635_v27 = vld [vmem:[#allocation9 + $0xb00] sm:$0xff]  ;;  %v1644_v30 = vld [vmem:[#allocation9 + $0xb48] sm:$0xff] }
 0x291   :  { %v1276_v42 = vmax.f32 %v7503_v34, 0.0  ;;  %v1278_v43 = vmax.f32 %v7507_v35, 0.0  ;;  %v7022_v55 = vcombine.high %v1620_v21, %v1628_v23  ;;  %v7019_v31 = vcombine.low %v1619_v17, %v1627_v19  ;;  %v1651_v35 = vld [vmem:[#allocation9 + $0xb80] sm:$0xff]  ;;  %v1700_v2 = vld [vmem:[#allocation9 + $0xd08] sm:$0xff] }
 0x292   :  { %v8320_v45 = vpack.c.bf16 %v1275_v38, %v1271_v36  ;;  %v8322_v46 = vpack.c.bf16 %v1277_v39, %v1273_v37  ;;  %v7021_v32 = vcombine.low %v1620_v21, %v1628_v23  ;;  %v7036_v33 = vcombine.high %v1635_v27, %v1643_v28  ;;  %v1659_v36 = vld [vmem:[#allocation9 + $0xbc0] sm:$0xff]  ;;  %v1652_v37 = vld [vmem:[#allocation9 + $0xb88] sm:$0xff] }
 0x293   :  { %v8324_v50 = vpack.c.bf16 %v1276_v42, %v1272_v40  ;;  %v8326_v51 = vpack.c.bf16 %v1278_v43, %v1274_v41  ;;  %v7038_v34 = vcombine.high %v1636_v29, %v1644_v30  ;;  %v1660_v38 = vld [vmem:[#allocation9 + $0xbc8] sm:$0xff]  ;;  %v7035_v39 = vcombine.low %v1635_v27, %v1643_v28  ;;  %v1667_v43 = vld [vmem:[#allocation9 + $0xc00] sm:$0xff] }
 0x294   :  { %v7037_v40 = vcombine.low %v1636_v29, %v1644_v30  ;;  %v7052_v41 = vcombine.high %v1651_v35, %v1659_v36  ;;  %v7054_v42 = vcombine.high %v1652_v37, %v1660_v38  ;;  %v7051_v49 = vcombine.low %v1651_v35, %v1659_v36  ;;  %v1707_v1 = vld [vmem:[#allocation9 + $0xd40] sm:$0xff]  ;;  %v1732_v23 = vld [vmem:[#allocation9 + $0xe08] sm:$0xff] }
 0x295   :  { %4471 = vmatprep.mubr.bf16.mxu0 %v8324_v50  ;;  %4557 = vmatprep.mubr.bf16.mxu1 %v8324_v50  ;;  %v7053_v52 = vcombine.low %v1652_v37, %v1660_v38  ;;  %v1731_v19 = vld [vmem:[#allocation9 + $0xe00] sm:$0xff]  ;;  %v1748_v30 = vld [vmem:[#allocation9 + $0xe88] sm:$0xff] }
 0x296   :  { %4472 = vmatmul.mubr.bf16.vlgmr.msra.gmra.mrb[8].mxu0 %v8320_v45  ;;  %4558 = vmatmul.mubr.bf16.vlgmr.msra.gmra.mrb[8].mxu1 %v8320_v45  ;;  %v1739_v21 = vld [vmem:[#allocation9 + $0xe40] sm:$0xff]  ;;  %v1764_v38 = vld [vmem:[#allocation9 + $0xf08] sm:$0xff] }
 0x297   :  { %4483 = vmatpush1.bf16.msra.mxu0 %v6939_v8  ;;  %4569 = vmatpush1.bf16.msra.mxu1 %v6941_v9  ;;  %v1611_v8 = vld [vmem:[#allocation9 + $0xa40] sm:$0xff]  ;;  %v1604_v9 = vld [vmem:[#allocation9 + $0xa08] sm:$0xff] }
 0x298   :  { %4514 = vmatprep.mubr.bf16.mxu0 %v8326_v51  ;;  %4600 = vmatprep.mubr.bf16.mxu1 %v8326_v51  ;;  %v7004_v13 = vcombine.high %v1603_v7, %v1611_v8  ;;  %v7006_v14 = vcombine.high %v1604_v9, %v1612_v10  ;;  %v7003_v24 = vcombine.low %v1603_v7, %v1611_v8  ;;  %v1715_v8 = vld [vmem:[#allocation9 + $0xd80] sm:$0xff] }
 0x299   :  { %4484 = vmatprep.subr.bf16.mxu0 %v6956_v53  ;;  %4570 = vmatprep.subr.bf16.mxu1 %v6958_v54  ;;  %v7005_v25 = vcombine.low %v1604_v9, %v1612_v10  ;;  %v7068_v53 = vcombine.high %v1667_v43, %v1675_v44  ;;  %v7070_v54 = vcombine.high %v1668_v47, %v1676_v48  ;;  %v1723_v9 = vld [vmem:[#allocation9 + $0xdc0] sm:$0xff]  ;;  %v1716_v10 = vld [vmem:[#allocation9 + $0xd88] sm:$0xff] }
 0x29a   :  { %v1747_v28 = vld [vmem:[#allocation9 + $0xe80] sm:$0xff] }
 0x29b   :  { %4485 = vmatpush1.bf16.msra.mxu0 %v6955_v59  ;;  %4571 = vmatpush1.bf16.msra.mxu1 %v6957_v60  ;;  %v1692_v59 = vld [vmem:[#allocation9 + $0xcc8] sm:$0xff]  ;;  %v7067_v60 = vcombine.low %v1667_v43, %v1675_v44  ;;  %v1755_v29 = vld [vmem:[#allocation9 + $0xec0] sm:$0xff] }
 0x29c   :  { %4486 = vmatprep.subr.bf16.mxu0 %v6972_v61  ;;  %4572 = vmatprep.subr.bf16.mxu1 %v6974_v62  ;;  %v7069_v61 = vcombine.low %v1668_v47, %v1676_v48  ;;  %v7084_v62 = vcombine.high %v1683_v56, %v1691_v57  ;;  %v7086_v63 = vcombine.high %v1684_v58, %v1692_v59  ;;  %v1763_v36 = vld [vmem:[#allocation9 + $0xf00] sm:$0xff]  ;;  %v1780_v48 = vld [vmem:[#allocation9 + $0xf88] sm:$0xff] }
 0x29d   :  { %v1771_v37 = vld [vmem:[#allocation9 + $0xf40] sm:$0xff] }
 0x29e   :  { %v1779_v44 = vld [vmem:[#allocation9 + $0xf80] sm:$0xff] }
 0x29f   :  { %4487 = vmatpush1.bf16.msra.mxu0 %v6971_v3  ;;  %4573 = vmatpush1.bf16.msra.mxu1 %v6973_v4  ;;  %v1708_v3 = vld [vmem:[#allocation9 + $0xd48] sm:$0xff]  ;;  %v7083_v4 = vcombine.low %v1683_v56, %v1691_v57  ;;  %v1787_v47 = vld [vmem:[#allocation9 + $0xfc0] sm:$0xff]  ;;  %v1285_v57 = vld [vmem:[#allocation9 + $0x10] sm:$0xff] }
 0x2a0   :  { %4488 = vmatprep.subr.bf16.mxu0 %v6988_v5  ;;  %4574 = vmatprep.subr.bf16.mxu1 %v6990_v6  ;;  %v7085_v5 = vcombine.low %v1684_v58, %v1692_v59  ;;  %v7100_v6 = vcombine.high %v1699_v0, %v1707_v1  ;;  %v7102_v7 = vcombine.high %v1700_v2, %v1708_v3  ;;  %v1293_v58 = vld [vmem:[#allocation9 + $0x50] sm:$0xff]  ;;  %v1286_v59 = vld [vmem:[#allocation9 + $0x18] sm:$0xff] }
 0x2a3   :  { %4489 = vmatpush1.bf16.msra.mxu0 %v6987_v11  ;;  %4575 = vmatpush1.bf16.msra.mxu1 %v6989_v12  ;;  %v1724_v11 = vld [vmem:[#allocation9 + $0xdc8] sm:$0xff]  ;;  %v7099_v12 = vcombine.low %v1699_v0, %v1707_v1  ;;  %v1301_v1 = vld [vmem:[#allocation9 + $0x90] sm:$0xff] }
 0x2a4   :  { %4490 = vmatprep.subr.bf16.mxu0 %v7004_v13  ;;  %4576 = vmatprep.subr.bf16.mxu1 %v7006_v14  ;;  %v7101_v13 = vcombine.low %v1700_v2, %v1708_v3  ;;  %v7116_v14 = vcombine.high %v1715_v8, %v1723_v9  ;;  %v7118_v17 = vcombine.high %v1716_v10, %v1724_v11  ;;  %v1309_v2 = vld [vmem:[#allocation9 + $0xd0] sm:$0xff]  ;;  %v1302_v3 = vld [vmem:[#allocation9 + $0x98] sm:$0xff] }
 0x2a7   :  { %4491 = vmatpush1.bf16.msra.mxu0 %v7003_v24  ;;  %4577 = vmatpush1.bf16.msra.mxu1 %v7005_v25  ;;  %v1740_v24 = vld [vmem:[#allocation9 + $0xe48] sm:$0xff]  ;;  %v7115_v25 = vcombine.low %v1715_v8, %v1723_v9  ;;  %v1317_v9 = vld [vmem:[#allocation9 + $0x110] sm:$0xff] }
 0x2a8   :  { %4492 = vmatprep.subr.bf16.mxu0 %v7020_v26  ;;  %4578 = vmatprep.subr.bf16.mxu1 %v7022_v55  ;;  %v7117_v26 = vcombine.low %v1716_v10, %v1724_v11  ;;  %v7132_v55 = vcombine.high %v1731_v19, %v1739_v21  ;;  %v7134_v27 = vcombine.high %v1732_v23, %v1740_v24  ;;  %v1325_v10 = vld [vmem:[#allocation9 + $0x150] sm:$0xff]  ;;  %v1318_v11 = vld [vmem:[#allocation9 + $0x118] sm:$0xff] }
 0x2ab   :  { %4493 = vmatpush1.bf16.msra.mxu0 %v7019_v31  ;;  %4579 = vmatpush1.bf16.msra.mxu1 %v7021_v32  ;;  %v1756_v31 = vld [vmem:[#allocation9 + $0xec8] sm:$0xff]  ;;  %v7131_v32 = vcombine.low %v1731_v19, %v1739_v21  ;;  %v1333_v21 = vld [vmem:[#allocation9 + $0x190] sm:$0xff] }
 0x2ac   :  { %4494 = vmatprep.subr.bf16.mxu0 %v7036_v33  ;;  %4580 = vmatprep.subr.bf16.mxu1 %v7038_v34  ;;  %v7133_v33 = vcombine.low %v1732_v23, %v1740_v24  ;;  %v7148_v34 = vcombine.high %v1747_v28, %v1755_v29  ;;  %v7150_v35 = vcombine.high %v1748_v30, %v1756_v31  ;;  %v1341_v23 = vld [vmem:[#allocation9 + $0x1d0] sm:$0xff]  ;;  %v1334_v24 = vld [vmem:[#allocation9 + $0x198] sm:$0xff] }
 0x2af   :  { %4495 = vmatpush1.bf16.msra.mxu0 %v7035_v39  ;;  %4581 = vmatpush1.bf16.msra.mxu1 %v7037_v40  ;;  %v1772_v39 = vld [vmem:[#allocation9 + $0xf48] sm:$0xff]  ;;  %v7147_v40 = vcombine.low %v1747_v28, %v1755_v29  ;;  %v1349_v29 = vld [vmem:[#allocation9 + $0x210] sm:$0xff] }
 0x2b0   :  { %4496 = vmatprep.subr.bf16.mxu0 %v7052_v41  ;;  %4582 = vmatprep.subr.bf16.mxu1 %v7054_v42  ;;  %v7149_v41 = vcombine.low %v1748_v30, %v1756_v31  ;;  %v7164_v42 = vcombine.high %v1763_v36, %v1771_v37  ;;  %v7166_v43 = vcombine.high %v1764_v38, %v1772_v39  ;;  %v1357_v30 = vld [vmem:[#allocation9 + $0x250] sm:$0xff]  ;;  %v1350_v31 = vld [vmem:[#allocation9 + $0x218] sm:$0xff] }
 0x2b3   :  { %4497 = vmatpush1.bf16.msra.mxu0 %v7051_v49  ;;  %4583 = vmatpush1.bf16.msra.mxu1 %v7053_v52  ;;  %v1788_v49 = vld [vmem:[#allocation9 + $0xfc8] sm:$0xff]  ;;  %v7163_v52 = vcombine.low %v1763_v36, %v1771_v37  ;;  %v1365_v37 = vld [vmem:[#allocation9 + $0x290] sm:$0xff] }
 0x2b4   :  { %4498 = vmatprep.subr.bf16.mxu0 %v7068_v53  ;;  %4584 = vmatprep.subr.bf16.mxu1 %v7070_v54  ;;  %v7165_v53 = vcombine.low %v1764_v38, %v1772_v39  ;;  %v7180_v54 = vcombine.high %v1779_v44, %v1787_v47  ;;  %v7182_v56 = vcombine.high %v1780_v48, %v1788_v49  ;;  %v1373_v38 = vld [vmem:[#allocation9 + $0x2d0] sm:$0xff]  ;;  %v1366_v39 = vld [vmem:[#allocation9 + $0x298] sm:$0xff] }
 0x2b7   :  { %4499 = vmatpush1.bf16.msra.mxu0 %v7067_v60  ;;  %4585 = vmatpush1.bf16.msra.mxu1 %v7069_v61  ;;  %v1294_v60 = vld [vmem:[#allocation9 + $0x58] sm:$0xff]  ;;  %v7179_v61 = vcombine.low %v1779_v44, %v1787_v47  ;;  %v1381_v47 = vld [vmem:[#allocation9 + $0x310] sm:$0xff] }
 0x2b8   :  { %4500 = vmatprep.subr.bf16.mxu0 %v7084_v62  ;;  %4586 = vmatprep.subr.bf16.mxu1 %v7086_v63  ;;  %v7181_v62 = vcombine.low %v1780_v48, %v1788_v49  ;;  %v6688_v63 = vcombine.high %v1285_v57, %v1293_v58  ;;  %v6690_v0 = vcombine.high %v1286_v59, %v1294_v60  ;;  %v1389_v48 = vld [vmem:[#allocation9 + $0x350] sm:$0xff]  ;;  %v1382_v49 = vld [vmem:[#allocation9 + $0x318] sm:$0xff] }
 0x2bb   :  { %4501 = vmatpush1.bf16.msra.mxu0 %v7083_v4  ;;  %4587 = vmatpush1.bf16.msra.mxu1 %v7085_v5  ;;  %v1310_v4 = vld [vmem:[#allocation9 + $0xd8] sm:$0xff]  ;;  %v6687_v5 = vcombine.low %v1285_v57, %v1293_v58  ;;  %v1397_v58 = vld [vmem:[#allocation9 + $0x390] sm:$0xff] }
 0x2bc   :  { %4502 = vmatprep.subr.bf16.mxu0 %v7100_v6  ;;  %4588 = vmatprep.subr.bf16.mxu1 %v7102_v7  ;;  %v6689_v6 = vcombine.low %v1286_v59, %v1294_v60  ;;  %v6704_v7 = vcombine.high %v1301_v1, %v1309_v2  ;;  %v6706_v8 = vcombine.high %v1302_v3, %v1310_v4  ;;  %v1405_v59 = vld [vmem:[#allocation9 + $0x3d0] sm:$0xff]  ;;  %v1398_v60 = vld [vmem:[#allocation9 + $0x398] sm:$0xff] }
 0x2bf   :  { %4503 = vmatpush1.bf16.msra.mxu0 %v7099_v12  ;;  %4589 = vmatpush1.bf16.msra.mxu1 %v7101_v13  ;;  %v1326_v12 = vld [vmem:[#allocation9 + $0x158] sm:$0xff]  ;;  %v6703_v13 = vcombine.low %v1301_v1, %v1309_v2  ;;  %v1413_v2 = vld [vmem:[#allocation9 + $0x410] sm:$0xff] }
 0x2c0   :  { %4504 = vmatprep.subr.bf16.mxu0 %v7116_v14  ;;  %4590 = vmatprep.subr.bf16.mxu1 %v7118_v17  ;;  %v6705_v14 = vcombine.low %v1302_v3, %v1310_v4  ;;  %v6720_v17 = vcombine.high %v1317_v9, %v1325_v10  ;;  %v6722_v19 = vcombine.high %v1318_v11, %v1326_v12  ;;  %v1421_v3 = vld [vmem:[#allocation9 + $0x450] sm:$0xff]  ;;  %v1414_v4 = vld [vmem:[#allocation9 + $0x418] sm:$0xff] }
 0x2c3   :  { %4505 = vmatpush1.bf16.msra.mxu0 %v7115_v25  ;;  %4591 = vmatpush1.bf16.msra.mxu1 %v7117_v26  ;;  %v1342_v25 = vld [vmem:[#allocation9 + $0x1d8] sm:$0xff]  ;;  %v6719_v26 = vcombine.low %v1317_v9, %v1325_v10  ;;  %v1429_v10 = vld [vmem:[#allocation9 + $0x490] sm:$0xff] }
 0x2c4   :  { %4506 = vmatprep.subr.bf16.mxu0 %v7132_v55  ;;  %4592 = vmatprep.subr.bf16.mxu1 %v7134_v27  ;;  %v6721_v55 = vcombine.low %v1318_v11, %v1326_v12  ;;  %v6736_v27 = vcombine.high %v1333_v21, %v1341_v23  ;;  %v6738_v28 = vcombine.high %v1334_v24, %v1342_v25  ;;  %v1437_v11 = vld [vmem:[#allocation9 + $0x4d0] sm:$0xff]  ;;  %v1430_v12 = vld [vmem:[#allocation9 + $0x498] sm:$0xff] }
 0x2c7   :  { %4507 = vmatpush1.bf16.msra.mxu0 %v7131_v32  ;;  %4593 = vmatpush1.bf16.msra.mxu1 %v7133_v33  ;;  %v1358_v32 = vld [vmem:[#allocation9 + $0x258] sm:$0xff]  ;;  %v6735_v33 = vcombine.low %v1333_v21, %v1341_v23  ;;  %v1445_v23 = vld [vmem:[#allocation9 + $0x510] sm:$0xff] }
 0x2c8   :  { %4508 = vmatprep.subr.bf16.mxu0 %v7148_v34  ;;  %4594 = vmatprep.subr.bf16.mxu1 %v7150_v35  ;;  %v6737_v34 = vcombine.low %v1334_v24, %v1342_v25  ;;  %v6752_v35 = vcombine.high %v1349_v29, %v1357_v30  ;;  %v6754_v36 = vcombine.high %v1350_v31, %v1358_v32  ;;  %v1453_v24 = vld [vmem:[#allocation9 + $0x550] sm:$0xff]  ;;  %v1446_v25 = vld [vmem:[#allocation9 + $0x518] sm:$0xff] }
 0x2cb   :  { %4509 = vmatpush1.bf16.msra.mxu0 %v7147_v40  ;;  %4595 = vmatpush1.bf16.msra.mxu1 %v7149_v41  ;;  %v1374_v40 = vld [vmem:[#allocation9 + $0x2d8] sm:$0xff]  ;;  %v6751_v41 = vcombine.low %v1349_v29, %v1357_v30  ;;  %v1461_v30 = vld [vmem:[#allocation9 + $0x590] sm:$0xff] }
 0x2cc   :  { %4510 = vmatprep.subr.bf16.mxu0 %v7164_v42  ;;  %4596 = vmatprep.subr.bf16.mxu1 %v7166_v43  ;;  %v6753_v42 = vcombine.low %v1350_v31, %v1358_v32  ;;  %v6768_v43 = vcombine.high %v1365_v37, %v1373_v38  ;;  %v6770_v44 = vcombine.high %v1366_v39, %v1374_v40  ;;  %v1469_v31 = vld [vmem:[#allocation9 + $0x5d0] sm:$0xff]  ;;  %v1462_v32 = vld [vmem:[#allocation9 + $0x598] sm:$0xff] }
 0x2cf   :  { %4511 = vmatpush1.bf16.msra.mxu0 %v7163_v52  ;;  %4597 = vmatpush1.bf16.msra.mxu1 %v7165_v53  ;;  %v1390_v52 = vld [vmem:[#allocation9 + $0x358] sm:$0xff]  ;;  %v6767_v53 = vcombine.low %v1365_v37, %v1373_v38  ;;  %v1477_v38 = vld [vmem:[#allocation9 + $0x610] sm:$0xff] }
 0x2d0   :  { %4512 = vmatprep.subr.bf16.mxu0 %v7180_v54  ;;  %4598 = vmatprep.subr.bf16.mxu1 %v7182_v56  ;;  %v6769_v54 = vcombine.low %v1366_v39, %v1374_v40  ;;  %v6784_v56 = vcombine.high %v1381_v47, %v1389_v48  ;;  %v6786_v57 = vcombine.high %v1382_v49, %v1390_v52  ;;  %v1485_v39 = vld [vmem:[#allocation9 + $0x650] sm:$0xff]  ;;  %v1478_v40 = vld [vmem:[#allocation9 + $0x618] sm:$0xff] }
 0x2d3   :  { %4513 = vmatpush1.bf16.msra.mxu0 %v7179_v61  ;;  %4599 = vmatpush1.bf16.msra.mxu1 %v7181_v62  ;;  %v1406_v61 = vld [vmem:[#allocation9 + $0x3d8] sm:$0xff]  ;;  %v6783_v62 = vcombine.low %v1381_v47, %v1389_v48  ;;  %v1493_v48 = vld [vmem:[#allocation9 + $0x690] sm:$0xff] }
 0x2d4   :  { %4611 = vmatprep.subr.bf16.mxu0 %v6688_v63  ;;  %4697 = vmatprep.subr.bf16.mxu1 %v6690_v0  ;;  %v6785_v63 = vcombine.low %v1382_v49, %v1390_v52  ;;  %v6800_v0 = vcombine.high %v1397_v58, %v1405_v59  ;;  %v6802_v1 = vcombine.high %v1398_v60, %v1406_v61  ;;  %v1501_v49 = vld [vmem:[#allocation9 + $0x6d0] sm:$0xff]  ;;  %v1494_v52 = vld [vmem:[#allocation9 + $0x698] sm:$0xff] }
 0x2d6   :  { %4515 = vmatmul.mubr.bf16.vlgmr.msra.gmra.mrb[8].mxu0 %v8322_v46  ;;  %4601 = vmatmul.mubr.bf16.vlgmr.msra.gmra.mrb[8].mxu1 %v8322_v46 }
 0x2d7   :  { %4612 = vmatpush1.bf16.msra.mxu0 %v6687_v5  ;;  %4643 = vmatprep.mubr.bf16.mxu0 %v8324_v50  ;;  %v1422_v5 = vld [vmem:[#allocation9 + $0x458] sm:$0xff] }
 0x2d8   :  { %4698 = vmatpush1.bf16.msra.mxu1 %v6689_v6  ;;  %4729 = vmatprep.mubr.bf16.mxu1 %v8324_v50  ;;  %v6799_v6 = vcombine.low %v1397_v58, %v1405_v59  ;;  %v6818_v9 = vcombine.high %v1414_v4, %v1422_v5  ;;  %v1509_v59 = vld [vmem:[#allocation9 + $0x710] sm:$0xff] }
 0x2d9   :  { %4613 = vmatprep.subr.bf16.mxu0 %v6704_v7  ;;  %4699 = vmatprep.subr.bf16.mxu1 %v6706_v8  ;;  %v6801_v7 = vcombine.low %v1398_v60, %v1406_v61  ;;  %v6816_v8 = vcombine.high %v1413_v2, %v1421_v3  ;;  %v1517_v60 = vld [vmem:[#allocation9 + $0x750] sm:$0xff]  ;;  %v1510_v61 = vld [vmem:[#allocation9 + $0x718] sm:$0xff] }
 0x2db   :  { %4614 = vmatpush1.bf16.msra.mxu0 %v6703_v13  ;;  %v1438_v13 = vld [vmem:[#allocation9 + $0x4d8] sm:$0xff] }
 0x2dc   :  { %4700 = vmatpush1.bf16.msra.mxu1 %v6705_v14  ;;  %4615 = vmatprep.subr.bf16.mxu0 %v6720_v17  ;;  %v6815_v14 = vcombine.low %v1413_v2, %v1421_v3  ;;  %v6817_v17 = vcombine.low %v1414_v4, %v1422_v5  ;;  %v6834_v21 = vcombine.high %v1430_v12, %v1438_v13  ;;  %v1525_v3 = vld [vmem:[#allocation9 + $0x790] sm:$0xff]  ;;  %v1526_v5 = vld [vmem:[#allocation9 + $0x798] sm:$0xff] }
 0x2dd   :  { %4701 = vmatprep.subr.bf16.mxu1 %v6722_v19  ;;  %v6832_v19 = vcombine.high %v1429_v10, %v1437_v11  ;;  %v1533_v4 = vld [vmem:[#allocation9 + $0x7d0] sm:$0xff] }
 0x2df   :  { %4616 = vmatpush1.bf16.msra.mxu0 %v6719_v26  ;;  %v1454_v26 = vld [vmem:[#allocation9 + $0x558] sm:$0xff] }
 0x2e0   :  { %4702 = vmatpush1.bf16.msra.mxu1 %v6721_v55  ;;  %4617 = vmatprep.subr.bf16.mxu0 %v6736_v27  ;;  %v6831_v55 = vcombine.low %v1429_v10, %v1437_v11  ;;  %v6833_v27 = vcombine.low %v1430_v12, %v1438_v13  ;;  %v6850_v29 = vcombine.high %v1446_v25, %v1454_v26  ;;  %v1541_v11 = vld [vmem:[#allocation9 + $0x810] sm:$0xff]  ;;  %v1542_v13 = vld [vmem:[#allocation9 + $0x818] sm:$0xff] }
 0x2e1   :  { %4703 = vmatprep.subr.bf16.mxu1 %v6738_v28  ;;  %v6848_v28 = vcombine.high %v1445_v23, %v1453_v24  ;;  %v1549_v12 = vld [vmem:[#allocation9 + $0x850] sm:$0xff] }
 0x2e3   :  { %4618 = vmatpush1.bf16.msra.mxu0 %v6735_v33  ;;  %v1470_v33 = vld [vmem:[#allocation9 + $0x5d8] sm:$0xff] }
 0x2e4   :  { %4704 = vmatpush1.bf16.msra.mxu1 %v6737_v34  ;;  %4619 = vmatprep.subr.bf16.mxu0 %v6752_v35  ;;  %v6847_v34 = vcombine.low %v1445_v23, %v1453_v24  ;;  %v6849_v35 = vcombine.low %v1446_v25, %v1454_v26  ;;  %v6866_v37 = vcombine.high %v1462_v32, %v1470_v33  ;;  %v1557_v24 = vld [vmem:[#allocation9 + $0x890] sm:$0xff] }
 0x2e5   :  { %4705 = vmatprep.subr.bf16.mxu1 %v6754_v36  ;;  %v6864_v36 = vcombine.high %v1461_v30, %v1469_v31  ;;  %v1565_v25 = vld [vmem:[#allocation9 + $0x8d0] sm:$0xff]  ;;  %v6943_v26 = vcombine.low %v1541_v11, %v1549_v12 }
 0x2e7   :  { %4620 = vmatpush1.bf16.msra.mxu0 %v6751_v41  ;;  %v1486_v41 = vld [vmem:[#allocation9 + $0x658] sm:$0xff] }
 0x2e8   :  { %4706 = vmatpush1.bf16.msra.mxu1 %v6753_v42  ;;  %4621 = vmatprep.subr.bf16.mxu0 %v6768_v43  ;;  %v6863_v42 = vcombine.low %v1461_v30, %v1469_v31  ;;  %v6865_v43 = vcombine.low %v1462_v32, %v1470_v33  ;;  %v6882_v47 = vcombine.high %v1478_v40, %v1486_v41  ;;  %v1573_v30 = vld [vmem:[#allocation9 + $0x910] sm:$0xff]  ;;  %v1574_v33 = vld [vmem:[#allocation9 + $0x918] sm:$0xff] }
 0x2e9   :  { %4707 = vmatprep.subr.bf16.mxu1 %v6770_v44  ;;  %v6880_v44 = vcombine.high %v1477_v38, %v1485_v39  ;;  %v1581_v31 = vld [vmem:[#allocation9 + $0x950] sm:$0xff] }
 0x2eb   :  { %4622 = vmatpush1.bf16.msra.mxu0 %v6767_v53  ;;  %v1502_v53 = vld [vmem:[#allocation9 + $0x6d8] sm:$0xff] }
 0x2ec   :  { %4708 = vmatpush1.bf16.msra.mxu1 %v6769_v54  ;;  %4623 = vmatprep.subr.bf16.mxu0 %v6784_v56  ;;  %v6879_v54 = vcombine.low %v1477_v38, %v1485_v39  ;;  %v6881_v56 = vcombine.low %v1478_v40, %v1486_v41  ;;  %v6898_v58 = vcombine.high %v1494_v52, %v1502_v53  ;;  %v1589_v39 = vld [vmem:[#allocation9 + $0x990] sm:$0xff]  ;;  %v1590_v41 = vld [vmem:[#allocation9 + $0x998] sm:$0xff] }
 0x2ed   :  { %4709 = vmatprep.subr.bf16.mxu1 %v6786_v57  ;;  %v6896_v57 = vcombine.high %v1493_v48, %v1501_v49  ;;  %v1597_v40 = vld [vmem:[#allocation9 + $0x9d0] sm:$0xff] }
 0x2ef   :  { %4624 = vmatpush1.bf16.msra.mxu0 %v6783_v62  ;;  %v1518_v62 = vld [vmem:[#allocation9 + $0x758] sm:$0xff] }
 0x2f0   :  { %4710 = vmatpush1.bf16.msra.mxu1 %v6785_v63  ;;  %4625 = vmatprep.subr.bf16.mxu0 %v6800_v0  ;;  %v6895_v63 = vcombine.low %v1493_v48, %v1501_v49  ;;  %v6897_v0 = vcombine.low %v1494_v52, %v1502_v53  ;;  %v6914_v2 = vcombine.high %v1510_v61, %v1518_v62  ;;  %v1605_v49 = vld [vmem:[#allocation9 + $0xa10] sm:$0xff]  ;;  %v1606_v53 = vld [vmem:[#allocation9 + $0xa18] sm:$0xff] }
 0x2f1   :  { %4711 = vmatprep.subr.bf16.mxu1 %v6802_v1  ;;  %v6912_v1 = vcombine.high %v1509_v59, %v1517_v60  ;;  %v1613_v52 = vld [vmem:[#allocation9 + $0xa50] sm:$0xff] }
 0x2f3   :  { %4626 = vmatpush1.bf16.msra.mxu0 %v6799_v6  ;;  %v1534_v6 = vld [vmem:[#allocation9 + $0x7d8] sm:$0xff] }
 0x2f4   :  { %4712 = vmatpush1.bf16.msra.mxu1 %v6801_v7  ;;  %4627 = vmatprep.subr.bf16.mxu0 %v6816_v8  ;;  %v6911_v7 = vcombine.low %v1509_v59, %v1517_v60  ;;  %v6913_v8 = vcombine.low %v1510_v61, %v1518_v62  ;;  %v6930_v10 = vcombine.high %v1526_v5, %v1534_v6  ;;  %v1621_v60 = vld [vmem:[#allocation9 + $0xa90] sm:$0xff]  ;;  %v1622_v62 = vld [vmem:[#allocation9 + $0xa98] sm:$0xff] }
 0x2f5   :  { %4713 = vmatprep.subr.bf16.mxu1 %v6818_v9  ;;  %v6928_v9 = vcombine.high %v1525_v3, %v1533_v4  ;;  %v1629_v61 = vld [vmem:[#allocation9 + $0xad0] sm:$0xff] }
 0x2f7   :  { %4628 = vmatpush1.bf16.msra.mxu0 %v6815_v14  ;;  %v1550_v14 = vld [vmem:[#allocation9 + $0x858] sm:$0xff] }
 0x2f8   :  { %4714 = vmatpush1.bf16.msra.mxu1 %v6817_v17  ;;  %4629 = vmatprep.subr.bf16.mxu0 %v6832_v19  ;;  %v6927_v17 = vcombine.low %v1525_v3, %v1533_v4  ;;  %v6929_v19 = vcombine.low %v1526_v5, %v1534_v6  ;;  %v6946_v23 = vcombine.high %v1542_v13, %v1550_v14  ;;  %v1637_v4 = vld [vmem:[#allocation9 + $0xb10] sm:$0xff]  ;;  %v1638_v6 = vld [vmem:[#allocation9 + $0xb18] sm:$0xff] }
 0x2f9   :  { %4715 = vmatprep.subr.bf16.mxu1 %v6834_v21  ;;  %v6944_v21 = vcombine.high %v1541_v11, %v1549_v12  ;;  %v1645_v5 = vld [vmem:[#allocation9 + $0xb50] sm:$0xff] }
 0x2fa   :  { %v1653_v12 = vld [vmem:[#allocation9 + $0xb90] sm:$0xff] }
 0x2fb   :  { %4630 = vmatpush1.bf16.msra.mxu0 %v6831_v55  ;;  %v1558_v55 = vld [vmem:[#allocation9 + $0x898] sm:$0xff] }
 0x2fc   :  { %4716 = vmatpush1.bf16.msra.mxu1 %v6833_v27  ;;  %4631 = vmatprep.subr.bf16.mxu0 %v6848_v28  ;;  %v1566_v27 = vld [vmem:[#allocation9 + $0x8d8] sm:$0xff]  ;;  %v6945_v28 = vcombine.low %v1542_v13, %v1550_v14  ;;  %v1661_v13 = vld [vmem:[#allocation9 + $0xbd0] sm:$0xff] }
 0x2fd   :  { %4717 = vmatprep.subr.bf16.mxu1 %v6850_v29  ;;  %v6960_v29 = vcombine.high %v1557_v24, %v1565_v25  ;;  %v6962_v32 = vcombine.high %v1558_v55, %v1566_v27  ;;  %v1654_v14 = vld [vmem:[#allocation9 + $0xb98] sm:$0xff] }
 0x2ff   :  { %4632 = vmatpush1.bf16.msra.mxu0 %v6847_v34  ;;  %v1582_v34 = vld [vmem:[#allocation9 + $0x958] sm:$0xff] }
 0x300   :  { %4718 = vmatpush1.bf16.msra.mxu1 %v6849_v35  ;;  %4633 = vmatprep.subr.bf16.mxu0 %v6864_v36  ;;  %v6959_v35 = vcombine.low %v1557_v24, %v1565_v25  ;;  %v6961_v36 = vcombine.low %v1558_v55, %v1566_v27  ;;  %v6978_v38 = vcombine.high %v1574_v33, %v1582_v34  ;;  %v1669_v25 = vld [vmem:[#allocation9 + $0xc10] sm:$0xff]  ;;  %v1670_v55 = vld [vmem:[#allocation9 + $0xc18] sm:$0xff] }
 0x301   :  { %4719 = vmatprep.subr.bf16.mxu1 %v6866_v37  ;;  %v6976_v37 = vcombine.high %v1573_v30, %v1581_v31  ;;  %v1678_v27 = vld [vmem:[#allocation9 + $0xc58] sm:$0xff] }
 0x303   :  { %4634 = vmatpush1.bf16.msra.mxu0 %v6863_v42  ;;  %v1598_v42 = vld [vmem:[#allocation9 + $0x9d8] sm:$0xff] }
 0x304   :  { %4720 = vmatpush1.bf16.msra.mxu1 %v6865_v43  ;;  %4635 = vmatprep.subr.bf16.mxu0 %v6880_v44  ;;  %v6975_v43 = vcombine.low %v1573_v30, %v1581_v31  ;;  %v6977_v44 = vcombine.low %v1574_v33, %v1582_v34  ;;  %v6994_v48 = vcombine.high %v1590_v41, %v1598_v42  ;;  %v1693_v33 = vld [vmem:[#allocation9 + $0xcd0] sm:$0xff]  ;;  %v1686_v34 = vld [vmem:[#allocation9 + $0xc98] sm:$0xff] }
 0x305   :  { %4721 = vmatprep.subr.bf16.mxu1 %v6882_v47  ;;  %v6992_v47 = vcombine.high %v1589_v39, %v1597_v40  ;;  %v7074_v31 = vcombine.high %v1670_v55, %v1678_v27 }
 0x307   :  { %4636 = vmatpush1.bf16.msra.mxu0 %v6879_v54  ;;  %v1614_v54 = vld [vmem:[#allocation9 + $0xa58] sm:$0xff] }
 0x308   :  { %4722 = vmatpush1.bf16.msra.mxu1 %v6881_v56  ;;  %4637 = vmatprep.subr.bf16.mxu0 %v6896_v57  ;;  %v6991_v56 = vcombine.low %v1589_v39, %v1597_v40  ;;  %v6993_v57 = vcombine.low %v1590_v41, %v1598_v42  ;;  %v7010_v59 = vcombine.high %v1606_v53, %v1614_v54  ;;  %v1701_v40 = vld [vmem:[#allocation9 + $0xd10] sm:$0xff]  ;;  %v1702_v42 = vld [vmem:[#allocation9 + $0xd18] sm:$0xff] }
 0x309   :  { %4723 = vmatprep.subr.bf16.mxu1 %v6898_v58  ;;  %v7008_v58 = vcombine.high %v1605_v49, %v1613_v52  ;;  %v1709_v41 = vld [vmem:[#allocation9 + $0xd50] sm:$0xff] }
 0x30b   :  { %4638 = vmatpush1.bf16.msra.mxu0 %v6895_v63  ;;  %v1630_v63 = vld [vmem:[#allocation9 + $0xad8] sm:$0xff] }
 0x30c   :  { %4724 = vmatpush1.bf16.msra.mxu1 %v6897_v0  ;;  %4639 = vmatprep.subr.bf16.mxu0 %v6912_v1  ;;  %v7007_v0 = vcombine.low %v1605_v49, %v1613_v52  ;;  %v7009_v1 = vcombine.low %v1606_v53, %v1614_v54  ;;  %v7026_v3 = vcombine.high %v1622_v62, %v1630_v63  ;;  %v1717_v52 = vld [vmem:[#allocation9 + $0xd90] sm:$0xff]  ;;  %v1718_v54 = vld [vmem:[#allocation9 + $0xd98] sm:$0xff] }
 0x30d   :  { %4725 = vmatprep.subr.bf16.mxu1 %v6914_v2  ;;  %v7024_v2 = vcombine.high %v1621_v60, %v1629_v61  ;;  %v1725_v53 = vld [vmem:[#allocation9 + $0xdd0] sm:$0xff] }
 0x30f   :  { %4640 = vmatpush1.bf16.msra.mxu0 %v6911_v7  ;;  %v1646_v7 = vld [vmem:[#allocation9 + $0xb58] sm:$0xff] }
 0x310   :  { %4726 = vmatpush1.bf16.msra.mxu1 %v6913_v8  ;;  %4641 = vmatprep.subr.bf16.mxu0 %v6928_v9  ;;  %v7023_v8 = vcombine.low %v1621_v60, %v1629_v61  ;;  %v7025_v9 = vcombine.low %v1622_v62, %v1630_v63  ;;  %v7042_v11 = vcombine.high %v1638_v6, %v1646_v7  ;;  %v1733_v61 = vld [vmem:[#allocation9 + $0xe10] sm:$0xff]  ;;  %v1734_v63 = vld [vmem:[#allocation9 + $0xe18] sm:$0xff] }
 0x311   :  { %4727 = vmatprep.subr.bf16.mxu1 %v6930_v10  ;;  %v7040_v10 = vcombine.high %v1637_v4, %v1645_v5  ;;  %v1741_v62 = vld [vmem:[#allocation9 + $0xe50] sm:$0xff] }
 0x313   :  { %4642 = vmatpush1.bf16.msra.mxu0 %v6927_v17  ;;  %v1662_v17 = vld [vmem:[#allocation9 + $0xbd8] sm:$0xff] }
 0x314   :  { %4728 = vmatpush1.bf16.msra.mxu1 %v6929_v19  ;;  %4654 = vmatprep.subr.bf16.mxu0 %v6944_v21  ;;  %v7039_v19 = vcombine.low %v1637_v4, %v1645_v5  ;;  %v7041_v21 = vcombine.low %v1638_v6, %v1646_v7  ;;  %v7058_v24 = vcombine.high %v1654_v14, %v1662_v17  ;;  %v1749_v5 = vld [vmem:[#allocation9 + $0xe90] sm:$0xff]  ;;  %v1750_v7 = vld [vmem:[#allocation9 + $0xe98] sm:$0xff] }
 0x315   :  { %4740 = vmatprep.subr.bf16.mxu1 %v6946_v23  ;;  %v7056_v23 = vcombine.high %v1653_v12, %v1661_v13  ;;  %v1757_v6 = vld [vmem:[#allocation9 + $0xed0] sm:$0xff] }
 0x316   :  { %4644 = vmatmul.mubr.bf16.vlgmr.msra.gmra.mrb[12].mxu0 %v8320_v45 }
 0x317   :  { %4730 = vmatmul.mubr.bf16.vlgmr.msra.gmra.mrb[12].mxu1 %v8320_v45  ;;  %4655 = vmatpush1.bf16.msra.mxu0 %v6943_v26  ;;  %v1677_v26 = vld [vmem:[#allocation9 + $0xc50] sm:$0xff] }
 0x318   :  { %4686 = vmatprep.mubr.bf16.mxu0 %v8326_v51  ;;  %4741 = vmatpush1.bf16.msra.mxu1 %v6945_v28  ;;  %v7055_v28 = vcombine.low %v1653_v12, %v1661_v13  ;;  %v7072_v30 = vcombine.high %v1669_v25, %v1677_v26  ;;  %v1765_v13 = vld [vmem:[#allocation9 + $0xf10] sm:$0xff] }
 0x319   :  { %4772 = vmatprep.mubr.bf16.mxu1 %v8326_v51  ;;  %4656 = vmatprep.subr.bf16.mxu0 %v6960_v29  ;;  %v7057_v29 = vcombine.low %v1654_v14, %v1662_v17  ;;  %v1773_v14 = vld [vmem:[#allocation9 + $0xf50] sm:$0xff]  ;;  %v1766_v17 = vld [vmem:[#allocation9 + $0xf18] sm:$0xff] }
 0x31a   :  { %4742 = vmatprep.subr.bf16.mxu1 %v6962_v32  ;;  %v1685_v32 = vld [vmem:[#allocation9 + $0xc90] sm:$0xff] }
 0x31b   :  { %4657 = vmatpush1.bf16.msra.mxu0 %v6959_v35  ;;  %v1694_v35 = vld [vmem:[#allocation9 + $0xcd8] sm:$0xff] }
 0x31c   :  { %4743 = vmatpush1.bf16.msra.mxu1 %v6961_v36  ;;  %4658 = vmatprep.subr.bf16.mxu0 %v6976_v37  ;;  %v7071_v36 = vcombine.low %v1669_v25, %v1677_v26  ;;  %v7073_v37 = vcombine.low %v1670_v55, %v1678_v27  ;;  %v7090_v39 = vcombine.high %v1686_v34, %v1694_v35  ;;  %v1781_v26 = vld [vmem:[#allocation9 + $0xf90] sm:$0xff]  ;;  %v1782_v27 = vld [vmem:[#allocation9 + $0xf98] sm:$0xff] }
 0x31d   :  { %4744 = vmatprep.subr.bf16.mxu1 %v6978_v38  ;;  %v7088_v38 = vcombine.high %v1685_v32, %v1693_v33  ;;  %v1789_v55 = vld [vmem:[#allocation9 + $0xfd0] sm:$0xff] }
 0x31f   :  { %4659 = vmatpush1.bf16.msra.mxu0 %v6975_v43  ;;  %v1710_v43 = vld [vmem:[#allocation9 + $0xd58] sm:$0xff] }
 0x320   :  { %4745 = vmatpush1.bf16.msra.mxu1 %v6977_v44  ;;  %4660 = vmatprep.subr.bf16.mxu0 %v6992_v47  ;;  %v7087_v44 = vcombine.low %v1685_v32, %v1693_v33  ;;  %v7089_v47 = vcombine.low %v1686_v34, %v1694_v35  ;;  %v7106_v49 = vcombine.high %v1702_v42, %v1710_v43  ;;  %v1287_v33 = vld [vmem:[#allocation9 + $0x20] sm:$0xff]  ;;  %v1288_v35 = vld [vmem:[#allocation9 + $0x28] sm:$0xff] }
 0x321   :  { %4746 = vmatprep.subr.bf16.mxu1 %v6994_v48  ;;  %v7104_v48 = vcombine.high %v1701_v40, %v1709_v41  ;;  %v1295_v34 = vld [vmem:[#allocation9 + $0x60] sm:$0xff] }
 0x323   :  { %4661 = vmatpush1.bf16.msra.mxu0 %v6991_v56  ;;  %v1726_v56 = vld [vmem:[#allocation9 + $0xdd8] sm:$0xff] }
 0x324   :  { %4747 = vmatpush1.bf16.msra.mxu1 %v6993_v57  ;;  %4662 = vmatprep.subr.bf16.mxu0 %v7008_v58  ;;  %v7103_v57 = vcombine.low %v1701_v40, %v1709_v41  ;;  %v7105_v58 = vcombine.low %v1702_v42, %v1710_v43  ;;  %v7122_v60 = vcombine.high %v1718_v54, %v1726_v56  ;;  %v1303_v41 = vld [vmem:[#allocation9 + $0xa0] sm:$0xff] }
 0x325   :  { %4748 = vmatprep.subr.bf16.mxu1 %v7010_v59  ;;  %v7120_v59 = vcombine.high %v1717_v52, %v1725_v53  ;;  %v1311_v42 = vld [vmem:[#allocation9 + $0xe0] sm:$0xff]  ;;  %v6691_v43 = vcombine.low %v1287_v33, %v1295_v34 }
 0x327   :  { %4663 = vmatpush1.bf16.msra.mxu0 %v7007_v0  ;;  %v1742_v0 = vld [vmem:[#allocation9 + $0xe58] sm:$0xff] }
 0x328   :  { %4749 = vmatpush1.bf16.msra.mxu1 %v7009_v1  ;;  %4664 = vmatprep.subr.bf16.mxu0 %v7024_v2  ;;  %v7119_v1 = vcombine.low %v1717_v52, %v1725_v53  ;;  %v7121_v2 = vcombine.low %v1718_v54, %v1726_v56  ;;  %v7138_v4 = vcombine.high %v1734_v63, %v1742_v0  ;;  %v1319_v52 = vld [vmem:[#allocation9 + $0x120] sm:$0xff]  ;;  %v1320_v56 = vld [vmem:[#allocation9 + $0x128] sm:$0xff] }
 0x329   :  { %4750 = vmatprep.subr.bf16.mxu1 %v7026_v3  ;;  %v7136_v3 = vcombine.high %v1733_v61, %v1741_v62  ;;  %v1327_v53 = vld [vmem:[#allocation9 + $0x160] sm:$0xff] }
 0x32b   :  { %4665 = vmatpush1.bf16.msra.mxu0 %v7023_v8  ;;  %v1758_v8 = vld [vmem:[#allocation9 + $0xed8] sm:$0xff] }
 0x32c   :  { %4751 = vmatpush1.bf16.msra.mxu1 %v7025_v9  ;;  %4666 = vmatprep.subr.bf16.mxu0 %v7040_v10  ;;  %v7135_v9 = vcombine.low %v1733_v61, %v1741_v62  ;;  %v7137_v10 = vcombine.low %v1734_v63, %v1742_v0  ;;  %v7154_v12 = vcombine.high %v1750_v7, %v1758_v8  ;;  %v1335_v62 = vld [vmem:[#allocation9 + $0x1a0] sm:$0xff]  ;;  %v1336_v0 = vld [vmem:[#allocation9 + $0x1a8] sm:$0xff] }
 0x32d   :  { %4752 = vmatprep.subr.bf16.mxu1 %v7042_v11  ;;  %v7152_v11 = vcombine.high %v1749_v5, %v1757_v6  ;;  %v1343_v63 = vld [vmem:[#allocation9 + $0x1e0] sm:$0xff] }
 0x32f   :  { %4667 = vmatpush1.bf16.msra.mxu0 %v7039_v19  ;;  %v1774_v19 = vld [vmem:[#allocation9 + $0xf58] sm:$0xff] }
 0x330   :  { %4753 = vmatpush1.bf16.msra.mxu1 %v7041_v21  ;;  %4668 = vmatprep.subr.bf16.mxu0 %v7056_v23  ;;  %v7151_v21 = vcombine.low %v1749_v5, %v1757_v6  ;;  %v7153_v23 = vcombine.low %v1750_v7, %v1758_v8  ;;  %v7170_v25 = vcombine.high %v1766_v17, %v1774_v19  ;;  %v1351_v6 = vld [vmem:[#allocation9 + $0x220] sm:$0xff]  ;;  %v1352_v8 = vld [vmem:[#allocation9 + $0x228] sm:$0xff] }
 0x331   :  { %4754 = vmatprep.subr.bf16.mxu1 %v7058_v24  ;;  %v7168_v24 = vcombine.high %v1765_v13, %v1773_v14  ;;  %v1359_v7 = vld [vmem:[#allocation9 + $0x260] sm:$0xff] }
 0x333   :  { %4669 = vmatpush1.bf16.msra.mxu0 %v7055_v28  ;;  %v1790_v28 = vld [vmem:[#allocation9 + $0xfd8] sm:$0xff] }
 0x334   :  { %4755 = vmatpush1.bf16.msra.mxu1 %v7057_v29  ;;  %4670 = vmatprep.subr.bf16.mxu0 %v7072_v30  ;;  %v7167_v29 = vcombine.low %v1765_v13, %v1773_v14  ;;  %v7169_v30 = vcombine.low %v1766_v17, %v1774_v19  ;;  %v7186_v32 = vcombine.high %v1782_v27, %v1790_v28  ;;  %v1367_v14 = vld [vmem:[#allocation9 + $0x2a0] sm:$0xff]  ;;  %v1368_v19 = vld [vmem:[#allocation9 + $0x2a8] sm:$0xff] }
 0x335   :  { %4756 = vmatprep.subr.bf16.mxu1 %v7074_v31  ;;  %v7184_v31 = vcombine.high %v1781_v26, %v1789_v55  ;;  %v1375_v17 = vld [vmem:[#allocation9 + $0x2e0] sm:$0xff] }
 0x337   :  { %4671 = vmatpush1.bf16.msra.mxu0 %v7071_v36  ;;  %v1296_v36 = vld [vmem:[#allocation9 + $0x68] sm:$0xff] }
 0x338   :  { %4757 = vmatpush1.bf16.msra.mxu1 %v7073_v37  ;;  %4672 = vmatprep.subr.bf16.mxu0 %v7088_v38  ;;  %v7183_v37 = vcombine.low %v1781_v26, %v1789_v55  ;;  %v7185_v38 = vcombine.low %v1782_v27, %v1790_v28  ;;  %v6694_v40 = vcombine.high %v1288_v35, %v1296_v36  ;;  %v1383_v55 = vld [vmem:[#allocation9 + $0x320] sm:$0xff]  ;;  %v1384_v28 = vld [vmem:[#allocation9 + $0x328] sm:$0xff] }
 0x339   :  { %4758 = vmatprep.subr.bf16.mxu1 %v7090_v39  ;;  %v6692_v39 = vcombine.high %v1287_v33, %v1295_v34  ;;  %v1391_v27 = vld [vmem:[#allocation9 + $0x360] sm:$0xff] }
 0x33a   :  { %v1399_v34 = vld [vmem:[#allocation9 + $0x3a0] sm:$0xff] }
 0x33b   :  { %4673 = vmatpush1.bf16.msra.mxu0 %v7087_v44  ;;  %v1304_v44 = vld [vmem:[#allocation9 + $0xa8] sm:$0xff] }
 0x33c   :  { %4759 = vmatpush1.bf16.msra.mxu1 %v7089_v47  ;;  %4674 = vmatprep.subr.bf16.mxu0 %v7104_v48  ;;  %v1312_v47 = vld [vmem:[#allocation9 + $0xe8] sm:$0xff]  ;;  %v6693_v48 = vcombine.low %v1288_v35, %v1296_v36  ;;  %v1407_v35 = vld [vmem:[#allocation9 + $0x3e0] sm:$0xff] }
 0x33d   :  { %4760 = vmatprep.subr.bf16.mxu1 %v7106_v49  ;;  %v6708_v49 = vcombine.high %v1303_v41, %v1311_v42  ;;  %v6710_v54 = vcombine.high %v1304_v44, %v1312_v47  ;;  %v1400_v36 = vld [vmem:[#allocation9 + $0x3a8] sm:$0xff] }
 0x33f   :  { %4675 = vmatpush1.bf16.msra.mxu0 %v7103_v57  ;;  %v1328_v57 = vld [vmem:[#allocation9 + $0x168] sm:$0xff] }
 0x340   :  { %4761 = vmatpush1.bf16.msra.mxu1 %v7105_v58  ;;  %4676 = vmatprep.subr.bf16.mxu0 %v7120_v59  ;;  %v6707_v58 = vcombine.low %v1303_v41, %v1311_v42  ;;  %v6709_v59 = vcombine.low %v1304_v44, %v1312_v47  ;;  %v6726_v61 = vcombine.high %v1320_v56, %v1328_v57  ;;  %v1415_v42 = vld [vmem:[#allocation9 + $0x420] sm:$0xff]  ;;  %v1416_v44 = vld [vmem:[#allocation9 + $0x428] sm:$0xff] }
 0x341   :  { %4762 = vmatprep.subr.bf16.mxu1 %v7122_v60  ;;  %v6724_v60 = vcombine.high %v1319_v52, %v1327_v53  ;;  %v1424_v47 = vld [vmem:[#allocation9 + $0x468] sm:$0xff] }
 0x343   :  { %4677 = vmatpush1.bf16.msra.mxu0 %v7119_v1  ;;  %v1344_v1 = vld [vmem:[#allocation9 + $0x1e8] sm:$0xff] }
 0x344   :  { %4763 = vmatpush1.bf16.msra.mxu1 %v7121_v2  ;;  %4678 = vmatprep.subr.bf16.mxu0 %v7136_v3  ;;  %v6723_v2 = vcombine.low %v1319_v52, %v1327_v53  ;;  %v6725_v3 = vcombine.low %v1320_v56, %v1328_v57  ;;  %v6742_v5 = vcombine.high %v1336_v0, %v1344_v1  ;;  %v1439_v56 = vld [vmem:[#allocation9 + $0x4e0] sm:$0xff]  ;;  %v1432_v57 = vld [vmem:[#allocation9 + $0x4a8] sm:$0xff] }
 0x345   :  { %4764 = vmatprep.subr.bf16.mxu1 %v7138_v4  ;;  %v6740_v4 = vcombine.high %v1335_v62, %v1343_v63  ;;  %v6822_v53 = vcombine.high %v1416_v44, %v1424_v47 }
 0x347   :  { %4679 = vmatpush1.bf16.msra.mxu0 %v7135_v9  ;;  %v1360_v9 = vld [vmem:[#allocation9 + $0x268] sm:$0xff] }
 0x348   :  { %4765 = vmatpush1.bf16.msra.mxu1 %v7137_v10  ;;  %4680 = vmatprep.subr.bf16.mxu0 %v7152_v11  ;;  %v6739_v10 = vcombine.low %v1335_v62, %v1343_v63  ;;  %v6741_v11 = vcombine.low %v1336_v0, %v1344_v1  ;;  %v6758_v13 = vcombine.high %v1352_v8, %v1360_v9  ;;  %v1447_v63 = vld [vmem:[#allocation9 + $0x520] sm:$0xff]  ;;  %v1448_v1 = vld [vmem:[#allocation9 + $0x528] sm:$0xff] }
 0x349   :  { %4766 = vmatprep.subr.bf16.mxu1 %v7154_v12  ;;  %v6756_v12 = vcombine.high %v1351_v6, %v1359_v7  ;;  %v1455_v0 = vld [vmem:[#allocation9 + $0x560] sm:$0xff] }
 0x34b   :  { %4681 = vmatpush1.bf16.msra.mxu0 %v7151_v21  ;;  %v1376_v21 = vld [vmem:[#allocation9 + $0x2e8] sm:$0xff] }
 0x34c   :  { %4767 = vmatpush1.bf16.msra.mxu1 %v7153_v23  ;;  %4682 = vmatprep.subr.bf16.mxu0 %v7168_v24  ;;  %v6755_v23 = vcombine.low %v1351_v6, %v1359_v7  ;;  %v6757_v24 = vcombine.low %v1352_v8, %v1360_v9  ;;  %v6774_v26 = vcombine.high %v1368_v19, %v1376_v21  ;;  %v1463_v7 = vld [vmem:[#allocation9 + $0x5a0] sm:$0xff]  ;;  %v1464_v9 = vld [vmem:[#allocation9 + $0x5a8] sm:$0xff] }
 0x34d   :  { %4768 = vmatprep.subr.bf16.mxu1 %v7170_v25  ;;  %v6772_v25 = vcombine.high %v1367_v14, %v1375_v17  ;;  %v1471_v8 = vld [vmem:[#allocation9 + $0x5e0] sm:$0xff] }
 0x34f   :  { %4683 = vmatpush1.bf16.msra.mxu0 %v7167_v29  ;;  %v1392_v29 = vld [vmem:[#allocation9 + $0x368] sm:$0xff] }
 0x350   :  { %4769 = vmatpush1.bf16.msra.mxu1 %v7169_v30  ;;  %4684 = vmatprep.subr.bf16.mxu0 %v7184_v31  ;;  %v6771_v30 = vcombine.low %v1367_v14, %v1375_v17  ;;  %v6773_v31 = vcombine.low %v1368_v19, %v1376_v21  ;;  %v6790_v33 = vcombine.high %v1384_v28, %v1392_v29  ;;  %v1479_v17 = vld [vmem:[#allocation9 + $0x620] sm:$0xff]  ;;  %v1480_v21 = vld [vmem:[#allocation9 + $0x628] sm:$0xff] }
 0x351   :  { %4770 = vmatprep.subr.bf16.mxu1 %v7186_v32  ;;  %v6788_v32 = vcombine.high %v1383_v55, %v1391_v27  ;;  %v1487_v19 = vld [vmem:[#allocation9 + $0x660] sm:$0xff] }
 0x353   :  { %4685 = vmatpush1.bf16.msra.mxu0 %v7183_v37  ;;  %v1408_v37 = vld [vmem:[#allocation9 + $0x3e8] sm:$0xff] }
 0x354   :  { %4771 = vmatpush1.bf16.msra.mxu1 %v7185_v38  ;;  %4783 = vmatprep.subr.bf16.mxu0 %v6692_v39  ;;  %v6787_v38 = vcombine.low %v1383_v55, %v1391_v27  ;;  %v6789_v39 = vcombine.low %v1384_v28, %v1392_v29  ;;  %v6806_v41 = vcombine.high %v1400_v36, %v1408_v37  ;;  %v1495_v27 = vld [vmem:[#allocation9 + $0x6a0] sm:$0xff]  ;;  %v1496_v29 = vld [vmem:[#allocation9 + $0x6a8] sm:$0xff] }
 0x355   :  { %4869 = vmatprep.subr.bf16.mxu1 %v6694_v40  ;;  %v6804_v40 = vcombine.high %v1399_v34, %v1407_v35  ;;  %v1503_v28 = vld [vmem:[#allocation9 + $0x6e0] sm:$0xff] }
 0x356   :  { %4687 = vmatmul.mubr.bf16.vlgmr.msra.gmra.mrb[12].mxu0 %v8322_v46 }
 0x357   :  { %4773 = vmatmul.mubr.bf16.vlgmr.msra.gmra.mrb[12].mxu1 %v8322_v46  ;;  %4784 = vmatpush1.bf16.msra.mxu0 %v6691_v43  ;;  %v1423_v43 = vld [vmem:[#allocation9 + $0x460] sm:$0xff] }
 0x358   :  { %4815 = vmatprep.mubr.bf16.mxu0 %v8324_v50  ;;  %4870 = vmatpush1.bf16.msra.mxu1 %v6693_v48  ;;  %v6803_v48 = vcombine.low %v1399_v34, %v1407_v35  ;;  %v6820_v52 = vcombine.high %v1415_v42, %v1423_v43  ;;  %v1511_v35 = vld [vmem:[#allocation9 + $0x720] sm:$0xff] }
 0x359   :  { %4901 = vmatprep.mubr.bf16.mxu1 %v8324_v50  ;;  %4785 = vmatprep.subr.bf16.mxu0 %v6708_v49  ;;  %v6805_v49 = vcombine.low %v1400_v36, %v1408_v37  ;;  %v1519_v36 = vld [vmem:[#allocation9 + $0x760] sm:$0xff]  ;;  %v1512_v37 = vld [vmem:[#allocation9 + $0x728] sm:$0xff] }
 0x35a   :  { %4871 = vmatprep.subr.bf16.mxu1 %v6710_v54  ;;  %v1431_v54 = vld [vmem:[#allocation9 + $0x4a0] sm:$0xff] }
 0x35b   :  { %4786 = vmatpush1.bf16.msra.mxu0 %v6707_v58  ;;  %v1440_v58 = vld [vmem:[#allocation9 + $0x4e8] sm:$0xff] }
 0x35c   :  { %4872 = vmatpush1.bf16.msra.mxu1 %v6709_v59  ;;  %4787 = vmatprep.subr.bf16.mxu0 %v6724_v60  ;;  %v6819_v59 = vcombine.low %v1415_v42, %v1423_v43  ;;  %v6821_v60 = vcombine.low %v1416_v44, %v1424_v47  ;;  %v6838_v62 = vcombine.high %v1432_v57, %v1440_v58  ;;  %v1527_v43 = vld [vmem:[#allocation9 + $0x7a0] sm:$0xff]  ;;  %v1528_v47 = vld [vmem:[#allocation9 + $0x7a8] sm:$0xff] }
 0x35d   :  { %4873 = vmatprep.subr.bf16.mxu1 %v6726_v61  ;;  %v6836_v61 = vcombine.high %v1431_v54, %v1439_v56  ;;  %v1535_v44 = vld [vmem:[#allocation9 + $0x7e0] sm:$0xff] }
 0x35f   :  { %4788 = vmatpush1.bf16.msra.mxu0 %v6723_v2  ;;  %v1456_v2 = vld [vmem:[#allocation9 + $0x568] sm:$0xff] }
 0x360   :  { %4874 = vmatpush1.bf16.msra.mxu1 %v6725_v3  ;;  %4789 = vmatprep.subr.bf16.mxu0 %v6740_v4  ;;  %v6835_v3 = vcombine.low %v1431_v54, %v1439_v56  ;;  %v6837_v4 = vcombine.low %v1432_v57, %v1440_v58  ;;  %v6854_v6 = vcombine.high %v1448_v1, %v1456_v2  ;;  %v1543_v56 = vld [vmem:[#allocation9 + $0x820] sm:$0xff]  ;;  %v1544_v58 = vld [vmem:[#allocation9 + $0x828] sm:$0xff] }
 0x361   :  { %4875 = vmatprep.subr.bf16.mxu1 %v6742_v5  ;;  %v6852_v5 = vcombine.high %v1447_v63, %v1455_v0  ;;  %v1551_v57 = vld [vmem:[#allocation9 + $0x860] sm:$0xff] }
 0x363   :  { %4790 = vmatpush1.bf16.msra.mxu0 %v6739_v10  ;;  %v1472_v10 = vld [vmem:[#allocation9 + $0x5e8] sm:$0xff] }
 0x364   :  { %4876 = vmatpush1.bf16.msra.mxu1 %v6741_v11  ;;  %4791 = vmatprep.subr.bf16.mxu0 %v6756_v12  ;;  %v6851_v11 = vcombine.low %v1447_v63, %v1455_v0  ;;  %v6853_v12 = vcombine.low %v1448_v1, %v1456_v2  ;;  %v6870_v14 = vcombine.high %v1464_v9, %v1472_v10  ;;  %v1559_v0 = vld [vmem:[#allocation9 + $0x8a0] sm:$0xff] }
 0x365   :  { %4877 = vmatprep.subr.bf16.mxu1 %v6758_v13  ;;  %v6868_v13 = vcombine.high %v1463_v7, %v1471_v8  ;;  %v1567_v1 = vld [vmem:[#allocation9 + $0x8e0] sm:$0xff]  ;;  %v6947_v2 = vcombine.low %v1543_v56, %v1551_v57 }
 0x367   :  { %4792 = vmatpush1.bf16.msra.mxu0 %v6755_v23  ;;  %v1488_v23 = vld [vmem:[#allocation9 + $0x668] sm:$0xff] }
 0x368   :  { %4878 = vmatpush1.bf16.msra.mxu1 %v6757_v24  ;;  %4793 = vmatprep.subr.bf16.mxu0 %v6772_v25  ;;  %v6867_v24 = vcombine.low %v1463_v7, %v1471_v8  ;;  %v6869_v25 = vcombine.low %v1464_v9, %v1472_v10  ;;  %v6886_v55 = vcombine.high %v1480_v21, %v1488_v23  ;;  %v1575_v7 = vld [vmem:[#allocation9 + $0x920] sm:$0xff]  ;;  %v1576_v10 = vld [vmem:[#allocation9 + $0x928] sm:$0xff] }
 0x369   :  { %4879 = vmatprep.subr.bf16.mxu1 %v6774_v26  ;;  %v6884_v26 = vcombine.high %v1479_v17, %v1487_v19  ;;  %v1583_v8 = vld [vmem:[#allocation9 + $0x960] sm:$0xff] }
 0x36b   :  { %4794 = vmatpush1.bf16.msra.mxu0 %v6771_v30  ;;  %v1504_v30 = vld [vmem:[#allocation9 + $0x6e8] sm:$0xff] }
 0x36c   :  { %4880 = vmatpush1.bf16.msra.mxu1 %v6773_v31  ;;  %4795 = vmatprep.subr.bf16.mxu0 %v6788_v32  ;;  %v6883_v31 = vcombine.low %v1479_v17, %v1487_v19  ;;  %v6885_v32 = vcombine.low %v1480_v21, %v1488_v23  ;;  %v6902_v34 = vcombine.high %v1496_v29, %v1504_v30  ;;  %v1591_v19 = vld [vmem:[#allocation9 + $0x9a0] sm:$0xff]  ;;  %v1592_v23 = vld [vmem:[#allocation9 + $0x9a8] sm:$0xff] }
 0x36d   :  { %4881 = vmatprep.subr.bf16.mxu1 %v6790_v33  ;;  %v6900_v33 = vcombine.high %v1495_v27, %v1503_v28  ;;  %v1599_v21 = vld [vmem:[#allocation9 + $0x9e0] sm:$0xff] }
 0x36f   :  { %4796 = vmatpush1.bf16.msra.mxu0 %v6787_v38  ;;  %v1520_v38 = vld [vmem:[#allocation9 + $0x768] sm:$0xff] }
 0x370   :  { %4882 = vmatpush1.bf16.msra.mxu1 %v6789_v39  ;;  %4797 = vmatprep.subr.bf16.mxu0 %v6804_v40  ;;  %v6899_v39 = vcombine.low %v1495_v27, %v1503_v28  ;;  %v6901_v40 = vcombine.low %v1496_v29, %v1504_v30  ;;  %v6918_v42 = vcombine.high %v1512_v37, %v1520_v38  ;;  %v1607_v28 = vld [vmem:[#allocation9 + $0xa20] sm:$0xff]  ;;  %v1608_v30 = vld [vmem:[#allocation9 + $0xa28] sm:$0xff] }
 0x371   :  { %4883 = vmatprep.subr.bf16.mxu1 %v6806_v41  ;;  %v6916_v41 = vcombine.high %v1511_v35, %v1519_v36  ;;  %v1615_v29 = vld [vmem:[#allocation9 + $0xa60] sm:$0xff] }
 0x373   :  { %4798 = vmatpush1.bf16.msra.mxu0 %v6803_v48  ;;  %v1536_v48 = vld [vmem:[#allocation9 + $0x7e8] sm:$0xff] }
 0x374   :  { %4884 = vmatpush1.bf16.msra.mxu1 %v6805_v49  ;;  %4799 = vmatprep.subr.bf16.mxu0 %v6820_v52  ;;  %v6915_v49 = vcombine.low %v1511_v35, %v1519_v36  ;;  %v6917_v52 = vcombine.low %v1512_v37, %v1520_v38  ;;  %v6934_v54 = vcombine.high %v1528_v47, %v1536_v48  ;;  %v1623_v36 = vld [vmem:[#allocation9 + $0xaa0] sm:$0xff]  ;;  %v1624_v38 = vld [vmem:[#allocation9 + $0xaa8] sm:$0xff] }
 0x375   :  { %4885 = vmatprep.subr.bf16.mxu1 %v6822_v53  ;;  %v6932_v53 = vcombine.high %v1527_v43, %v1535_v44  ;;  %v1631_v37 = vld [vmem:[#allocation9 + $0xae0] sm:$0xff] }
 0x377   :  { %4800 = vmatpush1.bf16.msra.mxu0 %v6819_v59  ;;  %v1552_v59 = vld [vmem:[#allocation9 + $0x868] sm:$0xff] }
 0x378   :  { %4886 = vmatpush1.bf16.msra.mxu1 %v6821_v60  ;;  %4801 = vmatprep.subr.bf16.mxu0 %v6836_v61  ;;  %v6931_v60 = vcombine.low %v1527_v43, %v1535_v44  ;;  %v6933_v61 = vcombine.low %v1528_v47, %v1536_v48  ;;  %v6950_v63 = vcombine.high %v1544_v58, %v1552_v59  ;;  %v1639_v47 = vld [vmem:[#allocation9 + $0xb20] sm:$0xff] }
 0x379   :  { %4887 = vmatprep.subr.bf16.mxu1 %v6838_v62  ;;  %v6948_v62 = vcombine.high %v1543_v56, %v1551_v57  ;;  %v7028_v43 = vcombine.high %v1623_v36, %v1631_v37  ;;  %v1647_v48 = vld [vmem:[#allocation9 + $0xb60] sm:$0xff] }
 0x37b   :  { %4802 = vmatpush1.bf16.msra.mxu0 %v6835_v3  ;;  %v1560_v3 = vld [vmem:[#allocation9 + $0x8a8] sm:$0xff] }
 0x37c   :  { %4888 = vmatpush1.bf16.msra.mxu1 %v6837_v4  ;;  %4803 = vmatprep.subr.bf16.mxu0 %v6852_v5  ;;  %v1568_v4 = vld [vmem:[#allocation9 + $0x8e8] sm:$0xff]  ;;  %v6949_v5 = vcombine.low %v1544_v58, %v1552_v59  ;;  %v7027_v58 = vcombine.low %v1623_v36, %v1631_v37 }
 0x37d   :  { %4889 = vmatprep.subr.bf16.mxu1 %v6854_v6  ;;  %v6964_v6 = vcombine.high %v1559_v0, %v1567_v1  ;;  %v6966_v9 = vcombine.high %v1560_v3, %v1568_v4 }
 0x37f   :  { %4804 = vmatpush1.bf16.msra.mxu0 %v6851_v11  ;;  %v1584_v11 = vld [vmem:[#allocation9 + $0x968] sm:$0xff] }
 0x380   :  { %4890 = vmatpush1.bf16.msra.mxu1 %v6853_v12  ;;  %4805 = vmatprep.subr.bf16.mxu0 %v6868_v13  ;;  %v6963_v12 = vcombine.low %v1559_v0, %v1567_v1  ;;  %v6965_v13 = vcombine.low %v1560_v3, %v1568_v4  ;;  %v6982_v17 = vcombine.high %v1576_v10, %v1584_v11 }
 0x381   :  { %4891 = vmatprep.subr.bf16.mxu1 %v6870_v14  ;;  %v6980_v14 = vcombine.high %v1575_v7, %v1583_v8 }
 0x383   :  { %4806 = vmatpush1.bf16.msra.mxu0 %v6867_v24  ;;  %v1600_v24 = vld [vmem:[#allocation9 + $0x9e8] sm:$0xff] }
 0x384   :  { %4892 = vmatpush1.bf16.msra.mxu1 %v6869_v25  ;;  %4807 = vmatprep.subr.bf16.mxu0 %v6884_v26  ;;  %v6979_v25 = vcombine.low %v1575_v7, %v1583_v8  ;;  %v6981_v26 = vcombine.low %v1576_v10, %v1584_v11  ;;  %v6998_v27 = vcombine.high %v1592_v23, %v1600_v24  ;;  %v1656_v7 = vld [vmem:[#allocation9 + $0xba8] sm:$0xff] }
 0x385   :  { %4893 = vmatprep.subr.bf16.mxu1 %v6886_v55  ;;  %v6996_v55 = vcombine.high %v1591_v19, %v1599_v21  ;;  %v1664_v8 = vld [vmem:[#allocation9 + $0xbe8] sm:$0xff] }
 0x387   :  { %4808 = vmatpush1.bf16.msra.mxu0 %v6883_v31  ;;  %v1616_v31 = vld [vmem:[#allocation9 + $0xa68] sm:$0xff] }
 0x388   :  { %4894 = vmatpush1.bf16.msra.mxu1 %v6885_v32  ;;  %4809 = vmatprep.subr.bf16.mxu0 %v6900_v33  ;;  %v6995_v32 = vcombine.low %v1591_v19, %v1599_v21  ;;  %v6997_v33 = vcombine.low %v1592_v23, %v1600_v24  ;;  %v7014_v35 = vcombine.high %v1608_v30, %v1616_v31 }
 0x389   :  { %4895 = vmatprep.subr.bf16.mxu1 %v6902_v34  ;;  %v7012_v34 = vcombine.high %v1607_v28, %v1615_v29 }
 0x38b   :  { %4810 = vmatpush1.bf16.msra.mxu0 %v6899_v39  ;;  %v1632_v39 = vld [vmem:[#allocation9 + $0xae8] sm:$0xff] }
 0x38c   :  { %4896 = vmatpush1.bf16.msra.mxu1 %v6901_v40  ;;  %4811 = vmatprep.subr.bf16.mxu0 %v6916_v41  ;;  %v7011_v40 = vcombine.low %v1607_v28, %v1615_v29  ;;  %v8350_v41 = vld [vmem:[#allocation10] sm:$0xff]  ;;  %v7030_v44 = vcombine.high %v1624_v38, %v1632_v39  ;;  %v7029_v59 = vcombine.low %v1624_v38, %v1632_v39 }
 0x38d   :  { %4897 = vmatprep.subr.bf16.mxu1 %v6918_v42  ;;  %v7013_v42 = vcombine.low %v1608_v30, %v1616_v31  ;;  %v1806_v56 = vrot.slane %v8350_v41, %v8300_v18  ;;  %v1814_v57 = vrot.slane %v8350_v41, %v8308_v22  ;;  %v1671_v28 = vld [vmem:[#allocation9 + $0xc20] sm:$0xff] }
 0x38e   :  { %v1679_v29 = vld [vmem:[#allocation9 + $0xc60] sm:$0xff] }
 0x38f   :  { %4812 = vmatpush1.bf16.msra.mxu0 %v6915_v49  ;;  %v1802_v49 = vrot.slane %v8350_v41, %v8297_v16 }
 0x390   :  { %4898 = vmatpush1.bf16.msra.mxu1 %v6917_v52  ;;  %4813 = vmatprep.subr.bf16.mxu0 %v6932_v53  ;;  %v1810_v52 = vrot.slane %v8350_v41, %v8304_v20  ;;  %v1640_v53 = vld [vmem:[#allocation9 + $0xb28] sm:$0xff] }
 0x391   :  { %4899 = vmatprep.subr.bf16.mxu1 %v6934_v54  ;;  %v1648_v54 = vld [vmem:[#allocation9 + $0xb68] sm:$0xff] }
 0x392   :  { %v7046_v1 = vcombine.high %v1640_v53, %v1648_v54 }
 0x393   :  { %4814 = vmatpush1.bf16.msra.mxu0 %v6931_v60  ;;  %v7044_v60 = vcombine.high %v1639_v47, %v1647_v48 }
 0x394   :  { %4900 = vmatpush1.bf16.msra.mxu1 %v6933_v61  ;;  %4826 = vmatprep.subr.bf16.mxu0 %v6948_v62  ;;  %v1655_v61 = vld [vmem:[#allocation9 + $0xba0] sm:$0xff] }
 0x395   :  { %4912 = vmatprep.subr.bf16.mxu1 %v6950_v63  ;;  %v1663_v62 = vld [vmem:[#allocation9 + $0xbe0] sm:$0xff] }
 0x396   :  { %4816 = vmatmul.mubr.bf16.vlgmr.msra.gmra.mrb[16].mxu0 %v8320_v45  ;;  %v7060_v24 = vcombine.high %v1655_v61, %v1663_v62 }
 0x397   :  { %4902 = vmatmul.mubr.bf16.vlgmr.msra.gmra.mrb[16].mxu1 %v8320_v45  ;;  %4827 = vmatpush1.bf16.msra.mxu0 %v6947_v2 }
 0x398   :  { %4858 = vmatprep.mubr.bf16.mxu0 %v8326_v51  ;;  %4913 = vmatpush1.bf16.msra.mxu1 %v6949_v5 }
 0x399   :  { %4944 = vmatprep.mubr.bf16.mxu1 %v8326_v51  ;;  %4828 = vmatprep.subr.bf16.mxu0 %v6964_v6  ;;  %v7043_v6 = vcombine.low %v1639_v47, %v1647_v48 }
 0x39a   :  { %4914 = vmatprep.subr.bf16.mxu1 %v6966_v9 }
 0x39b   :  { %4829 = vmatpush1.bf16.msra.mxu0 %v6963_v12 }
 0x39c   :  { %4915 = vmatpush1.bf16.msra.mxu1 %v6965_v13  ;;  %4830 = vmatprep.subr.bf16.mxu0 %v6980_v14  ;;  %v7045_v13 = vcombine.low %v1640_v53, %v1648_v54  ;;  %v7059_v14 = vcombine.low %v1655_v61, %v1663_v62  ;;  %v1688_v53 = vld [vmem:[#allocation9 + $0xca8] sm:$0xff]  ;;  %v1711_v61 = vld [vmem:[#allocation9 + $0xd60] sm:$0xff] }
 0x39d   :  { %4916 = vmatprep.subr.bf16.mxu1 %v6982_v17  ;;  %v1696_v54 = vld [vmem:[#allocation9 + $0xce8] sm:$0xff] }
 0x39e   :  { %v1704_v62 = vld [vmem:[#allocation9 + $0xd28] sm:$0xff] }
 0x39f   :  { %4831 = vmatpush1.bf16.msra.mxu0 %v6979_v25 }
 0x3a0   :  { %4917 = vmatpush1.bf16.msra.mxu1 %v6981_v26  ;;  %4832 = vmatprep.subr.bf16.mxu0 %v6996_v55  ;;  %v7061_v55 = vcombine.low %v1656_v7, %v1664_v8 }
 0x3a1   :  { %4918 = vmatprep.subr.bf16.mxu1 %v6998_v27  ;;  %v7062_v27 = vcombine.high %v1656_v7, %v1664_v8  ;;  %v1728_v7 = vld [vmem:[#allocation9 + $0xde8] sm:$0xff] }
 0x3a3   :  { %4833 = vmatpush1.bf16.msra.mxu0 %v6995_v32 }
 0x3a4   :  { %4919 = vmatpush1.bf16.msra.mxu1 %v6997_v33  ;;  %4834 = vmatprep.subr.bf16.mxu0 %v7012_v34  ;;  %v1672_v34 = vld [vmem:[#allocation9 + $0xc28] sm:$0xff] }
 0x3a5   :  { %4920 = vmatprep.subr.bf16.mxu1 %v7014_v35  ;;  %v1680_v35 = vld [vmem:[#allocation9 + $0xc68] sm:$0xff] }
 0x3a6   :  { %v7078_v48 = vcombine.high %v1672_v34, %v1680_v35 }
 0x3a7   :  { %4835 = vmatpush1.bf16.msra.mxu0 %v7011_v40 }
 0x3a8   :  { %4921 = vmatpush1.bf16.msra.mxu1 %v7013_v42  ;;  %4836 = vmatprep.subr.bf16.mxu0 %v7028_v43  ;;  %v7076_v43 = vcombine.high %v1671_v28, %v1679_v29 }
 0x3a9   :  { %v4516_v63 = vpop.f32.mrb[8].mxu0  ;;  %v4602_v0 = vpop.f32.mrb[8].mxu1  ;;  %4922 = vmatprep.subr.bf16.mxu1 %v7030_v44 }
 0x3aa   :  { %v7508_v2 = vadd.f32 %v4516_v63, %v1802_v49  ;;  %v7512_v3 = vadd.f32 %v4602_v0, %v1810_v52  ;;  %v4518_v4 = vpop.f32.mrb[9].mxu0  ;;  %v4604_v5 = vpop.f32.mrb[9].mxu1  ;;  %v1712_v63 = vld [vmem:[#allocation9 + $0xd68] sm:$0xff] }
 0x3ab   :  { %v7509_v9 = vadd.f32 %v4518_v4, %v1806_v56  ;;  %v7513_v10 = vadd.f32 %v4604_v5, %v1814_v57  ;;  %v4520_v11 = vpop.f32.mrb[10].mxu0  ;;  %v4606_v12 = vpop.f32.mrb[10].mxu1  ;;  %4837 = vmatpush1.bf16.msra.mxu0 %v7027_v58  ;;  %v1719_v4 = vld [vmem:[#allocation9 + $0xda0] sm:$0xff] }
 0x3ac   :  { %v7510_v17 = vadd.f32 %v4520_v11, %v1802_v49  ;;  %v7514_v19 = vadd.f32 %v4606_v12, %v1810_v52  ;;  %4923 = vmatpush1.bf16.msra.mxu1 %v7029_v59  ;;  %v4522_v21 = vpop.f32.mrb[11].mxu0  ;;  %v4608_v23 = vpop.f32.mrb[11].mxu1  ;;  %4838 = vmatprep.subr.bf16.mxu0 %v7044_v60  ;;  %v5127_v30 = vmax.f32 %v7508_v2, 0.0  ;;  %v5129_v31 = vmax.f32 %v7512_v3, 0.0  ;;  %v1687_v49 = vld [vmem:[#allocation9 + $0xca0] sm:$0xff] }
 0x3ad   :  { %v7511_v25 = vadd.f32 %v4522_v21, %v1806_v56  ;;  %v7515_v26 = vadd.f32 %v4608_v23, %v1814_v57  ;;  %4924 = vmatprep.subr.bf16.mxu1 %v7046_v1  ;;  %v5128_v36 = vmax.f32 %v7509_v9, 0.0  ;;  %v5130_v37 = vmax.f32 %v7513_v10, 0.0  ;;  %v1695_v52 = vld [vmem:[#allocation9 + $0xce0] sm:$0xff] }
 0x3ae   :  { %v5143_v32 = vmax.f32 %v7510_v17, 0.0  ;;  %v5145_v33 = vmax.f32 %v7514_v19, 0.0  ;;  %v7075_v56 = vcombine.low %v1671_v28, %v1679_v29  ;;  %v7077_v57 = vcombine.low %v1672_v34, %v1680_v35  ;;  %v1703_v60 = vld [vmem:[#allocation9 + $0xd20] sm:$0xff]  ;;  %v1744_v17 = vld [vmem:[#allocation9 + $0xe68] sm:$0xff] }
 0x3af   :  { %v5144_v38 = vmax.f32 %v7511_v25, 0.0  ;;  %v5146_v39 = vmax.f32 %v7515_v26, 0.0  ;;  %4839 = vmatpush1.bf16.msra.mxu0 %v7043_v6  ;;  %v7092_v58 = vcombine.high %v1687_v49, %v1695_v52  ;;  %v7094_v59 = vcombine.high %v1688_v53, %v1696_v54  ;;  %v1727_v5 = vld [vmem:[#allocation9 + $0xde0] sm:$0xff]  ;;  %v1720_v6 = vld [vmem:[#allocation9 + $0xda8] sm:$0xff] }
 0x3b0   :  { %v8360_v40 = vpack.c.bf16 %v5143_v32, %v5127_v30  ;;  %v8362_v42 = vpack.c.bf16 %v5145_v33, %v5129_v31  ;;  %4925 = vmatpush1.bf16.msra.mxu1 %v7045_v13  ;;  %4840 = vmatprep.subr.bf16.mxu0 %v7060_v24  ;;  %v7091_v0 = vcombine.low %v1687_v49, %v1695_v52  ;;  %v1735_v12 = vld [vmem:[#allocation9 + $0xe20] sm:$0xff]  ;;  %v1768_v34 = vld [vmem:[#allocation9 + $0xf28] sm:$0xff] }
 0x3b1   :  { %v8364_v44 = vpack.c.bf16 %v5144_v38, %v5128_v36  ;;  %v8366_v47 = vpack.c.bf16 %v5146_v39, %v5130_v37  ;;  %4926 = vmatprep.subr.bf16.mxu1 %v7062_v27  ;;  %v7093_v1 = vcombine.low %v1688_v53, %v1696_v54  ;;  %v7108_v2 = vcombine.high %v1703_v60, %v1711_v61  ;;  %v1743_v13 = vld [vmem:[#allocation9 + $0xe60] sm:$0xff]  ;;  %v1760_v27 = vld [vmem:[#allocation9 + $0xee8] sm:$0xff] }
 0x3b2   :  { %v7110_v3 = vcombine.high %v1704_v62, %v1712_v63  ;;  %v7107_v8 = vcombine.low %v1703_v60, %v1711_v61  ;;  %v7109_v9 = vcombine.low %v1704_v62, %v1712_v63  ;;  %v7124_v10 = vcombine.high %v1719_v4, %v1727_v5  ;;  %v1751_v25 = vld [vmem:[#allocation9 + $0xea0] sm:$0xff]  ;;  %v1776_v35 = vld [vmem:[#allocation9 + $0xf68] sm:$0xff]  ;;  %v1290_v60 = vld [vmem:[#allocation9 + $0x38] sm:$0xff] }
 0x3b3   :  { %4841 = vmatpush1.bf16.msra.mxu0 %v7059_v14  ;;  %v7126_v11 = vcombine.high %v1720_v6, %v1728_v7  ;;  %v1736_v14 = vld [vmem:[#allocation9 + $0xe28] sm:$0xff]  ;;  %v7123_v19 = vcombine.low %v1719_v4, %v1727_v5  ;;  %v7125_v21 = vcombine.low %v1720_v6, %v1728_v7  ;;  %v7140_v23 = vcombine.high %v1735_v12, %v1743_v13  ;;  %v1759_v26 = vld [vmem:[#allocation9 + $0xee0] sm:$0xff]  ;;  %v1298_v61 = vld [vmem:[#allocation9 + $0x78] sm:$0xff] }
 0x3b4   :  { %4927 = vmatpush1.bf16.msra.mxu1 %v7061_v55  ;;  %4842 = vmatprep.subr.bf16.mxu0 %v7076_v43  ;;  %v7142_v24 = vcombine.high %v1736_v14, %v1744_v17  ;;  %v1752_v55 = vld [vmem:[#allocation9 + $0xea8] sm:$0xff]  ;;  %v7139_v28 = vcombine.low %v1735_v12, %v1743_v13  ;;  %v7141_v29 = vcombine.low %v1736_v14, %v1744_v17  ;;  %v1767_v32 = vld [vmem:[#allocation9 + $0xf20] sm:$0xff]  ;;  %v1306_v5 = vld [vmem:[#allocation9 + $0xb8] sm:$0xff] }
 0x3b5   :  { %4928 = vmatprep.subr.bf16.mxu1 %v7078_v48  ;;  %v7156_v30 = vcombine.high %v1751_v25, %v1759_v26  ;;  %v7158_v31 = vcombine.high %v1752_v55, %v1760_v27  ;;  %v1775_v33 = vld [vmem:[#allocation9 + $0xf60] sm:$0xff]  ;;  %v7155_v36 = vcombine.low %v1751_v25, %v1759_v26  ;;  %v7157_v37 = vcombine.low %v1752_v55, %v1760_v27  ;;  %v1784_v49 = vld [vmem:[#allocation9 + $0xfa8] sm:$0xff]  ;;  %v1314_v6 = vld [vmem:[#allocation9 + $0xf8] sm:$0xff] }
 0x3b6   :  { %v7172_v38 = vcombine.high %v1767_v32, %v1775_v33  ;;  %v7174_v39 = vcombine.high %v1768_v34, %v1776_v35  ;;  %v1783_v43 = vld [vmem:[#allocation9 + $0xfa0] sm:$0xff]  ;;  %v1792_v52 = vld [vmem:[#allocation9 + $0xfe8] sm:$0xff]  ;;  %v7171_v53 = vcombine.low %v1767_v32, %v1775_v33  ;;  %v7173_v54 = vcombine.low %v1768_v34, %v1776_v35  ;;  %v1322_v12 = vld [vmem:[#allocation9 + $0x138] sm:$0xff] }
 0x3b7   :  { %4843 = vmatpush1.bf16.msra.mxu0 %v7075_v56  ;;  %v1791_v48 = vld [vmem:[#allocation9 + $0xfe0] sm:$0xff]  ;;  %v7189_v63 = vcombine.low %v1784_v49, %v1792_v52  ;;  %v6697_v7 = vcombine.low %v1290_v60, %v1298_v61  ;;  %v1330_v13 = vld [vmem:[#allocation9 + $0x178] sm:$0xff]  ;;  %v6713_v17 = vcombine.low %v1306_v5, %v1314_v6 }
 0x3b8   :  { %4929 = vmatpush1.bf16.msra.mxu1 %v7077_v57  ;;  %4844 = vmatprep.subr.bf16.mxu0 %v7092_v58  ;;  %v7188_v56 = vcombine.high %v1783_v43, %v1791_v48  ;;  %v7190_v57 = vcombine.high %v1784_v49, %v1792_v52  ;;  %v1289_v58 = vld [vmem:[#allocation9 + $0x30] sm:$0xff]  ;;  %v7187_v62 = vcombine.low %v1783_v43, %v1791_v48  ;;  %v1338_v25 = vld [vmem:[#allocation9 + $0x1b8] sm:$0xff] }
 0x3b9   :  { %4930 = vmatprep.subr.bf16.mxu1 %v7094_v59  ;;  %v1297_v59 = vld [vmem:[#allocation9 + $0x70] sm:$0xff]  ;;  %v1346_v26 = vld [vmem:[#allocation9 + $0x1f8] sm:$0xff]  ;;  %v6729_v27 = vcombine.low %v1322_v12, %v1330_v13 }
 0x3ba   :  { %v6695_v4 = vcombine.low %v1289_v58, %v1297_v59  ;;  %v1354_v32 = vld [vmem:[#allocation9 + $0x238] sm:$0xff]  ;;  %v6745_v34 = vcombine.low %v1338_v25, %v1346_v26 }
 0x3bb   :  { %4845 = vmatpush1.bf16.msra.mxu0 %v7091_v0  ;;  %v6696_v0 = vcombine.high %v1289_v58, %v1297_v59  ;;  %v1362_v33 = vld [vmem:[#allocation9 + $0x278] sm:$0xff] }
 0x3bc   :  { %4931 = vmatpush1.bf16.msra.mxu1 %v7093_v1  ;;  %4846 = vmatprep.subr.bf16.mxu0 %v7108_v2  ;;  %v6698_v1 = vcombine.high %v1290_v60, %v1298_v61  ;;  %v1305_v2 = vld [vmem:[#allocation9 + $0xb0] sm:$0xff]  ;;  %v1378_v43 = vld [vmem:[#allocation9 + $0x2f8] sm:$0xff]  ;;  %v6761_v49 = vcombine.low %v1354_v32, %v1362_v33 }
 0x3bd   :  { %4932 = vmatprep.subr.bf16.mxu1 %v7110_v3  ;;  %v1313_v3 = vld [vmem:[#allocation9 + $0xf0] sm:$0xff]  ;;  %v1394_v58 = vld [vmem:[#allocation9 + $0x378] sm:$0xff] }
 0x3be   :  { %v6711_v14 = vcombine.low %v1305_v2, %v1313_v3 }
 0x3bf   :  { %4847 = vmatpush1.bf16.msra.mxu0 %v7107_v8  ;;  %v6712_v8 = vcombine.high %v1305_v2, %v1313_v3  ;;  %v1410_v2 = vld [vmem:[#allocation9 + $0x3f8] sm:$0xff] }
 0x3c0   :  { %4933 = vmatpush1.bf16.msra.mxu1 %v7109_v9  ;;  %4848 = vmatprep.subr.bf16.mxu0 %v7124_v10  ;;  %v1321_v9 = vld [vmem:[#allocation9 + $0x130] sm:$0xff] }
 0x3c1   :  { %4934 = vmatprep.subr.bf16.mxu1 %v7126_v11  ;;  %v1329_v10 = vld [vmem:[#allocation9 + $0x170] sm:$0xff]  ;;  %v6714_v11 = vcombine.high %v1306_v5, %v1314_v6 }
 0x3c2   :  { %v6727_v55 = vcombine.low %v1321_v9, %v1329_v10 }
 0x3c3   :  { %4849 = vmatpush1.bf16.msra.mxu0 %v7123_v19  ;;  %v6728_v19 = vcombine.high %v1321_v9, %v1329_v10  ;;  %v1418_v9 = vld [vmem:[#allocation9 + $0x438] sm:$0xff] }
 0x3c4   :  { %4935 = vmatpush1.bf16.msra.mxu1 %v7125_v21  ;;  %4850 = vmatprep.subr.bf16.mxu0 %v7140_v23  ;;  %v6730_v21 = vcombine.high %v1322_v12, %v1330_v13  ;;  %v1337_v23 = vld [vmem:[#allocation9 + $0x1b0] sm:$0xff]  ;;  %v1426_v10 = vld [vmem:[#allocation9 + $0x478] sm:$0xff] }
 0x3c5   :  { %4936 = vmatprep.subr.bf16.mxu1 %v7142_v24  ;;  %v1345_v24 = vld [vmem:[#allocation9 + $0x1f0] sm:$0xff] }
 0x3c7   :  { %4851 = vmatpush1.bf16.msra.mxu0 %v7139_v28  ;;  %v6744_v28 = vcombine.high %v1337_v23, %v1345_v24 }
 0x3c8   :  { %4937 = vmatpush1.bf16.msra.mxu1 %v7141_v29  ;;  %4852 = vmatprep.subr.bf16.mxu0 %v7156_v30  ;;  %v6746_v29 = vcombine.high %v1338_v25, %v1346_v26  ;;  %v1353_v30 = vld [vmem:[#allocation9 + $0x230] sm:$0xff]  ;;  %v6825_v25 = vcombine.low %v1418_v9, %v1426_v10 }
 0x3c9   :  { %4938 = vmatprep.subr.bf16.mxu1 %v7158_v31  ;;  %v1361_v31 = vld [vmem:[#allocation9 + $0x270] sm:$0xff] }
 0x3ca   :  { %v6760_v35 = vcombine.high %v1353_v30, %v1361_v31  ;;  %v6759_v48 = vcombine.low %v1353_v30, %v1361_v31  ;;  %v1458_v30 = vld [vmem:[#allocation9 + $0x578] sm:$0xff] }
 0x3cb   :  { %4853 = vmatpush1.bf16.msra.mxu0 %v7155_v36  ;;  %v6762_v36 = vcombine.high %v1354_v32, %v1362_v33 }
 0x3cc   :  { %4939 = vmatpush1.bf16.msra.mxu1 %v7157_v37  ;;  %4854 = vmatprep.subr.bf16.mxu0 %v7172_v38  ;;  %v1369_v37 = vld [vmem:[#allocation9 + $0x2b0] sm:$0xff] }
 0x3cd   :  { %4940 = vmatprep.subr.bf16.mxu1 %v7174_v39  ;;  %v1377_v38 = vld [vmem:[#allocation9 + $0x2f0] sm:$0xff]  ;;  %v1370_v39 = vld [vmem:[#allocation9 + $0x2b8] sm:$0xff] }
 0x3ce   :  { %v6776_v52 = vcombine.high %v1369_v37, %v1377_v38  ;;  %v6775_v59 = vcombine.low %v1369_v37, %v1377_v38  ;;  %v6777_v60 = vcombine.low %v1370_v39, %v1378_v43  ;;  %v1474_v37 = vld [vmem:[#allocation9 + $0x5f8] sm:$0xff] }
 0x3cf   :  { %4855 = vmatpush1.bf16.msra.mxu0 %v7171_v53  ;;  %v6778_v53 = vcombine.high %v1370_v39, %v1378_v43 }
 0x3d0   :  { %4941 = vmatpush1.bf16.msra.mxu1 %v7173_v54  ;;  %4856 = vmatprep.subr.bf16.mxu0 %v7188_v56  ;;  %v1385_v54 = vld [vmem:[#allocation9 + $0x330] sm:$0xff] }
 0x3d1   :  { %4942 = vmatprep.subr.bf16.mxu1 %v7190_v57  ;;  %v1393_v56 = vld [vmem:[#allocation9 + $0x370] sm:$0xff]  ;;  %v1386_v57 = vld [vmem:[#allocation9 + $0x338] sm:$0xff] }
 0x3d2   :  { %v6792_v61 = vcombine.high %v1385_v54, %v1393_v56  ;;  %v6791_v3 = vcombine.low %v1385_v54, %v1393_v56  ;;  %v1490_v54 = vld [vmem:[#allocation9 + $0x678] sm:$0xff] }
 0x3d3   :  { %4857 = vmatpush1.bf16.msra.mxu0 %v7187_v62  ;;  %v6794_v62 = vcombine.high %v1386_v57, %v1394_v58 }
 0x3d4   :  { %4943 = vmatpush1.bf16.msra.mxu1 %v7189_v63  ;;  %4955 = vmatprep.subr.bf16.mxu0 %v6696_v0  ;;  %v1401_v63 = vld [vmem:[#allocation9 + $0x3b0] sm:$0xff] }
 0x3d5   :  { %5041 = vmatprep.subr.bf16.mxu1 %v6698_v1  ;;  %v1409_v0 = vld [vmem:[#allocation9 + $0x3f0] sm:$0xff]  ;;  %v1402_v1 = vld [vmem:[#allocation9 + $0x3b8] sm:$0xff] }
 0x3d6   :  { %4859 = vmatmul.mubr.bf16.vlgmr.msra.gmra.mrb[16].mxu0 %v8322_v46  ;;  %v6808_v5 = vcombine.high %v1401_v63, %v1409_v0  ;;  %v6810_v6 = vcombine.high %v1402_v1, %v1410_v2  ;;  %v6809_v12 = vcombine.low %v1402_v1, %v1410_v2 }
 0x3d7   :  { %4945 = vmatmul.mubr.bf16.vlgmr.msra.gmra.mrb[16].mxu1 %v8322_v46  ;;  %4956 = vmatpush1.bf16.msra.mxu0 %v6695_v4  ;;  %v6793_v4 = vcombine.low %v1386_v57, %v1394_v58 }
 0x3d8   :  { %4987 = vmatprep.mubr.bf16.mxu0 %v8324_v50  ;;  %5042 = vmatpush1.bf16.msra.mxu1 %v6697_v7  ;;  %v1417_v7 = vld [vmem:[#allocation9 + $0x430] sm:$0xff] }
 0x3d9   :  { %5073 = vmatprep.mubr.bf16.mxu1 %v8324_v50  ;;  %4957 = vmatprep.subr.bf16.mxu0 %v6712_v8  ;;  %v6743_v50 = vcombine.low %v1337_v23, %v1345_v24  ;;  %v1425_v8 = vld [vmem:[#allocation9 + $0x470] sm:$0xff]  ;;  %v1442_v23 = vld [vmem:[#allocation9 + $0x4f8] sm:$0xff] }
 0x3da   :  { %5043 = vmatprep.subr.bf16.mxu1 %v6714_v11  ;;  %v6807_v11 = vcombine.low %v1401_v63, %v1409_v0  ;;  %v6824_v13 = vcombine.high %v1417_v7, %v1425_v8  ;;  %v6823_v24 = vcombine.low %v1417_v7, %v1425_v8  ;;  %v1506_v63 = vld [vmem:[#allocation9 + $0x6f8] sm:$0xff] }
 0x3db   :  { %4958 = vmatpush1.bf16.msra.mxu0 %v6711_v14  ;;  %v6826_v14 = vcombine.high %v1418_v9, %v1426_v10  ;;  %v1522_v7 = vld [vmem:[#allocation9 + $0x778] sm:$0xff] }
 0x3dc   :  { %5044 = vmatpush1.bf16.msra.mxu1 %v6713_v17  ;;  %4959 = vmatprep.subr.bf16.mxu0 %v6728_v19  ;;  %v1433_v17 = vld [vmem:[#allocation9 + $0x4b0] sm:$0xff] }
 0x3dd   :  { %5045 = vmatprep.subr.bf16.mxu1 %v6730_v21  ;;  %v1441_v19 = vld [vmem:[#allocation9 + $0x4f0] sm:$0xff]  ;;  %v1434_v21 = vld [vmem:[#allocation9 + $0x4b8] sm:$0xff] }
 0x3de   :  { %v6840_v26 = vcombine.high %v1433_v17, %v1441_v19  ;;  %v6839_v31 = vcombine.low %v1433_v17, %v1441_v19  ;;  %v6841_v32 = vcombine.low %v1434_v21, %v1442_v23  ;;  %v1538_v17 = vld [vmem:[#allocation9 + $0x7f8] sm:$0xff] }
 0x3df   :  { %4960 = vmatpush1.bf16.msra.mxu0 %v6727_v55  ;;  %v6842_v55 = vcombine.high %v1434_v21, %v1442_v23 }
 0x3e0   :  { %5046 = vmatpush1.bf16.msra.mxu1 %v6729_v27  ;;  %4961 = vmatprep.subr.bf16.mxu0 %v6744_v28  ;;  %v1449_v27 = vld [vmem:[#allocation9 + $0x530] sm:$0xff] }
 0x3e1   :  { %5047 = vmatprep.subr.bf16.mxu1 %v6746_v29  ;;  %v1457_v28 = vld [vmem:[#allocation9 + $0x570] sm:$0xff]  ;;  %v1450_v29 = vld [vmem:[#allocation9 + $0x538] sm:$0xff] }
 0x3e2   :  { %v6856_v33 = vcombine.high %v1449_v27, %v1457_v28  ;;  %v6855_v38 = vcombine.low %v1449_v27, %v1457_v28  ;;  %v6857_v39 = vcombine.low %v1450_v29, %v1458_v30  ;;  %v1554_v27 = vld [vmem:[#allocation9 + $0x878] sm:$0xff] }
 0x3e3   :  { %4962 = vmatpush1.bf16.msra.mxu0 %v6743_v50  ;;  %v6858_v50 = vcombine.high %v1450_v29, %v1458_v30 }
 0x3e4   :  { %5048 = vmatpush1.bf16.msra.mxu1 %v6745_v34  ;;  %4963 = vmatprep.subr.bf16.mxu0 %v6760_v35  ;;  %v1465_v34 = vld [vmem:[#allocation9 + $0x5b0] sm:$0xff] }
 0x3e5   :  { %5049 = vmatprep.subr.bf16.mxu1 %v6762_v36  ;;  %v1473_v35 = vld [vmem:[#allocation9 + $0x5f0] sm:$0xff]  ;;  %v1466_v36 = vld [vmem:[#allocation9 + $0x5b8] sm:$0xff] }
 0x3e6   :  { %v6872_v43 = vcombine.high %v1465_v34, %v1473_v35  ;;  %v6871_v56 = vcombine.low %v1465_v34, %v1473_v35  ;;  %v6873_v57 = vcombine.low %v1466_v36, %v1474_v37  ;;  %v1562_v34 = vld [vmem:[#allocation9 + $0x8b8] sm:$0xff] }
 0x3e7   :  { %4964 = vmatpush1.bf16.msra.mxu0 %v6759_v48  ;;  %v6874_v48 = vcombine.high %v1466_v36, %v1474_v37  ;;  %v1570_v35 = vld [vmem:[#allocation9 + $0x8f8] sm:$0xff] }
 0x3e8   :  { %5050 = vmatpush1.bf16.msra.mxu1 %v6761_v49  ;;  %4965 = vmatprep.subr.bf16.mxu0 %v6776_v52  ;;  %v1481_v49 = vld [vmem:[#allocation9 + $0x630] sm:$0xff] }
 0x3e9   :  { %5051 = vmatprep.subr.bf16.mxu1 %v6778_v53  ;;  %v1489_v52 = vld [vmem:[#allocation9 + $0x670] sm:$0xff]  ;;  %v1482_v53 = vld [vmem:[#allocation9 + $0x638] sm:$0xff] }
 0x3ea   :  { %v6888_v58 = vcombine.high %v1481_v49, %v1489_v52  ;;  %v6887_v0 = vcombine.low %v1481_v49, %v1489_v52  ;;  %v6889_v1 = vcombine.low %v1482_v53, %v1490_v54  ;;  %v1586_v49 = vld [vmem:[#allocation9 + $0x978] sm:$0xff] }
 0x3eb   :  { %4966 = vmatpush1.bf16.msra.mxu0 %v6775_v59  ;;  %v6890_v59 = vcombine.high %v1482_v53, %v1490_v54  ;;  %v6969_v53 = vcombine.low %v1562_v34, %v1570_v35 }
 0x3ec   :  { %5052 = vmatpush1.bf16.msra.mxu1 %v6777_v60  ;;  %4967 = vmatprep.subr.bf16.mxu0 %v6792_v61  ;;  %v1497_v60 = vld [vmem:[#allocation9 + $0x6b0] sm:$0xff] }
 0x3ed   :  { %5053 = vmatprep.subr.bf16.mxu1 %v6794_v62  ;;  %v1505_v61 = vld [vmem:[#allocation9 + $0x6f0] sm:$0xff]  ;;  %v1498_v62 = vld [vmem:[#allocation9 + $0x6b8] sm:$0xff] }
 0x3ee   :  { %v6904_v2 = vcombine.high %v1497_v60, %v1505_v61  ;;  %v6903_v8 = vcombine.low %v1497_v60, %v1505_v61  ;;  %v6905_v9 = vcombine.low %v1498_v62, %v1506_v63  ;;  %v1602_v60 = vld [vmem:[#allocation9 + $0x9f8] sm:$0xff] }
 0x3ef   :  { %4968 = vmatpush1.bf16.msra.mxu0 %v6791_v3  ;;  %v6906_v3 = vcombine.high %v1498_v62, %v1506_v63 }
 0x3f0   :  { %5054 = vmatpush1.bf16.msra.mxu1 %v6793_v4  ;;  %4969 = vmatprep.subr.bf16.mxu0 %v6808_v5  ;;  %v1513_v4 = vld [vmem:[#allocation9 + $0x730] sm:$0xff] }
 0x3f1   :  { %5055 = vmatprep.subr.bf16.mxu1 %v6810_v6  ;;  %v1521_v5 = vld [vmem:[#allocation9 + $0x770] sm:$0xff]  ;;  %v1514_v6 = vld [vmem:[#allocation9 + $0x738] sm:$0xff] }
 0x3f2   :  { %v6920_v10 = vcombine.high %v1513_v4, %v1521_v5  ;;  %v6919_v19 = vcombine.low %v1513_v4, %v1521_v5  ;;  %v6921_v21 = vcombine.low %v1514_v6, %v1522_v7 }
 0x3f3   :  { %4970 = vmatpush1.bf16.msra.mxu0 %v6807_v11  ;;  %v6922_v11 = vcombine.high %v1514_v6, %v1522_v7  ;;  %v1625_v7 = vld [vmem:[#allocation9 + $0xab0] sm:$0xff] }
 0x3f4   :  { %5056 = vmatpush1.bf16.msra.mxu1 %v6809_v12  ;;  %4971 = vmatprep.subr.bf16.mxu0 %v6824_v13  ;;  %v1529_v12 = vld [vmem:[#allocation9 + $0x7b0] sm:$0xff] }
 0x3f5   :  { %5057 = vmatprep.subr.bf16.mxu1 %v6826_v14  ;;  %v1537_v13 = vld [vmem:[#allocation9 + $0x7f0] sm:$0xff]  ;;  %v1530_v14 = vld [vmem:[#allocation9 + $0x7b8] sm:$0xff] }
 0x3f6   :  { %v6936_v23 = vcombine.high %v1529_v12, %v1537_v13  ;;  %v6935_v28 = vcombine.low %v1529_v12, %v1537_v13  ;;  %v6937_v29 = vcombine.low %v1530_v14, %v1538_v17  ;;  %v1825_v13 = vsub.s32 6, %v8294_v15 }
 0x3f7   :  { %4972 = vmatpush1.bf16.msra.mxu0 %v6823_v24  ;;  %v6938_v24 = vcombine.high %v1530_v14, %v1538_v17  ;;  %v1821_v14 = vsub.s32 5, %v8294_v15 }
 0x3f8   :  { %5058 = vmatpush1.bf16.msra.mxu1 %v6825_v25  ;;  %4973 = vmatprep.subr.bf16.mxu0 %v6840_v26  ;;  %v1545_v25 = vld [vmem:[#allocation9 + $0x830] sm:$0xff] }
 0x3f9   :  { %5059 = vmatprep.subr.bf16.mxu1 %v6842_v55  ;;  %v1553_v26 = vld [vmem:[#allocation9 + $0x870] sm:$0xff]  ;;  %v1546_v55 = vld [vmem:[#allocation9 + $0x838] sm:$0xff] }
 0x3fa   :  { %v6952_v30 = vcombine.high %v1545_v25, %v1553_v26  ;;  %v6953_v36 = vcombine.low %v1546_v55, %v1554_v27 }
 0x3fb   :  { %4974 = vmatpush1.bf16.msra.mxu0 %v6839_v31  ;;  %v6954_v31 = vcombine.high %v1546_v55, %v1554_v27  ;;  %v1642_v55 = vld [vmem:[#allocation9 + $0xb38] sm:$0xff] }
 0x3fc   :  { %5060 = vmatpush1.bf16.msra.mxu1 %v6841_v32  ;;  %4975 = vmatprep.subr.bf16.mxu0 %v6856_v33  ;;  %v1561_v32 = vld [vmem:[#allocation9 + $0x8b0] sm:$0xff]  ;;  %v1650_v27 = vld [vmem:[#allocation9 + $0xb78] sm:$0xff] }
 0x3fd   :  { %5061 = vmatprep.subr.bf16.mxu1 %v6858_v50  ;;  %v1569_v33 = vld [vmem:[#allocation9 + $0x8f0] sm:$0xff]  ;;  %v6951_v50 = vcombine.low %v1545_v25, %v1553_v26 }
 0x3fe   :  { %v6968_v37 = vcombine.high %v1561_v32, %v1569_v33  ;;  %v6967_v52 = vcombine.low %v1561_v32, %v1569_v33  ;;  %v1649_v25 = vld [vmem:[#allocation9 + $0xb70] sm:$0xff] }
 0x3ff   :  { %4976 = vmatpush1.bf16.msra.mxu0 %v6855_v38  ;;  %v1577_v38 = vld [vmem:[#allocation9 + $0x930] sm:$0xff] }
 0x400   :  { %5062 = vmatpush1.bf16.msra.mxu1 %v6857_v39  ;;  %4977 = vmatprep.subr.bf16.mxu0 %v6872_v43  ;;  %v1585_v39 = vld [vmem:[#allocation9 + $0x970] sm:$0xff]  ;;  %v6970_v43 = vcombine.high %v1562_v34, %v1570_v35  ;;  %v7050_v34 = vcombine.high %v1642_v55, %v1650_v27 }
 0x401   :  { %5063 = vmatprep.subr.bf16.mxu1 %v6874_v48  ;;  %v1578_v48 = vld [vmem:[#allocation9 + $0x938] sm:$0xff]  ;;  %v6984_v54 = vcombine.high %v1577_v38, %v1585_v39  ;;  %v6983_v61 = vcombine.low %v1577_v38, %v1585_v39  ;;  %v1657_v35 = vld [vmem:[#allocation9 + $0xbb0] sm:$0xff] }
 0x403   :  { %4978 = vmatpush1.bf16.msra.mxu0 %v6871_v56  ;;  %v6986_v56 = vcombine.high %v1578_v48, %v1586_v49 }
 0x404   :  { %5064 = vmatpush1.bf16.msra.mxu1 %v6873_v57  ;;  %4979 = vmatprep.subr.bf16.mxu0 %v6888_v58  ;;  %v1593_v57 = vld [vmem:[#allocation9 + $0x9b0] sm:$0xff] }
 0x405   :  { %5065 = vmatprep.subr.bf16.mxu1 %v6890_v59  ;;  %v1601_v58 = vld [vmem:[#allocation9 + $0x9f0] sm:$0xff]  ;;  %v1594_v59 = vld [vmem:[#allocation9 + $0x9b8] sm:$0xff] }
 0x406   :  { %v7000_v62 = vcombine.high %v1593_v57, %v1601_v58  ;;  %v7002_v63 = vcombine.high %v1594_v59, %v1602_v60  ;;  %v7001_v4 = vcombine.low %v1594_v59, %v1602_v60 }
 0x407   :  { %4980 = vmatpush1.bf16.msra.mxu0 %v6887_v0  ;;  %v1609_v0 = vld [vmem:[#allocation9 + $0xa30] sm:$0xff] }
 0x408   :  { %5066 = vmatpush1.bf16.msra.mxu1 %v6889_v1  ;;  %4981 = vmatprep.subr.bf16.mxu0 %v6904_v2  ;;  %v1617_v1 = vld [vmem:[#allocation9 + $0xa70] sm:$0xff]  ;;  %v1610_v2 = vld [vmem:[#allocation9 + $0xa38] sm:$0xff] }
 0x409   :  { %5067 = vmatprep.subr.bf16.mxu1 %v6906_v3  ;;  %v1618_v3 = vld [vmem:[#allocation9 + $0xa78] sm:$0xff]  ;;  %v7016_v5 = vcombine.high %v1609_v0, %v1617_v1  ;;  %v7015_v12 = vcombine.low %v1609_v0, %v1617_v1 }
 0x40a   :  { %v7018_v6 = vcombine.high %v1610_v2, %v1618_v3  ;;  %v7017_v17 = vcombine.low %v1610_v2, %v1618_v3  ;;  %v1673_v2 = vld [vmem:[#allocation9 + $0xc30] sm:$0xff] }
 0x40b   :  { %4982 = vmatpush1.bf16.msra.mxu0 %v6903_v8  ;;  %v1633_v8 = vld [vmem:[#allocation9 + $0xaf0] sm:$0xff] }
 0x40c   :  { %5068 = vmatpush1.bf16.msra.mxu1 %v6905_v9  ;;  %4983 = vmatprep.subr.bf16.mxu0 %v6920_v10  ;;  %v1817_v9 = vsub.s32 4, %v8294_v15  ;;  %v1626_v10 = vld [vmem:[#allocation9 + $0xab8] sm:$0xff]  ;;  %v1681_v3 = vld [vmem:[#allocation9 + $0xc70] sm:$0xff] }
 0x40d   :  { %5069 = vmatprep.subr.bf16.mxu1 %v6922_v11  ;;  %v1634_v11 = vld [vmem:[#allocation9 + $0xaf8] sm:$0xff] }
 0x40e   :  { %v1818_v26 = vrot.slane %v8350_v41, %v1817_v9  ;;  %v7033_v32 = vcombine.low %v1626_v10, %v1634_v11 }
 0x40f   :  { %4984 = vmatpush1.bf16.msra.mxu0 %v6919_v19  ;;  %v1829_v19 = vsub.s32 7, %v8294_v15 }
 0x410   :  { %5070 = vmatpush1.bf16.msra.mxu1 %v6921_v21  ;;  %4985 = vmatprep.subr.bf16.mxu0 %v6936_v23  ;;  %v7032_v21 = vcombine.high %v1625_v7, %v1633_v8  ;;  %v7034_v23 = vcombine.high %v1626_v10, %v1634_v11 }
 0x411   :  { %5071 = vmatprep.subr.bf16.mxu1 %v6938_v24  ;;  %v1641_v24 = vld [vmem:[#allocation9 + $0xb30] sm:$0xff] }
 0x412   :  { %v7048_v33 = vcombine.high %v1641_v24, %v1649_v25 }
 0x413   :  { %4986 = vmatpush1.bf16.msra.mxu0 %v6935_v28  ;;  %v1826_v28 = vrot.slane %v8350_v41, %v1825_v13 }
 0x414   :  { %5072 = vmatpush1.bf16.msra.mxu1 %v6937_v29  ;;  %4998 = vmatprep.subr.bf16.mxu0 %v6952_v30  ;;  %v1822_v29 = vrot.slane %v8350_v41, %v1821_v14  ;;  %v7031_v30 = vcombine.low %v1625_v7, %v1633_v8  ;;  %v1674_v7 = vld [vmem:[#allocation9 + $0xc38] sm:$0xff] }
 0x415   :  { %5084 = vmatprep.subr.bf16.mxu1 %v6954_v31  ;;  %v1830_v31 = vrot.slane %v8350_v41, %v1829_v19  ;;  %v7049_v41 = vcombine.low %v1642_v55, %v1650_v27  ;;  %v1682_v8 = vld [vmem:[#allocation9 + $0xc78] sm:$0xff] }
 0x416   :  { %4988 = vmatmul.mubr.bf16.vlgmr.msra.gmra.mrb[20].mxu0 %v8320_v45  ;;  %v7082_v27 = vcombine.high %v1674_v7, %v1682_v8 }
 0x417   :  { %5074 = vmatmul.mubr.bf16.vlgmr.msra.gmra.mrb[20].mxu1 %v8320_v45  ;;  %4999 = vmatpush1.bf16.msra.mxu0 %v6951_v50  ;;  %v6985_v45 = vcombine.low %v1578_v48, %v1586_v49  ;;  %v1666_v48 = vld [vmem:[#allocation9 + $0xbf8] sm:$0xff] }
 0x418   :  { %5030 = vmatprep.mubr.bf16.mxu0 %v8326_v51  ;;  %5085 = vmatpush1.bf16.msra.mxu1 %v6953_v36  ;;  %v1665_v36 = vld [vmem:[#allocation9 + $0xbf0] sm:$0xff] }
 0x419   :  { %5116 = vmatprep.mubr.bf16.mxu1 %v8326_v51  ;;  %5000 = vmatprep.subr.bf16.mxu0 %v6968_v37  ;;  %v6999_v51 = vcombine.low %v1593_v57, %v1601_v58  ;;  %v7063_v0 = vcombine.low %v1657_v35, %v1665_v36 }
 0x41a   :  { %5086 = vmatprep.subr.bf16.mxu1 %v6970_v43  ;;  %v1658_v43 = vld [vmem:[#allocation9 + $0xbb8] sm:$0xff] }
 0x41b   :  { %5001 = vmatpush1.bf16.msra.mxu0 %v6967_v52  ;;  %v7066_v1 = vcombine.high %v1658_v43, %v1666_v48 }
 0x41c   :  { %5087 = vmatpush1.bf16.msra.mxu1 %v6969_v53  ;;  %5002 = vmatprep.subr.bf16.mxu0 %v6984_v54 }
 0x41d   :  { %5088 = vmatprep.subr.bf16.mxu1 %v6986_v56  ;;  %v7047_v56 = vcombine.low %v1641_v24, %v1649_v25  ;;  %v7080_v25 = vcombine.high %v1673_v2, %v1681_v3 }
 0x41f   :  { %5003 = vmatpush1.bf16.msra.mxu0 %v6983_v61  ;;  %v7064_v61 = vcombine.high %v1657_v35, %v1665_v36  ;;  %v1705_v36 = vld [vmem:[#allocation9 + $0xd30] sm:$0xff] }
 0x420   :  { %5089 = vmatpush1.bf16.msra.mxu1 %v6985_v45  ;;  %5004 = vmatprep.subr.bf16.mxu0 %v7000_v62 }
 0x421   :  { %5090 = vmatprep.subr.bf16.mxu1 %v7002_v63 }
 0x423   :  { %5005 = vmatpush1.bf16.msra.mxu0 %v6999_v51 }
 0x424   :  { %5091 = vmatpush1.bf16.msra.mxu1 %v7001_v4  ;;  %5006 = vmatprep.subr.bf16.mxu0 %v7016_v5 }
 0x425   :  { %5092 = vmatprep.subr.bf16.mxu1 %v7018_v6  ;;  %v7065_v6 = vcombine.low %v1658_v43, %v1666_v48 }
 0x427   :  { %5007 = vmatpush1.bf16.msra.mxu0 %v7015_v12 }
 0x428   :  { %5093 = vmatpush1.bf16.msra.mxu1 %v7017_v17  ;;  %5008 = vmatprep.subr.bf16.mxu0 %v7032_v21 }
 0x429   :  { %v4688_v50 = vpop.f32.mrb[12].mxu0  ;;  %5094 = vmatprep.subr.bf16.mxu1 %v7034_v23 }
 0x42a   :  { %v7516_v37 = vadd.f32 %v4688_v50, %v1818_v26  ;;  %v4774_v38 = vpop.f32.mrb[12].mxu1  ;;  %v4690_v39 = vpop.f32.mrb[13].mxu0  ;;  %v7081_v50 = vcombine.low %v1674_v7, %v1682_v8 }
 0x42b   :  { %v7520_v49 = vadd.f32 %v4774_v38, %v1826_v28  ;;  %v7517_v52 = vadd.f32 %v4690_v39, %v1822_v29  ;;  %v4776_v53 = vpop.f32.mrb[13].mxu1  ;;  %v4692_v54 = vpop.f32.mrb[14].mxu0  ;;  %5009 = vmatpush1.bf16.msra.mxu0 %v7031_v30  ;;  %v1706_v38 = vld [vmem:[#allocation9 + $0xd38] sm:$0xff] }
 0x42c   :  { %v7521_v57 = vadd.f32 %v4776_v53, %v1830_v31  ;;  %v7518_v58 = vadd.f32 %v4692_v54, %v1818_v26  ;;  %v4778_v59 = vpop.f32.mrb[14].mxu1  ;;  %5095 = vmatpush1.bf16.msra.mxu1 %v7033_v32  ;;  %v4694_v60 = vpop.f32.mrb[15].mxu0  ;;  %5010 = vmatprep.subr.bf16.mxu0 %v7048_v33  ;;  %v5131_v51 = vmax.f32 %v7516_v37, 0.0  ;;  %v1698_v32 = vld [vmem:[#allocation9 + $0xcf8] sm:$0xff]  ;;  %v7079_v33 = vcombine.low %v1673_v2, %v1681_v3  ;;  %v1713_v37 = vld [vmem:[#allocation9 + $0xd70] sm:$0xff] }
 0x42d   :  { %v7522_v45 = vadd.f32 %v4778_v59, %v1826_v28  ;;  %v7519_v62 = vadd.f32 %v4694_v60, %v1822_v29  ;;  %v4780_v63 = vpop.f32.mrb[15].mxu1  ;;  %5096 = vmatprep.subr.bf16.mxu1 %v7050_v34  ;;  %v5133_v10 = vmax.f32 %v7520_v49, 0.0  ;;  %v5132_v11 = vmax.f32 %v7517_v52, 0.0  ;;  %v1689_v28 = vld [vmem:[#allocation9 + $0xcb0] sm:$0xff]  ;;  %v1714_v39 = vld [vmem:[#allocation9 + $0xd78] sm:$0xff] }
 0x42e   :  { %v5147_v4 = vmax.f32 %v7518_v58, 0.0  ;;  %v7523_v5 = vadd.f32 %v4780_v63, %v1830_v31  ;;  %v5134_v21 = vmax.f32 %v7521_v57, 0.0  ;;  %v1697_v29 = vld [vmem:[#allocation9 + $0xcf0] sm:$0xff]  ;;  %v1690_v31 = vld [vmem:[#allocation9 + $0xcb8] sm:$0xff]  ;;  %v7112_v49 = vcombine.high %v1705_v36, %v1713_v37 }
 0x42f   :  { %v5149_v12 = vmax.f32 %v7522_v45, 0.0  ;;  %v5148_v17 = vmax.f32 %v7519_v62, 0.0  ;;  %5011 = vmatpush1.bf16.msra.mxu0 %v7047_v56  ;;  %v7096_v34 = vcombine.high %v1689_v28, %v1697_v29  ;;  %v7098_v35 = vcombine.high %v1690_v31, %v1698_v32  ;;  %v1721_v53 = vld [vmem:[#allocation9 + $0xdb0] sm:$0xff]  ;;  %v1722_v56 = vld [vmem:[#allocation9 + $0xdb8] sm:$0xff] }
 0x430   :  { %v8392_v23 = vpack.c.bf16 %v5147_v4, %v5131_v51  ;;  %v5150_v24 = vmax.f32 %v7523_v5, 0.0  ;;  %5097 = vmatpush1.bf16.msra.mxu1 %v7049_v41  ;;  %5012 = vmatprep.subr.bf16.mxu0 %v7064_v61  ;;  %v7095_v43 = vcombine.low %v1689_v28, %v1697_v29  ;;  %v7097_v48 = vcombine.low %v1690_v31, %v1698_v32  ;;  %v1729_v54 = vld [vmem:[#allocation9 + $0xdf0] sm:$0xff]  ;;  %v1730_v41 = vld [vmem:[#allocation9 + $0xdf8] sm:$0xff] }
 0x431   :  { %v8394_v26 = vpack.c.bf16 %v5149_v12, %v5133_v10  ;;  %v8396_v55 = vpack.c.bf16 %v5148_v17, %v5132_v11  ;;  %5098 = vmatprep.subr.bf16.mxu1 %v7066_v1  ;;  %v7114_v52 = vcombine.high %v1706_v38, %v1714_v39  ;;  %v7111_v57 = vcombine.low %v1705_v36, %v1713_v37  ;;  %v1737_v61 = vld [vmem:[#allocation9 + $0xe30] sm:$0xff]  ;;  %v1738_v62 = vld [vmem:[#allocation9 + $0xe38] sm:$0xff] }
 0x432   :  { %v8398_v30 = vpack.c.bf16 %v5150_v24, %v5134_v21  ;;  %v7113_v58 = vcombine.low %v1706_v38, %v1714_v39  ;;  %v7128_v59 = vcombine.high %v1721_v53, %v1729_v54  ;;  %v7130_v60 = vcombine.high %v1722_v56, %v1730_v41  ;;  %v1745_v45 = vld [vmem:[#allocation9 + $0xe70] sm:$0xff]  ;;  %v1746_v63 = vld [vmem:[#allocation9 + $0xe78] sm:$0xff] }
 0x433   :  { %5013 = vmatpush1.bf16.msra.mxu0 %v7063_v0  ;;  %v7127_v0 = vcombine.low %v1721_v53, %v1729_v54  ;;  %v7129_v1 = vcombine.low %v1722_v56, %v1730_v41  ;;  %v7144_v2 = vcombine.high %v1737_v61, %v1745_v45  ;;  %v7146_v3 = vcombine.high %v1738_v62, %v1746_v63  ;;  %v1753_v51 = vld [vmem:[#allocation9 + $0xeb0] sm:$0xff]  ;;  %v1754_v5 = vld [vmem:[#allocation9 + $0xeb8] sm:$0xff] }
 0x434   :  { %5099 = vmatpush1.bf16.msra.mxu1 %v7065_v6  ;;  %5014 = vmatprep.subr.bf16.mxu0 %v7080_v25  ;;  %v1761_v4 = vld [vmem:[#allocation9 + $0xef0] sm:$0xff]  ;;  %v1762_v6 = vld [vmem:[#allocation9 + $0xef8] sm:$0xff]  ;;  %v7143_v7 = vcombine.low %v1737_v61, %v1745_v45  ;;  %v7145_v8 = vcombine.low %v1738_v62, %v1746_v63  ;;  %v7810_v61 = vld [vmem:[#allocation12 + $0x58] sm:$0xff]  }
 0x435   :  { %5100 = vmatprep.subr.bf16.mxu1 %v7082_v27  ;;  %v7160_v10 = vcombine.high %v1753_v51, %v1761_v4  ;;  %v7162_v11 = vcombine.high %v1754_v5, %v1762_v6  ;;  %v1769_v12 = vld [vmem:[#allocation9 + $0xf30] sm:$0xff]  ;;  %v1770_v21 = vld [vmem:[#allocation9 + $0xf38] sm:$0xff]  ;;  %v7159_v25 = vcombine.low %v1753_v51, %v1761_v4  ;;  %v7161_v27 = vcombine.low %v1754_v5, %v1762_v6  ;;  %v7812_v45 = vld [vmem:[#allocation12 + $0x18] sm:$0xff]  }
 0x436   :  { %v1777_v17 = vld [vmem:[#allocation9 + $0xf70] sm:$0xff]  ;;  %v1778_v24 = vld [vmem:[#allocation9 + $0xf78] sm:$0xff]  ;;  %v7822_v4 = vld [vmem:[#allocation12 + $0x70] sm:$0xff]  }
 0x437   :  { %5015 = vmatpush1.bf16.msra.mxu0 %v7079_v33  ;;  %v7176_v28 = vcombine.high %v1769_v12, %v1777_v17  ;;  %v7178_v29 = vcombine.high %v1770_v21, %v1778_v24  ;;  %v1785_v31 = vld [vmem:[#allocation9 + $0xfb0] sm:$0xff]  ;;  %v1786_v33 = vld [vmem:[#allocation9 + $0xfb8] sm:$0xff]  ;;  %v7823_v5 = vld [vmem:[#allocation12 + $0xf0] sm:$0xff]  }
 0x438   :  { %5101 = vmatpush1.bf16.msra.mxu1 %v7081_v50  ;;  %5016 = vmatprep.subr.bf16.mxu0 %v7096_v34  ;;  %v1793_v32 = vld [vmem:[#allocation9 + $0xff0] sm:$0xff]  ;;  %v1794_v50 = vld [vmem:[#allocation9 + $0xff8] sm:$0xff]  ;;  %v7175_v34 = vcombine.low %v1769_v12, %v1777_v17  ;;  %v7824_v6 = vld [vmem:[#allocation12 + $0x30] sm:$0xff]  }
 0x439   :  { %5102 = vmatprep.subr.bf16.mxu1 %v7098_v35  ;;  %v7177_v35 = vcombine.low %v1770_v21, %v1778_v24  ;;  %v7192_v36 = vcombine.high %v1785_v31, %v1793_v32  ;;  %v7194_v37 = vcombine.high %v1786_v33, %v1794_v50  ;;  %v7191_v38 = vcombine.low %v1785_v31, %v1793_v32  ;;  %v7802_v53 = vld [vmem:[#allocation12 + $0x48] sm:$0xff]   ;;  %v7814_v62 = vld [vmem:[#allocation12 + $0x60] sm:$0xff]   ;;  %v7829_v12 = vld [vmem:[#allocation12 + $0xb8] sm:$0xff]  }
 0x43a   :  { %v7193_v39 = vcombine.low %v1786_v33, %v1794_v50  ;;  %v7803_v54 = vld [vmem:[#allocation12 + $0xc8] sm:$0xff]   ;;  %v7815_v63 = vld [vmem:[#allocation12 + $0xe0] sm:$0xff]   ;;  %v7838_v32 = vld [vmem:[#allocation12 + $0x150] sm:$0xff]  }
 0x43b   :  { %5017 = vmatpush1.bf16.msra.mxu0 %v7095_v43  ;;  %v7798_v43 = vld [vmem:[#allocation12 + $0x40] sm:$0xff]   ;;  %v7804_v56 = vld [vmem:[#allocation12 + $0x8] sm:$0xff]   ;;  %v7839_v33 = vld [vmem:[#allocation12 + $0x1d0] sm:$0xff]  }
 0x43c   :  { %5103 = vmatpush1.bf16.msra.mxu1 %v7097_v48  ;;  %5018 = vmatprep.subr.bf16.mxu0 %v7112_v49  ;;  %v7799_v48 = vld [vmem:[#allocation12 + $0xc0] sm:$0xff]   ;;  %v7805_v41 = vld [vmem:[#allocation12 + $0x88] sm:$0xff]   ;;  %v7840_v50 = vld [vmem:[#allocation12 + $0x110] sm:$0xff]  }
 0x43d   :  { %5104 = vmatprep.subr.bf16.mxu1 %v7114_v52  ;;  %v7800_v49 = vld [vmem:[#allocation12] sm:$0xff]   ;;  %v7821_v51 = vld [vmem:[#allocation12 + $0xa8] sm:$0xff]  }
 0x43e   :  { %v7801_v52 = vld [vmem:[#allocation12 + $0x80] sm:$0xff]   ;;  %v7837_v31 = vld [vmem:[#allocation12 + $0x188] sm:$0xff]  }
 0x43f   :  { %5019 = vmatpush1.bf16.msra.mxu0 %v7111_v57  ;;  %v7806_v57 = vld [vmem:[#allocation12 + $0x50] sm:$0xff]   ;;  %v7830_v17 = vld [vmem:[#allocation12 + $0x140] sm:$0xff]  }
 0x440   :  { %5105 = vmatpush1.bf16.msra.mxu1 %v7113_v58  ;;  %5020 = vmatprep.subr.bf16.mxu0 %v7128_v59  ;;  %v7807_v58 = vld [vmem:[#allocation12 + $0xd0] sm:$0xff]   ;;  %v7831_v21 = vld [vmem:[#allocation12 + $0x1c0] sm:$0xff]  }
 0x441   :  { %5106 = vmatprep.subr.bf16.mxu1 %v7130_v60  ;;  %v7808_v59 = vld [vmem:[#allocation12 + $0x10] sm:$0xff]   ;;  %v7832_v24 = vld [vmem:[#allocation12 + $0x100] sm:$0xff]  }
 0x442   :  { %v7809_v60 = vld [vmem:[#allocation12 + $0x90] sm:$0xff]  }
 0x443   :  { %5021 = vmatpush1.bf16.msra.mxu0 %v7127_v0  ;;  %v7817_v0 = vld [vmem:[#allocation12 + $0xa0] sm:$0xff]  }
 0x444   :  { %5107 = vmatpush1.bf16.msra.mxu1 %v7129_v1  ;;  %5022 = vmatprep.subr.bf16.mxu0 %v7144_v2  ;;  %v7818_v1 = vld [vmem:[#allocation12 + $0x68] sm:$0xff]  }
 0x445   :  { %5108 = vmatprep.subr.bf16.mxu1 %v7146_v3  ;;  %v7819_v2 = vld [vmem:[#allocation12 + $0xe8] sm:$0xff]  }
 0x446   :  { %v7820_v3 = vld [vmem:[#allocation12 + $0x28] sm:$0xff]  }
 0x447   :  { %5023 = vmatpush1.bf16.msra.mxu0 %v7143_v7  ;;  %v7825_v7 = vld [vmem:[#allocation12 + $0xb0] sm:$0xff]  }
 0x448   :  { %5109 = vmatpush1.bf16.msra.mxu1 %v7145_v8  ;;  %5024 = vmatprep.subr.bf16.mxu0 %v7160_v10  ;;  %v7826_v8 = vld [vmem:[#allocation12 + $0x78] sm:$0xff]  }
 0x449   :  { %5110 = vmatprep.subr.bf16.mxu1 %v7162_v11  ;;  %v7827_v10 = vld [vmem:[#allocation12 + $0xf8] sm:$0xff]  }
 0x44a   :  { %v7828_v11 = vld [vmem:[#allocation12 + $0x38] sm:$0xff]  }
 0x44b   :  { %5025 = vmatpush1.bf16.msra.mxu0 %v7159_v25  ;;  %v7833_v25 = vld [vmem:[#allocation12 + $0x180] sm:$0xff]  }
 0x44c   :  { %5111 = vmatpush1.bf16.msra.mxu1 %v7161_v27  ;;  %5026 = vmatprep.subr.bf16.mxu0 %v7176_v28  ;;  %v7834_v27 = vld [vmem:[#allocation12 + $0x148] sm:$0xff]  }
 0x44d   :  { %5112 = vmatprep.subr.bf16.mxu1 %v7178_v29  ;;  %v7835_v28 = vld [vmem:[#allocation12 + $0x1c8] sm:$0xff]  }
 0x44e   :  { %v7836_v29 = vld [vmem:[#allocation12 + $0x108] sm:$0xff]  }
 0x44f   :  { %5027 = vmatpush1.bf16.msra.mxu0 %v7175_v34  ;;  %v7842_v34 = vld [vmem:[#allocation12 + $0x158] sm:$0xff]  }
 0x450   :  { %5113 = vmatpush1.bf16.msra.mxu1 %v7177_v35  ;;  %5028 = vmatprep.subr.bf16.mxu0 %v7192_v36  ;;  %v7844_v35 = vld [vmem:[#allocation12 + $0x118] sm:$0xff]   ;;  %v7846_v36 = vld [vmem:[#allocation12 + $0x160] sm:$0xff]  }
 0x451   :  { %5114 = vmatprep.subr.bf16.mxu1 %v7194_v37  ;;  %v7847_v37 = vld [vmem:[#allocation12 + $0x1e0] sm:$0xff]  }
 0x453   :  { %5029 = vmatpush1.bf16.msra.mxu0 %v7191_v38  ;;  %v7849_v38 = vld [vmem:[#allocation12 + $0x1a0] sm:$0xff]  }
 0x454   :  { %5115 = vmatpush1.bf16.msra.mxu1 %v7193_v39  ;;  %7324 = vmatprep.subr.bf16.mxu0 %v7798_v43  ;;  %v7850_v39 = vld [vmem:[#allocation12 + $0x168] sm:$0xff]  }
 0x455   :  { %7346 = vmatprep.subr.bf16.mxu1 %v7799_v48  ;;  %v7851_v43 = vld [vmem:[#allocation12 + $0x1e8] sm:$0xff]  }
 0x456   :  { %5031 = vmatmul.mubr.bf16.vlgmr.msra.gmra.mrb[20].mxu0 %v8322_v46  ;;  %v7852_v48 = vld [vmem:[#allocation12 + $0x128] sm:$0xff]  }
 0x457   :  { %5117 = vmatmul.mubr.bf16.vlgmr.msra.gmra.mrb[20].mxu1 %v8322_v46  ;;  %7325 = vmatpush3.bf16.msra.mxu0 %v7800_v49  ;;  %v7811_v46 = vld [vmem:[#allocation12 + $0xd8] sm:$0xff]   ;;  %v7853_v49 = vld [vmem:[#allocation12 + $0x1a8] sm:$0xff]  }
 0x458   :  { %6238 = vmatprep.mubr.bf16.mxu0 %v8364_v44  ;;  %7347 = vmatpush3.bf16.msra.mxu1 %v7801_v52  ;;  %v7813_v44 = vld [vmem:[#allocation12 + $0x98] sm:$0xff]   ;;  %v7854_v52 = vld [vmem:[#allocation12 + $0x170] sm:$0xff]  }
 0x459   :  { %6279 = vmatprep.mubr.bf16.mxu1 %v8366_v47  ;;  %7326 = vmatprep.subr.bf16.mxu0 %v7802_v53  ;;  %v7816_v47 = vld [vmem:[#allocation12 + $0x20] sm:$0xff]   ;;  %v7855_v53 = vld [vmem:[#allocation12 + $0x1f0] sm:$0xff]  }
 0x45a   :  { %7348 = vmatprep.subr.bf16.mxu1 %v7803_v54  ;;  %v7856_v54 = vld [vmem:[#allocation12 + $0x130] sm:$0xff]  }
 0x45b   :  { %7327 = vmatpush3.bf16.msra.mxu0 %v7804_v56  ;;  %v7857_v56 = vld [vmem:[#allocation12 + $0x1b0] sm:$0xff]  }
 0x45c   :  { %7349 = vmatpush3.bf16.msra.mxu1 %v7805_v41  ;;  %7328 = vmatprep.subr.bf16.mxu0 %v7806_v57  ;;  %v7858_v41 = vld [vmem:[#allocation12 + $0x178] sm:$0xff]  }
 0x45d   :  { %7350 = vmatprep.subr.bf16.mxu1 %v7807_v58  ;;  %v7859_v57 = vld [vmem:[#allocation12 + $0x1f8] sm:$0xff]  }
 0x45e   :  { %v7860_v58 = vld [vmem:[#allocation12 + $0x138] sm:$0xff]  }
 0x45f   :  { %7329 = vmatpush3.bf16.msra.mxu0 %v7808_v59  ;;  %v7861_v59 = vld [vmem:[#allocation12 + $0x1b8] sm:$0xff]  }
 0x460   :  { %7351 = vmatpush3.bf16.msra.mxu1 %v7809_v60  ;;  %7330 = vmatprep.subr.bf16.mxu0 %v7810_v61  ;;  %v7862_v60 = vld [vmem:[#allocation12 + $0x240] sm:$0xff]  }
 0x461   :  { %7352 = vmatprep.subr.bf16.mxu1 %v7811_v46  ;;  %v7863_v61 = vld [vmem:[#allocation12 + $0x2c0] sm:$0xff]  }
 0x462   :  { %v7864_v46 = vld [vmem:[#allocation12 + $0x200] sm:$0xff]  }
 0x463   :  { %7331 = vmatpush3.bf16.msra.mxu0 %v7812_v45  ;;  %v7865_v45 = vld [vmem:[#allocation12 + $0x280] sm:$0xff]  }
 0x464   :  { %7353 = vmatpush3.bf16.msra.mxu1 %v7813_v44  ;;  %7332 = vmatprep.subr.bf16.mxu0 %v7814_v62  ;;  %v7866_v44 = vld [vmem:[#allocation12 + $0x248] sm:$0xff]  }
 0x465   :  { %7354 = vmatprep.subr.bf16.mxu1 %v7815_v63  ;;  %v7867_v62 = vld [vmem:[#allocation12 + $0x2c8] sm:$0xff]  }
 0x466   :  { %v7868_v63 = vld [vmem:[#allocation12 + $0x208] sm:$0xff]  }
 0x467   :  { %7333 = vmatpush3.bf16.msra.mxu0 %v7816_v47  ;;  %v7869_v47 = vld [vmem:[#allocation12 + $0x288] sm:$0xff]  }
 0x468   :  { %7355 = vmatpush3.bf16.msra.mxu1 %v7817_v0  ;;  %7334 = vmatprep.subr.bf16.mxu0 %v7818_v1  ;;  %v7870_v0 = vld [vmem:[#allocation12 + $0x250] sm:$0xff]  }
 0x469   :  { %7356 = vmatprep.subr.bf16.mxu1 %v7819_v2  ;;  %v7871_v1 = vld [vmem:[#allocation12 + $0x2d0] sm:$0xff]  }
 0x46a   :  { %v7872_v2 = vld [vmem:[#allocation12 + $0x210] sm:$0xff]  }
 0x46b   :  { %7335 = vmatpush3.bf16.msra.mxu0 %v7820_v3  ;;  %v7873_v3 = vld [vmem:[#allocation12 + $0x290] sm:$0xff]  }
 0x46c   :  { %7357 = vmatpush3.bf16.msra.mxu1 %v7821_v51  ;;  %7336 = vmatprep.subr.bf16.mxu0 %v7822_v4  ;;  %v7874_v51 = vld [vmem:[#allocation12 + $0x258] sm:$0xff]  }
 0x46d   :  { %7358 = vmatprep.subr.bf16.mxu1 %v7823_v5  ;;  %v7875_v4 = vld [vmem:[#allocation12 + $0x2d8] sm:$0xff]   ;;  %v7878_v5 = vld [vmem:[#allocation12 + $0x260] sm:$0xff]  }
 0x46f   :  { %7337 = vmatpush3.bf16.msra.mxu0 %v7824_v6  ;;  %v7879_v6 = vld [vmem:[#allocation12 + $0x2e0] sm:$0xff]  }
 0x470   :  { %7359 = vmatpush3.bf16.msra.mxu1 %v7825_v7  ;;  %7338 = vmatprep.subr.bf16.mxu0 %v7826_v8  ;;  %v7880_v7 = vld [vmem:[#allocation12 + $0x220] sm:$0xff]   ;;  %v8410_v8 = vld [vmem:[#allocation10 + $0x8] sm:$0xff] }
 0x471   :  { %7360 = vmatprep.subr.bf16.mxu1 %v7827_v10  ;;  %v7881_v10 = vld [vmem:[#allocation12 + $0x2a0] sm:$0xff]  }
 0x473   :  { %7339 = vmatpush3.bf16.msra.mxu0 %v7828_v11  ;;  %v7882_v11 = vld [vmem:[#allocation12 + $0x268] sm:$0xff]  }
 0x474   :  { %7361 = vmatpush3.bf16.msra.mxu1 %v7829_v12  ;;  %7368 = vmatprep.subr.bf16.mxu0 %v7830_v17  ;;  %v7883_v12 = vld [vmem:[#allocation12 + $0x2e8] sm:$0xff]   ;;  %v1834_v17 = vrot.slane %v8410_v8, %v8297_v16 }
 0x475   :  { %7390 = vmatprep.subr.bf16.mxu1 %v7831_v21  ;;  %v1842_v21 = vrot.slane %v8410_v8, %v8304_v20 }
 0x476   :  { %6239 = vmatmul.mubr.bf16.vlgmr.msra.gmra.mrb[24].mxu0 %v8360_v40  ;;  %v7841_v40 = vld [vmem:[#allocation12 + $0x190] sm:$0xff]  }
 0x477   :  { %6280 = vmatmul.mubr.bf16.vlgmr.msra.gmra.mrb[24].mxu1 %v8362_v42  ;;  %7369 = vmatpush3.bf16.msra.mxu0 %v7832_v24  ;;  %v7843_v42 = vld [vmem:[#allocation12 + $0x1d8] sm:$0xff]   ;;  %v1838_v24 = vrot.slane %v8410_v8, %v8300_v18  ;;  %v7888_v18 = vld [vmem:[#allocation12 + $0x230] sm:$0xff]  }
 0x478   :  { %6320 = vmatprep.mubr.bf16.mxu0 %v8396_v55  ;;  %7391 = vmatpush3.bf16.msra.mxu1 %v7833_v25  ;;  %v7845_v55 = vld [vmem:[#allocation12 + $0x198] sm:$0xff]   ;;  %v7884_v25 = vld [vmem:[#allocation12 + $0x228] sm:$0xff]  }
 0x479   :  { %6361 = vmatprep.mubr.bf16.mxu1 %v8398_v30  ;;  %7370 = vmatprep.subr.bf16.mxu0 %v7834_v27  ;;  %v7848_v30 = vld [vmem:[#allocation12 + $0x120] sm:$0xff]   ;;  %v1846_v27 = vrot.slane %v8410_v8, %v8308_v22 }
 0x47a   :  { %7392 = vmatprep.subr.bf16.mxu1 %v7835_v28  ;;  %v7885_v28 = vld [vmem:[#allocation12 + $0x2a8] sm:$0xff]  }
 0x47b   :  { %7371 = vmatpush3.bf16.msra.mxu0 %v7836_v29  ;;  %v7886_v29 = vld [vmem:[#allocation12 + $0x270] sm:$0xff]  }
 0x47c   :  { %7393 = vmatpush3.bf16.msra.mxu1 %v7837_v31  ;;  %7372 = vmatprep.subr.bf16.mxu0 %v7838_v32  ;;  %v7887_v32 = vld [vmem:[#allocation12 + $0x2f0] sm:$0xff]  }
 0x47d   :  { %7394 = vmatprep.subr.bf16.mxu1 %v7839_v33 }
 0x47f   :  { %7373 = vmatpush3.bf16.msra.mxu0 %v7840_v50 }
 0x480   :  { %7395 = vmatpush3.bf16.msra.mxu1 %v7841_v40  ;;  %7374 = vmatprep.subr.bf16.mxu0 %v7842_v34 }
 0x481   :  { %7396 = vmatprep.subr.bf16.mxu1 %v7843_v42 }
 0x483   :  { %7375 = vmatpush3.bf16.msra.mxu0 %v7844_v35 }
 0x484   :  { %7397 = vmatpush3.bf16.msra.mxu1 %v7845_v55  ;;  %7376 = vmatprep.subr.bf16.mxu0 %v7846_v36 }
 0x485   :  { %7398 = vmatprep.subr.bf16.mxu1 %v7847_v37  ;;  %v7889_v37 = vld [vmem:[#allocation12 + $0x2b0] sm:$0xff]  }
 0x487   :  { %7377 = vmatpush3.bf16.msra.mxu0 %v7848_v30  ;;  %v7890_v30 = vld [vmem:[#allocation12 + $0x278] sm:$0xff]  }
 0x488   :  { %7399 = vmatpush3.bf16.msra.mxu1 %v7849_v38  ;;  %7378 = vmatprep.subr.bf16.mxu0 %v7850_v39 }
 0x489   :  { %7400 = vmatprep.subr.bf16.mxu1 %v7851_v43 }
 0x48b   :  { %7379 = vmatpush3.bf16.msra.mxu0 %v7852_v48  ;;  %v7891_v48 = vld [vmem:[#allocation12 + $0x2f8] sm:$0xff]  }
 0x48c   :  { %7401 = vmatpush3.bf16.msra.mxu1 %v7853_v49  ;;  %7380 = vmatprep.subr.bf16.mxu0 %v7854_v52 }
 0x48d   :  { %7402 = vmatprep.subr.bf16.mxu1 %v7855_v53 }
 0x48f   :  { %7381 = vmatpush3.bf16.msra.mxu0 %v7856_v54 }
 0x490   :  { %7403 = vmatpush3.bf16.msra.mxu1 %v7857_v56  ;;  %7382 = vmatprep.subr.bf16.mxu0 %v7858_v41 }
 0x491   :  { %7404 = vmatprep.subr.bf16.mxu1 %v7859_v57 }
 0x493   :  { %7383 = vmatpush3.bf16.msra.mxu0 %v7860_v58  ;;  %v7892_v58 = vld [vmem:[#allocation12 + $0x238] sm:$0xff]  }
 0x494   :  { %7405 = vmatpush3.bf16.msra.mxu1 %v7861_v59  ;;  %7412 = vmatprep.subr.bf16.mxu0 %v7862_v60 }
 0x495   :  { %7434 = vmatprep.subr.bf16.mxu1 %v7863_v61 }
 0x496   :  { %6321 = vmatmul.mubr.bf16.vlgmr.msra.gmra.mrb[28].mxu0 %v8392_v23  ;;  %v7876_v23 = vld [vmem:[#allocation12 + $0x218] sm:$0xff]  }
 0x497   :  { %6362 = vmatmul.mubr.bf16.vlgmr.msra.gmra.mrb[28].mxu1 %v8394_v26  ;;  %7413 = vmatpush3.bf16.msra.mxu0 %v7864_v46  ;;  %v7877_v26 = vld [vmem:[#allocation12 + $0x298] sm:$0xff]  }
 0x498   :  { %7435 = vmatpush3.bf16.msra.mxu1 %v7865_v45  ;;  %7414 = vmatprep.subr.bf16.mxu0 %v7866_v44  ;;  %v7893_v46 = vld [vmem:[#allocation12 + $0x2b8] sm:$0xff]  }
 0x499   :  { %7436 = vmatprep.subr.bf16.mxu1 %v7867_v62  ;;  %v7894_v62 = vld [vmem:[#allocation12 + $0x340] sm:$0xff]  }
 0x49b   :  { %7415 = vmatpush3.bf16.msra.mxu0 %v7868_v63  ;;  %v7895_v63 = vld [vmem:[#allocation12 + $0x3c0] sm:$0xff]  }
 0x49c   :  { %7437 = vmatpush3.bf16.msra.mxu1 %v7869_v47  ;;  %7416 = vmatprep.subr.bf16.mxu0 %v7870_v0  ;;  %v7896_v0 = vld [vmem:[#allocation12 + $0x300] sm:$0xff]  }
 0x49d   :  { %7438 = vmatprep.subr.bf16.mxu1 %v7871_v1  ;;  %v7897_v1 = vld [vmem:[#allocation12 + $0x380] sm:$0xff]  }
 0x49f   :  { %7417 = vmatpush3.bf16.msra.mxu0 %v7872_v2  ;;  %v7898_v2 = vld [vmem:[#allocation12 + $0x348] sm:$0xff]  }
 0x4a0   :  { %7439 = vmatpush3.bf16.msra.mxu1 %v7873_v3  ;;  %7418 = vmatprep.subr.bf16.mxu0 %v7874_v51  ;;  %v7899_v3 = vld [vmem:[#allocation12 + $0x3c8] sm:$0xff]  }
 0x4a1   :  { %7440 = vmatprep.subr.bf16.mxu1 %v7875_v4  ;;  %v7900_v51 = vld [vmem:[#allocation12 + $0x308] sm:$0xff]  }
 0x4a2   :  { %v7901_v4 = vld [vmem:[#allocation12 + $0x388] sm:$0xff]  }
 0x4a3   :  { %7419 = vmatpush3.bf16.msra.mxu0 %v7876_v23  ;;  %v7902_v23 = vld [vmem:[#allocation12 + $0x350] sm:$0xff]  }
 0x4a4   :  { %7441 = vmatpush3.bf16.msra.mxu1 %v7877_v26  ;;  %7420 = vmatprep.subr.bf16.mxu0 %v7878_v5  ;;  %v7903_v26 = vld [vmem:[#allocation12 + $0x3d0] sm:$0xff]  }
 0x4a5   :  { %7442 = vmatprep.subr.bf16.mxu1 %v7879_v6  ;;  %v7904_v5 = vld [vmem:[#allocation12 + $0x310] sm:$0xff]  }
 0x4a6   :  { %v7905_v6 = vld [vmem:[#allocation12 + $0x390] sm:$0xff]  }
 0x4a7   :  { %7421 = vmatpush3.bf16.msra.mxu0 %v7880_v7  ;;  %v7906_v7 = vld [vmem:[#allocation12 + $0x358] sm:$0xff]  }
 0x4a8   :  { %7443 = vmatpush3.bf16.msra.mxu1 %v7881_v10  ;;  %7422 = vmatprep.subr.bf16.mxu0 %v7882_v11  ;;  %v7907_v10 = vld [vmem:[#allocation12 + $0x3d8] sm:$0xff]  }
 0x4a9   :  { %v4860_v31 = vpop.f32.mrb[16].mxu0  ;;  %7444 = vmatprep.subr.bf16.mxu1 %v7883_v12  ;;  %v7908_v11 = vld [vmem:[#allocation12 + $0x318] sm:$0xff]  }
 0x4aa   :  { %v7524_v33 = vadd.f32 %v4860_v31, %v1834_v17  ;;  %v4946_v16 = vpop.f32.mrb[16].mxu1  ;;  %v4862_v50 = vpop.f32.mrb[17].mxu0  ;;  %v7909_v12 = vld [vmem:[#allocation12 + $0x398] sm:$0xff]   ;;  %v7917_v31 = vld [vmem:[#allocation12 + $0x3a8] sm:$0xff]  }
 0x4ab   :  { %v7528_v40 = vadd.f32 %v4946_v16, %v1842_v21  ;;  %v7525_v34 = vadd.f32 %v4862_v50, %v1838_v24  ;;  %v4948_v20 = vpop.f32.mrb[17].mxu1  ;;  %v4864_v42 = vpop.f32.mrb[18].mxu0  ;;  %7423 = vmatpush3.bf16.msra.mxu0 %v7884_v25  ;;  %v7913_v25 = vld [vmem:[#allocation12 + $0x3a0] sm:$0xff]   ;;  %v7920_v16 = vld [vmem:[#allocation12 + $0x330] sm:$0xff]  }
 0x4ac   :  { %v7529_v35 = vadd.f32 %v4948_v20, %v1846_v27  ;;  %v7526_v55 = vadd.f32 %v4864_v42, %v1834_v17  ;;  %v4950_v36 = vpop.f32.mrb[18].mxu1  ;;  %7445 = vmatpush3.bf16.msra.mxu1 %v7885_v28  ;;  %v4866_v22 = vpop.f32.mrb[19].mxu0  ;;  %7424 = vmatprep.subr.bf16.mxu0 %v7886_v29  ;;  %v5135_v49 = vmax.f32 %v7524_v33, 0.0  ;;  %v7910_v17 = vld [vmem:[#allocation12 + $0x360] sm:$0xff]   ;;  %v7915_v28 = vld [vmem:[#allocation12 + $0x3e8] sm:$0xff]   ;;  %v7919_v33 = vld [vmem:[#allocation12 + $0x3f0] sm:$0xff]  }
 0x4ad   :  { %v7530_v38 = vadd.f32 %v4950_v36, %v1842_v21  ;;  %v7527_v39 = vadd.f32 %v4866_v22, %v1838_v24  ;;  %v4952_v43 = vpop.f32.mrb[19].mxu1  ;;  %7446 = vmatprep.subr.bf16.mxu1 %v7887_v32  ;;  %v5137_v54 = vmax.f32 %v7528_v40, 0.0  ;;  %v5136_v56 = vmax.f32 %v7525_v34, 0.0  ;;  %v7911_v21 = vld [vmem:[#allocation12 + $0x3e0] sm:$0xff]   ;;  %v7916_v29 = vld [vmem:[#allocation12 + $0x328] sm:$0xff]   ;;  %v7918_v32 = vld [vmem:[#allocation12 + $0x370] sm:$0xff]  }
 0x4ae   :  { %v5151_v52 = vmax.f32 %v7526_v55, 0.0  ;;  %v7531_v53 = vadd.f32 %v4952_v43, %v1846_v27  ;;  %v5138_v59 = vmax.f32 %v7529_v35, 0.0  ;;  %v7912_v24 = vld [vmem:[#allocation12 + $0x320] sm:$0xff]   ;;  %v7914_v27 = vld [vmem:[#allocation12 + $0x368] sm:$0xff]   ;;  %v7921_v50 = vld [vmem:[#allocation12 + $0x3b0] sm:$0xff]   ;;  %v1858_v35 = vrot.slane %v8410_v8, %v1825_v13 }
 0x4af   :  { %v5153_v41 = vmax.f32 %v7530_v38, 0.0  ;;  %v5152_v57 = vmax.f32 %v7527_v39, 0.0  ;;  %7425 = vmatpush3.bf16.msra.mxu0 %v7888_v18  ;;  %v7922_v40 = vld [vmem:[#allocation12 + $0x378] sm:$0xff]   ;;  %v1850_v18 = vrot.slane %v8410_v8, %v1817_v9  ;;  %v1854_v55 = vrot.slane %v8410_v8, %v1821_v14 }
 0x4b0   :  { %v5167_v60 = vpack.c.bf16 %v5151_v52, %v5135_v49  ;;  %v5154_v61 = vmax.f32 %v7531_v53, 0.0  ;;  %7447 = vmatpush3.bf16.msra.mxu1 %v7889_v37  ;;  %7426 = vmatprep.subr.bf16.mxu0 %v7890_v30  ;;  %v7923_v34 = vld [vmem:[#allocation12 + $0x3f8] sm:$0xff]   ;;  %v1862_v36 = vrot.slane %v8410_v8, %v1829_v19 }
 0x4b1   :  { %v5169_v45 = vpack.c.bf16 %v5153_v41, %v5137_v54  ;;  %v5168_v44 = vpack.c.bf16 %v5152_v57, %v5136_v56  ;;  %7448 = vmatprep.subr.bf16.mxu1 %v7891_v48  ;;  %v7924_v20 = vld [vmem:[#allocation12 + $0x338] sm:$0xff]  }
 0x4b2   :  { %v5170_v47 = vpack.c.bf16 %v5154_v61, %v5138_v59  ;;  %v7925_v42 = vld [vmem:[#allocation12 + $0x3b8] sm:$0xff]  }
 0x4b3   :  { %7427 = vmatpush3.bf16.msra.mxu0 %v7892_v58  ;;  %6402 = vmatprep.mubr.bf16.mxu0 %v5168_v44 }
 0x4b4   :  { %7449 = vmatpush3.bf16.msra.mxu1 %v7893_v46  ;;  %6443 = vmatprep.mubr.bf16.mxu1 %v5170_v47 }
 0x4b5   :  { %7456 = vmatprep.subr.bf16.mxu0 %v7894_v62  ;;  %7478 = vmatprep.subr.bf16.mxu1 %v7895_v63 }
 0x4b6   :  { %6403 = vmatmul.mubr.bf16.vlgmr.msra.gmra.mrb[32].mxu0 %v5167_v60 }
 0x4b7   :  { %6444 = vmatmul.mubr.bf16.vlgmr.msra.gmra.mrb[32].mxu1 %v5169_v45  ;;  %7457 = vmatpush3.bf16.msra.mxu0 %v7896_v0  ;;  %v7195_v0 = vld [vmem:[#allocation13] ss:$0 sm:$0xff] }
 0x4b8   :  { %7479 = vmatpush3.bf16.msra.mxu1 %v7897_v1  ;;  %7458 = vmatprep.subr.bf16.mxu0 %v7898_v2 }
 0x4b9   :  { %7480 = vmatprep.subr.bf16.mxu1 %v7899_v3 }
 0x4bb   :  { %7459 = vmatpush3.bf16.msra.mxu0 %v7900_v51 }
 0x4bc   :  { %7481 = vmatpush3.bf16.msra.mxu1 %v7901_v4  ;;  %7460 = vmatprep.subr.bf16.mxu0 %v7902_v23 }
 0x4bd   :  { %7482 = vmatprep.subr.bf16.mxu1 %v7903_v26 }
 0x4bf   :  { %7461 = vmatpush3.bf16.msra.mxu0 %v7904_v5 }
 0x4c0   :  { %7483 = vmatpush3.bf16.msra.mxu1 %v7905_v6  ;;  %7462 = vmatprep.subr.bf16.mxu0 %v7906_v7 }
 0x4c1   :  { %7484 = vmatprep.subr.bf16.mxu1 %v7907_v10 }
 0x4c3   :  { %7463 = vmatpush3.bf16.msra.mxu0 %v7908_v11 }
 0x4c4   :  { %7485 = vmatpush3.bf16.msra.mxu1 %v7909_v12  ;;  %7464 = vmatprep.subr.bf16.mxu0 %v7910_v17 }
 0x4c5   :  { %7486 = vmatprep.subr.bf16.mxu1 %v7911_v21 }
 0x4c7   :  { %7465 = vmatpush3.bf16.msra.mxu0 %v7912_v24 }
 0x4c8   :  { %7487 = vmatpush3.bf16.msra.mxu1 %v7913_v25  ;;  %7466 = vmatprep.subr.bf16.mxu0 %v7914_v27 }
 0x4c9   :  { %7488 = vmatprep.subr.bf16.mxu1 %v7915_v28 }
 0x4cb   :  { %7467 = vmatpush3.bf16.msra.mxu0 %v7916_v29 }
 0x4cc   :  { %7489 = vmatpush3.bf16.msra.mxu1 %v7917_v31  ;;  %7468 = vmatprep.subr.bf16.mxu0 %v7918_v32 }
 0x4cd   :  { %7490 = vmatprep.subr.bf16.mxu1 %v7919_v33 }
 0x4cf   :  { %7469 = vmatpush3.bf16.msra.mxu0 %v7920_v16 }
 0x4d0   :  { %7491 = vmatpush3.bf16.msra.mxu1 %v7921_v50  ;;  %7470 = vmatprep.subr.bf16.mxu0 %v7922_v40 }
 0x4d1   :  { %7492 = vmatprep.subr.bf16.mxu1 %v7923_v34 }
 0x4d3   :  { %7471 = vmatpush3.bf16.msra.mxu0 %v7924_v20 }
 0x4d4   :  { %7493 = vmatpush3.bf16.msra.mxu1 %v7925_v42 }
 0x529   :  { %v5032_v22 = vpop.f32.mrb[20].mxu0 }
 0x52a   :  { %v7532_v37 = vadd.f32 %v5032_v22, %v1850_v18  ;;  %v5118_v30 = vpop.f32.mrb[20].mxu1  ;;  %v5034_v38 = vpop.f32.mrb[21].mxu0 }
 0x52b   :  { %v7536_v39 = vadd.f32 %v5118_v30, %v1858_v35  ;;  %v7533_v43 = vadd.f32 %v5034_v38, %v1854_v55  ;;  %v5120_v48 = vpop.f32.mrb[21].mxu1  ;;  %v5036_v9 = vpop.f32.mrb[22].mxu0 }
 0x52c   :  { %v7537_v49 = vadd.f32 %v5120_v48, %v1862_v36  ;;  %v7534_v52 = vadd.f32 %v5036_v9, %v1850_v18  ;;  %v5122_v53 = vpop.f32.mrb[22].mxu1  ;;  %v5038_v13 = vpop.f32.mrb[23].mxu0  ;;  %v5139_v14 = vmax.f32 %v7532_v37, 0.0 }
 0x52d   :  { %v7538_v54 = vadd.f32 %v5122_v53, %v1858_v35  ;;  %v7535_v56 = vadd.f32 %v5038_v13, %v1854_v55  ;;  %v5124_v41 = vpop.f32.mrb[23].mxu1  ;;  %v5141_v58 = vmax.f32 %v7536_v39, 0.0  ;;  %v5140_v19 = vmax.f32 %v7533_v43, 0.0 }
 0x52e   :  { %v5155_v57 = vmax.f32 %v7534_v52, 0.0  ;;  %v7539_v15 = vadd.f32 %v5124_v41, %v1862_v36  ;;  %v5142_v60 = vmax.f32 %v7537_v49, 0.0 }
 0x52f   :  { %v5157_v8 = vmax.f32 %v7538_v54, 0.0  ;;  %v5156_v59 = vmax.f32 %v7535_v56, 0.0 }
 0x530   :  { %v5171_v61 = vpack.c.bf16 %v5155_v57, %v5139_v14  ;;  %v5158_v46 = vmax.f32 %v7539_v15, 0.0 }
 0x531   :  { %v5173_v45 = vpack.c.bf16 %v5157_v8, %v5141_v58  ;;  %v5172_v44 = vpack.c.bf16 %v5156_v59, %v5140_v19 }
 0x532   :  { %v5174_v62 = vpack.c.bf16 %v5158_v46, %v5142_v60 }
 0x533   :  { %6484 = vmatprep.mubr.bf16.mxu0 %v5172_v44 }
 0x534   :  { %6525 = vmatprep.mubr.bf16.mxu1 %v5174_v62  ;;  %6485 = vmatmul.mubr.bf16.vlgmr.msra.gmra.mrb[36].mxu0 %v5171_v61 }
 0x535   :  { %6526 = vmatmul.mubr.bf16.vlgmr.msra.gmra.mrb[36].mxu1 %v5173_v45 }
 0x549   :  { %v7340_v63 = vpop.f32.mrb[24].mxu0 }
 0x54a   :  { %v7362_v47 = vpop.f32.mrb[24].mxu1  ;;  %v7341_v1 = vpop.f32.mrb[25].mxu0 }
 0x54b   :  { %v7342_v2 = vadd.f32 %v7341_v1, %v7340_v63  ;;  %v7363_v3 = vpop.f32.mrb[25].mxu1  ;;  %v7343_v51 = vpop.f32.mrb[26].mxu0 }
 0x54c   :  { %v7364_v4 = vadd.f32 %v7363_v3, %v7362_v47  ;;  %v7365_v23 = vpop.f32.mrb[26].mxu1  ;;  %v7344_v26 = vpop.f32.mrb[27].mxu0 }
 0x54d   :  { %v6241_v5 = vadd.f32 %v7342_v2, %v7195_v0  ;;  %v7345_v6 = vadd.f32 %v7344_v26, %v7343_v51  ;;  %v7366_v7 = vpop.f32.mrb[27].mxu1 }
 0x54e   :  { %v7367_v10 = vadd.f32 %v7366_v7, %v7365_v23 }
 0x54f   :  { %v6282_v11 = vadd.f32 %v7364_v4, %v6241_v5  ;;  %v6244_v12 = vadd.f32 %v7345_v6, %v7195_v0 }
 0x551   :  { %v6285_v17 = vadd.f32 %v7367_v10, %v6244_v12 }
 0x569   :  { %v7384_v21 = vpop.f32.mrb[28].mxu0 }
 0x56a   :  { %v7406_v24 = vpop.f32.mrb[28].mxu1  ;;  %v7385_v25 = vpop.f32.mrb[29].mxu0 }
 0x56b   :  { %v7386_v27 = vadd.f32 %v7385_v25, %v7384_v21  ;;  %v7407_v28 = vpop.f32.mrb[29].mxu1  ;;  %v7387_v29 = vpop.f32.mrb[30].mxu0 }
 0x56c   :  { %v7408_v31 = vadd.f32 %v7407_v28, %v7406_v24  ;;  %v7409_v32 = vpop.f32.mrb[30].mxu1  ;;  %v7388_v33 = vpop.f32.mrb[31].mxu0 }
 0x56d   :  { %v6323_v16 = vadd.f32 %v7386_v27, %v6282_v11  ;;  %v7389_v50 = vadd.f32 %v7388_v33, %v7387_v29  ;;  %v7410_v40 = vpop.f32.mrb[31].mxu1 }
 0x56e   :  { %v7411_v34 = vadd.f32 %v7410_v40, %v7409_v32 }
 0x56f   :  { %v6364_v20 = vadd.f32 %v7408_v31, %v6323_v16  ;;  %v6326_v42 = vadd.f32 %v7389_v50, %v6285_v17 }
 0x571   :  { %v6367_v18 = vadd.f32 %v7411_v34, %v6326_v42 }
 0x589   :  { %v7428_v35 = vpop.f32.mrb[32].mxu0 }
 0x58a   :  { %v7450_v55 = vpop.f32.mrb[32].mxu1  ;;  %v7429_v36 = vpop.f32.mrb[33].mxu0 }
 0x58b   :  { %v7430_v22 = vadd.f32 %v7429_v36, %v7428_v35  ;;  %v7451_v37 = vpop.f32.mrb[33].mxu1  ;;  %v7431_v30 = vpop.f32.mrb[34].mxu0 }
 0x58c   :  { %v7452_v38 = vadd.f32 %v7451_v37, %v7450_v55  ;;  %v7453_v39 = vpop.f32.mrb[34].mxu1  ;;  %v7432_v43 = vpop.f32.mrb[35].mxu0 }
 0x58d   :  { %v6405_v48 = vadd.f32 %v7430_v22, %v6364_v20  ;;  %v7433_v9 = vadd.f32 %v7432_v43, %v7431_v30  ;;  %v7454_v49 = vpop.f32.mrb[35].mxu1 }
 0x58e   :  { %v7455_v52 = vadd.f32 %v7454_v49, %v7453_v39 }
 0x58f   :  { %v6446_v53 = vadd.f32 %v7452_v38, %v6405_v48  ;;  %v6408_v13 = vadd.f32 %v7433_v9, %v6367_v18 }
 0x591   :  { %v6449_v54 = vadd.f32 %v7455_v52, %v6408_v13 }
 0x607   :  { %v7472_v56 = vpop.f32.mrb[36].mxu0 }
 0x608   :  { %v7494_v41 = vpop.f32.mrb[36].mxu1  ;;  %v7473_v14 = vpop.f32.mrb[37].mxu0 }
 0x609   :  { %v7474_v57 = vadd.f32 %v7473_v14, %v7472_v56  ;;  %v7495_v15 = vpop.f32.mrb[37].mxu1  ;;  %v7475_v58 = vpop.f32.mrb[38].mxu0 }
 0x60a   :  { %v7496_v19 = vadd.f32 %v7495_v15, %v7494_v41  ;;  %v7497_v8 = vpop.f32.mrb[38].mxu1  ;;  %v7476_v59 = vpop.f32.mrb[39].mxu0 }
 0x60b   :  { %v6487_v60 = vadd.f32 %v7474_v57, %v6446_v53  ;;  %v7477_v61 = vadd.f32 %v7476_v59, %v7475_v58  ;;  %v7498_v46 = vpop.f32.mrb[39].mxu1 }
 0x60c   :  { %v7499_v45 = vadd.f32 %v7498_v46, %v7497_v8 }
 0x60d   :  { %v6528_v44 = vadd.f32 %v7496_v19, %v6487_v60  ;;  %v6490_v62 = vadd.f32 %v7477_v61, %v6449_v54 }
 0x60f   :  { %6534 = vst [vmem:[%s8447_s9] sm:$0xff] %v6528_v44  ;;  %v6531_v63 = vadd.f32 %v7499_v45, %v6490_v62 }
 0x611   :  { %6535 = vst [vmem:[%s8447_s9 + $0x8] sm:$0xff] %v6531_v63 }
 0x612   :  { %6540 = vsyncpa [#allocation3], 1 }
 0x613   :  { %6541 = vsyncpa [#allocation5], 1 }
 0x614   :  { %6542 = vsyncpa [#allocation8], 1 }
 0x615   :  { %6543 = vsyncpa [#allocation11], 1 }
 0x616   :  { %6544 = vsyncpa [#allocation14], 1 }

// kernel: _encoder_forward_impl.1
= control target key start
LH: loop header
LB: loop body
LE: loop exit
PB: predicated region body
PF: predicated region fallthrough
CT: control target
= control target key end

     0   :  { %14 = vsyncpa [#allocation3], 0  ;;  %s8438_s0 = inlined_call_operand.vmem [shape: f32[16,32], index: 0, kind: input, shape index: {}]   ;;  %s8439_s1 = inlined_call_operand.hbm [shape: bf16[32,512], index: 1, kind: input, shape index: {}]   ;;  %s8440_s2 = inlined_call_operand.hbm [shape: f32[1,512], index: 2, kind: input, shape index: {}]   ;;  %s8441_s3 = inlined_call_operand.hbm [shape: bf16[512,512], index: 3, kind: input, shape index: {}]   ;;  %s8442_s4 = inlined_call_operand.hbm [shape: f32[1,512], index: 4, kind: input, shape index: {}]   ;;  %s8443_s5 = inlined_call_operand.hbm [shape: bf16[512,2048], index: 5, kind: input, shape index: {}]   ;;  %s8444_s6 = inlined_call_operand.hbm [shape: f32[1,2048], index: 6, kind: input, shape index: {}]   ;;  %s8445_s7 = inlined_call_operand.hbm [shape: bf16[2048,128], index: 7, kind: input, shape index: {}]   ;;  %s8446_s8 = inlined_call_operand.hbm [shape: f32[1,128], index: 8, kind: input, shape index: {}]   ;;  %s8447_s9 = inlined_call_operand.vmem [shape: f32[16,128], index: 9, kind: output, shape index: {}]  }
   0x1   :  { %15 = vsyncpa [#allocation5], 0 }
   0x2   :  { %16 = vsyncpa [#allocation8], 0 }
   0x3   :  { %17 = vsyncpa [#allocation11], 0 }
   0x4   :  { %18 = vsyncpa [#allocation14], 0  ;;  %s8112_s30 = smov [#allocation4]   ;;  %s8113_s11 = smov [#allocation7]  }
   0x5   :  { %s39_s10 = sshll.u32 %s8112_s30, 4  ;;  %s61_s12 = sshll.u32 %s8113_s11, 4  ;;  %s40_s10 = int_to_ptr.vmem [resolvable:$true] %s39_s10  ;;  %s62_s12 = int_to_ptr.vmem [resolvable:$true] %s61_s12 }
   0x6   :  { %s7926_s15 = scalar_lea.hbm %s8440_s2, 64 }
   0x7   :  { %p7927_p0 = scmp.ne.s32.totalorder %s8440_s2, %s7926_s15  ;;  %p7930_p1 = scmp.lt.u32.totalorder %s7926_s15, %s8440_s2 }
   0x9   :  { %p7932_p2 = pnand %p7930_p1, %p7927_p0 }
   0xb   :  { %7935 = shalt.err (!%p7932_p2)
}
   0xc   :  { %s7936_s20 = scalar_lea.vmem %s40_s10, 64  ;;  %p7941_p4 = scmp.lt.s32.totalorder %s40_s10, %s40_s10 }
   0xd   :  { %p7937_p3 = scmp.ne.s32.totalorder %s40_s10, %s7936_s20  ;;  %p7942_p5 = scmp.lt.s32.totalorder %s7936_s20, %s7936_s20 }
   0xf   :  { %p7943_p6 = por %p7942_p5, %p7941_p4 }
  0x11   :  { %p7944_p7 = pnand %p7943_p6, %p7937_p3 }
  0x13   :  { %7947 = shalt.err (!%p7944_p7)
}
  0x14   :  { %42 = dma.hbm_to_vmem [thread:$0]  %s8440_s2, 64, %s40_s10, [#allocation5]  }
  0x15   :  { %s7948_s25 = scalar_lea.hbm %s8442_s4, 64 }
  0x16   :  { %p7949_p8 = scmp.ne.s32.totalorder %s8442_s4, %s7948_s25  ;;  %p7952_p9 = scmp.lt.u32.totalorder %s7948_s25, %s8442_s4 }
  0x18   :  { %p7954_p10 = pnand %p7952_p9, %p7949_p8 }
  0x1a   :  { %7957 = shalt.err (!%p7954_p10)
}
  0x1b   :  { %s7958_s30 = scalar_lea.vmem %s62_s12, 64  ;;  %p7963_p12 = scmp.lt.s32.totalorder %s62_s12, %s62_s12 }
  0x1c   :  { %p7959_p11 = scmp.ne.s32.totalorder %s62_s12, %s7958_s30  ;;  %p7964_p13 = scmp.lt.s32.totalorder %s7958_s30, %s7958_s30 }
  0x1e   :  { %p7965_p0 = por %p7964_p13, %p7963_p12 }
  0x20   :  { %p7966_p1 = pnand %p7965_p0, %p7959_p11 }
  0x22   :  { %7969 = shalt.err (!%p7966_p1)
}
  0x23   :  { %64 = dma.hbm_to_vmem [thread:$0]  %s8442_s4, 64, %s62_s12, [#allocation8]  }
  0x24   :  { %s8114_s11 = smov [#allocation10]   ;;  %s8115_s14 = smov [#allocation2]  }
  0x25   :  { %s83_s13 = sshll.u32 %s8114_s11, 4  ;;  %s26_s15 = sshll.u32 %s8115_s14, 4  ;;  %s84_s13 = int_to_ptr.vmem [resolvable:$true] %s83_s13  ;;  %s8200_s15 = int_to_ptr.vmem [resolvable:$true] %s26_s15 }
  0x26   :  { %s7970_s18 = scalar_lea.hbm %s8444_s6, 256 }
  0x27   :  { %p7971_p2 = scmp.ne.s32.totalorder %s8444_s6, %s7970_s18  ;;  %p7974_p3 = scmp.lt.u32.totalorder %s7970_s18, %s8444_s6 }
  0x29   :  { %p7976_p4 = pnand %p7974_p3, %p7971_p2 }
  0x2b   :  { %7979 = shalt.err (!%p7976_p4)
}
  0x2c   :  { %s7980_s4 = scalar_lea.vmem %s84_s13, 256  ;;  %p7985_p6 = scmp.lt.s32.totalorder %s84_s13, %s84_s13 }
  0x2d   :  { %p7981_p5 = scmp.ne.s32.totalorder %s84_s13, %s7980_s4  ;;  %p7986_p7 = scmp.lt.s32.totalorder %s7980_s4, %s7980_s4 }
  0x2f   :  { %p7987_p8 = por %p7986_p7, %p7985_p6 }
  0x31   :  { %p7988_p9 = pnand %p7987_p8, %p7981_p5 }
  0x33   :  { %7991 = shalt.err (!%p7988_p9)
}
  0x34   :  { %86 = dma.hbm_to_vmem [thread:$0]  %s8444_s6, 256, %s84_s13, [#allocation11]  }
  0x35   :  { %s7992_s26 = scalar_lea.hbm %s8439_s1, 1024 }
  0x36   :  { %p7993_p10 = scmp.ne.s32.totalorder %s8439_s1, %s7992_s26  ;;  %p7996_p11 = scmp.lt.u32.totalorder %s7992_s26, %s8439_s1 }
  0x38   :  { %p7998_p12 = pnand %p7996_p11, %p7993_p10 }
  0x3a   :  { %8001 = shalt.err (!%p7998_p12)
}
  0x3b   :  { %s8002_s2 = scalar_lea.vmem %s8200_s15, 1024  ;;  %p8007_p0 = scmp.lt.s32.totalorder %s8200_s15, %s8200_s15 }
  0x3c   :  { %p8003_p13 = scmp.ne.s32.totalorder %s8200_s15, %s8002_s2  ;;  %p8008_p1 = scmp.lt.s32.totalorder %s8002_s2, %s8002_s2 }
  0x3e   :  { %p8009_p2 = por %p8008_p1, %p8007_p0 }
  0x40   :  { %p8010_p3 = pnand %p8009_p2, %p8003_p13 }
  0x42   :  { %8013 = shalt.err (!%p8010_p3)
}
  0x43   :  { %s8116_s6 = smov 256   ;;  %s8117_s10 = smov 16  }
  0x44   :  { %32 = dma.hbm_to_vmem [thread:$0]  %s8439_s1, 1024, %s8200_s15, [#allocation3], %s8116_s6, %s8116_s6, %s8117_s10  }
  0x45   :  { %s8118_s14 = smov [#allocation6]   ;;  %s8119_s17 = smov [#allocation9]  }
  0x46   :  { %s48_s16 = sshll.u32 %s8118_s14, 4  ;;  %s70_s18 = sshll.u32 %s8119_s17, 4  ;;  %s49_s16 = int_to_ptr.vmem [resolvable:$true] %s48_s16  ;;  %s8231_s18 = int_to_ptr.vmem [resolvable:$true] %s70_s18 }
  0x47   :  { %s8014_s21 = scalar_lea.hbm %s8441_s3, 16384 }
  0x48   :  { %p8015_p4 = scmp.ne.s32.totalorder %s8441_s3, %s8014_s21  ;;  %p8018_p5 = scmp.lt.u32.totalorder %s8014_s21, %s8441_s3 }
  0x4a   :  { %p8020_p6 = pnand %p8018_p5, %p8015_p4 }
  0x4c   :  { %8023 = shalt.err (!%p8020_p6)
}
  0x4d   :  { %s8024_s1 = scalar_lea.vmem %s49_s16, 16384  ;;  %p8029_p8 = scmp.lt.s32.totalorder %s49_s16, %s49_s16 }
  0x4e   :  { %p8025_p7 = scmp.ne.s32.totalorder %s49_s16, %s8024_s1  ;;  %p8030_p9 = scmp.lt.s32.totalorder %s8024_s1, %s8024_s1 }
  0x50   :  { %p8031_p10 = por %p8030_p9, %p8029_p8 }
  0x52   :  { %p8032_p11 = pnand %p8031_p10, %p8025_p7 }
  0x54   :  { %8035 = shalt.err (!%p8032_p11)
}
  0x55   :  { %54 = dma.hbm_to_vmem [thread:$0]  %s8441_s3, 16384, %s49_s16, [#allocation5], %s8116_s6, %s8116_s6, %s8117_s10  }
  0x56   :  { %s8036_s27 = scalar_lea.hbm %s8443_s5, 65536 }
  0x57   :  { %p8037_p12 = scmp.ne.s32.totalorder %s8443_s5, %s8036_s27  ;;  %p8040_p13 = scmp.lt.u32.totalorder %s8036_s27, %s8443_s5 }
  0x59   :  { %p8042_p0 = pnand %p8040_p13, %p8037_p12 }
  0x5b   :  { %8045 = shalt.err (!%p8042_p0)
}
  0x5c   :  { %s8046_s11 = scalar_lea.vmem %s8231_s18, 65536  ;;  %p8051_p2 = scmp.lt.s32.totalorder %s8231_s18, %s8231_s18 }
  0x5d   :  { %p8047_p1 = scmp.ne.s32.totalorder %s8231_s18, %s8046_s11  ;;  %p8052_p3 = scmp.lt.s32.totalorder %s8046_s11, %s8046_s11 }
  0x5f   :  { %p8053_p4 = por %p8052_p3, %p8051_p2 }
  0x61   :  { %p8054_p5 = pnand %p8053_p4, %p8047_p1 }
  0x63   :  { %8057 = shalt.err (!%p8054_p5)
}
  0x64   :  { %s8120_s3 = smov 1024   ;;  %s8121_s6 = smov 64  }
  0x65   :  { %76 = dma.hbm_to_vmem [thread:$0]  %s8443_s5, 65536, %s8231_s18, [#allocation8], %s8120_s3, %s8120_s3, %s8121_s6  }
  0x66   :  { %s8122_s14 = smov [#allocation12]   ;;  %s8123_s17 = smov [#allocation13]  }
  0x67   :  { %s92_s16 = sshll.u32 %s8122_s14, 4  ;;  %s105_s19 = sshll.u32 %s8123_s17, 4  ;;  %s93_s16 = int_to_ptr.vmem [resolvable:$true] %s92_s16  ;;  %s106_s19 = int_to_ptr.vmem [resolvable:$true] %s105_s19 }
  0x68   :  { %s8058_s22 = scalar_lea.hbm %s8445_s7, 16384 }
  0x69   :  { %p8059_p6 = scmp.ne.s32.totalorder %s8445_s7, %s8058_s22  ;;  %p8062_p7 = scmp.lt.u32.totalorder %s8058_s22, %s8445_s7 }
  0x6b   :  { %p8064_p8 = pnand %p8062_p7, %p8059_p6 }
  0x6d   :  { %8067 = shalt.err (!%p8064_p8)
}
  0x6e   :  { %s8068_s5 = scalar_lea.vmem %s93_s16, 16384  ;;  %p8073_p10 = scmp.lt.s32.totalorder %s93_s16, %s93_s16 }
  0x6f   :  { %p8069_p9 = scmp.ne.s32.totalorder %s93_s16, %s8068_s5  ;;  %p8074_p11 = scmp.lt.s32.totalorder %s8068_s5, %s8068_s5 }
  0x71   :  { %p8075_p12 = por %p8074_p11, %p8073_p10 }
  0x73   :  { %p8076_p13 = pnand %p8075_p12, %p8069_p9 }
  0x75   :  { %8079 = shalt.err (!%p8076_p13)
}
  0x76   :  { %s8124_s18 = smov 4   ;;  %s8080_s27 = scalar_lea.hbm %s8446_s8, 16 }
  0x77   :  { %98 = dma.hbm_to_vmem [thread:$0]  %s8445_s7, 16384, %s93_s16, [#allocation11], %s8121_s6, %s8121_s6, %s8124_s18  }
  0x78   :  { %p8081_p0 = scmp.ne.s32.totalorder %s8446_s8, %s8080_s27  ;;  %p8084_p1 = scmp.lt.u32.totalorder %s8080_s27, %s8446_s8 }
  0x7a   :  { %p8086_p2 = pnand %p8084_p1, %p8081_p0 }
  0x7c   :  { %8089 = shalt.err (!%p8086_p2)
}
  0x7d   :  { %s8090_s11 = scalar_lea.vmem %s106_s19, 16  ;;  %s8094_s3 = scalar_lea.vmem %s106_s19, 32 }
  0x7e   :  { %p8091_p3 = scmp.ne.s32.totalorder %s106_s19, %s8090_s11  ;;  %p8095_p4 = scmp.lt.s32.totalorder %s106_s19, %s106_s19 }
  0x7f   :  { %p8096_p5 = scmp.lt.s32.totalorder %s8094_s3, %s8090_s11 }
  0x81   :  { %p8097_p6 = por %p8096_p5, %p8095_p4 }
  0x83   :  { %p8098_p7 = pnand %p8097_p6, %p8091_p3 }
  0x85   :  { %8101 = shalt.err (!%p8098_p7)
}
  0x86   :  { %108 = dma.hbm_to_vmem [thread:$0]  %s8446_s8, 16, %s106_s19, [#allocation14]  }
  0x87   :  { %8102 = dma.done.wait [#allocation3], 1024  }
  0x88   :  { %8103 = vsyncadd [#allocation3], 4294966272 }
  0x89   :  { %8104 = dma.done.wait [#allocation5], 16448  }
  0x8a   :  { %8105 = vsyncadd [#allocation5], 4294950848 }
  0x8b   :  { %8106 = dma.done.wait [#allocation8], 65600  }
  0x8c   :  { %8107 = vsyncadd [#allocation8], 4294901696 }
  0x8d   :  { %8108 = dma.done.wait [#allocation11], 16640  }
  0x8e   :  { %8109 = vsyncadd [#allocation11], 4294950656 }
  0x8f   :  { %8110 = dma.done.wait [#allocation14], 16  }
  0x90   :  { %8111 = vsyncadd [#allocation14], 4294967280  ;;  %v8125_v0 = vmov 0   ;;  %v7594_v1 = vld [vmem:[#allocation2 + $0x4] ss:$16 sps:$4 sm:$0xff]   ;;  %v135_v6 = vld [vmem:[%s8438_s0 + $0x8] sm:$0xff] }
  0x91   :  { %243 = vmatprep.mubr.bf16.mxu0 %v8125_v0  ;;  %286 = vmatprep.mubr.bf16.mxu1 %v8125_v0  ;;  %v7596_v2 = vld [vmem:[#allocation2] ss:$16 sps:$4 sm:$0xff]   ;;  %v7597_v3 = vld [vmem:[#allocation2 + $0x24] ss:$16 sps:$4 sm:$0xff]   ;;  %v7600_v7 = vld [vmem:[#allocation2 + $0xc] ss:$16 sps:$4 sm:$0xff]  }
  0x92   :  { %211 = vmatprep.subr.bf16.mxu0 %v7594_v1  ;;  %v7599_v4 = vld [vmem:[#allocation2 + $0x20] ss:$16 sps:$4 sm:$0xff]   ;;  %v7602_v8 = vld [vmem:[#allocation2 + $0x8] ss:$16 sps:$4 sm:$0xff]   ;;  %v7603_v9 = vld [vmem:[#allocation2 + $0x2c] ss:$16 sps:$4 sm:$0xff]   ;;  %254 = vmatprep.subr.bf16.mxu1 %v7600_v7 }
  0x93   :  { %v134_v5 = vld [vmem:[%s8438_s0] sm:$0xff]  ;;  %212 = vmatpush1.bf16.msra.mxu0 %v7596_v2  ;;  %v7605_v10 = vld [vmem:[#allocation2 + $0x28] ss:$16 sps:$4 sm:$0xff]   ;;  %vm207_vm0 = vcmask 261120   ;;  %255 = vmatpush1.bf16.msra.mxu1 %v7602_v8  ;;  %v7609_v16 = vld [vmem:[#allocation6 + $0x8] ss:$16 sps:$4 sm:$0xff]  }
  0x94   :  { %213 = vmatprep.subr.bf16.mxu0 %v7597_v3  ;;  %v136_v11 = vpack.c.bf16 %v135_v6, %v134_v5  ;;  %v7606_v12 = vld [vmem:[#allocation6] ss:$16 sps:$4 sm:$0xff]   ;;  %v7608_v13 = vld [vmem:[#allocation6 + $0x4] ss:$16 sps:$4 sm:$0xff]   ;;  %256 = vmatprep.subr.bf16.mxu1 %v7603_v9  ;;  %v7611_v14 = vld [vmem:[#allocation6 + $0xc] ss:$16 sps:$4 sm:$0xff]  }
  0x95   :  { %v7614_v15 = vld [vmem:[#allocation6 + $0x24] ss:$16 sps:$4 sm:$0xff]   ;;  %v7612_v17 = vld [vmem:[#allocation6 + $0x20] ss:$16 sps:$4 sm:$0xff]   ;;  %v7617_v18 = vld [vmem:[#allocation6 + $0x2c] ss:$16 sps:$4 sm:$0xff]  }
  0x96   :  { %v7620_v19 = vld [vmem:[#allocation6 + $0x44] ss:$16 sps:$4 sm:$0xff]   ;;  %v7615_v20 = vld [vmem:[#allocation6 + $0x28] ss:$16 sps:$4 sm:$0xff]   ;;  %v7618_v21 = vld [vmem:[#allocation6 + $0x40] ss:$16 sps:$4 sm:$0xff]  }
  0x97   :  { %214 = vmatpush1.bf16.msra.mxu0 %v7599_v4  ;;  %257 = vmatpush1.bf16.msra.mxu1 %v7605_v10  ;;  %v7623_v22 = vld [vmem:[#allocation6 + $0x4c] ss:$16 sps:$4 sm:$0xff]   ;;  %v7626_v23 = vld [vmem:[#allocation6 + $0x64] ss:$16 sps:$4 sm:$0xff]   ;;  %v7621_v24 = vld [vmem:[#allocation6 + $0x48] ss:$16 sps:$4 sm:$0xff]  }
  0x98   :  { %1099 = vmatprep.subr.bf16.mxu0 %v7608_v13  ;;  %1185 = vmatprep.subr.bf16.mxu1 %v7611_v14  ;;  %v7624_v25 = vld [vmem:[#allocation6 + $0x60] ss:$16 sps:$4 sm:$0xff]   ;;  %v7629_v26 = vld [vmem:[#allocation6 + $0x6c] ss:$16 sps:$4 sm:$0xff]   ;;  %v7632_v27 = vld [vmem:[#allocation6 + $0x84] ss:$16 sps:$4 sm:$0xff]   ;;  %v147_v14 = vlaneseq }
  0x99   :  { %v7627_v28 = vld [vmem:[#allocation6 + $0x68] ss:$16 sps:$4 sm:$0xff]   ;;  %v7630_v29 = vld [vmem:[#allocation6 + $0x80] ss:$16 sps:$4 sm:$0xff]   ;;  %v7635_v30 = vld [vmem:[#allocation6 + $0x8c] ss:$16 sps:$4 sm:$0xff]  }
  0x9a   :  { %6553 = vmatmul.mubr.msk.bf16.vlgmr.msra.gmra.mrb[0].mxu0 %vm207_vm0, %v136_v11  ;;  %6554 = vmatmul.mubr.msk.bf16.vlgmr.msra.gmra.mrb[0].mxu1 %vm207_vm0, %v136_v11  ;;  %v7638_v31 = vld [vmem:[#allocation6 + $0xa4] ss:$16 sps:$4 sm:$0xff]   ;;  %v7633_v32 = vld [vmem:[#allocation6 + $0x88] ss:$16 sps:$4 sm:$0xff]   ;;  %v7636_v33 = vld [vmem:[#allocation6 + $0xa0] ss:$16 sps:$4 sm:$0xff]  }
  0x9b   :  { %1100 = vmatpush1.bf16.msra.mxu0 %v7606_v12  ;;  %1186 = vmatpush1.bf16.msra.mxu1 %v7609_v16  ;;  %v7641_v34 = vld [vmem:[#allocation6 + $0xac] ss:$16 sps:$4 sm:$0xff]   ;;  %v7644_v35 = vld [vmem:[#allocation6 + $0xc4] ss:$16 sps:$4 sm:$0xff]   ;;  %v7639_v36 = vld [vmem:[#allocation6 + $0xa8] ss:$16 sps:$4 sm:$0xff]  }
  0x9c   :  { %1101 = vmatprep.subr.bf16.mxu0 %v7614_v15  ;;  %1187 = vmatprep.subr.bf16.mxu1 %v7617_v18  ;;  %v7642_v37 = vld [vmem:[#allocation6 + $0xc0] ss:$16 sps:$4 sm:$0xff]   ;;  %v7647_v38 = vld [vmem:[#allocation6 + $0xcc] ss:$16 sps:$4 sm:$0xff]   ;;  %v7650_v39 = vld [vmem:[#allocation6 + $0xe4] ss:$16 sps:$4 sm:$0xff]  }
  0x9d   :  { %v7645_v40 = vld [vmem:[#allocation6 + $0xc8] ss:$16 sps:$4 sm:$0xff]   ;;  %v7648_v41 = vld [vmem:[#allocation6 + $0xe0] ss:$16 sps:$4 sm:$0xff]   ;;  %v7653_v42 = vld [vmem:[#allocation6 + $0xec] ss:$16 sps:$4 sm:$0xff]  }
  0x9e   :  { %v7656_v43 = vld [vmem:[#allocation6 + $0x104] ss:$16 sps:$4 sm:$0xff]   ;;  %v7651_v44 = vld [vmem:[#allocation6 + $0xe8] ss:$16 sps:$4 sm:$0xff]   ;;  %v7654_v45 = vld [vmem:[#allocation6 + $0x100] ss:$16 sps:$4 sm:$0xff]  }
  0x9f   :  { %1102 = vmatpush1.bf16.msra.mxu0 %v7612_v17  ;;  %1188 = vmatpush1.bf16.msra.mxu1 %v7615_v20  ;;  %v7659_v46 = vld [vmem:[#allocation6 + $0x10c] ss:$16 sps:$4 sm:$0xff]   ;;  %v7662_v47 = vld [vmem:[#allocation6 + $0x124] ss:$16 sps:$4 sm:$0xff]   ;;  %v7657_v48 = vld [vmem:[#allocation6 + $0x108] ss:$16 sps:$4 sm:$0xff]  }
  0xa0   :  { %1103 = vmatprep.subr.bf16.mxu0 %v7620_v19  ;;  %1189 = vmatprep.subr.bf16.mxu1 %v7623_v22  ;;  %v7660_v49 = vld [vmem:[#allocation6 + $0x120] ss:$16 sps:$4 sm:$0xff]   ;;  %v7665_v50 = vld [vmem:[#allocation6 + $0x12c] ss:$16 sps:$4 sm:$0xff]   ;;  %v7668_v51 = vld [vmem:[#allocation6 + $0x144] ss:$16 sps:$4 sm:$0xff]  }
  0xa1   :  { %v7663_v52 = vld [vmem:[#allocation6 + $0x128] ss:$16 sps:$4 sm:$0xff]   ;;  %v7666_v53 = vld [vmem:[#allocation6 + $0x140] ss:$16 sps:$4 sm:$0xff]   ;;  %v7671_v54 = vld [vmem:[#allocation6 + $0x14c] ss:$16 sps:$4 sm:$0xff]  }
  0xa2   :  { %v7674_v55 = vld [vmem:[#allocation6 + $0x164] ss:$16 sps:$4 sm:$0xff]   ;;  %v7669_v56 = vld [vmem:[#allocation6 + $0x148] ss:$16 sps:$4 sm:$0xff]   ;;  %v7672_v57 = vld [vmem:[#allocation6 + $0x160] ss:$16 sps:$4 sm:$0xff]  }
  0xa3   :  { %1104 = vmatpush1.bf16.msra.mxu0 %v7618_v21  ;;  %1190 = vmatpush1.bf16.msra.mxu1 %v7621_v24  ;;  %v7677_v58 = vld [vmem:[#allocation6 + $0x16c] ss:$16 sps:$4 sm:$0xff]   ;;  %v7680_v59 = vld [vmem:[#allocation6 + $0x184] ss:$16 sps:$4 sm:$0xff]   ;;  %v7675_v60 = vld [vmem:[#allocation6 + $0x168] ss:$16 sps:$4 sm:$0xff]  }
  0xa4   :  { %1105 = vmatprep.subr.bf16.mxu0 %v7626_v23  ;;  %1191 = vmatprep.subr.bf16.mxu1 %v7629_v26  ;;  %v7678_v61 = vld [vmem:[#allocation6 + $0x180] ss:$16 sps:$4 sm:$0xff]   ;;  %v7683_v62 = vld [vmem:[#allocation6 + $0x18c] ss:$16 sps:$4 sm:$0xff]   ;;  %v7686_v63 = vld [vmem:[#allocation6 + $0x1a4] ss:$16 sps:$4 sm:$0xff]  }
  0xa5   :  { %v7681_v0 = vld [vmem:[#allocation6 + $0x188] ss:$16 sps:$4 sm:$0xff]   ;;  %v7684_v1 = vld [vmem:[#allocation6 + $0x1a0] ss:$16 sps:$4 sm:$0xff]   ;;  %v7689_v2 = vld [vmem:[#allocation6 + $0x1ac] ss:$16 sps:$4 sm:$0xff]  }
  0xa6   :  { %v7687_v3 = vld [vmem:[#allocation6 + $0x1a8] ss:$16 sps:$4 sm:$0xff]   ;;  %v7692_v4 = vld [vmem:[#allocation6 + $0x1c4] ss:$16 sps:$4 sm:$0xff]   ;;  %v7695_v5 = vld [vmem:[#allocation6 + $0x1cc] ss:$16 sps:$4 sm:$0xff]  }
  0xa7   :  { %1106 = vmatpush1.bf16.msra.mxu0 %v7624_v25  ;;  %1192 = vmatpush1.bf16.msra.mxu1 %v7627_v28  ;;  %v7690_v6 = vld [vmem:[#allocation6 + $0x1c0] ss:$16 sps:$4 sm:$0xff]   ;;  %v7693_v7 = vld [vmem:[#allocation6 + $0x1c8] ss:$16 sps:$4 sm:$0xff]   ;;  %v7698_v8 = vld [vmem:[#allocation6 + $0x1e4] ss:$16 sps:$4 sm:$0xff]  }
  0xa8   :  { %1107 = vmatprep.subr.bf16.mxu0 %v7632_v27  ;;  %1193 = vmatprep.subr.bf16.mxu1 %v7635_v30  ;;  %v7701_v9 = vld [vmem:[#allocation6 + $0x1ec] ss:$16 sps:$4 sm:$0xff]   ;;  %v7696_v10 = vld [vmem:[#allocation6 + $0x1e0] ss:$16 sps:$4 sm:$0xff]   ;;  %v7699_v11 = vld [vmem:[#allocation6 + $0x1e8] ss:$16 sps:$4 sm:$0xff]  }
  0xa9   :  { %v7704_v12 = vld [vmem:[#allocation6 + $0x204] ss:$16 sps:$4 sm:$0xff]   ;;  %v7707_v13 = vld [vmem:[#allocation6 + $0x20c] ss:$16 sps:$4 sm:$0xff]   ;;  %v8294_v15 = vshrl.u32 %v147_v14, 7 }
  0xaa   :  { %v145_v17 = vld [vmem:[#allocation4] sm:$0xf]  ;;  %v7741_v14 = vld [vmem:[#allocation6 + $0x2c8] ss:$16 sps:$4 sm:$0xff]  }
  0xab   :  { %1108 = vmatpush1.bf16.msra.mxu0 %v7630_v29  ;;  %1194 = vmatpush1.bf16.msra.mxu1 %v7633_v32  ;;  %v8297_v16 = vsub.s32 0, %v8294_v15  ;;  %v8300_v18 = vsub.s32 1, %v8294_v15  ;;  %v8304_v20 = vsub.s32 2, %v8294_v15  ;;  %v8308_v22 = vsub.s32 3, %v8294_v15 }
  0xac   :  { %1109 = vmatprep.subr.bf16.mxu0 %v7638_v31  ;;  %1195 = vmatprep.subr.bf16.mxu1 %v7641_v34 }
  0xad   :  { %v150_v19 = vrot.slane %v145_v17, %v8297_v16  ;;  %v154_v21 = vrot.slane %v145_v17, %v8300_v18  ;;  %v158_v26 = vrot.slane %v145_v17, %v8304_v20  ;;  %v162_v29 = vrot.slane %v145_v17, %v8308_v22  ;;  %v7746_v17 = vld [vmem:[#allocation6 + $0x2e4] ss:$16 sps:$4 sm:$0xff]  }
  0xaf   :  { %1110 = vmatpush1.bf16.msra.mxu0 %v7636_v33  ;;  %1196 = vmatpush1.bf16.msra.mxu1 %v7639_v36 }
  0xb0   :  { %1111 = vmatprep.subr.bf16.mxu0 %v7644_v35  ;;  %1197 = vmatprep.subr.bf16.mxu1 %v7647_v38 }
  0xb3   :  { %1112 = vmatpush1.bf16.msra.mxu0 %v7642_v37  ;;  %1198 = vmatpush1.bf16.msra.mxu1 %v7645_v40 }
  0xb4   :  { %1113 = vmatprep.subr.bf16.mxu0 %v7650_v39  ;;  %1199 = vmatprep.subr.bf16.mxu1 %v7653_v42 }
  0xb7   :  { %1114 = vmatpush1.bf16.msra.mxu0 %v7648_v41  ;;  %1200 = vmatpush1.bf16.msra.mxu1 %v7651_v44 }
  0xb8   :  { %1115 = vmatprep.subr.bf16.mxu0 %v7656_v43  ;;  %1201 = vmatprep.subr.bf16.mxu1 %v7659_v46 }
  0xbb   :  { %1116 = vmatpush1.bf16.msra.mxu0 %v7654_v45  ;;  %1202 = vmatpush1.bf16.msra.mxu1 %v7657_v48  ;;  %v7705_v48 = vld [vmem:[#allocation6 + $0x208] ss:$16 sps:$4 sm:$0xff]  }
  0xbc   :  { %1117 = vmatprep.subr.bf16.mxu0 %v7662_v47  ;;  %1203 = vmatprep.subr.bf16.mxu1 %v7665_v50  ;;  %v7702_v47 = vld [vmem:[#allocation6 + $0x200] ss:$16 sps:$4 sm:$0xff]  }
  0xbf   :  { %1118 = vmatpush1.bf16.msra.mxu0 %v7660_v49  ;;  %1204 = vmatpush1.bf16.msra.mxu1 %v7663_v52  ;;  %v7713_v52 = vld [vmem:[#allocation6 + $0x22c] ss:$16 sps:$4 sm:$0xff]  }
  0xc0   :  { %1119 = vmatprep.subr.bf16.mxu0 %v7668_v51  ;;  %1205 = vmatprep.subr.bf16.mxu1 %v7671_v54  ;;  %v7710_v51 = vld [vmem:[#allocation6 + $0x224] ss:$16 sps:$4 sm:$0xff]  }
  0xc3   :  { %1120 = vmatpush1.bf16.msra.mxu0 %v7666_v53  ;;  %1206 = vmatpush1.bf16.msra.mxu1 %v7669_v56  ;;  %v7708_v56 = vld [vmem:[#allocation6 + $0x220] ss:$16 sps:$4 sm:$0xff]  }
  0xc4   :  { %1121 = vmatprep.subr.bf16.mxu0 %v7674_v55  ;;  %1207 = vmatprep.subr.bf16.mxu1 %v7677_v58 }
  0xc7   :  { %1122 = vmatpush1.bf16.msra.mxu0 %v7672_v57  ;;  %1208 = vmatpush1.bf16.msra.mxu1 %v7675_v60  ;;  %v7711_v57 = vld [vmem:[#allocation6 + $0x228] ss:$16 sps:$4 sm:$0xff]   ;;  %v7719_v60 = vld [vmem:[#allocation6 + $0x24c] ss:$16 sps:$4 sm:$0xff]  }
  0xc8   :  { %1123 = vmatprep.subr.bf16.mxu0 %v7680_v59  ;;  %1209 = vmatprep.subr.bf16.mxu1 %v7683_v62  ;;  %v7716_v59 = vld [vmem:[#allocation6 + $0x244] ss:$16 sps:$4 sm:$0xff]   ;;  %v7717_v62 = vld [vmem:[#allocation6 + $0x248] ss:$16 sps:$4 sm:$0xff]  }
  0xcb   :  { %1124 = vmatpush1.bf16.msra.mxu0 %v7678_v61  ;;  %1210 = vmatpush1.bf16.msra.mxu1 %v7681_v0  ;;  %v7714_v61 = vld [vmem:[#allocation6 + $0x240] ss:$16 sps:$4 sm:$0xff]   ;;  %v7725_v0 = vld [vmem:[#allocation6 + $0x26c] ss:$16 sps:$4 sm:$0xff]  }
  0xcc   :  { %1125 = vmatprep.subr.bf16.mxu0 %v7686_v63  ;;  %1211 = vmatprep.subr.bf16.mxu1 %v7689_v2  ;;  %v7722_v63 = vld [vmem:[#allocation6 + $0x264] ss:$16 sps:$4 sm:$0xff]   ;;  %v7723_v2 = vld [vmem:[#allocation6 + $0x268] ss:$16 sps:$4 sm:$0xff]  }
  0xcf   :  { %1126 = vmatpush1.bf16.msra.mxu0 %v7684_v1  ;;  %1212 = vmatpush1.bf16.msra.mxu1 %v7687_v3  ;;  %v7720_v1 = vld [vmem:[#allocation6 + $0x260] ss:$16 sps:$4 sm:$0xff]   ;;  %v7728_v3 = vld [vmem:[#allocation6 + $0x284] ss:$16 sps:$4 sm:$0xff]  }
  0xd0   :  { %1127 = vmatprep.subr.bf16.mxu0 %v7692_v4  ;;  %1213 = vmatprep.subr.bf16.mxu1 %v7695_v5  ;;  %v7731_v4 = vld [vmem:[#allocation6 + $0x28c] ss:$16 sps:$4 sm:$0xff]   ;;  %v7726_v5 = vld [vmem:[#allocation6 + $0x280] ss:$16 sps:$4 sm:$0xff]  }
  0xd3   :  { %1128 = vmatpush1.bf16.msra.mxu0 %v7690_v6  ;;  %1214 = vmatpush1.bf16.msra.mxu1 %v7693_v7  ;;  %v7729_v6 = vld [vmem:[#allocation6 + $0x288] ss:$16 sps:$4 sm:$0xff]   ;;  %v7734_v7 = vld [vmem:[#allocation6 + $0x2a4] ss:$16 sps:$4 sm:$0xff]  }
  0xd4   :  { %1129 = vmatprep.subr.bf16.mxu0 %v7698_v8  ;;  %1215 = vmatprep.subr.bf16.mxu1 %v7701_v9  ;;  %v7737_v8 = vld [vmem:[#allocation6 + $0x2ac] ss:$16 sps:$4 sm:$0xff]   ;;  %v7732_v9 = vld [vmem:[#allocation6 + $0x2a0] ss:$16 sps:$4 sm:$0xff]  }
  0xd7   :  { %1130 = vmatpush1.bf16.msra.mxu0 %v7696_v10  ;;  %1216 = vmatpush1.bf16.msra.mxu1 %v7699_v11  ;;  %v7735_v10 = vld [vmem:[#allocation6 + $0x2a8] ss:$16 sps:$4 sm:$0xff]   ;;  %v7740_v11 = vld [vmem:[#allocation6 + $0x2c4] ss:$16 sps:$4 sm:$0xff]  }
  0xd8   :  { %1142 = vmatprep.subr.bf16.mxu0 %v7704_v12  ;;  %1228 = vmatprep.subr.bf16.mxu1 %v7707_v13  ;;  %v7743_v12 = vld [vmem:[#allocation6 + $0x2cc] ss:$16 sps:$4 sm:$0xff]   ;;  %v7738_v13 = vld [vmem:[#allocation6 + $0x2c0] ss:$16 sps:$4 sm:$0xff]  }
 0x16d   :  { %v245_v23 = vpop.f32.mrb[0].mxu0  ;;  %v288_v33 = vpop.f32.mrb[0].mxu1 }
 0x16e   :  { %v246_v24 = vadd.f32 %v245_v23, %v150_v19  ;;  %v247_v25 = vpop.f32.mrb[1].mxu0  ;;  %v289_v36 = vadd.f32 %v288_v33, %v158_v26  ;;  %v290_v37 = vpop.f32.mrb[1].mxu1  ;;  %v7747_v23 = vld [vmem:[#allocation6 + $0x2e8] ss:$16 sps:$4 sm:$0xff]   ;;  %v7767_v33 = vld [vmem:[#allocation6 + $0x34c] ss:$16 sps:$4 sm:$0xff]  }
 0x16f   :  { %v248_v27 = vadd.f32 %v247_v25, %v154_v21  ;;  %v249_v28 = vpop.f32.mrb[2].mxu0  ;;  %v291_v40 = vadd.f32 %v290_v37, %v162_v29  ;;  %v292_v41 = vpop.f32.mrb[2].mxu1  ;;  %v7755_v25 = vld [vmem:[#allocation6 + $0x30c] ss:$16 sps:$4 sm:$0xff]  }
 0x170   :  { %v250_v30 = vadd.f32 %v249_v28, %v150_v19  ;;  %v251_v31 = vpop.f32.mrb[3].mxu0  ;;  %v297_v34 = vmax.f32 %v246_v24, 0.0  ;;  %v299_v43 = vmax.f32 %v289_v36, 0.0  ;;  %v293_v44 = vadd.f32 %v292_v41, %v158_v26  ;;  %v294_v45 = vpop.f32.mrb[3].mxu1  ;;  %v7749_v19 = vld [vmem:[#allocation6 + $0x2ec] ss:$16 sps:$4 sm:$0xff]  }
 0x171   :  { %v252_v32 = vadd.f32 %v251_v31, %v154_v21  ;;  %v298_v38 = vmax.f32 %v248_v27, 0.0  ;;  %v300_v49 = vmax.f32 %v291_v40, 0.0  ;;  %v295_v50 = vadd.f32 %v294_v45, %v162_v29  ;;  %v7744_v21 = vld [vmem:[#allocation6 + $0x2e0] ss:$16 sps:$4 sm:$0xff]   ;;  %v7752_v24 = vld [vmem:[#allocation6 + $0x304] ss:$16 sps:$4 sm:$0xff]  }
 0x172   :  { %v301_v35 = vmax.f32 %v250_v30, 0.0  ;;  %v303_v53 = vmax.f32 %v293_v44, 0.0  ;;  %v7750_v26 = vld [vmem:[#allocation6 + $0x300] ss:$16 sps:$4 sm:$0xff]   ;;  %v7753_v27 = vld [vmem:[#allocation6 + $0x308] ss:$16 sps:$4 sm:$0xff]  }
 0x173   :  { %v302_v39 = vmax.f32 %v252_v32, 0.0  ;;  %v304_v54 = vmax.f32 %v295_v50, 0.0  ;;  %v7758_v28 = vld [vmem:[#allocation6 + $0x324] ss:$16 sps:$4 sm:$0xff]   ;;  %v7761_v29 = vld [vmem:[#allocation6 + $0x32c] ss:$16 sps:$4 sm:$0xff]  }
 0x174   :  { %v305_v42 = vpack.c.bf16 %v301_v35, %v297_v34  ;;  %v8312_v55 = vpack.c.bf16 %v303_v53, %v299_v43  ;;  %v7756_v30 = vld [vmem:[#allocation6 + $0x320] ss:$16 sps:$4 sm:$0xff]   ;;  %v7759_v31 = vld [vmem:[#allocation6 + $0x328] ss:$16 sps:$4 sm:$0xff]   ;;  %v7764_v32 = vld [vmem:[#allocation6 + $0x344] ss:$16 sps:$4 sm:$0xff]  }
 0x175   :  { %v306_v46 = vpack.c.bf16 %v302_v39, %v298_v38  ;;  %v308_v58 = vpack.c.bf16 %v304_v54, %v300_v49  ;;  %v7762_v34 = vld [vmem:[#allocation6 + $0x340] ss:$16 sps:$4 sm:$0xff]   ;;  %v7765_v35 = vld [vmem:[#allocation6 + $0x348] ss:$16 sps:$4 sm:$0xff]   ;;  %v7770_v36 = vld [vmem:[#allocation6 + $0x364] ss:$16 sps:$4 sm:$0xff]  }
 0x176   :  { %v7773_v37 = vld [vmem:[#allocation6 + $0x36c] ss:$16 sps:$4 sm:$0xff]   ;;  %v7768_v38 = vld [vmem:[#allocation6 + $0x360] ss:$16 sps:$4 sm:$0xff]   ;;  %v7771_v39 = vld [vmem:[#allocation6 + $0x368] ss:$16 sps:$4 sm:$0xff]  }
 0x177   :  { %1131 = vmatprep.mubr.bf16.mxu0 %v306_v46  ;;  %1217 = vmatprep.mubr.bf16.mxu1 %v306_v46  ;;  %v7776_v40 = vld [vmem:[#allocation6 + $0x384] ss:$16 sps:$4 sm:$0xff]   ;;  %v7779_v41 = vld [vmem:[#allocation6 + $0x38c] ss:$16 sps:$4 sm:$0xff]   ;;  %v7777_v43 = vld [vmem:[#allocation6 + $0x388] ss:$16 sps:$4 sm:$0xff]  }
 0x178   :  { %1132 = vmatmul.mubr.bf16.vlgmr.msra.gmra.mrb[4].mxu0 %v305_v42  ;;  %1218 = vmatmul.mubr.bf16.vlgmr.msra.gmra.mrb[4].mxu1 %v305_v42  ;;  %v7774_v42 = vld [vmem:[#allocation6 + $0x380] ss:$16 sps:$4 sm:$0xff]   ;;  %v7782_v44 = vld [vmem:[#allocation6 + $0x3a4] ss:$16 sps:$4 sm:$0xff]   ;;  %v7785_v45 = vld [vmem:[#allocation6 + $0x3ac] ss:$16 sps:$4 sm:$0xff]  }
 0x179   :  { %1143 = vmatpush1.bf16.msra.mxu0 %v7702_v47  ;;  %1229 = vmatpush1.bf16.msra.mxu1 %v7705_v48  ;;  %v7780_v46 = vld [vmem:[#allocation6 + $0x3a0] ss:$16 sps:$4 sm:$0xff]   ;;  %v7783_v47 = vld [vmem:[#allocation6 + $0x3a8] ss:$16 sps:$4 sm:$0xff]   ;;  %v7788_v48 = vld [vmem:[#allocation6 + $0x3c4] ss:$16 sps:$4 sm:$0xff]  }
 0x17a   :  { %1144 = vmatprep.subr.bf16.mxu0 %v7710_v51  ;;  %1230 = vmatprep.subr.bf16.mxu1 %v7713_v52  ;;  %v7791_v49 = vld [vmem:[#allocation6 + $0x3cc] ss:$16 sps:$4 sm:$0xff]   ;;  %v7786_v50 = vld [vmem:[#allocation6 + $0x3c0] ss:$16 sps:$4 sm:$0xff]   ;;  %v7789_v51 = vld [vmem:[#allocation6 + $0x3c8] ss:$16 sps:$4 sm:$0xff]  }
 0x17b   :  { %1174 = vmatprep.mubr.bf16.mxu0 %v308_v58  ;;  %1260 = vmatprep.mubr.bf16.mxu1 %v308_v58  ;;  %v7794_v52 = vld [vmem:[#allocation6 + $0x3e4] ss:$16 sps:$4 sm:$0xff]   ;;  %v7797_v53 = vld [vmem:[#allocation6 + $0x3ec] ss:$16 sps:$4 sm:$0xff]  }
 0x17c   :  { %v1283_v54 = vld [vmem:[#allocation9] sm:$0xff]  ;;  %v1292_v58 = vld [vmem:[#allocation9 + $0x48] sm:$0xff] }
 0x17d   :  { %1145 = vmatpush1.bf16.msra.mxu0 %v7708_v56  ;;  %1231 = vmatpush1.bf16.msra.mxu1 %v7711_v57  ;;  %v1291_v56 = vld [vmem:[#allocation9 + $0x40] sm:$0xff]  ;;  %v1284_v57 = vld [vmem:[#allocation9 + $0x8] sm:$0xff] }
 0x17e   :  { %1146 = vmatprep.subr.bf16.mxu0 %v7716_v59  ;;  %1232 = vmatprep.subr.bf16.mxu1 %v7719_v60  ;;  %v7792_v59 = vld [vmem:[#allocation6 + $0x3e0] ss:$16 sps:$4 sm:$0xff]   ;;  %v7795_v60 = vld [vmem:[#allocation6 + $0x3e8] ss:$16 sps:$4 sm:$0xff]  }
 0x181   :  { %1147 = vmatpush1.bf16.msra.mxu0 %v7714_v61  ;;  %1233 = vmatpush1.bf16.msra.mxu1 %v7717_v62  ;;  %v6684_v61 = vcombine.high %v1283_v54, %v1291_v56  ;;  %v6686_v62 = vcombine.high %v1284_v57, %v1292_v58 }
 0x182   :  { %1148 = vmatprep.subr.bf16.mxu0 %v7722_v63  ;;  %1234 = vmatprep.subr.bf16.mxu1 %v7725_v0  ;;  %v1299_v63 = vld [vmem:[#allocation9 + $0x80] sm:$0xff] }
 0x183   :  { %v1307_v0 = vld [vmem:[#allocation9 + $0xc0] sm:$0xff] }
 0x185   :  { %1149 = vmatpush1.bf16.msra.mxu0 %v7720_v1  ;;  %1235 = vmatpush1.bf16.msra.mxu1 %v7723_v2  ;;  %v1300_v1 = vld [vmem:[#allocation9 + $0x88] sm:$0xff] }
 0x186   :  { %1150 = vmatprep.subr.bf16.mxu0 %v7728_v3  ;;  %1236 = vmatprep.subr.bf16.mxu1 %v7731_v4  ;;  %v1308_v2 = vld [vmem:[#allocation9 + $0xc8] sm:$0xff]  ;;  %v6683_v3 = vcombine.low %v1283_v54, %v1291_v56  ;;  %v6685_v4 = vcombine.low %v1284_v57, %v1292_v58 }
 0x187   :  { %v1404_v54 = vld [vmem:[#allocation9 + $0x3c8] sm:$0xff] }
 0x189   :  { %1151 = vmatpush1.bf16.msra.mxu0 %v7726_v5  ;;  %1237 = vmatpush1.bf16.msra.mxu1 %v7729_v6  ;;  %v6700_v5 = vcombine.high %v1299_v63, %v1307_v0  ;;  %v6702_v6 = vcombine.high %v1300_v1, %v1308_v2 }
 0x18a   :  { %1152 = vmatprep.subr.bf16.mxu0 %v7734_v7  ;;  %1238 = vmatprep.subr.bf16.mxu1 %v7737_v8  ;;  %v1315_v7 = vld [vmem:[#allocation9 + $0x100] sm:$0xff] }
 0x18b   :  { %v1323_v8 = vld [vmem:[#allocation9 + $0x140] sm:$0xff] }
 0x18d   :  { %1153 = vmatpush1.bf16.msra.mxu0 %v7732_v9  ;;  %1239 = vmatpush1.bf16.msra.mxu1 %v7735_v10  ;;  %v1316_v9 = vld [vmem:[#allocation9 + $0x108] sm:$0xff] }
 0x18e   :  { %1154 = vmatprep.subr.bf16.mxu0 %v7740_v11  ;;  %1240 = vmatprep.subr.bf16.mxu1 %v7743_v12  ;;  %v1324_v10 = vld [vmem:[#allocation9 + $0x148] sm:$0xff]  ;;  %v6699_v11 = vcombine.low %v1299_v63, %v1307_v0  ;;  %v6701_v12 = vcombine.low %v1300_v1, %v1308_v2 }
 0x18f   :  { %v1420_v63 = vld [vmem:[#allocation9 + $0x448] sm:$0xff] }
 0x191   :  { %1155 = vmatpush1.bf16.msra.mxu0 %v7738_v13  ;;  %1241 = vmatpush1.bf16.msra.mxu1 %v7741_v14  ;;  %v6716_v13 = vcombine.high %v1315_v7, %v1323_v8  ;;  %v6718_v14 = vcombine.high %v1316_v9, %v1324_v10 }
 0x192   :  { %1156 = vmatprep.subr.bf16.mxu0 %v7746_v17  ;;  %1242 = vmatprep.subr.bf16.mxu1 %v7749_v19  ;;  %v1331_v17 = vld [vmem:[#allocation9 + $0x180] sm:$0xff] }
 0x193   :  { %v1339_v19 = vld [vmem:[#allocation9 + $0x1c0] sm:$0xff] }
 0x195   :  { %1157 = vmatpush1.bf16.msra.mxu0 %v7744_v21  ;;  %1243 = vmatpush1.bf16.msra.mxu1 %v7747_v23  ;;  %v1332_v21 = vld [vmem:[#allocation9 + $0x188] sm:$0xff] }
 0x196   :  { %1158 = vmatprep.subr.bf16.mxu0 %v7752_v24  ;;  %1244 = vmatprep.subr.bf16.mxu1 %v7755_v25  ;;  %v1340_v23 = vld [vmem:[#allocation9 + $0x1c8] sm:$0xff]  ;;  %v6715_v24 = vcombine.low %v1315_v7, %v1323_v8  ;;  %v6717_v25 = vcombine.low %v1316_v9, %v1324_v10 }
 0x197   :  { %v1436_v7 = vld [vmem:[#allocation9 + $0x4c8] sm:$0xff] }
 0x199   :  { %1159 = vmatpush1.bf16.msra.mxu0 %v7750_v26  ;;  %1245 = vmatpush1.bf16.msra.mxu1 %v7753_v27  ;;  %v6732_v26 = vcombine.high %v1331_v17, %v1339_v19  ;;  %v1347_v27 = vld [vmem:[#allocation9 + $0x200] sm:$0xff] }
 0x19a   :  { %1160 = vmatprep.subr.bf16.mxu0 %v7758_v28  ;;  %1246 = vmatprep.subr.bf16.mxu1 %v7761_v29  ;;  %v1355_v28 = vld [vmem:[#allocation9 + $0x240] sm:$0xff]  ;;  %v1348_v29 = vld [vmem:[#allocation9 + $0x208] sm:$0xff] }
 0x19d   :  { %1161 = vmatpush1.bf16.msra.mxu0 %v7756_v30  ;;  %1247 = vmatpush1.bf16.msra.mxu1 %v7759_v31  ;;  %v1356_v30 = vld [vmem:[#allocation9 + $0x248] sm:$0xff]  ;;  %v6731_v31 = vcombine.low %v1331_v17, %v1339_v19 }
 0x19e   :  { %1162 = vmatprep.subr.bf16.mxu0 %v7764_v32  ;;  %1248 = vmatprep.subr.bf16.mxu1 %v7767_v33  ;;  %v6733_v32 = vcombine.low %v1332_v21, %v1340_v23  ;;  %v6748_v33 = vcombine.high %v1347_v27, %v1355_v28  ;;  %v1452_v17 = vld [vmem:[#allocation9 + $0x548] sm:$0xff] }
 0x1a1   :  { %1163 = vmatpush1.bf16.msra.mxu0 %v7762_v34  ;;  %1249 = vmatpush1.bf16.msra.mxu1 %v7765_v35  ;;  %v6750_v34 = vcombine.high %v1348_v29, %v1356_v30  ;;  %v1363_v35 = vld [vmem:[#allocation9 + $0x280] sm:$0xff] }
 0x1a2   :  { %1164 = vmatprep.subr.bf16.mxu0 %v7770_v36  ;;  %1250 = vmatprep.subr.bf16.mxu1 %v7773_v37  ;;  %v1371_v36 = vld [vmem:[#allocation9 + $0x2c0] sm:$0xff]  ;;  %v1364_v37 = vld [vmem:[#allocation9 + $0x288] sm:$0xff] }
 0x1a5   :  { %1165 = vmatpush1.bf16.msra.mxu0 %v7768_v38  ;;  %1251 = vmatpush1.bf16.msra.mxu1 %v7771_v39  ;;  %v1372_v38 = vld [vmem:[#allocation9 + $0x2c8] sm:$0xff]  ;;  %v6747_v39 = vcombine.low %v1347_v27, %v1355_v28 }
 0x1a6   :  { %1166 = vmatprep.subr.bf16.mxu0 %v7776_v40  ;;  %1252 = vmatprep.subr.bf16.mxu1 %v7779_v41  ;;  %v6749_v40 = vcombine.low %v1348_v29, %v1356_v30  ;;  %v6764_v41 = vcombine.high %v1363_v35, %v1371_v36  ;;  %v1468_v27 = vld [vmem:[#allocation9 + $0x5c8] sm:$0xff] }
 0x1a9   :  { %1167 = vmatpush1.bf16.msra.mxu0 %v7774_v42  ;;  %1253 = vmatpush1.bf16.msra.mxu1 %v7777_v43  ;;  %v6766_v42 = vcombine.high %v1364_v37, %v1372_v38  ;;  %v1379_v43 = vld [vmem:[#allocation9 + $0x300] sm:$0xff] }
 0x1aa   :  { %1168 = vmatprep.subr.bf16.mxu0 %v7782_v44  ;;  %1254 = vmatprep.subr.bf16.mxu1 %v7785_v45  ;;  %v1387_v44 = vld [vmem:[#allocation9 + $0x340] sm:$0xff]  ;;  %v1380_v45 = vld [vmem:[#allocation9 + $0x308] sm:$0xff] }
 0x1ab   :  { %v6779_v56 = vcombine.low %v1379_v43, %v1387_v44 }
 0x1ad   :  { %1169 = vmatpush1.bf16.msra.mxu0 %v7780_v46  ;;  %1255 = vmatpush1.bf16.msra.mxu1 %v7783_v47  ;;  %v1388_v46 = vld [vmem:[#allocation9 + $0x348] sm:$0xff]  ;;  %v6763_v47 = vcombine.low %v1363_v35, %v1371_v36 }
 0x1ae   :  { %1170 = vmatprep.subr.bf16.mxu0 %v7788_v48  ;;  %1256 = vmatprep.subr.bf16.mxu1 %v7791_v49  ;;  %v6765_v48 = vcombine.low %v1364_v37, %v1372_v38  ;;  %v6780_v49 = vcombine.high %v1379_v43, %v1387_v44  ;;  %v6781_v57 = vcombine.low %v1380_v45, %v1388_v46  ;;  %v1484_v35 = vld [vmem:[#allocation9 + $0x648] sm:$0xff] }
 0x1af   :  { %v1500_v43 = vld [vmem:[#allocation9 + $0x6c8] sm:$0xff] }
 0x1b1   :  { %1171 = vmatpush1.bf16.msra.mxu0 %v7786_v50  ;;  %1257 = vmatpush1.bf16.msra.mxu1 %v7789_v51  ;;  %v6782_v50 = vcombine.high %v1380_v45, %v1388_v46  ;;  %v1395_v51 = vld [vmem:[#allocation9 + $0x380] sm:$0xff] }
 0x1b2   :  { %1172 = vmatprep.subr.bf16.mxu0 %v7794_v52  ;;  %1258 = vmatprep.subr.bf16.mxu1 %v7797_v53  ;;  %v1403_v52 = vld [vmem:[#allocation9 + $0x3c0] sm:$0xff]  ;;  %v1396_v53 = vld [vmem:[#allocation9 + $0x388] sm:$0xff] }
 0x1b3   :  { %v6796_v58 = vcombine.high %v1395_v51, %v1403_v52  ;;  %v6795_v0 = vcombine.low %v1395_v51, %v1403_v52  ;;  %v6797_v1 = vcombine.low %v1396_v53, %v1404_v54  ;;  %v1515_v51 = vld [vmem:[#allocation9 + $0x740] sm:$0xff]  ;;  %v1508_v52 = vld [vmem:[#allocation9 + $0x708] sm:$0xff] }
 0x1b5   :  { %1173 = vmatpush1.bf16.msra.mxu0 %v7792_v59  ;;  %1259 = vmatpush1.bf16.msra.mxu1 %v7795_v60  ;;  %v6798_v59 = vcombine.high %v1396_v53, %v1404_v54  ;;  %v1411_v60 = vld [vmem:[#allocation9 + $0x400] sm:$0xff]  ;;  %v1516_v54 = vld [vmem:[#allocation9 + $0x748] sm:$0xff] }
 0x1b6   :  { %4439 = vmatprep.subr.bf16.mxu0 %v6684_v61  ;;  %4525 = vmatprep.subr.bf16.mxu1 %v6686_v62  ;;  %v1419_v61 = vld [vmem:[#allocation9 + $0x440] sm:$0xff]  ;;  %v1412_v62 = vld [vmem:[#allocation9 + $0x408] sm:$0xff] }
 0x1b7   :  { %v6812_v2 = vcombine.high %v1411_v60, %v1419_v61  ;;  %v6811_v8 = vcombine.low %v1411_v60, %v1419_v61  ;;  %v6813_v9 = vcombine.low %v1412_v62, %v1420_v63  ;;  %v1531_v60 = vld [vmem:[#allocation9 + $0x7c0] sm:$0xff]  ;;  %v1524_v61 = vld [vmem:[#allocation9 + $0x788] sm:$0xff] }
 0x1b8   :  { %1175 = vmatmul.mubr.bf16.vlgmr.msra.gmra.mrb[4].mxu0 %v8312_v55  ;;  %1261 = vmatmul.mubr.bf16.vlgmr.msra.gmra.mrb[4].mxu1 %v8312_v55  ;;  %v6734_v55 = vcombine.high %v1332_v21, %v1340_v23 }
 0x1b9   :  { %4440 = vmatpush1.bf16.msra.mxu0 %v6683_v3  ;;  %4526 = vmatpush1.bf16.msra.mxu1 %v6685_v4  ;;  %v6814_v3 = vcombine.high %v1412_v62, %v1420_v63  ;;  %v1427_v4 = vld [vmem:[#allocation9 + $0x480] sm:$0xff]  ;;  %v1532_v63 = vld [vmem:[#allocation9 + $0x7c8] sm:$0xff] }
 0x1ba   :  { %4441 = vmatprep.subr.bf16.mxu0 %v6700_v5  ;;  %4527 = vmatprep.subr.bf16.mxu1 %v6702_v6  ;;  %v1435_v5 = vld [vmem:[#allocation9 + $0x4c0] sm:$0xff]  ;;  %v1428_v6 = vld [vmem:[#allocation9 + $0x488] sm:$0xff] }
 0x1bb   :  { %v6828_v10 = vcombine.high %v1427_v4, %v1435_v5  ;;  %v6827_v19 = vcombine.low %v1427_v4, %v1435_v5  ;;  %v6829_v21 = vcombine.low %v1428_v6, %v1436_v7  ;;  %v1547_v4 = vld [vmem:[#allocation9 + $0x840] sm:$0xff]  ;;  %v1540_v5 = vld [vmem:[#allocation9 + $0x808] sm:$0xff] }
 0x1bd   :  { %4442 = vmatpush1.bf16.msra.mxu0 %v6699_v11  ;;  %4528 = vmatpush1.bf16.msra.mxu1 %v6701_v12  ;;  %v6830_v11 = vcombine.high %v1428_v6, %v1436_v7  ;;  %v1443_v12 = vld [vmem:[#allocation9 + $0x500] sm:$0xff]  ;;  %v1548_v7 = vld [vmem:[#allocation9 + $0x848] sm:$0xff] }
 0x1be   :  { %4443 = vmatprep.subr.bf16.mxu0 %v6716_v13  ;;  %4529 = vmatprep.subr.bf16.mxu1 %v6718_v14  ;;  %v1451_v13 = vld [vmem:[#allocation9 + $0x540] sm:$0xff]  ;;  %v1444_v14 = vld [vmem:[#allocation9 + $0x508] sm:$0xff] }
 0x1bf   :  { %v6844_v23 = vcombine.high %v1443_v12, %v1451_v13  ;;  %v6843_v28 = vcombine.low %v1443_v12, %v1451_v13  ;;  %v6845_v29 = vcombine.low %v1444_v14, %v1452_v17 }
 0x1c1   :  { %4444 = vmatpush1.bf16.msra.mxu0 %v6715_v24  ;;  %4530 = vmatpush1.bf16.msra.mxu1 %v6717_v25  ;;  %v6846_v24 = vcombine.high %v1444_v14, %v1452_v17  ;;  %v1459_v25 = vld [vmem:[#allocation9 + $0x580] sm:$0xff] }
 0x1c2   :  { %4445 = vmatprep.subr.bf16.mxu0 %v6732_v26  ;;  %4531 = vmatprep.subr.bf16.mxu1 %v6734_v55  ;;  %v1467_v26 = vld [vmem:[#allocation9 + $0x5c0] sm:$0xff]  ;;  %v1460_v55 = vld [vmem:[#allocation9 + $0x588] sm:$0xff] }
 0x1c3   :  { %v6860_v30 = vcombine.high %v1459_v25, %v1467_v26  ;;  %v6859_v36 = vcombine.low %v1459_v25, %v1467_v26  ;;  %v6861_v37 = vcombine.low %v1460_v55, %v1468_v27 }
 0x1c5   :  { %4446 = vmatpush1.bf16.msra.mxu0 %v6731_v31  ;;  %4532 = vmatpush1.bf16.msra.mxu1 %v6733_v32  ;;  %v6862_v31 = vcombine.high %v1460_v55, %v1468_v27  ;;  %v1475_v32 = vld [vmem:[#allocation9 + $0x600] sm:$0xff] }
 0x1c6   :  { %4447 = vmatprep.subr.bf16.mxu0 %v6748_v33  ;;  %4533 = vmatprep.subr.bf16.mxu1 %v6750_v34  ;;  %v1483_v33 = vld [vmem:[#allocation9 + $0x640] sm:$0xff]  ;;  %v1476_v34 = vld [vmem:[#allocation9 + $0x608] sm:$0xff] }
 0x1c7   :  { %v6876_v38 = vcombine.high %v1475_v32, %v1483_v33  ;;  %v6875_v44 = vcombine.low %v1475_v32, %v1483_v33  ;;  %v6877_v45 = vcombine.low %v1476_v34, %v1484_v35 }
 0x1c9   :  { %4448 = vmatpush1.bf16.msra.mxu0 %v6747_v39  ;;  %4534 = vmatpush1.bf16.msra.mxu1 %v6749_v40  ;;  %v6878_v39 = vcombine.high %v1476_v34, %v1484_v35  ;;  %v1491_v40 = vld [vmem:[#allocation9 + $0x680] sm:$0xff] }
 0x1ca   :  { %4449 = vmatprep.subr.bf16.mxu0 %v6764_v41  ;;  %4535 = vmatprep.subr.bf16.mxu1 %v6766_v42  ;;  %v1499_v41 = vld [vmem:[#allocation9 + $0x6c0] sm:$0xff]  ;;  %v1492_v42 = vld [vmem:[#allocation9 + $0x688] sm:$0xff] }
 0x1cb   :  { %v6892_v46 = vcombine.high %v1491_v40, %v1499_v41 }
 0x1cd   :  { %4450 = vmatpush1.bf16.msra.mxu0 %v6763_v47  ;;  %4536 = vmatpush1.bf16.msra.mxu1 %v6765_v48  ;;  %v6894_v47 = vcombine.high %v1492_v42, %v1500_v43  ;;  %v6891_v48 = vcombine.low %v1491_v40, %v1499_v41 }
 0x1ce   :  { %4451 = vmatprep.subr.bf16.mxu0 %v6780_v49  ;;  %4537 = vmatprep.subr.bf16.mxu1 %v6782_v50  ;;  %v6893_v49 = vcombine.low %v1492_v42, %v1500_v43  ;;  %v1507_v50 = vld [vmem:[#allocation9 + $0x700] sm:$0xff] }
 0x1cf   :  { %v6908_v53 = vcombine.high %v1507_v50, %v1515_v51 }
 0x1d1   :  { %4452 = vmatpush1.bf16.msra.mxu0 %v6779_v56  ;;  %4538 = vmatpush1.bf16.msra.mxu1 %v6781_v57  ;;  %v6907_v56 = vcombine.low %v1507_v50, %v1515_v51  ;;  %v6909_v57 = vcombine.low %v1508_v52, %v1516_v54 }
 0x1d2   :  { %4453 = vmatprep.subr.bf16.mxu0 %v6796_v58  ;;  %4539 = vmatprep.subr.bf16.mxu1 %v6798_v59  ;;  %v6910_v58 = vcombine.high %v1508_v52, %v1516_v54  ;;  %v1523_v59 = vld [vmem:[#allocation9 + $0x780] sm:$0xff] }
 0x1d3   :  { %v6924_v62 = vcombine.high %v1523_v59, %v1531_v60  ;;  %v1571_v52 = vld [vmem:[#allocation9 + $0x900] sm:$0xff] }
 0x1d5   :  { %4454 = vmatpush1.bf16.msra.mxu0 %v6795_v0  ;;  %4540 = vmatpush1.bf16.msra.mxu1 %v6797_v1  ;;  %v6923_v0 = vcombine.low %v1523_v59, %v1531_v60  ;;  %v6925_v1 = vcombine.low %v1524_v61, %v1532_v63 }
 0x1d6   :  { %4455 = vmatprep.subr.bf16.mxu0 %v6812_v2  ;;  %4541 = vmatprep.subr.bf16.mxu1 %v6814_v3  ;;  %v6926_v2 = vcombine.high %v1524_v61, %v1532_v63  ;;  %v1539_v3 = vld [vmem:[#allocation9 + $0x800] sm:$0xff] }
 0x1d7   :  { %v6940_v6 = vcombine.high %v1539_v3, %v1547_v4  ;;  %v1587_v63 = vld [vmem:[#allocation9 + $0x980] sm:$0xff] }
 0x1d9   :  { %4456 = vmatpush1.bf16.msra.mxu0 %v6811_v8  ;;  %4542 = vmatpush1.bf16.msra.mxu1 %v6813_v9  ;;  %v6939_v8 = vcombine.low %v1539_v3, %v1547_v4  ;;  %v6941_v9 = vcombine.low %v1540_v5, %v1548_v7 }
 0x1da   :  { %4457 = vmatprep.subr.bf16.mxu0 %v6828_v10  ;;  %4543 = vmatprep.subr.bf16.mxu1 %v6830_v11  ;;  %v6942_v10 = vcombine.high %v1540_v5, %v1548_v7  ;;  %v437_v11 = vld [vmem:[#allocation7] sm:$0xf]  ;;  %v1603_v7 = vld [vmem:[#allocation9 + $0xa00] sm:$0xff] }
 0x1db   :  { %v442_v12 = vrot.slane %v437_v11, %v8297_v16  ;;  %v450_v13 = vrot.slane %v437_v11, %v8304_v20  ;;  %v446_v14 = vrot.slane %v437_v11, %v8300_v18  ;;  %v454_v17 = vrot.slane %v437_v11, %v8308_v22 }
 0x1dd   :  { %4458 = vmatpush1.bf16.msra.mxu0 %v6827_v19  ;;  %4544 = vmatpush1.bf16.msra.mxu1 %v6829_v21 }
 0x1de   :  { %4459 = vmatprep.subr.bf16.mxu0 %v6844_v23  ;;  %4545 = vmatprep.subr.bf16.mxu1 %v6846_v24 }
 0x1e1   :  { %4460 = vmatpush1.bf16.msra.mxu0 %v6843_v28  ;;  %4546 = vmatpush1.bf16.msra.mxu1 %v6845_v29 }
 0x1e2   :  { %4461 = vmatprep.subr.bf16.mxu0 %v6860_v30  ;;  %4547 = vmatprep.subr.bf16.mxu1 %v6862_v31 }
 0x1e5   :  { %4462 = vmatpush1.bf16.msra.mxu0 %v6859_v36  ;;  %4548 = vmatpush1.bf16.msra.mxu1 %v6861_v37 }
 0x1e6   :  { %4463 = vmatprep.subr.bf16.mxu0 %v6876_v38  ;;  %4549 = vmatprep.subr.bf16.mxu1 %v6878_v39 }
 0x1e9   :  { %4464 = vmatpush1.bf16.msra.mxu0 %v6875_v44  ;;  %4550 = vmatpush1.bf16.msra.mxu1 %v6877_v45  ;;  %v1555_v44 = vld [vmem:[#allocation9 + $0x880] sm:$0xff] }
 0x1ea   :  { %4465 = vmatprep.subr.bf16.mxu0 %v6892_v46  ;;  %4551 = vmatprep.subr.bf16.mxu1 %v6894_v47  ;;  %v1563_v47 = vld [vmem:[#allocation9 + $0x8c0] sm:$0xff] }
 0x1eb   :  { %v6955_v59 = vcombine.low %v1555_v44, %v1563_v47 }
 0x1ed   :  { %4466 = vmatpush1.bf16.msra.mxu0 %v6891_v48  ;;  %4552 = vmatpush1.bf16.msra.mxu1 %v6893_v49  ;;  %v1556_v48 = vld [vmem:[#allocation9 + $0x888] sm:$0xff] }
 0x1ee   :  { %4467 = vmatprep.subr.bf16.mxu0 %v6908_v53  ;;  %4553 = vmatprep.subr.bf16.mxu1 %v6910_v58  ;;  %v1564_v49 = vld [vmem:[#allocation9 + $0x8c8] sm:$0xff]  ;;  %v6956_v53 = vcombine.high %v1555_v44, %v1563_v47  ;;  %v1675_v44 = vld [vmem:[#allocation9 + $0xc40] sm:$0xff] }
 0x1ef   :  { %v6958_v54 = vcombine.high %v1556_v48, %v1564_v49  ;;  %v1580_v58 = vld [vmem:[#allocation9 + $0x948] sm:$0xff]  ;;  %v6957_v60 = vcombine.low %v1556_v48, %v1564_v49 }
 0x1f0   :  { %v1668_v47 = vld [vmem:[#allocation9 + $0xc08] sm:$0xff] }
 0x1f1   :  { %4468 = vmatpush1.bf16.msra.mxu0 %v6907_v56  ;;  %4554 = vmatpush1.bf16.msra.mxu1 %v6909_v57  ;;  %v1579_v56 = vld [vmem:[#allocation9 + $0x940] sm:$0xff]  ;;  %v1572_v57 = vld [vmem:[#allocation9 + $0x908] sm:$0xff] }
 0x1f2   :  { %4469 = vmatprep.subr.bf16.mxu0 %v6924_v62  ;;  %4555 = vmatprep.subr.bf16.mxu1 %v6926_v2  ;;  %v6972_v61 = vcombine.high %v1571_v52, %v1579_v56  ;;  %v6974_v62 = vcombine.high %v1572_v57, %v1580_v58  ;;  %v1596_v2 = vld [vmem:[#allocation9 + $0x9c8] sm:$0xff]  ;;  %v6971_v3 = vcombine.low %v1571_v52, %v1579_v56  ;;  %v1683_v56 = vld [vmem:[#allocation9 + $0xc80] sm:$0xff] }
 0x1f3   :  { %v6973_v4 = vcombine.low %v1572_v57, %v1580_v58  ;;  %v1676_v48 = vld [vmem:[#allocation9 + $0xc48] sm:$0xff]  ;;  %v1691_v57 = vld [vmem:[#allocation9 + $0xcc0] sm:$0xff] }
 0x1f4   :  { %v1684_v58 = vld [vmem:[#allocation9 + $0xc88] sm:$0xff] }
 0x1f5   :  { %4470 = vmatpush1.bf16.msra.mxu0 %v6923_v0  ;;  %4556 = vmatpush1.bf16.msra.mxu1 %v6925_v1  ;;  %v1595_v0 = vld [vmem:[#allocation9 + $0x9c0] sm:$0xff]  ;;  %v1588_v1 = vld [vmem:[#allocation9 + $0x988] sm:$0xff] }
 0x1f6   :  { %4482 = vmatprep.subr.bf16.mxu0 %v6940_v6  ;;  %4568 = vmatprep.subr.bf16.mxu1 %v6942_v10  ;;  %v6988_v5 = vcombine.high %v1587_v63, %v1595_v0  ;;  %v6990_v6 = vcombine.high %v1588_v1, %v1596_v2  ;;  %v1612_v10 = vld [vmem:[#allocation9 + $0xa48] sm:$0xff]  ;;  %v6987_v11 = vcombine.low %v1587_v63, %v1595_v0  ;;  %v1699_v0 = vld [vmem:[#allocation9 + $0xd00] sm:$0xff] }
 0x28b   :  { %v1176_v19 = vpop.f32.mrb[4].mxu0  ;;  %v1262_v21 = vpop.f32.mrb[4].mxu1 }
 0x28c   :  { %v7500_v23 = vadd.f32 %v1176_v19, %v442_v12  ;;  %v7504_v24 = vadd.f32 %v1262_v21, %v450_v13  ;;  %v1178_v25 = vpop.f32.mrb[5].mxu0  ;;  %v1264_v26 = vpop.f32.mrb[5].mxu1  ;;  %v1627_v19 = vld [vmem:[#allocation9 + $0xac0] sm:$0xff]  ;;  %v1620_v21 = vld [vmem:[#allocation9 + $0xa88] sm:$0xff] }
 0x28d   :  { %v7501_v55 = vadd.f32 %v1178_v25, %v446_v14  ;;  %v7505_v27 = vadd.f32 %v1264_v26, %v454_v17  ;;  %v1180_v28 = vpop.f32.mrb[6].mxu0  ;;  %v1266_v29 = vpop.f32.mrb[6].mxu1 }
 0x28e   :  { %v7502_v30 = vadd.f32 %v1180_v28, %v442_v12  ;;  %v7506_v31 = vadd.f32 %v1266_v29, %v450_v13  ;;  %v1182_v32 = vpop.f32.mrb[7].mxu0  ;;  %v1268_v33 = vpop.f32.mrb[7].mxu1  ;;  %v1271_v36 = vmax.f32 %v7500_v23, 0.0  ;;  %v1273_v37 = vmax.f32 %v7504_v24, 0.0  ;;  %v1628_v23 = vld [vmem:[#allocation9 + $0xac8] sm:$0xff]  ;;  %v1643_v28 = vld [vmem:[#allocation9 + $0xb40] sm:$0xff] }
 0x28f   :  { %v7503_v34 = vadd.f32 %v1182_v32, %v446_v14  ;;  %v7507_v35 = vadd.f32 %v1268_v33, %v454_v17  ;;  %v1272_v40 = vmax.f32 %v7501_v55, 0.0  ;;  %v1274_v41 = vmax.f32 %v7505_v27, 0.0  ;;  %v1619_v17 = vld [vmem:[#allocation9 + $0xa80] sm:$0xff]  ;;  %v1636_v29 = vld [vmem:[#allocation9 + $0xb08] sm:$0xff] }
 0x290   :  { %v1275_v38 = vmax.f32 %v7502_v30, 0.0  ;;  %v1277_v39 = vmax.f32 %v7506_v31, 0.0  ;;  %v6989_v12 = vcombine.low %v1588_v1, %v1596_v2  ;;  %v7020_v26 = vcombine.high %v1619_v17, %v1627_v19  ;;  %v1635_v27 = vld [vmem:[#allocation9 + $0xb00] sm:$0xff]  ;;  %v1644_v30 = vld [vmem:[#allocation9 + $0xb48] sm:$0xff] }
 0x291   :  { %v1276_v42 = vmax.f32 %v7503_v34, 0.0  ;;  %v1278_v43 = vmax.f32 %v7507_v35, 0.0  ;;  %v7022_v55 = vcombine.high %v1620_v21, %v1628_v23  ;;  %v7019_v31 = vcombine.low %v1619_v17, %v1627_v19  ;;  %v1651_v35 = vld [vmem:[#allocation9 + $0xb80] sm:$0xff]  ;;  %v1700_v2 = vld [vmem:[#allocation9 + $0xd08] sm:$0xff] }
 0x292   :  { %v8320_v45 = vpack.c.bf16 %v1275_v38, %v1271_v36  ;;  %v8322_v46 = vpack.c.bf16 %v1277_v39, %v1273_v37  ;;  %v7021_v32 = vcombine.low %v1620_v21, %v1628_v23  ;;  %v7036_v33 = vcombine.high %v1635_v27, %v1643_v28  ;;  %v1659_v36 = vld [vmem:[#allocation9 + $0xbc0] sm:$0xff]  ;;  %v1652_v37 = vld [vmem:[#allocation9 + $0xb88] sm:$0xff] }
 0x293   :  { %v8324_v50 = vpack.c.bf16 %v1276_v42, %v1272_v40  ;;  %v8326_v51 = vpack.c.bf16 %v1278_v43, %v1274_v41  ;;  %v7038_v34 = vcombine.high %v1636_v29, %v1644_v30  ;;  %v1660_v38 = vld [vmem:[#allocation9 + $0xbc8] sm:$0xff]  ;;  %v7035_v39 = vcombine.low %v1635_v27, %v1643_v28  ;;  %v1667_v43 = vld [vmem:[#allocation9 + $0xc00] sm:$0xff] }
 0x294   :  { %v7037_v40 = vcombine.low %v1636_v29, %v1644_v30  ;;  %v7052_v41 = vcombine.high %v1651_v35, %v1659_v36  ;;  %v7054_v42 = vcombine.high %v1652_v37, %v1660_v38  ;;  %v7051_v49 = vcombine.low %v1651_v35, %v1659_v36  ;;  %v1707_v1 = vld [vmem:[#allocation9 + $0xd40] sm:$0xff]  ;;  %v1732_v23 = vld [vmem:[#allocation9 + $0xe08] sm:$0xff] }
 0x295   :  { %4471 = vmatprep.mubr.bf16.mxu0 %v8324_v50  ;;  %4557 = vmatprep.mubr.bf16.mxu1 %v8324_v50  ;;  %v7053_v52 = vcombine.low %v1652_v37, %v1660_v38  ;;  %v1731_v19 = vld [vmem:[#allocation9 + $0xe00] sm:$0xff]  ;;  %v1748_v30 = vld [vmem:[#allocation9 + $0xe88] sm:$0xff] }
 0x296   :  { %4472 = vmatmul.mubr.bf16.vlgmr.msra.gmra.mrb[8].mxu0 %v8320_v45  ;;  %4558 = vmatmul.mubr.bf16.vlgmr.msra.gmra.mrb[8].mxu1 %v8320_v45  ;;  %v1739_v21 = vld [vmem:[#allocation9 + $0xe40] sm:$0xff]  ;;  %v1764_v38 = vld [vmem:[#allocation9 + $0xf08] sm:$0xff] }
 0x297   :  { %4483 = vmatpush1.bf16.msra.mxu0 %v6939_v8  ;;  %4569 = vmatpush1.bf16.msra.mxu1 %v6941_v9  ;;  %v1611_v8 = vld [vmem:[#allocation9 + $0xa40] sm:$0xff]  ;;  %v1604_v9 = vld [vmem:[#allocation9 + $0xa08] sm:$0xff] }
 0x298   :  { %4514 = vmatprep.mubr.bf16.mxu0 %v8326_v51  ;;  %4600 = vmatprep.mubr.bf16.mxu1 %v8326_v51  ;;  %v7004_v13 = vcombine.high %v1603_v7, %v1611_v8  ;;  %v7006_v14 = vcombine.high %v1604_v9, %v1612_v10  ;;  %v7003_v24 = vcombine.low %v1603_v7, %v1611_v8  ;;  %v1715_v8 = vld [vmem:[#allocation9 + $0xd80] sm:$0xff] }
 0x299   :  { %4484 = vmatprep.subr.bf16.mxu0 %v6956_v53  ;;  %4570 = vmatprep.subr.bf16.mxu1 %v6958_v54  ;;  %v7005_v25 = vcombine.low %v1604_v9, %v1612_v10  ;;  %v7068_v53 = vcombine.high %v1667_v43, %v1675_v44  ;;  %v7070_v54 = vcombine.high %v1668_v47, %v1676_v48  ;;  %v1723_v9 = vld [vmem:[#allocation9 + $0xdc0] sm:$0xff]  ;;  %v1716_v10 = vld [vmem:[#allocation9 + $0xd88] sm:$0xff] }
 0x29a   :  { %v1747_v28 = vld [vmem:[#allocation9 + $0xe80] sm:$0xff] }
 0x29b   :  { %4485 = vmatpush1.bf16.msra.mxu0 %v6955_v59  ;;  %4571 = vmatpush1.bf16.msra.mxu1 %v6957_v60  ;;  %v1692_v59 = vld [vmem:[#allocation9 + $0xcc8] sm:$0xff]  ;;  %v7067_v60 = vcombine.low %v1667_v43, %v1675_v44  ;;  %v1755_v29 = vld [vmem:[#allocation9 + $0xec0] sm:$0xff] }
 0x29c   :  { %4486 = vmatprep.subr.bf16.mxu0 %v6972_v61  ;;  %4572 = vmatprep.subr.bf16.mxu1 %v6974_v62  ;;  %v7069_v61 = vcombine.low %v1668_v47, %v1676_v48  ;;  %v7084_v62 = vcombine.high %v1683_v56, %v1691_v57  ;;  %v7086_v63 = vcombine.high %v1684_v58, %v1692_v59  ;;  %v1763_v36 = vld [vmem:[#allocation9 + $0xf00] sm:$0xff]  ;;  %v1780_v48 = vld [vmem:[#allocation9 + $0xf88] sm:$0xff] }
 0x29d   :  { %v1771_v37 = vld [vmem:[#allocation9 + $0xf40] sm:$0xff] }
 0x29e   :  { %v1779_v44 = vld [vmem:[#allocation9 + $0xf80] sm:$0xff] }
 0x29f   :  { %4487 = vmatpush1.bf16.msra.mxu0 %v6971_v3  ;;  %4573 = vmatpush1.bf16.msra.mxu1 %v6973_v4  ;;  %v1708_v3 = vld [vmem:[#allocation9 + $0xd48] sm:$0xff]  ;;  %v7083_v4 = vcombine.low %v1683_v56, %v1691_v57  ;;  %v1787_v47 = vld [vmem:[#allocation9 + $0xfc0] sm:$0xff]  ;;  %v1285_v57 = vld [vmem:[#allocation9 + $0x10] sm:$0xff] }
 0x2a0   :  { %4488 = vmatprep.subr.bf16.mxu0 %v6988_v5  ;;  %4574 = vmatprep.subr.bf16.mxu1 %v6990_v6  ;;  %v7085_v5 = vcombine.low %v1684_v58, %v1692_v59  ;;  %v7100_v6 = vcombine.high %v1699_v0, %v1707_v1  ;;  %v7102_v7 = vcombine.high %v1700_v2, %v1708_v3  ;;  %v1293_v58 = vld [vmem:[#allocation9 + $0x50] sm:$0xff]  ;;  %v1286_v59 = vld [vmem:[#allocation9 + $0x18] sm:$0xff] }
 0x2a3   :  { %4489 = vmatpush1.bf16.msra.mxu0 %v6987_v11  ;;  %4575 = vmatpush1.bf16.msra.mxu1 %v6989_v12  ;;  %v1724_v11 = vld [vmem:[#allocation9 + $0xdc8] sm:$0xff]  ;;  %v7099_v12 = vcombine.low %v1699_v0, %v1707_v1  ;;  %v1301_v1 = vld [vmem:[#allocation9 + $0x90] sm:$0xff] }
 0x2a4   :  { %4490 = vmatprep.subr.bf16.mxu0 %v7004_v13  ;;  %4576 = vmatprep.subr.bf16.mxu1 %v7006_v14  ;;  %v7101_v13 = vcombine.low %v1700_v2, %v1708_v3  ;;  %v7116_v14 = vcombine.high %v1715_v8, %v1723_v9  ;;  %v7118_v17 = vcombine.high %v1716_v10, %v1724_v11  ;;  %v1309_v2 = vld [vmem:[#allocation9 + $0xd0] sm:$0xff]  ;;  %v1302_v3 = vld [vmem:[#allocation9 + $0x98] sm:$0xff] }
 0x2a7   :  { %4491 = vmatpush1.bf16.msra.mxu0 %v7003_v24  ;;  %4577 = vmatpush1.bf16.msra.mxu1 %v7005_v25  ;;  %v1740_v24 = vld [vmem:[#allocation9 + $0xe48] sm:$0xff]  ;;  %v7115_v25 = vcombine.low %v1715_v8, %v1723_v9  ;;  %v1317_v9 = vld [vmem:[#allocation9 + $0x110] sm:$0xff] }
 0x2a8   :  { %4492 = vmatprep.subr.bf16.mxu0 %v7020_v26  ;;  %4578 = vmatprep.subr.bf16.mxu1 %v7022_v55  ;;  %v7117_v26 = vcombine.low %v1716_v10, %v1724_v11  ;;  %v7132_v55 = vcombine.high %v1731_v19, %v1739_v21  ;;  %v7134_v27 = vcombine.high %v1732_v23, %v1740_v24  ;;  %v1325_v10 = vld [vmem:[#allocation9 + $0x150] sm:$0xff]  ;;  %v1318_v11 = vld [vmem:[#allocation9 + $0x118] sm:$0xff] }
 0x2ab   :  { %4493 = vmatpush1.bf16.msra.mxu0 %v7019_v31  ;;  %4579 = vmatpush1.bf16.msra.mxu1 %v7021_v32  ;;  %v1756_v31 = vld [vmem:[#allocation9 + $0xec8] sm:$0xff]  ;;  %v7131_v32 = vcombine.low %v1731_v19, %v1739_v21  ;;  %v1333_v21 = vld [vmem:[#allocation9 + $0x190] sm:$0xff] }
 0x2ac   :  { %4494 = vmatprep.subr.bf16.mxu0 %v7036_v33  ;;  %4580 = vmatprep.subr.bf16.mxu1 %v7038_v34  ;;  %v7133_v33 = vcombine.low %v1732_v23, %v1740_v24  ;;  %v7148_v34 = vcombine.high %v1747_v28, %v1755_v29  ;;  %v7150_v35 = vcombine.high %v1748_v30, %v1756_v31  ;;  %v1341_v23 = vld [vmem:[#allocation9 + $0x1d0] sm:$0xff]  ;;  %v1334_v24 = vld [vmem:[#allocation9 + $0x198] sm:$0xff] }
 0x2af   :  { %4495 = vmatpush1.bf16.msra.mxu0 %v7035_v39  ;;  %4581 = vmatpush1.bf16.msra.mxu1 %v7037_v40  ;;  %v1772_v39 = vld [vmem:[#allocation9 + $0xf48] sm:$0xff]  ;;  %v7147_v40 = vcombine.low %v1747_v28, %v1755_v29  ;;  %v1349_v29 = vld [vmem:[#allocation9 + $0x210] sm:$0xff] }
 0x2b0   :  { %4496 = vmatprep.subr.bf16.mxu0 %v7052_v41  ;;  %4582 = vmatprep.subr.bf16.mxu1 %v7054_v42  ;;  %v7149_v41 = vcombine.low %v1748_v30, %v1756_v31  ;;  %v7164_v42 = vcombine.high %v1763_v36, %v1771_v37  ;;  %v7166_v43 = vcombine.high %v1764_v38, %v1772_v39  ;;  %v1357_v30 = vld [vmem:[#allocation9 + $0x250] sm:$0xff]  ;;  %v1350_v31 = vld [vmem:[#allocation9 + $0x218] sm:$0xff] }
 0x2b3   :  { %4497 = vmatpush1.bf16.msra.mxu0 %v7051_v49  ;;  %4583 = vmatpush1.bf16.msra.mxu1 %v7053_v52  ;;  %v1788_v49 = vld [vmem:[#allocation9 + $0xfc8] sm:$0xff]  ;;  %v7163_v52 = vcombine.low %v1763_v36, %v1771_v37  ;;  %v1365_v37 = vld [vmem:[#allocation9 + $0x290] sm:$0xff] }
 0x2b4   :  { %4498 = vmatprep.subr.bf16.mxu0 %v7068_v53  ;;  %4584 = vmatprep.subr.bf16.mxu1 %v7070_v54  ;;  %v7165_v53 = vcombine.low %v1764_v38, %v1772_v39  ;;  %v7180_v54 = vcombine.high %v1779_v44, %v1787_v47  ;;  %v7182_v56 = vcombine.high %v1780_v48, %v1788_v49  ;;  %v1373_v38 = vld [vmem:[#allocation9 + $0x2d0] sm:$0xff]  ;;  %v1366_v39 = vld [vmem:[#allocation9 + $0x298] sm:$0xff] }
 0x2b7   :  { %4499 = vmatpush1.bf16.msra.mxu0 %v7067_v60  ;;  %4585 = vmatpush1.bf16.msra.mxu1 %v7069_v61  ;;  %v1294_v60 = vld [vmem:[#allocation9 + $0x58] sm:$0xff]  ;;  %v7179_v61 = vcombine.low %v1779_v44, %v1787_v47  ;;  %v1381_v47 = vld [vmem:[#allocation9 + $0x310] sm:$0xff] }
 0x2b8   :  { %4500 = vmatprep.subr.bf16.mxu0 %v7084_v62  ;;  %4586 = vmatprep.subr.bf16.mxu1 %v7086_v63  ;;  %v7181_v62 = vcombine.low %v1780_v48, %v1788_v49  ;;  %v6688_v63 = vcombine.high %v1285_v57, %v1293_v58  ;;  %v6690_v0 = vcombine.high %v1286_v59, %v1294_v60  ;;  %v1389_v48 = vld [vmem:[#allocation9 + $0x350] sm:$0xff]  ;;  %v1382_v49 = vld [vmem:[#allocation9 + $0x318] sm:$0xff] }
 0x2bb   :  { %4501 = vmatpush1.bf16.msra.mxu0 %v7083_v4  ;;  %4587 = vmatpush1.bf16.msra.mxu1 %v7085_v5  ;;  %v1310_v4 = vld [vmem:[#allocation9 + $0xd8] sm:$0xff]  ;;  %v6687_v5 = vcombine.low %v1285_v57, %v1293_v58  ;;  %v1397_v58 = vld [vmem:[#allocation9 + $0x390] sm:$0xff] }
 0x2bc   :  { %4502 = vmatprep.subr.bf16.mxu0 %v7100_v6  ;;  %4588 = vmatprep.subr.bf16.mxu1 %v7102_v7  ;;  %v6689_v6 = vcombine.low %v1286_v59, %v1294_v60  ;;  %v6704_v7 = vcombine.high %v1301_v1, %v1309_v2  ;;  %v6706_v8 = vcombine.high %v1302_v3, %v1310_v4  ;;  %v1405_v59 = vld [vmem:[#allocation9 + $0x3d0] sm:$0xff]  ;;  %v1398_v60 = vld [vmem:[#allocation9 + $0x398] sm:$0xff] }
 0x2bf   :  { %4503 = vmatpush1.bf16.msra.mxu0 %v7099_v12  ;;  %4589 = vmatpush1.bf16.msra.mxu1 %v7101_v13  ;;  %v1326_v12 = vld [vmem:[#allocation9 + $0x158] sm:$0xff]  ;;  %v6703_v13 = vcombine.low %v1301_v1, %v1309_v2  ;;  %v1413_v2 = vld [vmem:[#allocation9 + $0x410] sm:$0xff] }
 0x2c0   :  { %4504 = vmatprep.subr.bf16.mxu0 %v7116_v14  ;;  %4590 = vmatprep.subr.bf16.mxu1 %v7118_v17  ;;  %v6705_v14 = vcombine.low %v1302_v3, %v1310_v4  ;;  %v6720_v17 = vcombine.high %v1317_v9, %v1325_v10  ;;  %v6722_v19 = vcombine.high %v1318_v11, %v1326_v12  ;;  %v1421_v3 = vld [vmem:[#allocation9 + $0x450] sm:$0xff]  ;;  %v1414_v4 = vld [vmem:[#allocation9 + $0x418] sm:$0xff] }
 0x2c3   :  { %4505 = vmatpush1.bf16.msra.mxu0 %v7115_v25  ;;  %4591 = vmatpush1.bf16.msra.mxu1 %v7117_v26  ;;  %v1342_v25 = vld [vmem:[#allocation9 + $0x1d8] sm:$0xff]  ;;  %v6719_v26 = vcombine.low %v1317_v9, %v1325_v10  ;;  %v1429_v10 = vld [vmem:[#allocation9 + $0x490] sm:$0xff] }
 0x2c4   :  { %4506 = vmatprep.subr.bf16.mxu0 %v7132_v55  ;;  %4592 = vmatprep.subr.bf16.mxu1 %v7134_v27  ;;  %v6721_v55 = vcombine.low %v1318_v11, %v1326_v12  ;;  %v6736_v27 = vcombine.high %v1333_v21, %v1341_v23  ;;  %v6738_v28 = vcombine.high %v1334_v24, %v1342_v25  ;;  %v1437_v11 = vld [vmem:[#allocation9 + $0x4d0] sm:$0xff]  ;;  %v1430_v12 = vld [vmem:[#allocation9 + $0x498] sm:$0xff] }
 0x2c7   :  { %4507 = vmatpush1.bf16.msra.mxu0 %v7131_v32  ;;  %4593 = vmatpush1.bf16.msra.mxu1 %v7133_v33  ;;  %v1358_v32 = vld [vmem:[#allocation9 + $0x258] sm:$0xff]  ;;  %v6735_v33 = vcombine.low %v1333_v21, %v1341_v23  ;;  %v1445_v23 = vld [vmem:[#allocation9 + $0x510] sm:$0xff] }
 0x2c8   :  { %4508 = vmatprep.subr.bf16.mxu0 %v7148_v34  ;;  %4594 = vmatprep.subr.bf16.mxu1 %v7150_v35  ;;  %v6737_v34 = vcombine.low %v1334_v24, %v1342_v25  ;;  %v6752_v35 = vcombine.high %v1349_v29, %v1357_v30  ;;  %v6754_v36 = vcombine.high %v1350_v31, %v1358_v32  ;;  %v1453_v24 = vld [vmem:[#allocation9 + $0x550] sm:$0xff]  ;;  %v1446_v25 = vld [vmem:[#allocation9 + $0x518] sm:$0xff] }
 0x2cb   :  { %4509 = vmatpush1.bf16.msra.mxu0 %v7147_v40  ;;  %4595 = vmatpush1.bf16.msra.mxu1 %v7149_v41  ;;  %v1374_v40 = vld [vmem:[#allocation9 + $0x2d8] sm:$0xff]  ;;  %v6751_v41 = vcombine.low %v1349_v29, %v1357_v30  ;;  %v1461_v30 = vld [vmem:[#allocation9 + $0x590] sm:$0xff] }
 0x2cc   :  { %4510 = vmatprep.subr.bf16.mxu0 %v7164_v42  ;;  %4596 = vmatprep.subr.bf16.mxu1 %v7166_v43  ;;  %v6753_v42 = vcombine.low %v1350_v31, %v1358_v32  ;;  %v6768_v43 = vcombine.high %v1365_v37, %v1373_v38  ;;  %v6770_v44 = vcombine.high %v1366_v39, %v1374_v40  ;;  %v1469_v31 = vld [vmem:[#allocation9 + $0x5d0] sm:$0xff]  ;;  %v1462_v32 = vld [vmem:[#allocation9 + $0x598] sm:$0xff] }
 0x2cf   :  { %4511 = vmatpush1.bf16.msra.mxu0 %v7163_v52  ;;  %4597 = vmatpush1.bf16.msra.mxu1 %v7165_v53  ;;  %v1390_v52 = vld [vmem:[#allocation9 + $0x358] sm:$0xff]  ;;  %v6767_v53 = vcombine.low %v1365_v37, %v1373_v38  ;;  %v1477_v38 = vld [vmem:[#allocation9 + $0x610] sm:$0xff] }
 0x2d0   :  { %4512 = vmatprep.subr.bf16.mxu0 %v7180_v54  ;;  %4598 = vmatprep.subr.bf16.mxu1 %v7182_v56  ;;  %v6769_v54 = vcombine.low %v1366_v39, %v1374_v40  ;;  %v6784_v56 = vcombine.high %v1381_v47, %v1389_v48  ;;  %v6786_v57 = vcombine.high %v1382_v49, %v1390_v52  ;;  %v1485_v39 = vld [vmem:[#allocation9 + $0x650] sm:$0xff]  ;;  %v1478_v40 = vld [vmem:[#allocation9 + $0x618] sm:$0xff] }
 0x2d3   :  { %4513 = vmatpush1.bf16.msra.mxu0 %v7179_v61  ;;  %4599 = vmatpush1.bf16.msra.mxu1 %v7181_v62  ;;  %v1406_v61 = vld [vmem:[#allocation9 + $0x3d8] sm:$0xff]  ;;  %v6783_v62 = vcombine.low %v1381_v47, %v1389_v48  ;;  %v1493_v48 = vld [vmem:[#allocation9 + $0x690] sm:$0xff] }
 0x2d4   :  { %4611 = vmatprep.subr.bf16.mxu0 %v6688_v63  ;;  %4697 = vmatprep.subr.bf16.mxu1 %v6690_v0  ;;  %v6785_v63 = vcombine.low %v1382_v49, %v1390_v52  ;;  %v6800_v0 = vcombine.high %v1397_v58, %v1405_v59  ;;  %v6802_v1 = vcombine.high %v1398_v60, %v1406_v61  ;;  %v1501_v49 = vld [vmem:[#allocation9 + $0x6d0] sm:$0xff]  ;;  %v1494_v52 = vld [vmem:[#allocation9 + $0x698] sm:$0xff] }
 0x2d6   :  { %4515 = vmatmul.mubr.bf16.vlgmr.msra.gmra.mrb[8].mxu0 %v8322_v46  ;;  %4601 = vmatmul.mubr.bf16.vlgmr.msra.gmra.mrb[8].mxu1 %v8322_v46 }
 0x2d7   :  { %4612 = vmatpush1.bf16.msra.mxu0 %v6687_v5  ;;  %4643 = vmatprep.mubr.bf16.mxu0 %v8324_v50  ;;  %v1422_v5 = vld [vmem:[#allocation9 + $0x458] sm:$0xff] }
 0x2d8   :  { %4698 = vmatpush1.bf16.msra.mxu1 %v6689_v6  ;;  %4729 = vmatprep.mubr.bf16.mxu1 %v8324_v50  ;;  %v6799_v6 = vcombine.low %v1397_v58, %v1405_v59  ;;  %v6818_v9 = vcombine.high %v1414_v4, %v1422_v5  ;;  %v1509_v59 = vld [vmem:[#allocation9 + $0x710] sm:$0xff] }
 0x2d9   :  { %4613 = vmatprep.subr.bf16.mxu0 %v6704_v7  ;;  %4699 = vmatprep.subr.bf16.mxu1 %v6706_v8  ;;  %v6801_v7 = vcombine.low %v1398_v60, %v1406_v61  ;;  %v6816_v8 = vcombine.high %v1413_v2, %v1421_v3  ;;  %v1517_v60 = vld [vmem:[#allocation9 + $0x750] sm:$0xff]  ;;  %v1510_v61 = vld [vmem:[#allocation9 + $0x718] sm:$0xff] }
 0x2db   :  { %4614 = vmatpush1.bf16.msra.mxu0 %v6703_v13  ;;  %v1438_v13 = vld [vmem:[#allocation9 + $0x4d8] sm:$0xff] }
 0x2dc   :  { %4700 = vmatpush1.bf16.msra.mxu1 %v6705_v14  ;;  %4615 = vmatprep.subr.bf16.mxu0 %v6720_v17  ;;  %v6815_v14 = vcombine.low %v1413_v2, %v1421_v3  ;;  %v6817_v17 = vcombine.low %v1414_v4, %v1422_v5  ;;  %v6834_v21 = vcombine.high %v1430_v12, %v1438_v13  ;;  %v1525_v3 = vld [vmem:[#allocation9 + $0x790] sm:$0xff]  ;;  %v1526_v5 = vld [vmem:[#allocation9 + $0x798] sm:$0xff] }
 0x2dd   :  { %4701 = vmatprep.subr.bf16.mxu1 %v6722_v19  ;;  %v6832_v19 = vcombine.high %v1429_v10, %v1437_v11  ;;  %v1533_v4 = vld [vmem:[#allocation9 + $0x7d0] sm:$0xff] }
 0x2df   :  { %4616 = vmatpush1.bf16.msra.mxu0 %v6719_v26  ;;  %v1454_v26 = vld [vmem:[#allocation9 + $0x558] sm:$0xff] }
 0x2e0   :  { %4702 = vmatpush1.bf16.msra.mxu1 %v6721_v55  ;;  %4617 = vmatprep.subr.bf16.mxu0 %v6736_v27  ;;  %v6831_v55 = vcombine.low %v1429_v10, %v1437_v11  ;;  %v6833_v27 = vcombine.low %v1430_v12, %v1438_v13  ;;  %v6850_v29 = vcombine.high %v1446_v25, %v1454_v26  ;;  %v1541_v11 = vld [vmem:[#allocation9 + $0x810] sm:$0xff]  ;;  %v1542_v13 = vld [vmem:[#allocation9 + $0x818] sm:$0xff] }
 0x2e1   :  { %4703 = vmatprep.subr.bf16.mxu1 %v6738_v28  ;;  %v6848_v28 = vcombine.high %v1445_v23, %v1453_v24  ;;  %v1549_v12 = vld [vmem:[#allocation9 + $0x850] sm:$0xff] }
 0x2e3   :  { %4618 = vmatpush1.bf16.msra.mxu0 %v6735_v33  ;;  %v1470_v33 = vld [vmem:[#allocation9 + $0x5d8] sm:$0xff] }
 0x2e4   :  { %4704 = vmatpush1.bf16.msra.mxu1 %v6737_v34  ;;  %4619 = vmatprep.subr.bf16.mxu0 %v6752_v35  ;;  %v6847_v34 = vcombine.low %v1445_v23, %v1453_v24  ;;  %v6849_v35 = vcombine.low %v1446_v25, %v1454_v26  ;;  %v6866_v37 = vcombine.high %v1462_v32, %v1470_v33  ;;  %v1557_v24 = vld [vmem:[#allocation9 + $0x890] sm:$0xff] }
 0x2e5   :  { %4705 = vmatprep.subr.bf16.mxu1 %v6754_v36  ;;  %v6864_v36 = vcombine.high %v1461_v30, %v1469_v31  ;;  %v1565_v25 = vld [vmem:[#allocation9 + $0x8d0] sm:$0xff]  ;;  %v6943_v26 = vcombine.low %v1541_v11, %v1549_v12 }
 0x2e7   :  { %4620 = vmatpush1.bf16.msra.mxu0 %v6751_v41  ;;  %v1486_v41 = vld [vmem:[#allocation9 + $0x658] sm:$0xff] }
 0x2e8   :  { %4706 = vmatpush1.bf16.msra.mxu1 %v6753_v42  ;;  %4621 = vmatprep.subr.bf16.mxu0 %v6768_v43  ;;  %v6863_v42 = vcombine.low %v1461_v30, %v1469_v31  ;;  %v6865_v43 = vcombine.low %v1462_v32, %v1470_v33  ;;  %v6882_v47 = vcombine.high %v1478_v40, %v1486_v41  ;;  %v1573_v30 = vld [vmem:[#allocation9 + $0x910] sm:$0xff]  ;;  %v1574_v33 = vld [vmem:[#allocation9 + $0x918] sm:$0xff] }
 0x2e9   :  { %4707 = vmatprep.subr.bf16.mxu1 %v6770_v44  ;;  %v6880_v44 = vcombine.high %v1477_v38, %v1485_v39  ;;  %v1581_v31 = vld [vmem:[#allocation9 + $0x950] sm:$0xff] }
 0x2eb   :  { %4622 = vmatpush1.bf16.msra.mxu0 %v6767_v53  ;;  %v1502_v53 = vld [vmem:[#allocation9 + $0x6d8] sm:$0xff] }
 0x2ec   :  { %4708 = vmatpush1.bf16.msra.mxu1 %v6769_v54  ;;  %4623 = vmatprep.subr.bf16.mxu0 %v6784_v56  ;;  %v6879_v54 = vcombine.low %v1477_v38, %v1485_v39  ;;  %v6881_v56 = vcombine.low %v1478_v40, %v1486_v41  ;;  %v6898_v58 = vcombine.high %v1494_v52, %v1502_v53  ;;  %v1589_v39 = vld [vmem:[#allocation9 + $0x990] sm:$0xff]  ;;  %v1590_v41 = vld [vmem:[#allocation9 + $0x998] sm:$0xff] }
 0x2ed   :  { %4709 = vmatprep.subr.bf16.mxu1 %v6786_v57  ;;  %v6896_v57 = vcombine.high %v1493_v48, %v1501_v49  ;;  %v1597_v40 = vld [vmem:[#allocation9 + $0x9d0] sm:$0xff] }
 0x2ef   :  { %4624 = vmatpush1.bf16.msra.mxu0 %v6783_v62  ;;  %v1518_v62 = vld [vmem:[#allocation9 + $0x758] sm:$0xff] }
 0x2f0   :  { %4710 = vmatpush1.bf16.msra.mxu1 %v6785_v63  ;;  %4625 = vmatprep.subr.bf16.mxu0 %v6800_v0  ;;  %v6895_v63 = vcombine.low %v1493_v48, %v1501_v49  ;;  %v6897_v0 = vcombine.low %v1494_v52, %v1502_v53  ;;  %v6914_v2 = vcombine.high %v1510_v61, %v1518_v62  ;;  %v1605_v49 = vld [vmem:[#allocation9 + $0xa10] sm:$0xff]  ;;  %v1606_v53 = vld [vmem:[#allocation9 + $0xa18] sm:$0xff] }
 0x2f1   :  { %4711 = vmatprep.subr.bf16.mxu1 %v6802_v1  ;;  %v6912_v1 = vcombine.high %v1509_v59, %v1517_v60  ;;  %v1613_v52 = vld [vmem:[#allocation9 + $0xa50] sm:$0xff] }
 0x2f3   :  { %4626 = vmatpush1.bf16.msra.mxu0 %v6799_v6  ;;  %v1534_v6 = vld [vmem:[#allocation9 + $0x7d8] sm:$0xff] }
 0x2f4   :  { %4712 = vmatpush1.bf16.msra.mxu1 %v6801_v7  ;;  %4627 = vmatprep.subr.bf16.mxu0 %v6816_v8  ;;  %v6911_v7 = vcombine.low %v1509_v59, %v1517_v60  ;;  %v6913_v8 = vcombine.low %v1510_v61, %v1518_v62  ;;  %v6930_v10 = vcombine.high %v1526_v5, %v1534_v6  ;;  %v1621_v60 = vld [vmem:[#allocation9 + $0xa90] sm:$0xff]  ;;  %v1622_v62 = vld [vmem:[#allocation9 + $0xa98] sm:$0xff] }
 0x2f5   :  { %4713 = vmatprep.subr.bf16.mxu1 %v6818_v9  ;;  %v6928_v9 = vcombine.high %v1525_v3, %v1533_v4  ;;  %v1629_v61 = vld [vmem:[#allocation9 + $0xad0] sm:$0xff] }
 0x2f7   :  { %4628 = vmatpush1.bf16.msra.mxu0 %v6815_v14  ;;  %v1550_v14 = vld [vmem:[#allocation9 + $0x858] sm:$0xff] }
 0x2f8   :  { %4714 = vmatpush1.bf16.msra.mxu1 %v6817_v17  ;;  %4629 = vmatprep.subr.bf16.mxu0 %v6832_v19  ;;  %v6927_v17 = vcombine.low %v1525_v3, %v1533_v4  ;;  %v6929_v19 = vcombine.low %v1526_v5, %v1534_v6  ;;  %v6946_v23 = vcombine.high %v1542_v13, %v1550_v14  ;;  %v1637_v4 = vld [vmem:[#allocation9 + $0xb10] sm:$0xff]  ;;  %v1638_v6 = vld [vmem:[#allocation9 + $0xb18] sm:$0xff] }
 0x2f9   :  { %4715 = vmatprep.subr.bf16.mxu1 %v6834_v21  ;;  %v6944_v21 = vcombine.high %v1541_v11, %v1549_v12  ;;  %v1645_v5 = vld [vmem:[#allocation9 + $0xb50] sm:$0xff] }
 0x2fa   :  { %v1653_v12 = vld [vmem:[#allocation9 + $0xb90] sm:$0xff] }
 0x2fb   :  { %4630 = vmatpush1.bf16.msra.mxu0 %v6831_v55  ;;  %v1558_v55 = vld [vmem:[#allocation9 + $0x898] sm:$0xff] }
 0x2fc   :  { %4716 = vmatpush1.bf16.msra.mxu1 %v6833_v27  ;;  %4631 = vmatprep.subr.bf16.mxu0 %v6848_v28  ;;  %v1566_v27 = vld [vmem:[#allocation9 + $0x8d8] sm:$0xff]  ;;  %v6945_v28 = vcombine.low %v1542_v13, %v1550_v14  ;;  %v1661_v13 = vld [vmem:[#allocation9 + $0xbd0] sm:$0xff] }
 0x2fd   :  { %4717 = vmatprep.subr.bf16.mxu1 %v6850_v29  ;;  %v6960_v29 = vcombine.high %v1557_v24, %v1565_v25  ;;  %v6962_v32 = vcombine.high %v1558_v55, %v1566_v27  ;;  %v1654_v14 = vld [vmem:[#allocation9 + $0xb98] sm:$0xff] }
 0x2ff   :  { %4632 = vmatpush1.bf16.msra.mxu0 %v6847_v34  ;;  %v1582_v34 = vld [vmem:[#allocation9 + $0x958] sm:$0xff] }
 0x300   :  { %4718 = vmatpush1.bf16.msra.mxu1 %v6849_v35  ;;  %4633 = vmatprep.subr.bf16.mxu0 %v6864_v36  ;;  %v6959_v35 = vcombine.low %v1557_v24, %v1565_v25  ;;  %v6961_v36 = vcombine.low %v1558_v55, %v1566_v27  ;;  %v6978_v38 = vcombine.high %v1574_v33, %v1582_v34  ;;  %v1669_v25 = vld [vmem:[#allocation9 + $0xc10] sm:$0xff]  ;;  %v1670_v55 = vld [vmem:[#allocation9 + $0xc18] sm:$0xff] }
 0x301   :  { %4719 = vmatprep.subr.bf16.mxu1 %v6866_v37  ;;  %v6976_v37 = vcombine.high %v1573_v30, %v1581_v31  ;;  %v1678_v27 = vld [vmem:[#allocation9 + $0xc58] sm:$0xff] }
 0x303   :  { %4634 = vmatpush1.bf16.msra.mxu0 %v6863_v42  ;;  %v1598_v42 = vld [vmem:[#allocation9 + $0x9d8] sm:$0xff] }
 0x304   :  { %4720 = vmatpush1.bf16.msra.mxu1 %v6865_v43  ;;  %4635 = vmatprep.subr.bf16.mxu0 %v6880_v44  ;;  %v6975_v43 = vcombine.low %v1573_v30, %v1581_v31  ;;  %v6977_v44 = vcombine.low %v1574_v33, %v1582_v34  ;;  %v6994_v48 = vcombine.high %v1590_v41, %v1598_v42  ;;  %v1693_v33 = vld [vmem:[#allocation9 + $0xcd0] sm:$0xff]  ;;  %v1686_v34 = vld [vmem:[#allocation9 + $0xc98] sm:$0xff] }
 0x305   :  { %4721 = vmatprep.subr.bf16.mxu1 %v6882_v47  ;;  %v6992_v47 = vcombine.high %v1589_v39, %v1597_v40  ;;  %v7074_v31 = vcombine.high %v1670_v55, %v1678_v27 }
 0x307   :  { %4636 = vmatpush1.bf16.msra.mxu0 %v6879_v54  ;;  %v1614_v54 = vld [vmem:[#allocation9 + $0xa58] sm:$0xff] }
 0x308   :  { %4722 = vmatpush1.bf16.msra.mxu1 %v6881_v56  ;;  %4637 = vmatprep.subr.bf16.mxu0 %v6896_v57  ;;  %v6991_v56 = vcombine.low %v1589_v39, %v1597_v40  ;;  %v6993_v57 = vcombine.low %v1590_v41, %v1598_v42  ;;  %v7010_v59 = vcombine.high %v1606_v53, %v1614_v54  ;;  %v1701_v40 = vld [vmem:[#allocation9 + $0xd10] sm:$0xff]  ;;  %v1702_v42 = vld [vmem:[#allocation9 + $0xd18] sm:$0xff] }
 0x309   :  { %4723 = vmatprep.subr.bf16.mxu1 %v6898_v58  ;;  %v7008_v58 = vcombine.high %v1605_v49, %v1613_v52  ;;  %v1709_v41 = vld [vmem:[#allocation9 + $0xd50] sm:$0xff] }
 0x30b   :  { %4638 = vmatpush1.bf16.msra.mxu0 %v6895_v63  ;;  %v1630_v63 = vld [vmem:[#allocation9 + $0xad8] sm:$0xff] }
 0x30c   :  { %4724 = vmatpush1.bf16.msra.mxu1 %v6897_v0  ;;  %4639 = vmatprep.subr.bf16.mxu0 %v6912_v1  ;;  %v7007_v0 = vcombine.low %v1605_v49, %v1613_v52  ;;  %v7009_v1 = vcombine.low %v1606_v53, %v1614_v54  ;;  %v7026_v3 = vcombine.high %v1622_v62, %v1630_v63  ;;  %v1717_v52 = vld [vmem:[#allocation9 + $0xd90] sm:$0xff]  ;;  %v1718_v54 = vld [vmem:[#allocation9 + $0xd98] sm:$0xff] }
 0x30d   :  { %4725 = vmatprep.subr.bf16.mxu1 %v6914_v2  ;;  %v7024_v2 = vcombine.high %v1621_v60, %v1629_v61  ;;  %v1725_v53 = vld [vmem:[#allocation9 + $0xdd0] sm:$0xff] }
 0x30f   :  { %4640 = vmatpush1.bf16.msra.mxu0 %v6911_v7  ;;  %v1646_v7 = vld [vmem:[#allocation9 + $0xb58] sm:$0xff] }
 0x310   :  { %4726 = vmatpush1.bf16.msra.mxu1 %v6913_v8  ;;  %4641 = vmatprep.subr.bf16.mxu0 %v6928_v9  ;;  %v7023_v8 = vcombine.low %v1621_v60, %v1629_v61  ;;  %v7025_v9 = vcombine.low %v1622_v62, %v1630_v63  ;;  %v7042_v11 = vcombine.high %v1638_v6, %v1646_v7  ;;  %v1733_v61 = vld [vmem:[#allocation9 + $0xe10] sm:$0xff]  ;;  %v1734_v63 = vld [vmem:[#allocation9 + $0xe18] sm:$0xff] }
 0x311   :  { %4727 = vmatprep.subr.bf16.mxu1 %v6930_v10  ;;  %v7040_v10 = vcombine.high %v1637_v4, %v1645_v5  ;;  %v1741_v62 = vld [vmem:[#allocation9 + $0xe50] sm:$0xff] }
 0x313   :  { %4642 = vmatpush1.bf16.msra.mxu0 %v6927_v17  ;;  %v1662_v17 = vld [vmem:[#allocation9 + $0xbd8] sm:$0xff] }
 0x314   :  { %4728 = vmatpush1.bf16.msra.mxu1 %v6929_v19  ;;  %4654 = vmatprep.subr.bf16.mxu0 %v6944_v21  ;;  %v7039_v19 = vcombine.low %v1637_v4, %v1645_v5  ;;  %v7041_v21 = vcombine.low %v1638_v6, %v1646_v7  ;;  %v7058_v24 = vcombine.high %v1654_v14, %v1662_v17  ;;  %v1749_v5 = vld [vmem:[#allocation9 + $0xe90] sm:$0xff]  ;;  %v1750_v7 = vld [vmem:[#allocation9 + $0xe98] sm:$0xff] }
 0x315   :  { %4740 = vmatprep.subr.bf16.mxu1 %v6946_v23  ;;  %v7056_v23 = vcombine.high %v1653_v12, %v1661_v13  ;;  %v1757_v6 = vld [vmem:[#allocation9 + $0xed0] sm:$0xff] }
 0x316   :  { %4644 = vmatmul.mubr.bf16.vlgmr.msra.gmra.mrb[12].mxu0 %v8320_v45 }
 0x317   :  { %4730 = vmatmul.mubr.bf16.vlgmr.msra.gmra.mrb[12].mxu1 %v8320_v45  ;;  %4655 = vmatpush1.bf16.msra.mxu0 %v6943_v26  ;;  %v1677_v26 = vld [vmem:[#allocation9 + $0xc50] sm:$0xff] }
 0x318   :  { %4686 = vmatprep.mubr.bf16.mxu0 %v8326_v51  ;;  %4741 = vmatpush1.bf16.msra.mxu1 %v6945_v28  ;;  %v7055_v28 = vcombine.low %v1653_v12, %v1661_v13  ;;  %v7072_v30 = vcombine.high %v1669_v25, %v1677_v26  ;;  %v1765_v13 = vld [vmem:[#allocation9 + $0xf10] sm:$0xff] }
 0x319   :  { %4772 = vmatprep.mubr.bf16.mxu1 %v8326_v51  ;;  %4656 = vmatprep.subr.bf16.mxu0 %v6960_v29  ;;  %v7057_v29 = vcombine.low %v1654_v14, %v1662_v17  ;;  %v1773_v14 = vld [vmem:[#allocation9 + $0xf50] sm:$0xff]  ;;  %v1766_v17 = vld [vmem:[#allocation9 + $0xf18] sm:$0xff] }
 0x31a   :  { %4742 = vmatprep.subr.bf16.mxu1 %v6962_v32  ;;  %v1685_v32 = vld [vmem:[#allocation9 + $0xc90] sm:$0xff] }
 0x31b   :  { %4657 = vmatpush1.bf16.msra.mxu0 %v6959_v35  ;;  %v1694_v35 = vld [vmem:[#allocation9 + $0xcd8] sm:$0xff] }
 0x31c   :  { %4743 = vmatpush1.bf16.msra.mxu1 %v6961_v36  ;;  %4658 = vmatprep.subr.bf16.mxu0 %v6976_v37  ;;  %v7071_v36 = vcombine.low %v1669_v25, %v1677_v26  ;;  %v7073_v37 = vcombine.low %v1670_v55, %v1678_v27  ;;  %v7090_v39 = vcombine.high %v1686_v34, %v1694_v35  ;;  %v1781_v26 = vld [vmem:[#allocation9 + $0xf90] sm:$0xff]  ;;  %v1782_v27 = vld [vmem:[#allocation9 + $0xf98] sm:$0xff] }
 0x31d   :  { %4744 = vmatprep.subr.bf16.mxu1 %v6978_v38  ;;  %v7088_v38 = vcombine.high %v1685_v32, %v1693_v33  ;;  %v1789_v55 = vld [vmem:[#allocation9 + $0xfd0] sm:$0xff] }
 0x31f   :  { %4659 = vmatpush1.bf16.msra.mxu0 %v6975_v43  ;;  %v1710_v43 = vld [vmem:[#allocation9 + $0xd58] sm:$0xff] }
 0x320   :  { %4745 = vmatpush1.bf16.msra.mxu1 %v6977_v44  ;;  %4660 = vmatprep.subr.bf16.mxu0 %v6992_v47  ;;  %v7087_v44 = vcombine.low %v1685_v32, %v1693_v33  ;;  %v7089_v47 = vcombine.low %v1686_v34, %v1694_v35  ;;  %v7106_v49 = vcombine.high %v1702_v42, %v1710_v43  ;;  %v1287_v33 = vld [vmem:[#allocation9 + $0x20] sm:$0xff]  ;;  %v1288_v35 = vld [vmem:[#allocation9 + $0x28] sm:$0xff] }
 0x321   :  { %4746 = vmatprep.subr.bf16.mxu1 %v6994_v48  ;;  %v7104_v48 = vcombine.high %v1701_v40, %v1709_v41  ;;  %v1295_v34 = vld [vmem:[#allocation9 + $0x60] sm:$0xff] }
 0x323   :  { %4661 = vmatpush1.bf16.msra.mxu0 %v6991_v56  ;;  %v1726_v56 = vld [vmem:[#allocation9 + $0xdd8] sm:$0xff] }
 0x324   :  { %4747 = vmatpush1.bf16.msra.mxu1 %v6993_v57  ;;  %4662 = vmatprep.subr.bf16.mxu0 %v7008_v58  ;;  %v7103_v57 = vcombine.low %v1701_v40, %v1709_v41  ;;  %v7105_v58 = vcombine.low %v1702_v42, %v1710_v43  ;;  %v7122_v60 = vcombine.high %v1718_v54, %v1726_v56  ;;  %v1303_v41 = vld [vmem:[#allocation9 + $0xa0] sm:$0xff] }
 0x325   :  { %4748 = vmatprep.subr.bf16.mxu1 %v7010_v59  ;;  %v7120_v59 = vcombine.high %v1717_v52, %v1725_v53  ;;  %v1311_v42 = vld [vmem:[#allocation9 + $0xe0] sm:$0xff]  ;;  %v6691_v43 = vcombine.low %v1287_v33, %v1295_v34 }
 0x327   :  { %4663 = vmatpush1.bf16.msra.mxu0 %v7007_v0  ;;  %v1742_v0 = vld [vmem:[#allocation9 + $0xe58] sm:$0xff] }
 0x328   :  { %4749 = vmatpush1.bf16.msra.mxu1 %v7009_v1  ;;  %4664 = vmatprep.subr.bf16.mxu0 %v7024_v2  ;;  %v7119_v1 = vcombine.low %v1717_v52, %v1725_v53  ;;  %v7121_v2 = vcombine.low %v1718_v54, %v1726_v56  ;;  %v7138_v4 = vcombine.high %v1734_v63, %v1742_v0  ;;  %v1319_v52 = vld [vmem:[#allocation9 + $0x120] sm:$0xff]  ;;  %v1320_v56 = vld [vmem:[#allocation9 + $0x128] sm:$0xff] }
 0x329   :  { %4750 = vmatprep.subr.bf16.mxu1 %v7026_v3  ;;  %v7136_v3 = vcombine.high %v1733_v61, %v1741_v62  ;;  %v1327_v53 = vld [vmem:[#allocation9 + $0x160] sm:$0xff] }
 0x32b   :  { %4665 = vmatpush1.bf16.msra.mxu0 %v7023_v8  ;;  %v1758_v8 = vld [vmem:[#allocation9 + $0xed8] sm:$0xff] }
 0x32c   :  { %4751 = vmatpush1.bf16.msra.mxu1 %v7025_v9  ;;  %4666 = vmatprep.subr.bf16.mxu0 %v7040_v10  ;;  %v7135_v9 = vcombine.low %v1733_v61, %v1741_v62  ;;  %v7137_v10 = vcombine.low %v1734_v63, %v1742_v0  ;;  %v7154_v12 = vcombine.high %v1750_v7, %v1758_v8  ;;  %v1335_v62 = vld [vmem:[#allocation9 + $0x1a0] sm:$0xff]  ;;  %v1336_v0 = vld [vmem:[#allocation9 + $0x1a8] sm:$0xff] }
 0x32d   :  { %4752 = vmatprep.subr.bf16.mxu1 %v7042_v11  ;;  %v7152_v11 = vcombine.high %v1749_v5, %v1757_v6  ;;  %v1343_v63 = vld [vmem:[#allocation9 + $0x1e0] sm:$0xff] }
 0x32f   :  { %4667 = vmatpush1.bf16.msra.mxu0 %v7039_v19  ;;  %v1774_v19 = vld [vmem:[#allocation9 + $0xf58] sm:$0xff] }
 0x330   :  { %4753 = vmatpush1.bf16.msra.mxu1 %v7041_v21  ;;  %4668 = vmatprep.subr.bf16.mxu0 %v7056_v23  ;;  %v7151_v21 = vcombine.low %v1749_v5, %v1757_v6  ;;  %v7153_v23 = vcombine.low %v1750_v7, %v1758_v8  ;;  %v7170_v25 = vcombine.high %v1766_v17, %v1774_v19  ;;  %v1351_v6 = vld [vmem:[#allocation9 + $0x220] sm:$0xff]  ;;  %v1352_v8 = vld [vmem:[#allocation9 + $0x228] sm:$0xff] }
 0x331   :  { %4754 = vmatprep.subr.bf16.mxu1 %v7058_v24  ;;  %v7168_v24 = vcombine.high %v1765_v13, %v1773_v14  ;;  %v1359_v7 = vld [vmem:[#allocation9 + $0x260] sm:$0xff] }
 0x333   :  { %4669 = vmatpush1.bf16.msra.mxu0 %v7055_v28  ;;  %v1790_v28 = vld [vmem:[#allocation9 + $0xfd8] sm:$0xff] }
 0x334   :  { %4755 = vmatpush1.bf16.msra.mxu1 %v7057_v29  ;;  %4670 = vmatprep.subr.bf16.mxu0 %v7072_v30  ;;  %v7167_v29 = vcombine.low %v1765_v13, %v1773_v14  ;;  %v7169_v30 = vcombine.low %v1766_v17, %v1774_v19  ;;  %v7186_v32 = vcombine.high %v1782_v27, %v1790_v28  ;;  %v1367_v14 = vld [vmem:[#allocation9 + $0x2a0] sm:$0xff]  ;;  %v1368_v19 = vld [vmem:[#allocation9 + $0x2a8] sm:$0xff] }
 0x335   :  { %4756 = vmatprep.subr.bf16.mxu1 %v7074_v31  ;;  %v7184_v31 = vcombine.high %v1781_v26, %v1789_v55  ;;  %v1375_v17 = vld [vmem:[#allocation9 + $0x2e0] sm:$0xff] }
 0x337   :  { %4671 = vmatpush1.bf16.msra.mxu0 %v7071_v36  ;;  %v1296_v36 = vld [vmem:[#allocation9 + $0x68] sm:$0xff] }
 0x338   :  { %4757 = vmatpush1.bf16.msra.mxu1 %v7073_v37  ;;  %4672 = vmatprep.subr.bf16.mxu0 %v7088_v38  ;;  %v7183_v37 = vcombine.low %v1781_v26, %v1789_v55  ;;  %v7185_v38 = vcombine.low %v1782_v27, %v1790_v28  ;;  %v6694_v40 = vcombine.high %v1288_v35, %v1296_v36  ;;  %v1383_v55 = vld [vmem:[#allocation9 + $0x320] sm:$0xff]  ;;  %v1384_v28 = vld [vmem:[#allocation9 + $0x328] sm:$0xff] }
 0x339   :  { %4758 = vmatprep.subr.bf16.mxu1 %v7090_v39  ;;  %v6692_v39 = vcombine.high %v1287_v33, %v1295_v34  ;;  %v1391_v27 = vld [vmem:[#allocation9 + $0x360] sm:$0xff] }
 0x33a   :  { %v1399_v34 = vld [vmem:[#allocation9 + $0x3a0] sm:$0xff] }
 0x33b   :  { %4673 = vmatpush1.bf16.msra.mxu0 %v7087_v44  ;;  %v1304_v44 = vld [vmem:[#allocation9 + $0xa8] sm:$0xff] }
 0x33c   :  { %4759 = vmatpush1.bf16.msra.mxu1 %v7089_v47  ;;  %4674 = vmatprep.subr.bf16.mxu0 %v7104_v48  ;;  %v1312_v47 = vld [vmem:[#allocation9 + $0xe8] sm:$0xff]  ;;  %v6693_v48 = vcombine.low %v1288_v35, %v1296_v36  ;;  %v1407_v35 = vld [vmem:[#allocation9 + $0x3e0] sm:$0xff] }
 0x33d   :  { %4760 = vmatprep.subr.bf16.mxu1 %v7106_v49  ;;  %v6708_v49 = vcombine.high %v1303_v41, %v1311_v42  ;;  %v6710_v54 = vcombine.high %v1304_v44, %v1312_v47  ;;  %v1400_v36 = vld [vmem:[#allocation9 + $0x3a8] sm:$0xff] }
 0x33f   :  { %4675 = vmatpush1.bf16.msra.mxu0 %v7103_v57  ;;  %v1328_v57 = vld [vmem:[#allocation9 + $0x168] sm:$0xff] }
 0x340   :  { %4761 = vmatpush1.bf16.msra.mxu1 %v7105_v58  ;;  %4676 = vmatprep.subr.bf16.mxu0 %v7120_v59  ;;  %v6707_v58 = vcombine.low %v1303_v41, %v1311_v42  ;;  %v6709_v59 = vcombine.low %v1304_v44, %v1312_v47  ;;  %v6726_v61 = vcombine.high %v1320_v56, %v1328_v57  ;;  %v1415_v42 = vld [vmem:[#allocation9 + $0x420] sm:$0xff]  ;;  %v1416_v44 = vld [vmem:[#allocation9 + $0x428] sm:$0xff] }
 0x341   :  { %4762 = vmatprep.subr.bf16.mxu1 %v7122_v60  ;;  %v6724_v60 = vcombine.high %v1319_v52, %v1327_v53  ;;  %v1424_v47 = vld [vmem:[#allocation9 + $0x468] sm:$0xff] }
 0x343   :  { %4677 = vmatpush1.bf16.msra.mxu0 %v7119_v1  ;;  %v1344_v1 = vld [vmem:[#allocation9 + $0x1e8] sm:$0xff] }
 0x344   :  { %4763 = vmatpush1.bf16.msra.mxu1 %v7121_v2  ;;  %4678 = vmatprep.subr.bf16.mxu0 %v7136_v3  ;;  %v6723_v2 = vcombine.low %v1319_v52, %v1327_v53  ;;  %v6725_v3 = vcombine.low %v1320_v56, %v1328_v57  ;;  %v6742_v5 = vcombine.high %v1336_v0, %v1344_v1  ;;  %v1439_v56 = vld [vmem:[#allocation9 + $0x4e0] sm:$0xff]  ;;  %v1432_v57 = vld [vmem:[#allocation9 + $0x4a8] sm:$0xff] }
 0x345   :  { %4764 = vmatprep.subr.bf16.mxu1 %v7138_v4  ;;  %v6740_v4 = vcombine.high %v1335_v62, %v1343_v63  ;;  %v6822_v53 = vcombine.high %v1416_v44, %v1424_v47 }
 0x347   :  { %4679 = vmatpush1.bf16.msra.mxu0 %v7135_v9  ;;  %v1360_v9 = vld [vmem:[#allocation9 + $0x268] sm:$0xff] }
 0x348   :  { %4765 = vmatpush1.bf16.msra.mxu1 %v7137_v10  ;;  %4680 = vmatprep.subr.bf16.mxu0 %v7152_v11  ;;  %v6739_v10 = vcombine.low %v1335_v62, %v1343_v63  ;;  %v6741_v11 = vcombine.low %v1336_v0, %v1344_v1  ;;  %v6758_v13 = vcombine.high %v1352_v8, %v1360_v9  ;;  %v1447_v63 = vld [vmem:[#allocation9 + $0x520] sm:$0xff]  ;;  %v1448_v1 = vld [vmem:[#allocation9 + $0x528] sm:$0xff] }
 0x349   :  { %4766 = vmatprep.subr.bf16.mxu1 %v7154_v12  ;;  %v6756_v12 = vcombine.high %v1351_v6, %v1359_v7  ;;  %v1455_v0 = vld [vmem:[#allocation9 + $0x560] sm:$0xff] }
 0x34b   :  { %4681 = vmatpush1.bf16.msra.mxu0 %v7151_v21  ;;  %v1376_v21 = vld [vmem:[#allocation9 + $0x2e8] sm:$0xff] }
 0x34c   :  { %4767 = vmatpush1.bf16.msra.mxu1 %v7153_v23  ;;  %4682 = vmatprep.subr.bf16.mxu0 %v7168_v24  ;;  %v6755_v23 = vcombine.low %v1351_v6, %v1359_v7  ;;  %v6757_v24 = vcombine.low %v1352_v8, %v1360_v9  ;;  %v6774_v26 = vcombine.high %v1368_v19, %v1376_v21  ;;  %v1463_v7 = vld [vmem:[#allocation9 + $0x5a0] sm:$0xff]  ;;  %v1464_v9 = vld [vmem:[#allocation9 + $0x5a8] sm:$0xff] }
 0x34d   :  { %4768 = vmatprep.subr.bf16.mxu1 %v7170_v25  ;;  %v6772_v25 = vcombine.high %v1367_v14, %v1375_v17  ;;  %v1471_v8 = vld [vmem:[#allocation9 + $0x5e0] sm:$0xff] }
 0x34f   :  { %4683 = vmatpush1.bf16.msra.mxu0 %v7167_v29  ;;  %v1392_v29 = vld [vmem:[#allocation9 + $0x368] sm:$0xff] }
 0x350   :  { %4769 = vmatpush1.bf16.msra.mxu1 %v7169_v30  ;;  %4684 = vmatprep.subr.bf16.mxu0 %v7184_v31  ;;  %v6771_v30 = vcombine.low %v1367_v14, %v1375_v17  ;;  %v6773_v31 = vcombine.low %v1368_v19, %v1376_v21  ;;  %v6790_v33 = vcombine.high %v1384_v28, %v1392_v29  ;;  %v1479_v17 = vld [vmem:[#allocation9 + $0x620] sm:$0xff]  ;;  %v1480_v21 = vld [vmem:[#allocation9 + $0x628] sm:$0xff] }
 0x351   :  { %4770 = vmatprep.subr.bf16.mxu1 %v7186_v32  ;;  %v6788_v32 = vcombine.high %v1383_v55, %v1391_v27  ;;  %v1487_v19 = vld [vmem:[#allocation9 + $0x660] sm:$0xff] }
 0x353   :  { %4685 = vmatpush1.bf16.msra.mxu0 %v7183_v37  ;;  %v1408_v37 = vld [vmem:[#allocation9 + $0x3e8] sm:$0xff] }
 0x354   :  { %4771 = vmatpush1.bf16.msra.mxu1 %v7185_v38  ;;  %4783 = vmatprep.subr.bf16.mxu0 %v6692_v39  ;;  %v6787_v38 = vcombine.low %v1383_v55, %v1391_v27  ;;  %v6789_v39 = vcombine.low %v1384_v28, %v1392_v29  ;;  %v6806_v41 = vcombine.high %v1400_v36, %v1408_v37  ;;  %v1495_v27 = vld [vmem:[#allocation9 + $0x6a0] sm:$0xff]  ;;  %v1496_v29 = vld [vmem:[#allocation9 + $0x6a8] sm:$0xff] }
 0x355   :  { %4869 = vmatprep.subr.bf16.mxu1 %v6694_v40  ;;  %v6804_v40 = vcombine.high %v1399_v34, %v1407_v35  ;;  %v1503_v28 = vld [vmem:[#allocation9 + $0x6e0] sm:$0xff] }
 0x356   :  { %4687 = vmatmul.mubr.bf16.vlgmr.msra.gmra.mrb[12].mxu0 %v8322_v46 }
 0x357   :  { %4773 = vmatmul.mubr.bf16.vlgmr.msra.gmra.mrb[12].mxu1 %v8322_v46  ;;  %4784 = vmatpush1.bf16.msra.mxu0 %v6691_v43  ;;  %v1423_v43 = vld [vmem:[#allocation9 + $0x460] sm:$0xff] }
 0x358   :  { %4815 = vmatprep.mubr.bf16.mxu0 %v8324_v50  ;;  %4870 = vmatpush1.bf16.msra.mxu1 %v6693_v48  ;;  %v6803_v48 = vcombine.low %v1399_v34, %v1407_v35  ;;  %v6820_v52 = vcombine.high %v1415_v42, %v1423_v43  ;;  %v1511_v35 = vld [vmem:[#allocation9 + $0x720] sm:$0xff] }
 0x359   :  { %4901 = vmatprep.mubr.bf16.mxu1 %v8324_v50  ;;  %4785 = vmatprep.subr.bf16.mxu0 %v6708_v49  ;;  %v6805_v49 = vcombine.low %v1400_v36, %v1408_v37  ;;  %v1519_v36 = vld [vmem:[#allocation9 + $0x760] sm:$0xff]  ;;  %v1512_v37 = vld [vmem:[#allocation9 + $0x728] sm:$0xff] }
 0x35a   :  { %4871 = vmatprep.subr.bf16.mxu1 %v6710_v54  ;;  %v1431_v54 = vld [vmem:[#allocation9 + $0x4a0] sm:$0xff] }
 0x35b   :  { %4786 = vmatpush1.bf16.msra.mxu0 %v6707_v58  ;;  %v1440_v58 = vld [vmem:[#allocation9 + $0x4e8] sm:$0xff] }
 0x35c   :  { %4872 = vmatpush1.bf16.msra.mxu1 %v6709_v59  ;;  %4787 = vmatprep.subr.bf16.mxu0 %v6724_v60  ;;  %v6819_v59 = vcombine.low %v1415_v42, %v1423_v43  ;;  %v6821_v60 = vcombine.low %v1416_v44, %v1424_v47  ;;  %v6838_v62 = vcombine.high %v1432_v57, %v1440_v58  ;;  %v1527_v43 = vld [vmem:[#allocation9 + $0x7a0] sm:$0xff]  ;;  %v1528_v47 = vld [vmem:[#allocation9 + $0x7a8] sm:$0xff] }
 0x35d   :  { %4873 = vmatprep.subr.bf16.mxu1 %v6726_v61  ;;  %v6836_v61 = vcombine.high %v1431_v54, %v1439_v56  ;;  %v1535_v44 = vld [vmem:[#allocation9 + $0x7e0] sm:$0xff] }
 0x35f   :  { %4788 = vmatpush1.bf16.msra.mxu0 %v6723_v2  ;;  %v1456_v2 = vld [vmem:[#allocation9 + $0x568] sm:$0xff] }
 0x360   :  { %4874 = vmatpush1.bf16.msra.mxu1 %v6725_v3  ;;  %4789 = vmatprep.subr.bf16.mxu0 %v6740_v4  ;;  %v6835_v3 = vcombine.low %v1431_v54, %v1439_v56  ;;  %v6837_v4 = vcombine.low %v1432_v57, %v1440_v58  ;;  %v6854_v6 = vcombine.high %v1448_v1, %v1456_v2  ;;  %v1543_v56 = vld [vmem:[#allocation9 + $0x820] sm:$0xff]  ;;  %v1544_v58 = vld [vmem:[#allocation9 + $0x828] sm:$0xff] }
 0x361   :  { %4875 = vmatprep.subr.bf16.mxu1 %v6742_v5  ;;  %v6852_v5 = vcombine.high %v1447_v63, %v1455_v0  ;;  %v1551_v57 = vld [vmem:[#allocation9 + $0x860] sm:$0xff] }
 0x363   :  { %4790 = vmatpush1.bf16.msra.mxu0 %v6739_v10  ;;  %v1472_v10 = vld [vmem:[#allocation9 + $0x5e8] sm:$0xff] }
 0x364   :  { %4876 = vmatpush1.bf16.msra.mxu1 %v6741_v11  ;;  %4791 = vmatprep.subr.bf16.mxu0 %v6756_v12  ;;  %v6851_v11 = vcombine.low %v1447_v63, %v1455_v0  ;;  %v6853_v12 = vcombine.low %v1448_v1, %v1456_v2  ;;  %v6870_v14 = vcombine.high %v1464_v9, %v1472_v10  ;;  %v1559_v0 = vld [vmem:[#allocation9 + $0x8a0] sm:$0xff] }
 0x365   :  { %4877 = vmatprep.subr.bf16.mxu1 %v6758_v13  ;;  %v6868_v13 = vcombine.high %v1463_v7, %v1471_v8  ;;  %v1567_v1 = vld [vmem:[#allocation9 + $0x8e0] sm:$0xff]  ;;  %v6947_v2 = vcombine.low %v1543_v56, %v1551_v57 }
 0x367   :  { %4792 = vmatpush1.bf16.msra.mxu0 %v6755_v23  ;;  %v1488_v23 = vld [vmem:[#allocation9 + $0x668] sm:$0xff] }
 0x368   :  { %4878 = vmatpush1.bf16.msra.mxu1 %v6757_v24  ;;  %4793 = vmatprep.subr.bf16.mxu0 %v6772_v25  ;;  %v6867_v24 = vcombine.low %v1463_v7, %v1471_v8  ;;  %v6869_v25 = vcombine.low %v1464_v9, %v1472_v10  ;;  %v6886_v55 = vcombine.high %v1480_v21, %v1488_v23  ;;  %v1575_v7 = vld [vmem:[#allocation9 + $0x920] sm:$0xff]  ;;  %v1576_v10 = vld [vmem:[#allocation9 + $0x928] sm:$0xff] }
 0x369   :  { %4879 = vmatprep.subr.bf16.mxu1 %v6774_v26  ;;  %v6884_v26 = vcombine.high %v1479_v17, %v1487_v19  ;;  %v1583_v8 = vld [vmem:[#allocation9 + $0x960] sm:$0xff] }
 0x36b   :  { %4794 = vmatpush1.bf16.msra.mxu0 %v6771_v30  ;;  %v1504_v30 = vld [vmem:[#allocation9 + $0x6e8] sm:$0xff] }
 0x36c   :  { %4880 = vmatpush1.bf16.msra.mxu1 %v6773_v31  ;;  %4795 = vmatprep.subr.bf16.mxu0 %v6788_v32  ;;  %v6883_v31 = vcombine.low %v1479_v17, %v1487_v19  ;;  %v6885_v32 = vcombine.low %v1480_v21, %v1488_v23  ;;  %v6902_v34 = vcombine.high %v1496_v29, %v1504_v30  ;;  %v1591_v19 = vld [vmem:[#allocation9 + $0x9a0] sm:$0xff]  ;;  %v1592_v23 = vld [vmem:[#allocation9 + $0x9a8] sm:$0xff] }
 0x36d   :  { %4881 = vmatprep.subr.bf16.mxu1 %v6790_v33  ;;  %v6900_v33 = vcombine.high %v1495_v27, %v1503_v28  ;;  %v1599_v21 = vld [vmem:[#allocation9 + $0x9e0] sm:$0xff] }
 0x36f   :  { %4796 = vmatpush1.bf16.msra.mxu0 %v6787_v38  ;;  %v1520_v38 = vld [vmem:[#allocation9 + $0x768] sm:$0xff] }
 0x370   :  { %4882 = vmatpush1.bf16.msra.mxu1 %v6789_v39  ;;  %4797 = vmatprep.subr.bf16.mxu0 %v6804_v40  ;;  %v6899_v39 = vcombine.low %v1495_v27, %v1503_v28  ;;  %v6901_v40 = vcombine.low %v1496_v29, %v1504_v30  ;;  %v6918_v42 = vcombine.high %v1512_v37, %v1520_v38  ;;  %v1607_v28 = vld [vmem:[#allocation9 + $0xa20] sm:$0xff]  ;;  %v1608_v30 = vld [vmem:[#allocation9 + $0xa28] sm:$0xff] }
 0x371   :  { %4883 = vmatprep.subr.bf16.mxu1 %v6806_v41  ;;  %v6916_v41 = vcombine.high %v1511_v35, %v1519_v36  ;;  %v1615_v29 = vld [vmem:[#allocation9 + $0xa60] sm:$0xff] }
 0x373   :  { %4798 = vmatpush1.bf16.msra.mxu0 %v6803_v48  ;;  %v1536_v48 = vld [vmem:[#allocation9 + $0x7e8] sm:$0xff] }
 0x374   :  { %4884 = vmatpush1.bf16.msra.mxu1 %v6805_v49  ;;  %4799 = vmatprep.subr.bf16.mxu0 %v6820_v52  ;;  %v6915_v49 = vcombine.low %v1511_v35, %v1519_v36  ;;  %v6917_v52 = vcombine.low %v1512_v37, %v1520_v38  ;;  %v6934_v54 = vcombine.high %v1528_v47, %v1536_v48  ;;  %v1623_v36 = vld [vmem:[#allocation9 + $0xaa0] sm:$0xff]  ;;  %v1624_v38 = vld [vmem:[#allocation9 + $0xaa8] sm:$0xff] }
 0x375   :  { %4885 = vmatprep.subr.bf16.mxu1 %v6822_v53  ;;  %v6932_v53 = vcombine.high %v1527_v43, %v1535_v44  ;;  %v1631_v37 = vld [vmem:[#allocation9 + $0xae0] sm:$0xff] }
 0x377   :  { %4800 = vmatpush1.bf16.msra.mxu0 %v6819_v59  ;;  %v1552_v59 = vld [vmem:[#allocation9 + $0x868] sm:$0xff] }
 0x378   :  { %4886 = vmatpush1.bf16.msra.mxu1 %v6821_v60  ;;  %4801 = vmatprep.subr.bf16.mxu0 %v6836_v61  ;;  %v6931_v60 = vcombine.low %v1527_v43, %v1535_v44  ;;  %v6933_v61 = vcombine.low %v1528_v47, %v1536_v48  ;;  %v6950_v63 = vcombine.high %v1544_v58, %v1552_v59  ;;  %v1639_v47 = vld [vmem:[#allocation9 + $0xb20] sm:$0xff] }
 0x379   :  { %4887 = vmatprep.subr.bf16.mxu1 %v6838_v62  ;;  %v6948_v62 = vcombine.high %v1543_v56, %v1551_v57  ;;  %v7028_v43 = vcombine.high %v1623_v36, %v1631_v37  ;;  %v1647_v48 = vld [vmem:[#allocation9 + $0xb60] sm:$0xff] }
 0x37b   :  { %4802 = vmatpush1.bf16.msra.mxu0 %v6835_v3  ;;  %v1560_v3 = vld [vmem:[#allocation9 + $0x8a8] sm:$0xff] }
 0x37c   :  { %4888 = vmatpush1.bf16.msra.mxu1 %v6837_v4  ;;  %4803 = vmatprep.subr.bf16.mxu0 %v6852_v5  ;;  %v1568_v4 = vld [vmem:[#allocation9 + $0x8e8] sm:$0xff]  ;;  %v6949_v5 = vcombine.low %v1544_v58, %v1552_v59  ;;  %v7027_v58 = vcombine.low %v1623_v36, %v1631_v37 }
 0x37d   :  { %4889 = vmatprep.subr.bf16.mxu1 %v6854_v6  ;;  %v6964_v6 = vcombine.high %v1559_v0, %v1567_v1  ;;  %v6966_v9 = vcombine.high %v1560_v3, %v1568_v4 }
 0x37f   :  { %4804 = vmatpush1.bf16.msra.mxu0 %v6851_v11  ;;  %v1584_v11 = vld [vmem:[#allocation9 + $0x968] sm:$0xff] }
 0x380   :  { %4890 = vmatpush1.bf16.msra.mxu1 %v6853_v12  ;;  %4805 = vmatprep.subr.bf16.mxu0 %v6868_v13  ;;  %v6963_v12 = vcombine.low %v1559_v0, %v1567_v1  ;;  %v6965_v13 = vcombine.low %v1560_v3, %v1568_v4  ;;  %v6982_v17 = vcombine.high %v1576_v10, %v1584_v11 }
 0x381   :  { %4891 = vmatprep.subr.bf16.mxu1 %v6870_v14  ;;  %v6980_v14 = vcombine.high %v1575_v7, %v1583_v8 }
 0x383   :  { %4806 = vmatpush1.bf16.msra.mxu0 %v6867_v24  ;;  %v1600_v24 = vld [vmem:[#allocation9 + $0x9e8] sm:$0xff] }
 0x384   :  { %4892 = vmatpush1.bf16.msra.mxu1 %v6869_v25  ;;  %4807 = vmatprep.subr.bf16.mxu0 %v6884_v26  ;;  %v6979_v25 = vcombine.low %v1575_v7, %v1583_v8  ;;  %v6981_v26 = vcombine.low %v1576_v10, %v1584_v11  ;;  %v6998_v27 = vcombine.high %v1592_v23, %v1600_v24  ;;  %v1656_v7 = vld [vmem:[#allocation9 + $0xba8] sm:$0xff] }
 0x385   :  { %4893 = vmatprep.subr.bf16.mxu1 %v6886_v55  ;;  %v6996_v55 = vcombine.high %v1591_v19, %v1599_v21  ;;  %v1664_v8 = vld [vmem:[#allocation9 + $0xbe8] sm:$0xff] }
 0x387   :  { %4808 = vmatpush1.bf16.msra.mxu0 %v6883_v31  ;;  %v1616_v31 = vld [vmem:[#allocation9 + $0xa68] sm:$0xff] }
 0x388   :  { %4894 = vmatpush1.bf16.msra.mxu1 %v6885_v32  ;;  %4809 = vmatprep.subr.bf16.mxu0 %v6900_v33  ;;  %v6995_v32 = vcombine.low %v1591_v19, %v1599_v21  ;;  %v6997_v33 = vcombine.low %v1592_v23, %v1600_v24  ;;  %v7014_v35 = vcombine.high %v1608_v30, %v1616_v31 }
 0x389   :  { %4895 = vmatprep.subr.bf16.mxu1 %v6902_v34  ;;  %v7012_v34 = vcombine.high %v1607_v28, %v1615_v29 }
 0x38b   :  { %4810 = vmatpush1.bf16.msra.mxu0 %v6899_v39  ;;  %v1632_v39 = vld [vmem:[#allocation9 + $0xae8] sm:$0xff] }
 0x38c   :  { %4896 = vmatpush1.bf16.msra.mxu1 %v6901_v40  ;;  %4811 = vmatprep.subr.bf16.mxu0 %v6916_v41  ;;  %v7011_v40 = vcombine.low %v1607_v28, %v1615_v29  ;;  %v8350_v41 = vld [vmem:[#allocation10] sm:$0xff]  ;;  %v7030_v44 = vcombine.high %v1624_v38, %v1632_v39  ;;  %v7029_v59 = vcombine.low %v1624_v38, %v1632_v39 }
 0x38d   :  { %4897 = vmatprep.subr.bf16.mxu1 %v6918_v42  ;;  %v7013_v42 = vcombine.low %v1608_v30, %v1616_v31  ;;  %v1806_v56 = vrot.slane %v8350_v41, %v8300_v18  ;;  %v1814_v57 = vrot.slane %v8350_v41, %v8308_v22  ;;  %v1671_v28 = vld [vmem:[#allocation9 + $0xc20] sm:$0xff] }
 0x38e   :  { %v1679_v29 = vld [vmem:[#allocation9 + $0xc60] sm:$0xff] }
 0x38f   :  { %4812 = vmatpush1.bf16.msra.mxu0 %v6915_v49  ;;  %v1802_v49 = vrot.slane %v8350_v41, %v8297_v16 }
 0x390   :  { %4898 = vmatpush1.bf16.msra.mxu1 %v6917_v52  ;;  %4813 = vmatprep.subr.bf16.mxu0 %v6932_v53  ;;  %v1810_v52 = vrot.slane %v8350_v41, %v8304_v20  ;;  %v1640_v53 = vld [vmem:[#allocation9 + $0xb28] sm:$0xff] }
 0x391   :  { %4899 = vmatprep.subr.bf16.mxu1 %v6934_v54  ;;  %v1648_v54 = vld [vmem:[#allocation9 + $0xb68] sm:$0xff] }
 0x392   :  { %v7046_v1 = vcombine.high %v1640_v53, %v1648_v54 }
 0x393   :  { %4814 = vmatpush1.bf16.msra.mxu0 %v6931_v60  ;;  %v7044_v60 = vcombine.high %v1639_v47, %v1647_v48 }
 0x394   :  { %4900 = vmatpush1.bf16.msra.mxu1 %v6933_v61  ;;  %4826 = vmatprep.subr.bf16.mxu0 %v6948_v62  ;;  %v1655_v61 = vld [vmem:[#allocation9 + $0xba0] sm:$0xff] }
 0x395   :  { %4912 = vmatprep.subr.bf16.mxu1 %v6950_v63  ;;  %v1663_v62 = vld [vmem:[#allocation9 + $0xbe0] sm:$0xff] }
 0x396   :  { %4816 = vmatmul.mubr.bf16.vlgmr.msra.gmra.mrb[16].mxu0 %v8320_v45  ;;  %v7060_v24 = vcombine.high %v1655_v61, %v1663_v62 }
 0x397   :  { %4902 = vmatmul.mubr.bf16.vlgmr.msra.gmra.mrb[16].mxu1 %v8320_v45  ;;  %4827 = vmatpush1.bf16.msra.mxu0 %v6947_v2 }
 0x398   :  { %4858 = vmatprep.mubr.bf16.mxu0 %v8326_v51  ;;  %4913 = vmatpush1.bf16.msra.mxu1 %v6949_v5 }
 0x399   :  { %4944 = vmatprep.mubr.bf16.mxu1 %v8326_v51  ;;  %4828 = vmatprep.subr.bf16.mxu0 %v6964_v6  ;;  %v7043_v6 = vcombine.low %v1639_v47, %v1647_v48 }
 0x39a   :  { %4914 = vmatprep.subr.bf16.mxu1 %v6966_v9 }
 0x39b   :  { %4829 = vmatpush1.bf16.msra.mxu0 %v6963_v12 }
 0x39c   :  { %4915 = vmatpush1.bf16.msra.mxu1 %v6965_v13  ;;  %4830 = vmatprep.subr.bf16.mxu0 %v6980_v14  ;;  %v7045_v13 = vcombine.low %v1640_v53, %v1648_v54  ;;  %v7059_v14 = vcombine.low %v1655_v61, %v1663_v62  ;;  %v1688_v53 = vld [vmem:[#allocation9 + $0xca8] sm:$0xff]  ;;  %v1711_v61 = vld [vmem:[#allocation9 + $0xd60] sm:$0xff] }
 0x39d   :  { %4916 = vmatprep.subr.bf16.mxu1 %v6982_v17  ;;  %v1696_v54 = vld [vmem:[#allocation9 + $0xce8] sm:$0xff] }
 0x39e   :  { %v1704_v62 = vld [vmem:[#allocation9 + $0xd28] sm:$0xff] }
 0x39f   :  { %4831 = vmatpush1.bf16.msra.mxu0 %v6979_v25 }
 0x3a0   :  { %4917 = vmatpush1.bf16.msra.mxu1 %v6981_v26  ;;  %4832 = vmatprep.subr.bf16.mxu0 %v6996_v55  ;;  %v7061_v55 = vcombine.low %v1656_v7, %v1664_v8 }
 0x3a1   :  { %4918 = vmatprep.subr.bf16.mxu1 %v6998_v27  ;;  %v7062_v27 = vcombine.high %v1656_v7, %v1664_v8  ;;  %v1728_v7 = vld [vmem:[#allocation9 + $0xde8] sm:$0xff] }
 0x3a3   :  { %4833 = vmatpush1.bf16.msra.mxu0 %v6995_v32 }
 0x3a4   :  { %4919 = vmatpush1.bf16.msra.mxu1 %v6997_v33  ;;  %4834 = vmatprep.subr.bf16.mxu0 %v7012_v34  ;;  %v1672_v34 = vld [vmem:[#allocation9 + $0xc28] sm:$0xff] }
 0x3a5   :  { %4920 = vmatprep.subr.bf16.mxu1 %v7014_v35  ;;  %v1680_v35 = vld [vmem:[#allocation9 + $0xc68] sm:$0xff] }
 0x3a6   :  { %v7078_v48 = vcombine.high %v1672_v34, %v1680_v35 }
 0x3a7   :  { %4835 = vmatpush1.bf16.msra.mxu0 %v7011_v40 }
 0x3a8   :  { %4921 = vmatpush1.bf16.msra.mxu1 %v7013_v42  ;;  %4836 = vmatprep.subr.bf16.mxu0 %v7028_v43  ;;  %v7076_v43 = vcombine.high %v1671_v28, %v1679_v29 }
 0x3a9   :  { %v4516_v63 = vpop.f32.mrb[8].mxu0  ;;  %v4602_v0 = vpop.f32.mrb[8].mxu1  ;;  %4922 = vmatprep.subr.bf16.mxu1 %v7030_v44 }
 0x3aa   :  { %v7508_v2 = vadd.f32 %v4516_v63, %v1802_v49  ;;  %v7512_v3 = vadd.f32 %v4602_v0, %v1810_v52  ;;  %v4518_v4 = vpop.f32.mrb[9].mxu0  ;;  %v4604_v5 = vpop.f32.mrb[9].mxu1  ;;  %v1712_v63 = vld [vmem:[#allocation9 + $0xd68] sm:$0xff] }
 0x3ab   :  { %v7509_v9 = vadd.f32 %v4518_v4, %v1806_v56  ;;  %v7513_v10 = vadd.f32 %v4604_v5, %v1814_v57  ;;  %v4520_v11 = vpop.f32.mrb[10].mxu0  ;;  %v4606_v12 = vpop.f32.mrb[10].mxu1  ;;  %4837 = vmatpush1.bf16.msra.mxu0 %v7027_v58  ;;  %v1719_v4 = vld [vmem:[#allocation9 + $0xda0] sm:$0xff] }
 0x3ac   :  { %v7510_v17 = vadd.f32 %v4520_v11, %v1802_v49  ;;  %v7514_v19 = vadd.f32 %v4606_v12, %v1810_v52  ;;  %4923 = vmatpush1.bf16.msra.mxu1 %v7029_v59  ;;  %v4522_v21 = vpop.f32.mrb[11].mxu0  ;;  %v4608_v23 = vpop.f32.mrb[11].mxu1  ;;  %4838 = vmatprep.subr.bf16.mxu0 %v7044_v60  ;;  %v5127_v30 = vmax.f32 %v7508_v2, 0.0  ;;  %v5129_v31 = vmax.f32 %v7512_v3, 0.0  ;;  %v1687_v49 = vld [vmem:[#allocation9 + $0xca0] sm:$0xff] }
 0x3ad   :  { %v7511_v25 = vadd.f32 %v4522_v21, %v1806_v56  ;;  %v7515_v26 = vadd.f32 %v4608_v23, %v1814_v57  ;;  %4924 = vmatprep.subr.bf16.mxu1 %v7046_v1  ;;  %v5128_v36 = vmax.f32 %v7509_v9, 0.0  ;;  %v5130_v37 = vmax.f32 %v7513_v10, 0.0  ;;  %v1695_v52 = vld [vmem:[#allocation9 + $0xce0] sm:$0xff] }
 0x3ae   :  { %v5143_v32 = vmax.f32 %v7510_v17, 0.0  ;;  %v5145_v33 = vmax.f32 %v7514_v19, 0.0  ;;  %v7075_v56 = vcombine.low %v1671_v28, %v1679_v29  ;;  %v7077_v57 = vcombine.low %v1672_v34, %v1680_v35  ;;  %v1703_v60 = vld [vmem:[#allocation9 + $0xd20] sm:$0xff]  ;;  %v1744_v17 = vld [vmem:[#allocation9 + $0xe68] sm:$0xff] }
 0x3af   :  { %v5144_v38 = vmax.f32 %v7511_v25, 0.0  ;;  %v5146_v39 = vmax.f32 %v7515_v26, 0.0  ;;  %4839 = vmatpush1.bf16.msra.mxu0 %v7043_v6  ;;  %v7092_v58 = vcombine.high %v1687_v49, %v1695_v52  ;;  %v7094_v59 = vcombine.high %v1688_v53, %v1696_v54  ;;  %v1727_v5 = vld [vmem:[#allocation9 + $0xde0] sm:$0xff]  ;;  %v1720_v6 = vld [vmem:[#allocation9 + $0xda8] sm:$0xff] }
 0x3b0   :  { %v8360_v40 = vpack.c.bf16 %v5143_v32, %v5127_v30  ;;  %v8362_v42 = vpack.c.bf16 %v5145_v33, %v5129_v31  ;;  %4925 = vmatpush1.bf16.msra.mxu1 %v7045_v13  ;;  %4840 = vmatprep.subr.bf16.mxu0 %v7060_v24  ;;  %v7091_v0 = vcombine.low %v1687_v49, %v1695_v52  ;;  %v1735_v12 = vld [vmem:[#allocation9 + $0xe20] sm:$0xff]  ;;  %v1768_v34 = vld [vmem:[#allocation9 + $0xf28] sm:$0xff] }
 0x3b1   :  { %v8364_v44 = vpack.c.bf16 %v5144_v38, %v5128_v36  ;;  %v8366_v47 = vpack.c.bf16 %v5146_v39, %v5130_v37  ;;  %4926 = vmatprep.subr.bf16.mxu1 %v7062_v27  ;;  %v7093_v1 = vcombine.low %v1688_v53, %v1696_v54  ;;  %v7108_v2 = vcombine.high %v1703_v60, %v1711_v61  ;;  %v1743_v13 = vld [vmem:[#allocation9 + $0xe60] sm:$0xff]  ;;  %v1760_v27 = vld [vmem:[#allocation9 + $0xee8] sm:$0xff] }
 0x3b2   :  { %v7110_v3 = vcombine.high %v1704_v62, %v1712_v63  ;;  %v7107_v8 = vcombine.low %v1703_v60, %v1711_v61  ;;  %v7109_v9 = vcombine.low %v1704_v62, %v1712_v63  ;;  %v7124_v10 = vcombine.high %v1719_v4, %v1727_v5  ;;  %v1751_v25 = vld [vmem:[#allocation9 + $0xea0] sm:$0xff]  ;;  %v1776_v35 = vld [vmem:[#allocation9 + $0xf68] sm:$0xff]  ;;  %v1290_v60 = vld [vmem:[#allocation9 + $0x38] sm:$0xff] }
 0x3b3   :  { %4841 = vmatpush1.bf16.msra.mxu0 %v7059_v14  ;;  %v7126_v11 = vcombine.high %v1720_v6, %v1728_v7  ;;  %v1736_v14 = vld [vmem:[#allocation9 + $0xe28] sm:$0xff]  ;;  %v7123_v19 = vcombine.low %v1719_v4, %v1727_v5  ;;  %v7125_v21 = vcombine.low %v1720_v6, %v1728_v7  ;;  %v7140_v23 = vcombine.high %v1735_v12, %v1743_v13  ;;  %v1759_v26 = vld [vmem:[#allocation9 + $0xee0] sm:$0xff]  ;;  %v1298_v61 = vld [vmem:[#allocation9 + $0x78] sm:$0xff] }
 0x3b4   :  { %4927 = vmatpush1.bf16.msra.mxu1 %v7061_v55  ;;  %4842 = vmatprep.subr.bf16.mxu0 %v7076_v43  ;;  %v7142_v24 = vcombine.high %v1736_v14, %v1744_v17  ;;  %v1752_v55 = vld [vmem:[#allocation9 + $0xea8] sm:$0xff]  ;;  %v7139_v28 = vcombine.low %v1735_v12, %v1743_v13  ;;  %v7141_v29 = vcombine.low %v1736_v14, %v1744_v17  ;;  %v1767_v32 = vld [vmem:[#allocation9 + $0xf20] sm:$0xff]  ;;  %v1306_v5 = vld [vmem:[#allocation9 + $0xb8] sm:$0xff] }
 0x3b5   :  { %4928 = vmatprep.subr.bf16.mxu1 %v7078_v48  ;;  %v7156_v30 = vcombine.high %v1751_v25, %v1759_v26  ;;  %v7158_v31 = vcombine.high %v1752_v55, %v1760_v27  ;;  %v1775_v33 = vld [vmem:[#allocation9 + $0xf60] sm:$0xff]  ;;  %v7155_v36 = vcombine.low %v1751_v25, %v1759_v26  ;;  %v7157_v37 = vcombine.low %v1752_v55, %v1760_v27  ;;  %v1784_v49 = vld [vmem:[#allocation9 + $0xfa8] sm:$0xff]  ;;  %v1314_v6 = vld [vmem:[#allocation9 + $0xf8] sm:$0xff] }
 0x3b6   :  { %v7172_v38 = vcombine.high %v1767_v32, %v1775_v33  ;;  %v7174_v39 = vcombine.high %v1768_v34, %v1776_v35  ;;  %v1783_v43 = vld [vmem:[#allocation9 + $0xfa0] sm:$0xff]  ;;  %v1792_v52 = vld [vmem:[#allocation9 + $0xfe8] sm:$0xff]  ;;  %v7171_v53 = vcombine.low %v1767_v32, %v1775_v33  ;;  %v7173_v54 = vcombine.low %v1768_v34, %v1776_v35  ;;  %v1322_v12 = vld [vmem:[#allocation9 + $0x138] sm:$0xff] }
 0x3b7   :  { %4843 = vmatpush1.bf16.msra.mxu0 %v7075_v56  ;;  %v1791_v48 = vld [vmem:[#allocation9 + $0xfe0] sm:$0xff]  ;;  %v7189_v63 = vcombine.low %v1784_v49, %v1792_v52  ;;  %v6697_v7 = vcombine.low %v1290_v60, %v1298_v61  ;;  %v1330_v13 = vld [vmem:[#allocation9 + $0x178] sm:$0xff]  ;;  %v6713_v17 = vcombine.low %v1306_v5, %v1314_v6 }
 0x3b8   :  { %4929 = vmatpush1.bf16.msra.mxu1 %v7077_v57  ;;  %4844 = vmatprep.subr.bf16.mxu0 %v7092_v58  ;;  %v7188_v56 = vcombine.high %v1783_v43, %v1791_v48  ;;  %v7190_v57 = vcombine.high %v1784_v49, %v1792_v52  ;;  %v1289_v58 = vld [vmem:[#allocation9 + $0x30] sm:$0xff]  ;;  %v7187_v62 = vcombine.low %v1783_v43, %v1791_v48  ;;  %v1338_v25 = vld [vmem:[#allocation9 + $0x1b8] sm:$0xff] }
 0x3b9   :  { %4930 = vmatprep.subr.bf16.mxu1 %v7094_v59  ;;  %v1297_v59 = vld [vmem:[#allocation9 + $0x70] sm:$0xff]  ;;  %v1346_v26 = vld [vmem:[#allocation9 + $0x1f8] sm:$0xff]  ;;  %v6729_v27 = vcombine.low %v1322_v12, %v1330_v13 }
 0x3ba   :  { %v6695_v4 = vcombine.low %v1289_v58, %v1297_v59  ;;  %v1354_v32 = vld [vmem:[#allocation9 + $0x238] sm:$0xff]  ;;  %v6745_v34 = vcombine.low %v1338_v25, %v1346_v26 }
 0x3bb   :  { %4845 = vmatpush1.bf16.msra.mxu0 %v7091_v0  ;;  %v6696_v0 = vcombine.high %v1289_v58, %v1297_v59  ;;  %v1362_v33 = vld [vmem:[#allocation9 + $0x278] sm:$0xff] }
 0x3bc   :  { %4931 = vmatpush1.bf16.msra.mxu1 %v7093_v1  ;;  %4846 = vmatprep.subr.bf16.mxu0 %v7108_v2  ;;  %v6698_v1 = vcombine.high %v1290_v60, %v1298_v61  ;;  %v1305_v2 = vld [vmem:[#allocation9 + $0xb0] sm:$0xff]  ;;  %v1378_v43 = vld [vmem:[#allocation9 + $0x2f8] sm:$0xff]  ;;  %v6761_v49 = vcombine.low %v1354_v32, %v1362_v33 }
 0x3bd   :  { %4932 = vmatprep.subr.bf16.mxu1 %v7110_v3  ;;  %v1313_v3 = vld [vmem:[#allocation9 + $0xf0] sm:$0xff]  ;;  %v1394_v58 = vld [vmem:[#allocation9 + $0x378] sm:$0xff] }
 0x3be   :  { %v6711_v14 = vcombine.low %v1305_v2, %v1313_v3 }
 0x3bf   :  { %4847 = vmatpush1.bf16.msra.mxu0 %v7107_v8  ;;  %v6712_v8 = vcombine.high %v1305_v2, %v1313_v3  ;;  %v1410_v2 = vld [vmem:[#allocation9 + $0x3f8] sm:$0xff] }
 0x3c0   :  { %4933 = vmatpush1.bf16.msra.mxu1 %v7109_v9  ;;  %4848 = vmatprep.subr.bf16.mxu0 %v7124_v10  ;;  %v1321_v9 = vld [vmem:[#allocation9 + $0x130] sm:$0xff] }
 0x3c1   :  { %4934 = vmatprep.subr.bf16.mxu1 %v7126_v11  ;;  %v1329_v10 = vld [vmem:[#allocation9 + $0x170] sm:$0xff]  ;;  %v6714_v11 = vcombine.high %v1306_v5, %v1314_v6 }
 0x3c2   :  { %v6727_v55 = vcombine.low %v1321_v9, %v1329_v10 }
 0x3c3   :  { %4849 = vmatpush1.bf16.msra.mxu0 %v7123_v19  ;;  %v6728_v19 = vcombine.high %v1321_v9, %v1329_v10  ;;  %v1418_v9 = vld [vmem:[#allocation9 + $0x438] sm:$0xff] }
 0x3c4   :  { %4935 = vmatpush1.bf16.msra.mxu1 %v7125_v21  ;;  %4850 = vmatprep.subr.bf16.mxu0 %v7140_v23  ;;  %v6730_v21 = vcombine.high %v1322_v12, %v1330_v13  ;;  %v1337_v23 = vld [vmem:[#allocation9 + $0x1b0] sm:$0xff]  ;;  %v1426_v10 = vld [vmem:[#allocation9 + $0x478] sm:$0xff] }
 0x3c5   :  { %4936 = vmatprep.subr.bf16.mxu1 %v7142_v24  ;;  %v1345_v24 = vld [vmem:[#allocation9 + $0x1f0] sm:$0xff] }
 0x3c7   :  { %4851 = vmatpush1.bf16.msra.mxu0 %v7139_v28  ;;  %v6744_v28 = vcombine.high %v1337_v23, %v1345_v24 }
 0x3c8   :  { %4937 = vmatpush1.bf16.msra.mxu1 %v7141_v29  ;;  %4852 = vmatprep.subr.bf16.mxu0 %v7156_v30  ;;  %v6746_v29 = vcombine.high %v1338_v25, %v1346_v26  ;;  %v1353_v30 = vld [vmem:[#allocation9 + $0x230] sm:$0xff]  ;;  %v6825_v25 = vcombine.low %v1418_v9, %v1426_v10 }
 0x3c9   :  { %4938 = vmatprep.subr.bf16.mxu1 %v7158_v31  ;;  %v1361_v31 = vld [vmem:[#allocation9 + $0x270] sm:$0xff] }
 0x3ca   :  { %v6760_v35 = vcombine.high %v1353_v30, %v1361_v31  ;;  %v6759_v48 = vcombine.low %v1353_v30, %v1361_v31  ;;  %v1458_v30 = vld [vmem:[#allocation9 + $0x578] sm:$0xff] }
 0x3cb   :  { %4853 = vmatpush1.bf16.msra.mxu0 %v7155_v36  ;;  %v6762_v36 = vcombine.high %v1354_v32, %v1362_v33 }
 0x3cc   :  { %4939 = vmatpush1.bf16.msra.mxu1 %v7157_v37  ;;  %4854 = vmatprep.subr.bf16.mxu0 %v7172_v38  ;;  %v1369_v37 = vld [vmem:[#allocation9 + $0x2b0] sm:$0xff] }
 0x3cd   :  { %4940 = vmatprep.subr.bf16.mxu1 %v7174_v39  ;;  %v1377_v38 = vld [vmem:[#allocation9 + $0x2f0] sm:$0xff]  ;;  %v1370_v39 = vld [vmem:[#allocation9 + $0x2b8] sm:$0xff] }
 0x3ce   :  { %v6776_v52 = vcombine.high %v1369_v37, %v1377_v38  ;;  %v6775_v59 = vcombine.low %v1369_v37, %v1377_v38  ;;  %v6777_v60 = vcombine.low %v1370_v39, %v1378_v43  ;;  %v1474_v37 = vld [vmem:[#allocation9 + $0x5f8] sm:$0xff] }
 0x3cf   :  { %4855 = vmatpush1.bf16.msra.mxu0 %v7171_v53  ;;  %v6778_v53 = vcombine.high %v1370_v39, %v1378_v43 }
 0x3d0   :  { %4941 = vmatpush1.bf16.msra.mxu1 %v7173_v54  ;;  %4856 = vmatprep.subr.bf16.mxu0 %v7188_v56  ;;  %v1385_v54 = vld [vmem:[#allocation9 + $0x330] sm:$0xff] }
 0x3d1   :  { %4942 = vmatprep.subr.bf16.mxu1 %v7190_v57  ;;  %v1393_v56 = vld [vmem:[#allocation9 + $0x370] sm:$0xff]  ;;  %v1386_v57 = vld [vmem:[#allocation9 + $0x338] sm:$0xff] }
 0x3d2   :  { %v6792_v61 = vcombine.high %v1385_v54, %v1393_v56  ;;  %v6791_v3 = vcombine.low %v1385_v54, %v1393_v56  ;;  %v1490_v54 = vld [vmem:[#allocation9 + $0x678] sm:$0xff] }
 0x3d3   :  { %4857 = vmatpush1.bf16.msra.mxu0 %v7187_v62  ;;  %v6794_v62 = vcombine.high %v1386_v57, %v1394_v58 }
 0x3d4   :  { %4943 = vmatpush1.bf16.msra.mxu1 %v7189_v63  ;;  %4955 = vmatprep.subr.bf16.mxu0 %v6696_v0  ;;  %v1401_v63 = vld [vmem:[#allocation9 + $0x3b0] sm:$0xff] }
 0x3d5   :  { %5041 = vmatprep.subr.bf16.mxu1 %v6698_v1  ;;  %v1409_v0 = vld [vmem:[#allocation9 + $0x3f0] sm:$0xff]  ;;  %v1402_v1 = vld [vmem:[#allocation9 + $0x3b8] sm:$0xff] }
 0x3d6   :  { %4859 = vmatmul.mubr.bf16.vlgmr.msra.gmra.mrb[16].mxu0 %v8322_v46  ;;  %v6808_v5 = vcombine.high %v1401_v63, %v1409_v0  ;;  %v6810_v6 = vcombine.high %v1402_v1, %v1410_v2  ;;  %v6809_v12 = vcombine.low %v1402_v1, %v1410_v2 }
 0x3d7   :  { %4945 = vmatmul.mubr.bf16.vlgmr.msra.gmra.mrb[16].mxu1 %v8322_v46  ;;  %4956 = vmatpush1.bf16.msra.mxu0 %v6695_v4  ;;  %v6793_v4 = vcombine.low %v1386_v57, %v1394_v58 }
 0x3d8   :  { %4987 = vmatprep.mubr.bf16.mxu0 %v8324_v50  ;;  %5042 = vmatpush1.bf16.msra.mxu1 %v6697_v7  ;;  %v1417_v7 = vld [vmem:[#allocation9 + $0x430] sm:$0xff] }
 0x3d9   :  { %5073 = vmatprep.mubr.bf16.mxu1 %v8324_v50  ;;  %4957 = vmatprep.subr.bf16.mxu0 %v6712_v8  ;;  %v6743_v50 = vcombine.low %v1337_v23, %v1345_v24  ;;  %v1425_v8 = vld [vmem:[#allocation9 + $0x470] sm:$0xff]  ;;  %v1442_v23 = vld [vmem:[#allocation9 + $0x4f8] sm:$0xff] }
 0x3da   :  { %5043 = vmatprep.subr.bf16.mxu1 %v6714_v11  ;;  %v6807_v11 = vcombine.low %v1401_v63, %v1409_v0  ;;  %v6824_v13 = vcombine.high %v1417_v7, %v1425_v8  ;;  %v6823_v24 = vcombine.low %v1417_v7, %v1425_v8  ;;  %v1506_v63 = vld [vmem:[#allocation9 + $0x6f8] sm:$0xff] }
 0x3db   :  { %4958 = vmatpush1.bf16.msra.mxu0 %v6711_v14  ;;  %v6826_v14 = vcombine.high %v1418_v9, %v1426_v10  ;;  %v1522_v7 = vld [vmem:[#allocation9 + $0x778] sm:$0xff] }
 0x3dc   :  { %5044 = vmatpush1.bf16.msra.mxu1 %v6713_v17  ;;  %4959 = vmatprep.subr.bf16.mxu0 %v6728_v19  ;;  %v1433_v17 = vld [vmem:[#allocation9 + $0x4b0] sm:$0xff] }
 0x3dd   :  { %5045 = vmatprep.subr.bf16.mxu1 %v6730_v21  ;;  %v1441_v19 = vld [vmem:[#allocation9 + $0x4f0] sm:$0xff]  ;;  %v1434_v21 = vld [vmem:[#allocation9 + $0x4b8] sm:$0xff] }
 0x3de   :  { %v6840_v26 = vcombine.high %v1433_v17, %v1441_v19  ;;  %v6839_v31 = vcombine.low %v1433_v17, %v1441_v19  ;;  %v6841_v32 = vcombine.low %v1434_v21, %v1442_v23  ;;  %v1538_v17 = vld [vmem:[#allocation9 + $0x7f8] sm:$0xff] }
 0x3df   :  { %4960 = vmatpush1.bf16.msra.mxu0 %v6727_v55  ;;  %v6842_v55 = vcombine.high %v1434_v21, %v1442_v23 }
 0x3e0   :  { %5046 = vmatpush1.bf16.msra.mxu1 %v6729_v27  ;;  %4961 = vmatprep.subr.bf16.mxu0 %v6744_v28  ;;  %v1449_v27 = vld [vmem:[#allocation9 + $0x530] sm:$0xff] }
 0x3e1   :  { %5047 = vmatprep.subr.bf16.mxu1 %v6746_v29  ;;  %v1457_v28 = vld [vmem:[#allocation9 + $0x570] sm:$0xff]  ;;  %v1450_v29 = vld [vmem:[#allocation9 + $0x538] sm:$0xff] }
 0x3e2   :  { %v6856_v33 = vcombine.high %v1449_v27, %v1457_v28  ;;  %v6855_v38 = vcombine.low %v1449_v27, %v1457_v28  ;;  %v6857_v39 = vcombine.low %v1450_v29, %v1458_v30  ;;  %v1554_v27 = vld [vmem:[#allocation9 + $0x878] sm:$0xff] }
 0x3e3   :  { %4962 = vmatpush1.bf16.msra.mxu0 %v6743_v50  ;;  %v6858_v50 = vcombine.high %v1450_v29, %v1458_v30 }
 0x3e4   :  { %5048 = vmatpush1.bf16.msra.mxu1 %v6745_v34  ;;  %4963 = vmatprep.subr.bf16.mxu0 %v6760_v35  ;;  %v1465_v34 = vld [vmem:[#allocation9 + $0x5b0] sm:$0xff] }
 0x3e5   :  { %5049 = vmatprep.subr.bf16.mxu1 %v6762_v36  ;;  %v1473_v35 = vld [vmem:[#allocation9 + $0x5f0] sm:$0xff]  ;;  %v1466_v36 = vld [vmem:[#allocation9 + $0x5b8] sm:$0xff] }
 0x3e6   :  { %v6872_v43 = vcombine.high %v1465_v34, %v1473_v35  ;;  %v6871_v56 = vcombine.low %v1465_v34, %v1473_v35  ;;  %v6873_v57 = vcombine.low %v1466_v36, %v1474_v37  ;;  %v1562_v34 = vld [vmem:[#allocation9 + $0x8b8] sm:$0xff] }
 0x3e7   :  { %4964 = vmatpush1.bf16.msra.mxu0 %v6759_v48  ;;  %v6874_v48 = vcombine.high %v1466_v36, %v1474_v37  ;;  %v1570_v35 = vld [vmem:[#allocation9 + $0x8f8] sm:$0xff] }
 0x3e8   :  { %5050 = vmatpush1.bf16.msra.mxu1 %v6761_v49  ;;  %4965 = vmatprep.subr.bf16.mxu0 %v6776_v52  ;;  %v1481_v49 = vld [vmem:[#allocation9 + $0x630] sm:$0xff] }
 0x3e9   :  { %5051 = vmatprep.subr.bf16.mxu1 %v6778_v53  ;;  %v1489_v52 = vld [vmem:[#allocation9 + $0x670] sm:$0xff]  ;;  %v1482_v53 = vld [vmem:[#allocation9 + $0x638] sm:$0xff] }
 0x3ea   :  { %v6888_v58 = vcombine.high %v1481_v49, %v1489_v52  ;;  %v6887_v0 = vcombine.low %v1481_v49, %v1489_v52  ;;  %v6889_v1 = vcombine.low %v1482_v53, %v1490_v54  ;;  %v1586_v49 = vld [vmem:[#allocation9 + $0x978] sm:$0xff] }
 0x3eb   :  { %4966 = vmatpush1.bf16.msra.mxu0 %v6775_v59  ;;  %v6890_v59 = vcombine.high %v1482_v53, %v1490_v54  ;;  %v6969_v53 = vcombine.low %v1562_v34, %v1570_v35 }
 0x3ec   :  { %5052 = vmatpush1.bf16.msra.mxu1 %v6777_v60  ;;  %4967 = vmatprep.subr.bf16.mxu0 %v6792_v61  ;;  %v1497_v60 = vld [vmem:[#allocation9 + $0x6b0] sm:$0xff] }
 0x3ed   :  { %5053 = vmatprep.subr.bf16.mxu1 %v6794_v62  ;;  %v1505_v61 = vld [vmem:[#allocation9 + $0x6f0] sm:$0xff]  ;;  %v1498_v62 = vld [vmem:[#allocation9 + $0x6b8] sm:$0xff] }
 0x3ee   :  { %v6904_v2 = vcombine.high %v1497_v60, %v1505_v61  ;;  %v6903_v8 = vcombine.low %v1497_v60, %v1505_v61  ;;  %v6905_v9 = vcombine.low %v1498_v62, %v1506_v63  ;;  %v1602_v60 = vld [vmem:[#allocation9 + $0x9f8] sm:$0xff] }
 0x3ef   :  { %4968 = vmatpush1.bf16.msra.mxu0 %v6791_v3  ;;  %v6906_v3 = vcombine.high %v1498_v62, %v1506_v63 }
 0x3f0   :  { %5054 = vmatpush1.bf16.msra.mxu1 %v6793_v4  ;;  %4969 = vmatprep.subr.bf16.mxu0 %v6808_v5  ;;  %v1513_v4 = vld [vmem:[#allocation9 + $0x730] sm:$0xff] }
 0x3f1   :  { %5055 = vmatprep.subr.bf16.mxu1 %v6810_v6  ;;  %v1521_v5 = vld [vmem:[#allocation9 + $0x770] sm:$0xff]  ;;  %v1514_v6 = vld [vmem:[#allocation9 + $0x738] sm:$0xff] }
 0x3f2   :  { %v6920_v10 = vcombine.high %v1513_v4, %v1521_v5  ;;  %v6919_v19 = vcombine.low %v1513_v4, %v1521_v5  ;;  %v6921_v21 = vcombine.low %v1514_v6, %v1522_v7 }
 0x3f3   :  { %4970 = vmatpush1.bf16.msra.mxu0 %v6807_v11  ;;  %v6922_v11 = vcombine.high %v1514_v6, %v1522_v7  ;;  %v1625_v7 = vld [vmem:[#allocation9 + $0xab0] sm:$0xff] }
 0x3f4   :  { %5056 = vmatpush1.bf16.msra.mxu1 %v6809_v12  ;;  %4971 = vmatprep.subr.bf16.mxu0 %v6824_v13  ;;  %v1529_v12 = vld [vmem:[#allocation9 + $0x7b0] sm:$0xff] }
 0x3f5   :  { %5057 = vmatprep.subr.bf16.mxu1 %v6826_v14  ;;  %v1537_v13 = vld [vmem:[#allocation9 + $0x7f0] sm:$0xff]  ;;  %v1530_v14 = vld [vmem:[#allocation9 + $0x7b8] sm:$0xff] }
 0x3f6   :  { %v6936_v23 = vcombine.high %v1529_v12, %v1537_v13  ;;  %v6935_v28 = vcombine.low %v1529_v12, %v1537_v13  ;;  %v6937_v29 = vcombine.low %v1530_v14, %v1538_v17  ;;  %v1825_v13 = vsub.s32 6, %v8294_v15 }
 0x3f7   :  { %4972 = vmatpush1.bf16.msra.mxu0 %v6823_v24  ;;  %v6938_v24 = vcombine.high %v1530_v14, %v1538_v17  ;;  %v1821_v14 = vsub.s32 5, %v8294_v15 }
 0x3f8   :  { %5058 = vmatpush1.bf16.msra.mxu1 %v6825_v25  ;;  %4973 = vmatprep.subr.bf16.mxu0 %v6840_v26  ;;  %v1545_v25 = vld [vmem:[#allocation9 + $0x830] sm:$0xff] }
 0x3f9   :  { %5059 = vmatprep.subr.bf16.mxu1 %v6842_v55  ;;  %v1553_v26 = vld [vmem:[#allocation9 + $0x870] sm:$0xff]  ;;  %v1546_v55 = vld [vmem:[#allocation9 + $0x838] sm:$0xff] }
 0x3fa   :  { %v6952_v30 = vcombine.high %v1545_v25, %v1553_v26  ;;  %v6953_v36 = vcombine.low %v1546_v55, %v1554_v27 }
 0x3fb   :  { %4974 = vmatpush1.bf16.msra.mxu0 %v6839_v31  ;;  %v6954_v31 = vcombine.high %v1546_v55, %v1554_v27  ;;  %v1642_v55 = vld [vmem:[#allocation9 + $0xb38] sm:$0xff] }
 0x3fc   :  { %5060 = vmatpush1.bf16.msra.mxu1 %v6841_v32  ;;  %4975 = vmatprep.subr.bf16.mxu0 %v6856_v33  ;;  %v1561_v32 = vld [vmem:[#allocation9 + $0x8b0] sm:$0xff]  ;;  %v1650_v27 = vld [vmem:[#allocation9 + $0xb78] sm:$0xff] }
 0x3fd   :  { %5061 = vmatprep.subr.bf16.mxu1 %v6858_v50  ;;  %v1569_v33 = vld [vmem:[#allocation9 + $0x8f0] sm:$0xff]  ;;  %v6951_v50 = vcombine.low %v1545_v25, %v1553_v26 }
 0x3fe   :  { %v6968_v37 = vcombine.high %v1561_v32, %v1569_v33  ;;  %v6967_v52 = vcombine.low %v1561_v32, %v1569_v33  ;;  %v1649_v25 = vld [vmem:[#allocation9 + $0xb70] sm:$0xff] }
 0x3ff   :  { %4976 = vmatpush1.bf16.msra.mxu0 %v6855_v38  ;;  %v1577_v38 = vld [vmem:[#allocation9 + $0x930] sm:$0xff] }
 0x400   :  { %5062 = vmatpush1.bf16.msra.mxu1 %v6857_v39  ;;  %4977 = vmatprep.subr.bf16.mxu0 %v6872_v43  ;;  %v1585_v39 = vld [vmem:[#allocation9 + $0x970] sm:$0xff]  ;;  %v6970_v43 = vcombine.high %v1562_v34, %v1570_v35  ;;  %v7050_v34 = vcombine.high %v1642_v55, %v1650_v27 }
 0x401   :  { %5063 = vmatprep.subr.bf16.mxu1 %v6874_v48  ;;  %v1578_v48 = vld [vmem:[#allocation9 + $0x938] sm:$0xff]  ;;  %v6984_v54 = vcombine.high %v1577_v38, %v1585_v39  ;;  %v6983_v61 = vcombine.low %v1577_v38, %v1585_v39  ;;  %v1657_v35 = vld [vmem:[#allocation9 + $0xbb0] sm:$0xff] }
 0x403   :  { %4978 = vmatpush1.bf16.msra.mxu0 %v6871_v56  ;;  %v6986_v56 = vcombine.high %v1578_v48, %v1586_v49 }
 0x404   :  { %5064 = vmatpush1.bf16.msra.mxu1 %v6873_v57  ;;  %4979 = vmatprep.subr.bf16.mxu0 %v6888_v58  ;;  %v1593_v57 = vld [vmem:[#allocation9 + $0x9b0] sm:$0xff] }
 0x405   :  { %5065 = vmatprep.subr.bf16.mxu1 %v6890_v59  ;;  %v1601_v58 = vld [vmem:[#allocation9 + $0x9f0] sm:$0xff]  ;;  %v1594_v59 = vld [vmem:[#allocation9 + $0x9b8] sm:$0xff] }
 0x406   :  { %v7000_v62 = vcombine.high %v1593_v57, %v1601_v58  ;;  %v7002_v63 = vcombine.high %v1594_v59, %v1602_v60  ;;  %v7001_v4 = vcombine.low %v1594_v59, %v1602_v60 }
 0x407   :  { %4980 = vmatpush1.bf16.msra.mxu0 %v6887_v0  ;;  %v1609_v0 = vld [vmem:[#allocation9 + $0xa30] sm:$0xff] }
 0x408   :  { %5066 = vmatpush1.bf16.msra.mxu1 %v6889_v1  ;;  %4981 = vmatprep.subr.bf16.mxu0 %v6904_v2  ;;  %v1617_v1 = vld [vmem:[#allocation9 + $0xa70] sm:$0xff]  ;;  %v1610_v2 = vld [vmem:[#allocation9 + $0xa38] sm:$0xff] }
 0x409   :  { %5067 = vmatprep.subr.bf16.mxu1 %v6906_v3  ;;  %v1618_v3 = vld [vmem:[#allocation9 + $0xa78] sm:$0xff]  ;;  %v7016_v5 = vcombine.high %v1609_v0, %v1617_v1  ;;  %v7015_v12 = vcombine.low %v1609_v0, %v1617_v1 }
 0x40a   :  { %v7018_v6 = vcombine.high %v1610_v2, %v1618_v3  ;;  %v7017_v17 = vcombine.low %v1610_v2, %v1618_v3  ;;  %v1673_v2 = vld [vmem:[#allocation9 + $0xc30] sm:$0xff] }
 0x40b   :  { %4982 = vmatpush1.bf16.msra.mxu0 %v6903_v8  ;;  %v1633_v8 = vld [vmem:[#allocation9 + $0xaf0] sm:$0xff] }
 0x40c   :  { %5068 = vmatpush1.bf16.msra.mxu1 %v6905_v9  ;;  %4983 = vmatprep.subr.bf16.mxu0 %v6920_v10  ;;  %v1817_v9 = vsub.s32 4, %v8294_v15  ;;  %v1626_v10 = vld [vmem:[#allocation9 + $0xab8] sm:$0xff]  ;;  %v1681_v3 = vld [vmem:[#allocation9 + $0xc70] sm:$0xff] }
 0x40d   :  { %5069 = vmatprep.subr.bf16.mxu1 %v6922_v11  ;;  %v1634_v11 = vld [vmem:[#allocation9 + $0xaf8] sm:$0xff] }
 0x40e   :  { %v1818_v26 = vrot.slane %v8350_v41, %v1817_v9  ;;  %v7033_v32 = vcombine.low %v1626_v10, %v1634_v11 }
 0x40f   :  { %4984 = vmatpush1.bf16.msra.mxu0 %v6919_v19  ;;  %v1829_v19 = vsub.s32 7, %v8294_v15 }
 0x410   :  { %5070 = vmatpush1.bf16.msra.mxu1 %v6921_v21  ;;  %4985 = vmatprep.subr.bf16.mxu0 %v6936_v23  ;;  %v7032_v21 = vcombine.high %v1625_v7, %v1633_v8  ;;  %v7034_v23 = vcombine.high %v1626_v10, %v1634_v11 }
 0x411   :  { %5071 = vmatprep.subr.bf16.mxu1 %v6938_v24  ;;  %v1641_v24 = vld [vmem:[#allocation9 + $0xb30] sm:$0xff] }
 0x412   :  { %v7048_v33 = vcombine.high %v1641_v24, %v1649_v25 }
 0x413   :  { %4986 = vmatpush1.bf16.msra.mxu0 %v6935_v28  ;;  %v1826_v28 = vrot.slane %v8350_v41, %v1825_v13 }
 0x414   :  { %5072 = vmatpush1.bf16.msra.mxu1 %v6937_v29  ;;  %4998 = vmatprep.subr.bf16.mxu0 %v6952_v30  ;;  %v1822_v29 = vrot.slane %v8350_v41, %v1821_v14  ;;  %v7031_v30 = vcombine.low %v1625_v7, %v1633_v8  ;;  %v1674_v7 = vld [vmem:[#allocation9 + $0xc38] sm:$0xff] }
 0x415   :  { %5084 = vmatprep.subr.bf16.mxu1 %v6954_v31  ;;  %v1830_v31 = vrot.slane %v8350_v41, %v1829_v19  ;;  %v7049_v41 = vcombine.low %v1642_v55, %v1650_v27  ;;  %v1682_v8 = vld [vmem:[#allocation9 + $0xc78] sm:$0xff] }
 0x416   :  { %4988 = vmatmul.mubr.bf16.vlgmr.msra.gmra.mrb[20].mxu0 %v8320_v45  ;;  %v7082_v27 = vcombine.high %v1674_v7, %v1682_v8 }
 0x417   :  { %5074 = vmatmul.mubr.bf16.vlgmr.msra.gmra.mrb[20].mxu1 %v8320_v45  ;;  %4999 = vmatpush1.bf16.msra.mxu0 %v6951_v50  ;;  %v6985_v45 = vcombine.low %v1578_v48, %v1586_v49  ;;  %v1666_v48 = vld [vmem:[#allocation9 + $0xbf8] sm:$0xff] }
 0x418   :  { %5030 = vmatprep.mubr.bf16.mxu0 %v8326_v51  ;;  %5085 = vmatpush1.bf16.msra.mxu1 %v6953_v36  ;;  %v1665_v36 = vld [vmem:[#allocation9 + $0xbf0] sm:$0xff] }
 0x419   :  { %5116 = vmatprep.mubr.bf16.mxu1 %v8326_v51  ;;  %5000 = vmatprep.subr.bf16.mxu0 %v6968_v37  ;;  %v6999_v51 = vcombine.low %v1593_v57, %v1601_v58  ;;  %v7063_v0 = vcombine.low %v1657_v35, %v1665_v36 }
 0x41a   :  { %5086 = vmatprep.subr.bf16.mxu1 %v6970_v43  ;;  %v1658_v43 = vld [vmem:[#allocation9 + $0xbb8] sm:$0xff] }
 0x41b   :  { %5001 = vmatpush1.bf16.msra.mxu0 %v6967_v52  ;;  %v7066_v1 = vcombine.high %v1658_v43, %v1666_v48 }
 0x41c   :  { %5087 = vmatpush1.bf16.msra.mxu1 %v6969_v53  ;;  %5002 = vmatprep.subr.bf16.mxu0 %v6984_v54 }
 0x41d   :  { %5088 = vmatprep.subr.bf16.mxu1 %v6986_v56  ;;  %v7047_v56 = vcombine.low %v1641_v24, %v1649_v25  ;;  %v7080_v25 = vcombine.high %v1673_v2, %v1681_v3 }
 0x41f   :  { %5003 = vmatpush1.bf16.msra.mxu0 %v6983_v61  ;;  %v7064_v61 = vcombine.high %v1657_v35, %v1665_v36  ;;  %v1705_v36 = vld [vmem:[#allocation9 + $0xd30] sm:$0xff] }
 0x420   :  { %5089 = vmatpush1.bf16.msra.mxu1 %v6985_v45  ;;  %5004 = vmatprep.subr.bf16.mxu0 %v7000_v62 }
 0x421   :  { %5090 = vmatprep.subr.bf16.mxu1 %v7002_v63 }
 0x423   :  { %5005 = vmatpush1.bf16.msra.mxu0 %v6999_v51 }
 0x424   :  { %5091 = vmatpush1.bf16.msra.mxu1 %v7001_v4  ;;  %5006 = vmatprep.subr.bf16.mxu0 %v7016_v5 }
 0x425   :  { %5092 = vmatprep.subr.bf16.mxu1 %v7018_v6  ;;  %v7065_v6 = vcombine.low %v1658_v43, %v1666_v48 }
 0x427   :  { %5007 = vmatpush1.bf16.msra.mxu0 %v7015_v12 }
 0x428   :  { %5093 = vmatpush1.bf16.msra.mxu1 %v7017_v17  ;;  %5008 = vmatprep.subr.bf16.mxu0 %v7032_v21 }
 0x429   :  { %v4688_v50 = vpop.f32.mrb[12].mxu0  ;;  %5094 = vmatprep.subr.bf16.mxu1 %v7034_v23 }
 0x42a   :  { %v7516_v37 = vadd.f32 %v4688_v50, %v1818_v26  ;;  %v4774_v38 = vpop.f32.mrb[12].mxu1  ;;  %v4690_v39 = vpop.f32.mrb[13].mxu0  ;;  %v7081_v50 = vcombine.low %v1674_v7, %v1682_v8 }
 0x42b   :  { %v7520_v49 = vadd.f32 %v4774_v38, %v1826_v28  ;;  %v7517_v52 = vadd.f32 %v4690_v39, %v1822_v29  ;;  %v4776_v53 = vpop.f32.mrb[13].mxu1  ;;  %v4692_v54 = vpop.f32.mrb[14].mxu0  ;;  %5009 = vmatpush1.bf16.msra.mxu0 %v7031_v30  ;;  %v1706_v38 = vld [vmem:[#allocation9 + $0xd38] sm:$0xff] }
 0x42c   :  { %v7521_v57 = vadd.f32 %v4776_v53, %v1830_v31  ;;  %v7518_v58 = vadd.f32 %v4692_v54, %v1818_v26  ;;  %v4778_v59 = vpop.f32.mrb[14].mxu1  ;;  %5095 = vmatpush1.bf16.msra.mxu1 %v7033_v32  ;;  %v4694_v60 = vpop.f32.mrb[15].mxu0  ;;  %5010 = vmatprep.subr.bf16.mxu0 %v7048_v33  ;;  %v5131_v51 = vmax.f32 %v7516_v37, 0.0  ;;  %v1698_v32 = vld [vmem:[#allocation9 + $0xcf8] sm:$0xff]  ;;  %v7079_v33 = vcombine.low %v1673_v2, %v1681_v3  ;;  %v1713_v37 = vld [vmem:[#allocation9 + $0xd70] sm:$0xff] }
 0x42d   :  { %v7522_v45 = vadd.f32 %v4778_v59, %v1826_v28  ;;  %v7519_v62 = vadd.f32 %v4694_v60, %v1822_v29  ;;  %v4780_v63 = vpop.f32.mrb[15].mxu1  ;;  %5096 = vmatprep.subr.bf16.mxu1 %v7050_v34  ;;  %v5133_v10 = vmax.f32 %v7520_v49, 0.0  ;;  %v5132_v11 = vmax.f32 %v7517_v52, 0.0  ;;  %v1689_v28 = vld [vmem:[#allocation9 + $0xcb0] sm:$0xff]  ;;  %v1714_v39 = vld [vmem:[#allocation9 + $0xd78] sm:$0xff] }
 0x42e   :  { %v5147_v4 = vmax.f32 %v7518_v58, 0.0  ;;  %v7523_v5 = vadd.f32 %v4780_v63, %v1830_v31  ;;  %v5134_v21 = vmax.f32 %v7521_v57, 0.0  ;;  %v1697_v29 = vld [vmem:[#allocation9 + $0xcf0] sm:$0xff]  ;;  %v1690_v31 = vld [vmem:[#allocation9 + $0xcb8] sm:$0xff]  ;;  %v7112_v49 = vcombine.high %v1705_v36, %v1713_v37 }
 0x42f   :  { %v5149_v12 = vmax.f32 %v7522_v45, 0.0  ;;  %v5148_v17 = vmax.f32 %v7519_v62, 0.0  ;;  %5011 = vmatpush1.bf16.msra.mxu0 %v7047_v56  ;;  %v7096_v34 = vcombine.high %v1689_v28, %v1697_v29  ;;  %v7098_v35 = vcombine.high %v1690_v31, %v1698_v32  ;;  %v1721_v53 = vld [vmem:[#allocation9 + $0xdb0] sm:$0xff]  ;;  %v1722_v56 = vld [vmem:[#allocation9 + $0xdb8] sm:$0xff] }
 0x430   :  { %v8392_v23 = vpack.c.bf16 %v5147_v4, %v5131_v51  ;;  %v5150_v24 = vmax.f32 %v7523_v5, 0.0  ;;  %5097 = vmatpush1.bf16.msra.mxu1 %v7049_v41  ;;  %5012 = vmatprep.subr.bf16.mxu0 %v7064_v61  ;;  %v7095_v43 = vcombine.low %v1689_v28, %v1697_v29  ;;  %v7097_v48 = vcombine.low %v1690_v31, %v1698_v32  ;;  %v1729_v54 = vld [vmem:[#allocation9 + $0xdf0] sm:$0xff]  ;;  %v1730_v41 = vld [vmem:[#allocation9 + $0xdf8] sm:$0xff] }
 0x431   :  { %v8394_v26 = vpack.c.bf16 %v5149_v12, %v5133_v10  ;;  %v8396_v55 = vpack.c.bf16 %v5148_v17, %v5132_v11  ;;  %5098 = vmatprep.subr.bf16.mxu1 %v7066_v1  ;;  %v7114_v52 = vcombine.high %v1706_v38, %v1714_v39  ;;  %v7111_v57 = vcombine.low %v1705_v36, %v1713_v37  ;;  %v1737_v61 = vld [vmem:[#allocation9 + $0xe30] sm:$0xff]  ;;  %v1738_v62 = vld [vmem:[#allocation9 + $0xe38] sm:$0xff] }
 0x432   :  { %v8398_v30 = vpack.c.bf16 %v5150_v24, %v5134_v21  ;;  %v7113_v58 = vcombine.low %v1706_v38, %v1714_v39  ;;  %v7128_v59 = vcombine.high %v1721_v53, %v1729_v54  ;;  %v7130_v60 = vcombine.high %v1722_v56, %v1730_v41  ;;  %v1745_v45 = vld [vmem:[#allocation9 + $0xe70] sm:$0xff]  ;;  %v1746_v63 = vld [vmem:[#allocation9 + $0xe78] sm:$0xff] }
 0x433   :  { %5013 = vmatpush1.bf16.msra.mxu0 %v7063_v0  ;;  %v7127_v0 = vcombine.low %v1721_v53, %v1729_v54  ;;  %v7129_v1 = vcombine.low %v1722_v56, %v1730_v41  ;;  %v7144_v2 = vcombine.high %v1737_v61, %v1745_v45  ;;  %v7146_v3 = vcombine.high %v1738_v62, %v1746_v63  ;;  %v1753_v51 = vld [vmem:[#allocation9 + $0xeb0] sm:$0xff]  ;;  %v1754_v5 = vld [vmem:[#allocation9 + $0xeb8] sm:$0xff] }
 0x434   :  { %5099 = vmatpush1.bf16.msra.mxu1 %v7065_v6  ;;  %5014 = vmatprep.subr.bf16.mxu0 %v7080_v25  ;;  %v1761_v4 = vld [vmem:[#allocation9 + $0xef0] sm:$0xff]  ;;  %v1762_v6 = vld [vmem:[#allocation9 + $0xef8] sm:$0xff]  ;;  %v7143_v7 = vcombine.low %v1737_v61, %v1745_v45  ;;  %v7145_v8 = vcombine.low %v1738_v62, %v1746_v63  ;;  %v7810_v61 = vld [vmem:[#allocation12 + $0x58] sm:$0xff]  }
 0x435   :  { %5100 = vmatprep.subr.bf16.mxu1 %v7082_v27  ;;  %v7160_v10 = vcombine.high %v1753_v51, %v1761_v4  ;;  %v7162_v11 = vcombine.high %v1754_v5, %v1762_v6  ;;  %v1769_v12 = vld [vmem:[#allocation9 + $0xf30] sm:$0xff]  ;;  %v1770_v21 = vld [vmem:[#allocation9 + $0xf38] sm:$0xff]  ;;  %v7159_v25 = vcombine.low %v1753_v51, %v1761_v4  ;;  %v7161_v27 = vcombine.low %v1754_v5, %v1762_v6  ;;  %v7812_v45 = vld [vmem:[#allocation12 + $0x18] sm:$0xff]  }
 0x436   :  { %v1777_v17 = vld [vmem:[#allocation9 + $0xf70] sm:$0xff]  ;;  %v1778_v24 = vld [vmem:[#allocation9 + $0xf78] sm:$0xff]  ;;  %v7822_v4 = vld [vmem:[#allocation12 + $0x70] sm:$0xff]  }
 0x437   :  { %5015 = vmatpush1.bf16.msra.mxu0 %v7079_v33  ;;  %v7176_v28 = vcombine.high %v1769_v12, %v1777_v17  ;;  %v7178_v29 = vcombine.high %v1770_v21, %v1778_v24  ;;  %v1785_v31 = vld [vmem:[#allocation9 + $0xfb0] sm:$0xff]  ;;  %v1786_v33 = vld [vmem:[#allocation9 + $0xfb8] sm:$0xff]  ;;  %v7823_v5 = vld [vmem:[#allocation12 + $0xf0] sm:$0xff]  }
 0x438   :  { %5101 = vmatpush1.bf16.msra.mxu1 %v7081_v50  ;;  %5016 = vmatprep.subr.bf16.mxu0 %v7096_v34  ;;  %v1793_v32 = vld [vmem:[#allocation9 + $0xff0] sm:$0xff]  ;;  %v1794_v50 = vld [vmem:[#allocation9 + $0xff8] sm:$0xff]  ;;  %v7175_v34 = vcombine.low %v1769_v12, %v1777_v17  ;;  %v7824_v6 = vld [vmem:[#allocation12 + $0x30] sm:$0xff]  }
 0x439   :  { %5102 = vmatprep.subr.bf16.mxu1 %v7098_v35  ;;  %v7177_v35 = vcombine.low %v1770_v21, %v1778_v24  ;;  %v7192_v36 = vcombine.high %v1785_v31, %v1793_v32  ;;  %v7194_v37 = vcombine.high %v1786_v33, %v1794_v50  ;;  %v7191_v38 = vcombine.low %v1785_v31, %v1793_v32  ;;  %v7802_v53 = vld [vmem:[#allocation12 + $0x48] sm:$0xff]   ;;  %v7814_v62 = vld [vmem:[#allocation12 + $0x60] sm:$0xff]   ;;  %v7829_v12 = vld [vmem:[#allocation12 + $0xb8] sm:$0xff]  }
 0x43a   :  { %v7193_v39 = vcombine.low %v1786_v33, %v1794_v50  ;;  %v7803_v54 = vld [vmem:[#allocation12 + $0xc8] sm:$0xff]   ;;  %v7815_v63 = vld [vmem:[#allocation12 + $0xe0] sm:$0xff]   ;;  %v7838_v32 = vld [vmem:[#allocation12 + $0x150] sm:$0xff]  }
 0x43b   :  { %5017 = vmatpush1.bf16.msra.mxu0 %v7095_v43  ;;  %v7798_v43 = vld [vmem:[#allocation12 + $0x40] sm:$0xff]   ;;  %v7804_v56 = vld [vmem:[#allocation12 + $0x8] sm:$0xff]   ;;  %v7839_v33 = vld [vmem:[#allocation12 + $0x1d0] sm:$0xff]  }
 0x43c   :  { %5103 = vmatpush1.bf16.msra.mxu1 %v7097_v48  ;;  %5018 = vmatprep.subr.bf16.mxu0 %v7112_v49  ;;  %v7799_v48 = vld [vmem:[#allocation12 + $0xc0] sm:$0xff]   ;;  %v7805_v41 = vld [vmem:[#allocation12 + $0x88] sm:$0xff]   ;;  %v7840_v50 = vld [vmem:[#allocation12 + $0x110] sm:$0xff]  }
 0x43d   :  { %5104 = vmatprep.subr.bf16.mxu1 %v7114_v52  ;;  %v7800_v49 = vld [vmem:[#allocation12] sm:$0xff]   ;;  %v7821_v51 = vld [vmem:[#allocation12 + $0xa8] sm:$0xff]  }
 0x43e   :  { %v7801_v52 = vld [vmem:[#allocation12 + $0x80] sm:$0xff]   ;;  %v7837_v31 = vld [vmem:[#allocation12 + $0x188] sm:$0xff]  }
 0x43f   :  { %5019 = vmatpush1.bf16.msra.mxu0 %v7111_v57  ;;  %v7806_v57 = vld [vmem:[#allocation12 + $0x50] sm:$0xff]   ;;  %v7830_v17 = vld [vmem:[#allocation12 + $0x140] sm:$0xff]  }
 0x440   :  { %5105 = vmatpush1.bf16.msra.mxu1 %v7113_v58  ;;  %5020 = vmatprep.subr.bf16.mxu0 %v7128_v59  ;;  %v7807_v58 = vld [vmem:[#allocation12 + $0xd0] sm:$0xff]   ;;  %v7831_v21 = vld [vmem:[#allocation12 + $0x1c0] sm:$0xff]  }
 0x441   :  { %5106 = vmatprep.subr.bf16.mxu1 %v7130_v60  ;;  %v7808_v59 = vld [vmem:[#allocation12 + $0x10] sm:$0xff]   ;;  %v7832_v24 = vld [vmem:[#allocation12 + $0x100] sm:$0xff]  }
 0x442   :  { %v7809_v60 = vld [vmem:[#allocation12 + $0x90] sm:$0xff]  }
 0x443   :  { %5021 = vmatpush1.bf16.msra.mxu0 %v7127_v0  ;;  %v7817_v0 = vld [vmem:[#allocation12 + $0xa0] sm:$0xff]  }
 0x444   :  { %5107 = vmatpush1.bf16.msra.mxu1 %v7129_v1  ;;  %5022 = vmatprep.subr.bf16.mxu0 %v7144_v2  ;;  %v7818_v1 = vld [vmem:[#allocation12 + $0x68] sm:$0xff]  }
 0x445   :  { %5108 = vmatprep.subr.bf16.mxu1 %v7146_v3  ;;  %v7819_v2 = vld [vmem:[#allocation12 + $0xe8] sm:$0xff]  }
 0x446   :  { %v7820_v3 = vld [vmem:[#allocation12 + $0x28] sm:$0xff]  }
 0x447   :  { %5023 = vmatpush1.bf16.msra.mxu0 %v7143_v7  ;;  %v7825_v7 = vld [vmem:[#allocation12 + $0xb0] sm:$0xff]  }
 0x448   :  { %5109 = vmatpush1.bf16.msra.mxu1 %v7145_v8  ;;  %5024 = vmatprep.subr.bf16.mxu0 %v7160_v10  ;;  %v7826_v8 = vld [vmem:[#allocation12 + $0x78] sm:$0xff]  }
 0x449   :  { %5110 = vmatprep.subr.bf16.mxu1 %v7162_v11  ;;  %v7827_v10 = vld [vmem:[#allocation12 + $0xf8] sm:$0xff]  }
 0x44a   :  { %v7828_v11 = vld [vmem:[#allocation12 + $0x38] sm:$0xff]  }
 0x44b   :  { %5025 = vmatpush1.bf16.msra.mxu0 %v7159_v25  ;;  %v7833_v25 = vld [vmem:[#allocation12 + $0x180] sm:$0xff]  }
 0x44c   :  { %5111 = vmatpush1.bf16.msra.mxu1 %v7161_v27  ;;  %5026 = vmatprep.subr.bf16.mxu0 %v7176_v28  ;;  %v7834_v27 = vld [vmem:[#allocation12 + $0x148] sm:$0xff]  }
 0x44d   :  { %5112 = vmatprep.subr.bf16.mxu1 %v7178_v29  ;;  %v7835_v28 = vld [vmem:[#allocation12 + $0x1c8] sm:$0xff]  }
 0x44e   :  { %v7836_v29 = vld [vmem:[#allocation12 + $0x108] sm:$0xff]  }
 0x44f   :  { %5027 = vmatpush1.bf16.msra.mxu0 %v7175_v34  ;;  %v7842_v34 = vld [vmem:[#allocation12 + $0x158] sm:$0xff]  }
 0x450   :  { %5113 = vmatpush1.bf16.msra.mxu1 %v7177_v35  ;;  %5028 = vmatprep.subr.bf16.mxu0 %v7192_v36  ;;  %v7844_v35 = vld [vmem:[#allocation12 + $0x118] sm:$0xff]   ;;  %v7846_v36 = vld [vmem:[#allocation12 + $0x160] sm:$0xff]  }
 0x451   :  { %5114 = vmatprep.subr.bf16.mxu1 %v7194_v37  ;;  %v7847_v37 = vld [vmem:[#allocation12 + $0x1e0] sm:$0xff]  }
 0x453   :  { %5029 = vmatpush1.bf16.msra.mxu0 %v7191_v38  ;;  %v7849_v38 = vld [vmem:[#allocation12 + $0x1a0] sm:$0xff]  }
 0x454   :  { %5115 = vmatpush1.bf16.msra.mxu1 %v7193_v39  ;;  %7324 = vmatprep.subr.bf16.mxu0 %v7798_v43  ;;  %v7850_v39 = vld [vmem:[#allocation12 + $0x168] sm:$0xff]  }
 0x455   :  { %7346 = vmatprep.subr.bf16.mxu1 %v7799_v48  ;;  %v7851_v43 = vld [vmem:[#allocation12 + $0x1e8] sm:$0xff]  }
 0x456   :  { %5031 = vmatmul.mubr.bf16.vlgmr.msra.gmra.mrb[20].mxu0 %v8322_v46  ;;  %v7852_v48 = vld [vmem:[#allocation12 + $0x128] sm:$0xff]  }
 0x457   :  { %5117 = vmatmul.mubr.bf16.vlgmr.msra.gmra.mrb[20].mxu1 %v8322_v46  ;;  %7325 = vmatpush3.bf16.msra.mxu0 %v7800_v49  ;;  %v7811_v46 = vld [vmem:[#allocation12 + $0xd8] sm:$0xff]   ;;  %v7853_v49 = vld [vmem:[#allocation12 + $0x1a8] sm:$0xff]  }
 0x458   :  { %6238 = vmatprep.mubr.bf16.mxu0 %v8364_v44  ;;  %7347 = vmatpush3.bf16.msra.mxu1 %v7801_v52  ;;  %v7813_v44 = vld [vmem:[#allocation12 + $0x98] sm:$0xff]   ;;  %v7854_v52 = vld [vmem:[#allocation12 + $0x170] sm:$0xff]  }
 0x459   :  { %6279 = vmatprep.mubr.bf16.mxu1 %v8366_v47  ;;  %7326 = vmatprep.subr.bf16.mxu0 %v7802_v53  ;;  %v7816_v47 = vld [vmem:[#allocation12 + $0x20] sm:$0xff]   ;;  %v7855_v53 = vld [vmem:[#allocation12 + $0x1f0] sm:$0xff]  }
 0x45a   :  { %7348 = vmatprep.subr.bf16.mxu1 %v7803_v54  ;;  %v7856_v54 = vld [vmem:[#allocation12 + $0x130] sm:$0xff]  }
 0x45b   :  { %7327 = vmatpush3.bf16.msra.mxu0 %v7804_v56  ;;  %v7857_v56 = vld [vmem:[#allocation12 + $0x1b0] sm:$0xff]  }
 0x45c   :  { %7349 = vmatpush3.bf16.msra.mxu1 %v7805_v41  ;;  %7328 = vmatprep.subr.bf16.mxu0 %v7806_v57  ;;  %v7858_v41 = vld [vmem:[#allocation12 + $0x178] sm:$0xff]  }
 0x45d   :  { %7350 = vmatprep.subr.bf16.mxu1 %v7807_v58  ;;  %v7859_v57 = vld [vmem:[#allocation12 + $0x1f8] sm:$0xff]  }
 0x45e   :  { %v7860_v58 = vld [vmem:[#allocation12 + $0x138] sm:$0xff]  }
 0x45f   :  { %7329 = vmatpush3.bf16.msra.mxu0 %v7808_v59  ;;  %v7861_v59 = vld [vmem:[#allocation12 + $0x1b8] sm:$0xff]  }
 0x460   :  { %7351 = vmatpush3.bf16.msra.mxu1 %v7809_v60  ;;  %7330 = vmatprep.subr.bf16.mxu0 %v7810_v61  ;;  %v7862_v60 = vld [vmem:[#allocation12 + $0x240] sm:$0xff]  }
 0x461   :  { %7352 = vmatprep.subr.bf16.mxu1 %v7811_v46  ;;  %v7863_v61 = vld [vmem:[#allocation12 + $0x2c0] sm:$0xff]  }
 0x462   :  { %v7864_v46 = vld [vmem:[#allocation12 + $0x200] sm:$0xff]  }
 0x463   :  { %7331 = vmatpush3.bf16.msra.mxu0 %v7812_v45  ;;  %v7865_v45 = vld [vmem:[#allocation12 + $0x280] sm:$0xff]  }
 0x464   :  { %7353 = vmatpush3.bf16.msra.mxu1 %v7813_v44  ;;  %7332 = vmatprep.subr.bf16.mxu0 %v7814_v62  ;;  %v7866_v44 = vld [vmem:[#allocation12 + $0x248] sm:$0xff]  }
 0x465   :  { %7354 = vmatprep.subr.bf16.mxu1 %v7815_v63  ;;  %v7867_v62 = vld [vmem:[#allocation12 + $0x2c8] sm:$0xff]  }
 0x466   :  { %v7868_v63 = vld [vmem:[#allocation12 + $0x208] sm:$0xff]  }
 0x467   :  { %7333 = vmatpush3.bf16.msra.mxu0 %v7816_v47  ;;  %v7869_v47 = vld [vmem:[#allocation12 + $0x288] sm:$0xff]  }
 0x468   :  { %7355 = vmatpush3.bf16.msra.mxu1 %v7817_v0  ;;  %7334 = vmatprep.subr.bf16.mxu0 %v7818_v1  ;;  %v7870_v0 = vld [vmem:[#allocation12 + $0x250] sm:$0xff]  }
 0x469   :  { %7356 = vmatprep.subr.bf16.mxu1 %v7819_v2  ;;  %v7871_v1 = vld [vmem:[#allocation12 + $0x2d0] sm:$0xff]  }
 0x46a   :  { %v7872_v2 = vld [vmem:[#allocation12 + $0x210] sm:$0xff]  }
 0x46b   :  { %7335 = vmatpush3.bf16.msra.mxu0 %v7820_v3  ;;  %v7873_v3 = vld [vmem:[#allocation12 + $0x290] sm:$0xff]  }
 0x46c   :  { %7357 = vmatpush3.bf16.msra.mxu1 %v7821_v51  ;;  %7336 = vmatprep.subr.bf16.mxu0 %v7822_v4  ;;  %v7874_v51 = vld [vmem:[#allocation12 + $0x258] sm:$0xff]  }
 0x46d   :  { %7358 = vmatprep.subr.bf16.mxu1 %v7823_v5  ;;  %v7875_v4 = vld [vmem:[#allocation12 + $0x2d8] sm:$0xff]   ;;  %v7878_v5 = vld [vmem:[#allocation12 + $0x260] sm:$0xff]  }
 0x46f   :  { %7337 = vmatpush3.bf16.msra.mxu0 %v7824_v6  ;;  %v7879_v6 = vld [vmem:[#allocation12 + $0x2e0] sm:$0xff]  }
 0x470   :  { %7359 = vmatpush3.bf16.msra.mxu1 %v7825_v7  ;;  %7338 = vmatprep.subr.bf16.mxu0 %v7826_v8  ;;  %v7880_v7 = vld [vmem:[#allocation12 + $0x220] sm:$0xff]   ;;  %v8410_v8 = vld [vmem:[#allocation10 + $0x8] sm:$0xff] }
 0x471   :  { %7360 = vmatprep.subr.bf16.mxu1 %v7827_v10  ;;  %v7881_v10 = vld [vmem:[#allocation12 + $0x2a0] sm:$0xff]  }
 0x473   :  { %7339 = vmatpush3.bf16.msra.mxu0 %v7828_v11  ;;  %v7882_v11 = vld [vmem:[#allocation12 + $0x268] sm:$0xff]  }
 0x474   :  { %7361 = vmatpush3.bf16.msra.mxu1 %v7829_v12  ;;  %7368 = vmatprep.subr.bf16.mxu0 %v7830_v17  ;;  %v7883_v12 = vld [vmem:[#allocation12 + $0x2e8] sm:$0xff]   ;;  %v1834_v17 = vrot.slane %v8410_v8, %v8297_v16 }
 0x475   :  { %7390 = vmatprep.subr.bf16.mxu1 %v7831_v21  ;;  %v1842_v21 = vrot.slane %v8410_v8, %v8304_v20 }
 0x476   :  { %6239 = vmatmul.mubr.bf16.vlgmr.msra.gmra.mrb[24].mxu0 %v8360_v40  ;;  %v7841_v40 = vld [vmem:[#allocation12 + $0x190] sm:$0xff]  }
 0x477   :  { %6280 = vmatmul.mubr.bf16.vlgmr.msra.gmra.mrb[24].mxu1 %v8362_v42  ;;  %7369 = vmatpush3.bf16.msra.mxu0 %v7832_v24  ;;  %v7843_v42 = vld [vmem:[#allocation12 + $0x1d8] sm:$0xff]   ;;  %v1838_v24 = vrot.slane %v8410_v8, %v8300_v18  ;;  %v7888_v18 = vld [vmem:[#allocation12 + $0x230] sm:$0xff]  }
 0x478   :  { %6320 = vmatprep.mubr.bf16.mxu0 %v8396_v55  ;;  %7391 = vmatpush3.bf16.msra.mxu1 %v7833_v25  ;;  %v7845_v55 = vld [vmem:[#allocation12 + $0x198] sm:$0xff]   ;;  %v7884_v25 = vld [vmem:[#allocation12 + $0x228] sm:$0xff]  }
 0x479   :  { %6361 = vmatprep.mubr.bf16.mxu1 %v8398_v30  ;;  %7370 = vmatprep.subr.bf16.mxu0 %v7834_v27  ;;  %v7848_v30 = vld [vmem:[#allocation12 + $0x120] sm:$0xff]   ;;  %v1846_v27 = vrot.slane %v8410_v8, %v8308_v22 }
 0x47a   :  { %7392 = vmatprep.subr.bf16.mxu1 %v7835_v28  ;;  %v7885_v28 = vld [vmem:[#allocation12 + $0x2a8] sm:$0xff]  }
 0x47b   :  { %7371 = vmatpush3.bf16.msra.mxu0 %v7836_v29  ;;  %v7886_v29 = vld [vmem:[#allocation12 + $0x270] sm:$0xff]  }
 0x47c   :  { %7393 = vmatpush3.bf16.msra.mxu1 %v7837_v31  ;;  %7372 = vmatprep.subr.bf16.mxu0 %v7838_v32  ;;  %v7887_v32 = vld [vmem:[#allocation12 + $0x2f0] sm:$0xff]  }
 0x47d   :  { %7394 = vmatprep.subr.bf16.mxu1 %v7839_v33 }
 0x47f   :  { %7373 = vmatpush3.bf16.msra.mxu0 %v7840_v50 }
 0x480   :  { %7395 = vmatpush3.bf16.msra.mxu1 %v7841_v40  ;;  %7374 = vmatprep.subr.bf16.mxu0 %v7842_v34 }
 0x481   :  { %7396 = vmatprep.subr.bf16.mxu1 %v7843_v42 }
 0x483   :  { %7375 = vmatpush3.bf16.msra.mxu0 %v7844_v35 }
 0x484   :  { %7397 = vmatpush3.bf16.msra.mxu1 %v7845_v55  ;;  %7376 = vmatprep.subr.bf16.mxu0 %v7846_v36 }
 0x485   :  { %7398 = vmatprep.subr.bf16.mxu1 %v7847_v37  ;;  %v7889_v37 = vld [vmem:[#allocation12 + $0x2b0] sm:$0xff]  }
 0x487   :  { %7377 = vmatpush3.bf16.msra.mxu0 %v7848_v30  ;;  %v7890_v30 = vld [vmem:[#allocation12 + $0x278] sm:$0xff]  }
 0x488   :  { %7399 = vmatpush3.bf16.msra.mxu1 %v7849_v38  ;;  %7378 = vmatprep.subr.bf16.mxu0 %v7850_v39 }
 0x489   :  { %7400 = vmatprep.subr.bf16.mxu1 %v7851_v43 }
 0x48b   :  { %7379 = vmatpush3.bf16.msra.mxu0 %v7852_v48  ;;  %v7891_v48 = vld [vmem:[#allocation12 + $0x2f8] sm:$0xff]  }
 0x48c   :  { %7401 = vmatpush3.bf16.msra.mxu1 %v7853_v49  ;;  %7380 = vmatprep.subr.bf16.mxu0 %v7854_v52 }
 0x48d   :  { %7402 = vmatprep.subr.bf16.mxu1 %v7855_v53 }
 0x48f   :  { %7381 = vmatpush3.bf16.msra.mxu0 %v7856_v54 }
 0x490   :  { %7403 = vmatpush3.bf16.msra.mxu1 %v7857_v56  ;;  %7382 = vmatprep.subr.bf16.mxu0 %v7858_v41 }
 0x491   :  { %7404 = vmatprep.subr.bf16.mxu1 %v7859_v57 }
 0x493   :  { %7383 = vmatpush3.bf16.msra.mxu0 %v7860_v58  ;;  %v7892_v58 = vld [vmem:[#allocation12 + $0x238] sm:$0xff]  }
 0x494   :  { %7405 = vmatpush3.bf16.msra.mxu1 %v7861_v59  ;;  %7412 = vmatprep.subr.bf16.mxu0 %v7862_v60 }
 0x495   :  { %7434 = vmatprep.subr.bf16.mxu1 %v7863_v61 }
 0x496   :  { %6321 = vmatmul.mubr.bf16.vlgmr.msra.gmra.mrb[28].mxu0 %v8392_v23  ;;  %v7876_v23 = vld [vmem:[#allocation12 + $0x218] sm:$0xff]  }
 0x497   :  { %6362 = vmatmul.mubr.bf16.vlgmr.msra.gmra.mrb[28].mxu1 %v8394_v26  ;;  %7413 = vmatpush3.bf16.msra.mxu0 %v7864_v46  ;;  %v7877_v26 = vld [vmem:[#allocation12 + $0x298] sm:$0xff]  }
 0x498   :  { %7435 = vmatpush3.bf16.msra.mxu1 %v7865_v45  ;;  %7414 = vmatprep.subr.bf16.mxu0 %v7866_v44  ;;  %v7893_v46 = vld [vmem:[#allocation12 + $0x2b8] sm:$0xff]  }
 0x499   :  { %7436 = vmatprep.subr.bf16.mxu1 %v7867_v62  ;;  %v7894_v62 = vld [vmem:[#allocation12 + $0x340] sm:$0xff]  }
 0x49b   :  { %7415 = vmatpush3.bf16.msra.mxu0 %v7868_v63  ;;  %v7895_v63 = vld [vmem:[#allocation12 + $0x3c0] sm:$0xff]  }
 0x49c   :  { %7437 = vmatpush3.bf16.msra.mxu1 %v7869_v47  ;;  %7416 = vmatprep.subr.bf16.mxu0 %v7870_v0  ;;  %v7896_v0 = vld [vmem:[#allocation12 + $0x300] sm:$0xff]  }
 0x49d   :  { %7438 = vmatprep.subr.bf16.mxu1 %v7871_v1  ;;  %v7897_v1 = vld [vmem:[#allocation12 + $0x380] sm:$0xff]  }
 0x49f   :  { %7417 = vmatpush3.bf16.msra.mxu0 %v7872_v2  ;;  %v7898_v2 = vld [vmem:[#allocation12 + $0x348] sm:$0xff]  }
 0x4a0   :  { %7439 = vmatpush3.bf16.msra.mxu1 %v7873_v3  ;;  %7418 = vmatprep.subr.bf16.mxu0 %v7874_v51  ;;  %v7899_v3 = vld [vmem:[#allocation12 + $0x3c8] sm:$0xff]  }
 0x4a1   :  { %7440 = vmatprep.subr.bf16.mxu1 %v7875_v4  ;;  %v7900_v51 = vld [vmem:[#allocation12 + $0x308] sm:$0xff]  }
 0x4a2   :  { %v7901_v4 = vld [vmem:[#allocation12 + $0x388] sm:$0xff]  }
 0x4a3   :  { %7419 = vmatpush3.bf16.msra.mxu0 %v7876_v23  ;;  %v7902_v23 = vld [vmem:[#allocation12 + $0x350] sm:$0xff]  }
 0x4a4   :  { %7441 = vmatpush3.bf16.msra.mxu1 %v7877_v26  ;;  %7420 = vmatprep.subr.bf16.mxu0 %v7878_v5  ;;  %v7903_v26 = vld [vmem:[#allocation12 + $0x3d0] sm:$0xff]  }
 0x4a5   :  { %7442 = vmatprep.subr.bf16.mxu1 %v7879_v6  ;;  %v7904_v5 = vld [vmem:[#allocation12 + $0x310] sm:$0xff]  }
 0x4a6   :  { %v7905_v6 = vld [vmem:[#allocation12 + $0x390] sm:$0xff]  }
 0x4a7   :  { %7421 = vmatpush3.bf16.msra.mxu0 %v7880_v7  ;;  %v7906_v7 = vld [vmem:[#allocation12 + $0x358] sm:$0xff]  }
 0x4a8   :  { %7443 = vmatpush3.bf16.msra.mxu1 %v7881_v10  ;;  %7422 = vmatprep.subr.bf16.mxu0 %v7882_v11  ;;  %v7907_v10 = vld [vmem:[#allocation12 + $0x3d8] sm:$0xff]  }
 0x4a9   :  { %v4860_v31 = vpop.f32.mrb[16].mxu0  ;;  %7444 = vmatprep.subr.bf16.mxu1 %v7883_v12  ;;  %v7908_v11 = vld [vmem:[#allocation12 + $0x318] sm:$0xff]  }
 0x4aa   :  { %v7524_v33 = vadd.f32 %v4860_v31, %v1834_v17  ;;  %v4946_v16 = vpop.f32.mrb[16].mxu1  ;;  %v4862_v50 = vpop.f32.mrb[17].mxu0  ;;  %v7909_v12 = vld [vmem:[#allocation12 + $0x398] sm:$0xff]   ;;  %v7917_v31 = vld [vmem:[#allocation12 + $0x3a8] sm:$0xff]  }
 0x4ab   :  { %v7528_v40 = vadd.f32 %v4946_v16, %v1842_v21  ;;  %v7525_v34 = vadd.f32 %v4862_v50, %v1838_v24  ;;  %v4948_v20 = vpop.f32.mrb[17].mxu1  ;;  %v4864_v42 = vpop.f32.mrb[18].mxu0  ;;  %7423 = vmatpush3.bf16.msra.mxu0 %v7884_v25  ;;  %v7913_v25 = vld [vmem:[#allocation12 + $0x3a0] sm:$0xff]   ;;  %v7920_v16 = vld [vmem:[#allocation12 + $0x330] sm:$0xff]  }
 0x4ac   :  { %v7529_v35 = vadd.f32 %v4948_v20, %v1846_v27  ;;  %v7526_v55 = vadd.f32 %v4864_v42, %v1834_v17  ;;  %v4950_v36 = vpop.f32.mrb[18].mxu1  ;;  %7445 = vmatpush3.bf16.msra.mxu1 %v7885_v28  ;;  %v4866_v22 = vpop.f32.mrb[19].mxu0  ;;  %7424 = vmatprep.subr.bf16.mxu0 %v7886_v29  ;;  %v5135_v49 = vmax.f32 %v7524_v33, 0.0  ;;  %v7910_v17 = vld [vmem:[#allocation12 + $0x360] sm:$0xff]   ;;  %v7915_v28 = vld [vmem:[#allocation12 + $0x3e8] sm:$0xff]   ;;  %v7919_v33 = vld [vmem:[#allocation12 + $0x3f0] sm:$0xff]  }
 0x4ad   :  { %v7530_v38 = vadd.f32 %v4950_v36, %v1842_v21  ;;  %v7527_v39 = vadd.f32 %v4866_v22, %v1838_v24  ;;  %v4952_v43 = vpop.f32.mrb[19].mxu1  ;;  %7446 = vmatprep.subr.bf16.mxu1 %v7887_v32  ;;  %v5137_v54 = vmax.f32 %v7528_v40, 0.0  ;;  %v5136_v56 = vmax.f32 %v7525_v34, 0.0  ;;  %v7911_v21 = vld [vmem:[#allocation12 + $0x3e0] sm:$0xff]   ;;  %v7916_v29 = vld [vmem:[#allocation12 + $0x328] sm:$0xff]   ;;  %v7918_v32 = vld [vmem:[#allocation12 + $0x370] sm:$0xff]  }
 0x4ae   :  { %v5151_v52 = vmax.f32 %v7526_v55, 0.0  ;;  %v7531_v53 = vadd.f32 %v4952_v43, %v1846_v27  ;;  %v5138_v59 = vmax.f32 %v7529_v35, 0.0  ;;  %v7912_v24 = vld [vmem:[#allocation12 + $0x320] sm:$0xff]   ;;  %v7914_v27 = vld [vmem:[#allocation12 + $0x368] sm:$0xff]   ;;  %v7921_v50 = vld [vmem:[#allocation12 + $0x3b0] sm:$0xff]   ;;  %v1858_v35 = vrot.slane %v8410_v8, %v1825_v13 }
 0x4af   :  { %v5153_v41 = vmax.f32 %v7530_v38, 0.0  ;;  %v5152_v57 = vmax.f32 %v7527_v39, 0.0  ;;  %7425 = vmatpush3.bf16.msra.mxu0 %v7888_v18  ;;  %v7922_v40 = vld [vmem:[#allocation12 + $0x378] sm:$0xff]   ;;  %v1850_v18 = vrot.slane %v8410_v8, %v1817_v9  ;;  %v1854_v55 = vrot.slane %v8410_v8, %v1821_v14 }
 0x4b0   :  { %v5167_v60 = vpack.c.bf16 %v5151_v52, %v5135_v49  ;;  %v5154_v61 = vmax.f32 %v7531_v53, 0.0  ;;  %7447 = vmatpush3.bf16.msra.mxu1 %v7889_v37  ;;  %7426 = vmatprep.subr.bf16.mxu0 %v7890_v30  ;;  %v7923_v34 = vld [vmem:[#allocation12 + $0x3f8] sm:$0xff]   ;;  %v1862_v36 = vrot.slane %v8410_v8, %v1829_v19 }
 0x4b1   :  { %v5169_v45 = vpack.c.bf16 %v5153_v41, %v5137_v54  ;;  %v5168_v44 = vpack.c.bf16 %v5152_v57, %v5136_v56  ;;  %7448 = vmatprep.subr.bf16.mxu1 %v7891_v48  ;;  %v7924_v20 = vld [vmem:[#allocation12 + $0x338] sm:$0xff]  }
 0x4b2   :  { %v5170_v47 = vpack.c.bf16 %v5154_v61, %v5138_v59  ;;  %v7925_v42 = vld [vmem:[#allocation12 + $0x3b8] sm:$0xff]  }
 0x4b3   :  { %7427 = vmatpush3.bf16.msra.mxu0 %v7892_v58  ;;  %6402 = vmatprep.mubr.bf16.mxu0 %v5168_v44 }
 0x4b4   :  { %7449 = vmatpush3.bf16.msra.mxu1 %v7893_v46  ;;  %6443 = vmatprep.mubr.bf16.mxu1 %v5170_v47 }
 0x4b5   :  { %7456 = vmatprep.subr.bf16.mxu0 %v7894_v62  ;;  %7478 = vmatprep.subr.bf16.mxu1 %v7895_v63 }
 0x4b6   :  { %6403 = vmatmul.mubr.bf16.vlgmr.msra.gmra.mrb[32].mxu0 %v5167_v60 }
 0x4b7   :  { %6444 = vmatmul.mubr.bf16.vlgmr.msra.gmra.mrb[32].mxu1 %v5169_v45  ;;  %7457 = vmatpush3.bf16.msra.mxu0 %v7896_v0  ;;  %v7195_v0 = vld [vmem:[#allocation13] ss:$0 sm:$0xff] }
 0x4b8   :  { %7479 = vmatpush3.bf16.msra.mxu1 %v7897_v1  ;;  %7458 = vmatprep.subr.bf16.mxu0 %v7898_v2 }
 0x4b9   :  { %7480 = vmatprep.subr.bf16.mxu1 %v7899_v3 }
 0x4bb   :  { %7459 = vmatpush3.bf16.msra.mxu0 %v7900_v51 }
 0x4bc   :  { %7481 = vmatpush3.bf16.msra.mxu1 %v7901_v4  ;;  %7460 = vmatprep.subr.bf16.mxu0 %v7902_v23 }
 0x4bd   :  { %7482 = vmatprep.subr.bf16.mxu1 %v7903_v26 }
 0x4bf   :  { %7461 = vmatpush3.bf16.msra.mxu0 %v7904_v5 }
 0x4c0   :  { %7483 = vmatpush3.bf16.msra.mxu1 %v7905_v6  ;;  %7462 = vmatprep.subr.bf16.mxu0 %v7906_v7 }
 0x4c1   :  { %7484 = vmatprep.subr.bf16.mxu1 %v7907_v10 }
 0x4c3   :  { %7463 = vmatpush3.bf16.msra.mxu0 %v7908_v11 }
 0x4c4   :  { %7485 = vmatpush3.bf16.msra.mxu1 %v7909_v12  ;;  %7464 = vmatprep.subr.bf16.mxu0 %v7910_v17 }
 0x4c5   :  { %7486 = vmatprep.subr.bf16.mxu1 %v7911_v21 }
 0x4c7   :  { %7465 = vmatpush3.bf16.msra.mxu0 %v7912_v24 }
 0x4c8   :  { %7487 = vmatpush3.bf16.msra.mxu1 %v7913_v25  ;;  %7466 = vmatprep.subr.bf16.mxu0 %v7914_v27 }
 0x4c9   :  { %7488 = vmatprep.subr.bf16.mxu1 %v7915_v28 }
 0x4cb   :  { %7467 = vmatpush3.bf16.msra.mxu0 %v7916_v29 }
 0x4cc   :  { %7489 = vmatpush3.bf16.msra.mxu1 %v7917_v31  ;;  %7468 = vmatprep.subr.bf16.mxu0 %v7918_v32 }
 0x4cd   :  { %7490 = vmatprep.subr.bf16.mxu1 %v7919_v33 }
 0x4cf   :  { %7469 = vmatpush3.bf16.msra.mxu0 %v7920_v16 }
 0x4d0   :  { %7491 = vmatpush3.bf16.msra.mxu1 %v7921_v50  ;;  %7470 = vmatprep.subr.bf16.mxu0 %v7922_v40 }
 0x4d1   :  { %7492 = vmatprep.subr.bf16.mxu1 %v7923_v34 }
 0x4d3   :  { %7471 = vmatpush3.bf16.msra.mxu0 %v7924_v20 }
 0x4d4   :  { %7493 = vmatpush3.bf16.msra.mxu1 %v7925_v42 }
 0x529   :  { %v5032_v22 = vpop.f32.mrb[20].mxu0 }
 0x52a   :  { %v7532_v37 = vadd.f32 %v5032_v22, %v1850_v18  ;;  %v5118_v30 = vpop.f32.mrb[20].mxu1  ;;  %v5034_v38 = vpop.f32.mrb[21].mxu0 }
 0x52b   :  { %v7536_v39 = vadd.f32 %v5118_v30, %v1858_v35  ;;  %v7533_v43 = vadd.f32 %v5034_v38, %v1854_v55  ;;  %v5120_v48 = vpop.f32.mrb[21].mxu1  ;;  %v5036_v9 = vpop.f32.mrb[22].mxu0 }
 0x52c   :  { %v7537_v49 = vadd.f32 %v5120_v48, %v1862_v36  ;;  %v7534_v52 = vadd.f32 %v5036_v9, %v1850_v18  ;;  %v5122_v53 = vpop.f32.mrb[22].mxu1  ;;  %v5038_v13 = vpop.f32.mrb[23].mxu0  ;;  %v5139_v14 = vmax.f32 %v7532_v37, 0.0 }
 0x52d   :  { %v7538_v54 = vadd.f32 %v5122_v53, %v1858_v35  ;;  %v7535_v56 = vadd.f32 %v5038_v13, %v1854_v55  ;;  %v5124_v41 = vpop.f32.mrb[23].mxu1  ;;  %v5141_v58 = vmax.f32 %v7536_v39, 0.0  ;;  %v5140_v19 = vmax.f32 %v7533_v43, 0.0 }
 0x52e   :  { %v5155_v57 = vmax.f32 %v7534_v52, 0.0  ;;  %v7539_v15 = vadd.f32 %v5124_v41, %v1862_v36  ;;  %v5142_v60 = vmax.f32 %v7537_v49, 0.0 }
 0x52f   :  { %v5157_v8 = vmax.f32 %v7538_v54, 0.0  ;;  %v5156_v59 = vmax.f32 %v7535_v56, 0.0 }
 0x530   :  { %v5171_v61 = vpack.c.bf16 %v5155_v57, %v5139_v14  ;;  %v5158_v46 = vmax.f32 %v7539_v15, 0.0 }
 0x531   :  { %v5173_v45 = vpack.c.bf16 %v5157_v8, %v5141_v58  ;;  %v5172_v44 = vpack.c.bf16 %v5156_v59, %v5140_v19 }
 0x532   :  { %v5174_v62 = vpack.c.bf16 %v5158_v46, %v5142_v60 }
 0x533   :  { %6484 = vmatprep.mubr.bf16.mxu0 %v5172_v44 }
 0x534   :  { %6525 = vmatprep.mubr.bf16.mxu1 %v5174_v62  ;;  %6485 = vmatmul.mubr.bf16.vlgmr.msra.gmra.mrb[36].mxu0 %v5171_v61 }
 0x535   :  { %6526 = vmatmul.mubr.bf16.vlgmr.msra.gmra.mrb[36].mxu1 %v5173_v45 }
 0x549   :  { %v7340_v63 = vpop.f32.mrb[24].mxu0 }
 0x54a   :  { %v7362_v47 = vpop.f32.mrb[24].mxu1  ;;  %v7341_v1 = vpop.f32.mrb[25].mxu0 }
 0x54b   :  { %v7342_v2 = vadd.f32 %v7341_v1, %v7340_v63  ;;  %v7363_v3 = vpop.f32.mrb[25].mxu1  ;;  %v7343_v51 = vpop.f32.mrb[26].mxu0 }
 0x54c   :  { %v7364_v4 = vadd.f32 %v7363_v3, %v7362_v47  ;;  %v7365_v23 = vpop.f32.mrb[26].mxu1  ;;  %v7344_v26 = vpop.f32.mrb[27].mxu0 }
 0x54d   :  { %v6241_v5 = vadd.f32 %v7342_v2, %v7195_v0  ;;  %v7345_v6 = vadd.f32 %v7344_v26, %v7343_v51  ;;  %v7366_v7 = vpop.f32.mrb[27].mxu1 }
 0x54e   :  { %v7367_v10 = vadd.f32 %v7366_v7, %v7365_v23 }
 0x54f   :  { %v6282_v11 = vadd.f32 %v7364_v4, %v6241_v5  ;;  %v6244_v12 = vadd.f32 %v7345_v6, %v7195_v0 }
 0x551   :  { %v6285_v17 = vadd.f32 %v7367_v10, %v6244_v12 }
 0x569   :  { %v7384_v21 = vpop.f32.mrb[28].mxu0 }
 0x56a   :  { %v7406_v24 = vpop.f32.mrb[28].mxu1  ;;  %v7385_v25 = vpop.f32.mrb[29].mxu0 }
 0x56b   :  { %v7386_v27 = vadd.f32 %v7385_v25, %v7384_v21  ;;  %v7407_v28 = vpop.f32.mrb[29].mxu1  ;;  %v7387_v29 = vpop.f32.mrb[30].mxu0 }
 0x56c   :  { %v7408_v31 = vadd.f32 %v7407_v28, %v7406_v24  ;;  %v7409_v32 = vpop.f32.mrb[30].mxu1  ;;  %v7388_v33 = vpop.f32.mrb[31].mxu0 }
 0x56d   :  { %v6323_v16 = vadd.f32 %v7386_v27, %v6282_v11  ;;  %v7389_v50 = vadd.f32 %v7388_v33, %v7387_v29  ;;  %v7410_v40 = vpop.f32.mrb[31].mxu1 }
 0x56e   :  { %v7411_v34 = vadd.f32 %v7410_v40, %v7409_v32 }
 0x56f   :  { %v6364_v20 = vadd.f32 %v7408_v31, %v6323_v16  ;;  %v6326_v42 = vadd.f32 %v7389_v50, %v6285_v17 }
 0x571   :  { %v6367_v18 = vadd.f32 %v7411_v34, %v6326_v42 }
 0x589   :  { %v7428_v35 = vpop.f32.mrb[32].mxu0 }
 0x58a   :  { %v7450_v55 = vpop.f32.mrb[32].mxu1  ;;  %v7429_v36 = vpop.f32.mrb[33].mxu0 }
 0x58b   :  { %v7430_v22 = vadd.f32 %v7429_v36, %v7428_v35  ;;  %v7451_v37 = vpop.f32.mrb[33].mxu1  ;;  %v7431_v30 = vpop.f32.mrb[34].mxu0 }
 0x58c   :  { %v7452_v38 = vadd.f32 %v7451_v37, %v7450_v55  ;;  %v7453_v39 = vpop.f32.mrb[34].mxu1  ;;  %v7432_v43 = vpop.f32.mrb[35].mxu0 }
 0x58d   :  { %v6405_v48 = vadd.f32 %v7430_v22, %v6364_v20  ;;  %v7433_v9 = vadd.f32 %v7432_v43, %v7431_v30  ;;  %v7454_v49 = vpop.f32.mrb[35].mxu1 }
 0x58e   :  { %v7455_v52 = vadd.f32 %v7454_v49, %v7453_v39 }
 0x58f   :  { %v6446_v53 = vadd.f32 %v7452_v38, %v6405_v48  ;;  %v6408_v13 = vadd.f32 %v7433_v9, %v6367_v18 }
 0x591   :  { %v6449_v54 = vadd.f32 %v7455_v52, %v6408_v13 }
 0x607   :  { %v7472_v56 = vpop.f32.mrb[36].mxu0 }
 0x608   :  { %v7494_v41 = vpop.f32.mrb[36].mxu1  ;;  %v7473_v14 = vpop.f32.mrb[37].mxu0 }
 0x609   :  { %v7474_v57 = vadd.f32 %v7473_v14, %v7472_v56  ;;  %v7495_v15 = vpop.f32.mrb[37].mxu1  ;;  %v7475_v58 = vpop.f32.mrb[38].mxu0 }
 0x60a   :  { %v7496_v19 = vadd.f32 %v7495_v15, %v7494_v41  ;;  %v7497_v8 = vpop.f32.mrb[38].mxu1  ;;  %v7476_v59 = vpop.f32.mrb[39].mxu0 }
 0x60b   :  { %v6487_v60 = vadd.f32 %v7474_v57, %v6446_v53  ;;  %v7477_v61 = vadd.f32 %v7476_v59, %v7475_v58  ;;  %v7498_v46 = vpop.f32.mrb[39].mxu1 }
 0x60c   :  { %v7499_v45 = vadd.f32 %v7498_v46, %v7497_v8 }
 0x60d   :  { %v6528_v44 = vadd.f32 %v7496_v19, %v6487_v60  ;;  %v6490_v62 = vadd.f32 %v7477_v61, %v6449_v54 }
 0x60f   :  { %6534 = vst [vmem:[%s8447_s9] sm:$0xff] %v6528_v44  ;;  %v6531_v63 = vadd.f32 %v7499_v45, %v6490_v62 }
 0x611   :  { %6535 = vst [vmem:[%s8447_s9 + $0x8] sm:$0xff] %v6531_v63 }
 0x612   :  { %6540 = vsyncpa [#allocation3], 1 }
 0x613   :  { %6541 = vsyncpa [#allocation5], 1 }
 0x614   :  { %6542 = vsyncpa [#allocation8], 1 }
 0x615   :  { %6543 = vsyncpa [#allocation11], 1 }
 0x616   :  { %6544 = vsyncpa [#allocation14], 1 }

</bundles_post_ra>
